<compile_context>
chip_gen: v7x
topology: tpu7x:2x2x1
jax: 0.10.0
libtpu: 0.0.40
codegen_flags: <defaults>
</compile_context>

<pallas_src>
import functools

import jax
import jax.numpy as jnp
from jax.experimental import pallas as pl
from jax.experimental.pallas import tpu as pltpu

LEAKY_SLOPE = 0.01   # nn.LeakyReLU default
BN_EPS = 1e-5        # nn.BatchNorm2d default


@functools.lru_cache(maxsize=None)
def _vmem_limit_bytes():
    """Per-generation scoped-VMEM request (review: don't hard-code 32 MB)."""
    try:
        cap = int(pltpu.get_tpu_info().vmem_capacity_bytes)
        # ~3/4 of physical, capped: 96 MB on v5e/v6e (128 MiB), 48 MB on v7x (64 MiB).
        return int(min(96 * 1024 * 1024, (cap * 3) // 4))
    except Exception:
        return 48 * 1024 * 1024   # safe on every generation


# ---------------------------------------------------------------------------
# Kernel 1: fused Conv3x3(pad=1) + (folded BN) + LeakyReLU + MaxPool2x2
#           grid = (B, H_tiles); halo handled via an in-kernel padded scratch.
# ---------------------------------------------------------------------------
def conv_bn_lrelu_pool_kernel(x_ref, w_ref, b_ref, o_ref, xpad_ref):
    # x_ref:    (1, H, W, Cin)     bf16, full (unpadded) image for this batch element
    # w_ref:    (3, 3*Cin, Cout)   bf16, BN-folded weights, [dy, dx*Cin+ci, co]
    # b_ref:    (1, Cout)          f32,  BN-folded bias
    # o_ref:    (1, TH, Wo, Cout)  bf16, pooled output row tile
    # xpad_ref: (H+2, W+2, Cin)    bf16 scratch holding the zero-padded image
    t = pl.program_id(1)
    H, W, Cin = x_ref.shape[1], x_ref.shape[2], x_ref.shape[3]
    TH, Wo, Cout = o_ref.shape[1], o_ref.shape[2], o_ref.shape[3]
    Hc = 2 * TH                      # pre-pool output rows produced by this tile

    # Build the zero-padded image once per batch element (t == 0). The input block index
    # depends only on b, so it stays resident across the t axis. Only the 1-px halo is
    # zeroed (four thin strips); the interior is fully overwritten right after.
    @pl.when(t == 0)
    def _():
        zrow = jnp.zeros((1, W + 2, Cin), xpad_ref.dtype)
        xpad_ref[0:1, :, :] = zrow
        xpad_ref[H + 1:H + 2, :, :] = zrow
        zcol = jnp.zeros((H, 1, Cin), xpad_ref.dtype)
        xpad_ref[1:H + 1, 0:1, :] = zcol
        xpad_ref[1:H + 1, W + 1:W + 2, :] = zcol
        xpad_ref[1:H + 1, 1:W + 1, :] = x_ref[0]

    r0 = t * Hc
    if Hc % 8 == 0:
        r0 = pl.multiple_of(r0, 8)
    xt = xpad_ref[pl.ds(r0, Hc + 2), :, :]                      # (Hc+2, W+2, Cin)

    # dx-shifted windows, concatenated once along lanes -> (Hc+2, W, 3*Cin). The dy taps
    # are handled as 3 accumulated dots over leading-dim slices (no (Hc, W, 9*Cin) patch
    # tensor and no second lane-concat).
    cols = jnp.concatenate(
        [xt[:, 0:W, :], xt[:, 1:W + 1, :], xt[:, 2:W + 2, :]], axis=-1)

    acc = jnp.zeros((Hc * W, Cout), jnp.float32)
    for dy in range(3):                                          # static unroll
        lhs = cols[dy:dy + Hc].reshape(Hc * W, 3 * Cin)
        acc = acc + jnp.dot(lhs, w_ref[dy], preferred_element_type=jnp.float32)
    acc = acc + b_ref[...]
    acc = jnp.where(acc > 0, acc, LEAKY_SLOPE * acc)             # LeakyReLU

    # 2x2 max pool (stride 2)
    y = acc.reshape(TH, 2, Wo, 2, Cout)
    y = jnp.maximum(y[:, 0], y[:, 1])                            # pool over H
    y = jnp.maximum(y[:, :, 0], y[:, :, 1])                      # pool over W
    o_ref[0] = y.astype(o_ref.dtype)


def _row_tile(ho, max_rows):
    """Largest divisor of ho that is <= max_rows."""
    th = max(1, min(ho, max_rows))
    while ho % th:
        th -= 1
    return th


def conv_layer(x, w, b, *, max_rows=16):
    """x: (B, H, W, Cin) NHWC bf16. w: (3, 3*Cin, Cout) bf16. -> (B, H//2, W//2, Cout)."""
    B, H, W, Cin = x.shape
    Cout = w.shape[-1]
    Ho, Wo = H // 2, W // 2
    TH = _row_tile(Ho, max_rows)
    T = Ho // TH
    return pl.pallas_call(
        conv_bn_lrelu_pool_kernel,
        out_shape=jax.ShapeDtypeStruct((B, Ho, Wo, Cout), jnp.bfloat16),
        grid=(B, T),
        in_specs=[
            pl.BlockSpec((1, H, W, Cin), lambda bb, t: (bb, 0, 0, 0)),
            pl.BlockSpec((3, 3 * Cin, Cout), lambda bb, t: (0, 0, 0)),
            pl.BlockSpec((1, Cout), lambda bb, t: (0, 0)),
        ],
        out_specs=pl.BlockSpec((1, TH, Wo, Cout), lambda bb, t: (bb, t, 0, 0)),
        scratch_shapes=[pltpu.VMEM((H + 2, W + 2, Cin), x.dtype)],
        compiler_params=pltpu.CompilerParams(
            dimension_semantics=("parallel", "arbitrary"),
            vmem_limit_bytes=_vmem_limit_bytes()),
    )(x, w, b)


# ---------------------------------------------------------------------------
# Kernel 2: fused FC1+ReLU -> FC2+ReLU -> Softmax(dim=1), K-blocked over fc1.
# ---------------------------------------------------------------------------
def mlp_softmax_kernel(x_ref, w1_ref, b1_ref, w2_ref, b2_ref, o_ref, h_acc, *, n_classes):
    # TODO(synk): Dropout(0.5) layers are identity in eval mode and omitted.
    k = pl.program_id(0)

    @pl.when(k == 0)
    def _():
        h_acc[...] = jnp.zeros_like(h_acc)

    h_acc[...] += jnp.dot(x_ref[...], w1_ref[...], preferred_element_type=jnp.float32)

    @pl.when(k == pl.num_programs(0) - 1)
    def _():
        h = jnp.maximum(h_acc[...] + b1_ref[...], 0.0)                     # fc1 bias + ReLU
        logits = jnp.dot(h.astype(w2_ref.dtype), w2_ref[...],
                         preferred_element_type=jnp.float32)
        logits = jnp.maximum(logits + b2_ref[...], 0.0)                    # fc2 bias + ReLU
        # mask lane padding (classes padded to a 128-wide, lane-dense output block)
        lane = jax.lax.broadcasted_iota(jnp.int32, logits.shape, dimension=1)
        logits = jnp.where(lane < n_classes, logits, jnp.float32(-1e30))
        m = jnp.max(logits, axis=-1, keepdims=True)
        e = jnp.exp(logits - m)
        # exact normalization (review correctness note on approx reciprocal)
        o_ref[...] = (e / jnp.sum(e, axis=-1, keepdims=True)).astype(o_ref.dtype)


def mlp_head(flat, fc1, fc2, n_classes, *, tk_target=512):
    w1, b1 = fc1
    w2p, b2p = fc2
    B, K = flat.shape
    hidden = w1.shape[1]
    ncp = w2p.shape[1]                         # padded (lane-dense) class dim
    # 512-row K tile (review: HBM roofline for the streamed fc1 weight). Any K is
    # zero-padded up to a tile multiple: never a whole-weight single VMEM block.
    tk = min(tk_target, ((K + 127) // 128) * 128)
    k_pad = ((K + tk - 1) // tk) * tk
    if k_pad != K:
        flat = jnp.pad(flat, ((0, 0), (0, k_pad - K)))
        w1 = jnp.pad(w1, ((0, k_pad - K), (0, 0)))
    kernel = functools.partial(mlp_softmax_kernel, n_classes=n_classes)
    out = pl.pallas_call(
        kernel,
        out_shape=jax.ShapeDtypeStruct((B, ncp), jnp.float32),
        grid=(k_pad // tk,),
        in_specs=[
            pl.BlockSpec((B, tk), lambda k: (0, k)),
            pl.BlockSpec((tk, hidden), lambda k: (k, 0)),
            pl.BlockSpec((1, hidden), lambda k: (0, 0)),
            pl.BlockSpec((hidden, ncp), lambda k: (0, 0)),
            pl.BlockSpec((1, ncp), lambda k: (0, 0)),
        ],
        out_specs=pl.BlockSpec((B, ncp), lambda k: (0, 0)),
        scratch_shapes=[pltpu.VMEM((B, hidden), jnp.float32)],
        compiler_params=pltpu.CompilerParams(
            dimension_semantics=("arbitrary",),
            vmem_limit_bytes=_vmem_limit_bytes()),
        # TODO(synk): v7x -- add a "parallel" axis over the hidden dim (fc2+softmax in a
        # small follow-up kernel) so the second TensorCore shares the fc1 weight stream.
    )(flat, w1, b1, w2p, b2p)
    return out[:, :n_classes]


# ---------------------------------------------------------------------------
# Parameter initialization (deterministic, synthetic; BN folded into conv)
# ---------------------------------------------------------------------------
def init_conv_bn(key, cin, cout):
    kw, kb, kg, kbeta, km, kv = jax.random.split(key, 6)
    w = jax.random.normal(kw, (3, 3, cin, cout), jnp.float32) / jnp.sqrt(9.0 * cin)
    b = 0.01 * jax.random.normal(kb, (cout,), jnp.float32)
    gamma = 1.0 + 0.1 * jax.random.normal(kg, (cout,), jnp.float32)
    beta = 0.1 * jax.random.normal(kbeta, (cout,), jnp.float32)
    rmean = 0.1 * jax.random.normal(km, (cout,), jnp.float32)
    rvar = 1.0 + 0.1 * jax.random.uniform(kv, (cout,), jnp.float32)
    scale = gamma / jnp.sqrt(rvar + BN_EPS)                 # eval-mode BN fold
    w_f = (w * scale).reshape(3, 3 * cin, cout)             # rows ordered [dy][(dx, cin)]
    b_f = (b - rmean) * scale + beta
    return w_f.astype(jnp.bfloat16), b_f.reshape(1, cout)


def init_fc1(key, c, h, w, hidden):
    # Generated in PyTorch's NCHW feature order, then rows permuted ONCE to the NHWC
    # flatten order the kernels produce -> exact NCHW-flatten semantics, no runtime
    # transpose of the layer-3 activation.
    kw, kb = jax.random.split(key)
    fin = c * h * w
    w_nchw = jax.random.normal(kw, (fin, hidden), jnp.float32) / jnp.sqrt(float(fin))
    perm = jnp.transpose(jnp.arange(fin).reshape(c, h, w), (1, 2, 0)).reshape(-1)
    w_nhwc = w_nchw[perm]
    b = 0.01 * jax.random.normal(kb, (hidden,), jnp.float32)
    return w_nhwc.astype(jnp.bfloat16), b.reshape(1, hidden)


def init_fc2(key, fin, n_classes, ncp):
    kw, kb = jax.random.split(key)
    w = jax.random.normal(kw, (fin, n_classes), jnp.float32) / jnp.sqrt(float(fin))
    b = 0.01 * jax.random.normal(kb, (n_classes,), jnp.float32)
    w_p = jnp.pad(w, ((0, 0), (0, ncp - n_classes)))        # lane-dense class padding
    b_p = jnp.pad(b, (0, ncp - n_classes))
    return w_p.astype(jnp.bfloat16), b_p.reshape(1, ncp)


def init_params(key, n_channels, n_classes, in_hw, hidden=4096):
    k1, k2, k3, k4, k5 = jax.random.split(key, 5)
    hw3 = in_hw // 8                                         # after three 2x2 pools
    ncp = ((n_classes + 127) // 128) * 128
    return {
        "l1": init_conv_bn(k1, n_channels, 32),
        "l2": init_conv_bn(k2, 32, 128),
        "l3": init_conv_bn(k3, 128, 64),
        "fc1": init_fc1(k4, 64, hw3, hw3, hidden),
        "fc2": init_fc2(k5, hidden, n_classes, ncp),
    }


# ---------------------------------------------------------------------------
# Full forward pass (mirrors custom_2DCNN.forward, eval mode)
# ---------------------------------------------------------------------------
def custom_2dcnn_forward(x_nchw, params, n_classes, conv_row_tile=16):
    x = jnp.transpose(x_nchw, (0, 2, 3, 1)).astype(jnp.bfloat16)   # NCHW -> NHWC, bf16
    x = conv_layer(x, *params["l1"], max_rows=conv_row_tile)       # layer1
    x = conv_layer(x, *params["l2"], max_rows=conv_row_tile)       # layer2
    x = conv_layer(x, *params["l3"], max_rows=conv_row_tile)       # layer3
    B = x.shape[0]
    flat = x.reshape(B, -1)            # NHWC flatten; fc1 rows pre-permuted to NCHW order
    return mlp_head(flat, params["fc1"], params["fc2"], n_classes)


if __name__ == "__main__":
    key = jax.random.PRNGKey(0)
    kx, kp = jax.random.split(key)

    B, C, HW = 2, 1, 16                                # small demo shapes
    n_classes = 20
    x = jax.random.normal(kx, (B, C, HW, HW), jnp.float32)     # NCHW like PyTorch
    params = init_params(kp, n_channels=C, n_classes=n_classes, in_hw=HW)

    # small row tile so the multi-tile (t > 0) conv path is exercised even at 16x16
    fwd = jax.jit(lambda xx: custom_2dcnn_forward(xx, params, n_classes, conv_row_tile=4))
    out = jax.block_until_ready(fwd(x))

    assert out.shape == (B, n_classes), out.shape
    assert bool(jnp.all(jnp.isfinite(out)))
    assert bool(jnp.all(out >= 0.0))
    row_sums = jnp.sum(out, axis=-1)
    assert bool(jnp.all(jnp.abs(row_sums - 1.0) < 1e-3)), row_sums
    print("KERNEL_OK")
</pallas_src>

<mosaic_0001>
module attributes {stable_mosaic.version = 11 : i64} {
  func.func @conv_bn_lrelu_pool_kernel(%arg0: i32, %arg1: i32, %arg2: memref<1x8x8x32xbf16, #tpu.memory_space<vmem>>, %arg3: memref<3x96x128xbf16, #tpu.memory_space<vmem>>, %arg4: memref<1x128xf32, #tpu.memory_space<vmem>>, %arg5: memref<1x4x4x128xbf16, #tpu.memory_space<vmem>>, %arg6: memref<10x10x32xbf16, #tpu.memory_space<vmem>>) attributes {dimension_semantics = [#tpu.dimension_semantics<parallel>, #tpu.dimension_semantics<arbitrary>], iteration_bounds = array<i64: 2, 1>, scalar_prefetch = 0 : i64, scratch_operands = 1 : i64, tpu.core_type = #tpu.core_type<tc>, window_params = [{transform_indices = @transform_0, window_bounds = array<i64: 1, 8, 8, 32>}, {pipeline_mode = #tpu.pipeline_mode<synchronous>, transform_indices = @transform_1, window_bounds = array<i64: 3, 96, 128>}, {pipeline_mode = #tpu.pipeline_mode<synchronous>, transform_indices = @transform_2, window_bounds = array<i64: 1, 128>}, {transform_indices = @transform_3, window_bounds = array<i64: 1, 4, 4, 128>}]} {
    %c0_i32 = arith.constant 0 : i32
    %0 = arith.cmpi eq, %arg1, %c0_i32 : i32
    %1 = arith.extui %0 : i1 to i32
    %c0_i32_0 = arith.constant 0 : i32
    %2 = arith.cmpi ne, %1, %c0_i32_0 : i32
    scf.if %2 {
      %cst_20 = arith.constant 0.000000e+00 : bf16
      %53 = vector.broadcast %cst_20 : bf16 to vector<1x10x32xbf16>
      %c0_21 = arith.constant 0 : index
      %c0_22 = arith.constant 0 : index
      %c0_23 = arith.constant 0 : index
      %54 = vector.load %arg6[%c0_21, %c0_22, %c0_23] : memref<10x10x32xbf16, #tpu.memory_space<vmem>>, vector<1x10x32xbf16>
      tpu.vector_store %arg6[%c0_21, %c0_22, %c0_23], %53 {strides = array<i32>} : memref<10x10x32xbf16, #tpu.memory_space<vmem>>, vector<1x10x32xbf16>,
      %c9 = arith.constant 9 : index
      %c0_24 = arith.constant 0 : index
      %c0_25 = arith.constant 0 : index
      %55 = vector.load %arg6[%c9, %c0_24, %c0_25] : memref<10x10x32xbf16, #tpu.memory_space<vmem>>, vector<1x10x32xbf16>
      tpu.vector_store %arg6[%c9, %c0_24, %c0_25], %53 {strides = array<i32>} : memref<10x10x32xbf16, #tpu.memory_space<vmem>>, vector<1x10x32xbf16>,
      %cst_26 = arith.constant 0.000000e+00 : bf16
      %56 = vector.broadcast %cst_26 : bf16 to vector<8x1x32xbf16>
      %c1_27 = arith.constant 1 : index
      %c0_28 = arith.constant 0 : index
      %c0_29 = arith.constant 0 : index
      %57 = vector.load %arg6[%c1_27, %c0_28, %c0_29] : memref<10x10x32xbf16, #tpu.memory_space<vmem>>, vector<8x1x32xbf16>
      tpu.vector_store %arg6[%c1_27, %c0_28, %c0_29], %56 {strides = array<i32>} : memref<10x10x32xbf16, #tpu.memory_space<vmem>>, vector<8x1x32xbf16>,
      %c1_30 = arith.constant 1 : index
      %c9_31 = arith.constant 9 : index
      %c0_32 = arith.constant 0 : index
      %58 = vector.load %arg6[%c1_30, %c9_31, %c0_32] : memref<10x10x32xbf16, #tpu.memory_space<vmem>>, vector<8x1x32xbf16>
      tpu.vector_store %arg6[%c1_30, %c9_31, %c0_32], %56 {strides = array<i32>} : memref<10x10x32xbf16, #tpu.memory_space<vmem>>, vector<8x1x32xbf16>,
      %c0_33 = arith.constant 0 : index
      %c0_34 = arith.constant 0 : index
      %c0_35 = arith.constant 0 : index
      %c0_36 = arith.constant 0 : index
      %59 = vector.load %arg2[%c0_33, %c0_34, %c0_35, %c0_36] : memref<1x8x8x32xbf16, #tpu.memory_space<vmem>>, vector<1x8x8x32xbf16>
      %60 = vector.shape_cast %59 : vector<1x8x8x32xbf16> to vector<8x8x32xbf16>
      %c1_37 = arith.constant 1 : index
      %c1_38 = arith.constant 1 : index
      %c0_39 = arith.constant 0 : index
      %61 = vector.load %arg6[%c1_37, %c1_38, %c0_39] : memref<10x10x32xbf16, #tpu.memory_space<vmem>>, vector<8x8x32xbf16>
      tpu.vector_store %arg6[%c1_37, %c1_38, %c0_39], %60 {strides = array<i32>} : memref<10x10x32xbf16, #tpu.memory_space<vmem>>, vector<8x8x32xbf16>,
    } else {
    }
    %c8_i32 = arith.constant 8 : i32
    %3 = arith.muli %arg1, %c8_i32 : i32
    %4 = tpu.assume_multiple %3, 8 : i32
    %5 = arith.index_cast %4 : i32 to index
    %c0 = arith.constant 0 : index
    %c0_1 = arith.constant 0 : index
    %6 = vector.load %arg6[%5, %c0, %c0_1] : memref<10x10x32xbf16, #tpu.memory_space<vmem>>, vector<10x10x32xbf16>
    %7 = vector.extract_strided_slice %6 {offsets = [0, 0, 0], sizes = [10, 8, 32], strides = [1, 1, 1]} : vector<10x10x32xbf16> to vector<10x8x32xbf16>
    %8 = vector.extract_strided_slice %6 {offsets = [0, 1, 0], sizes = [10, 8, 32], strides = [1, 1, 1]} : vector<10x10x32xbf16> to vector<10x8x32xbf16>
    %9 = vector.extract_strided_slice %6 {offsets = [0, 2, 0], sizes = [10, 8, 32], strides = [1, 1, 1]} : vector<10x10x32xbf16> to vector<10x8x32xbf16>
    %10 = tpu.concatenate %7, %8, %9 in 2 : vector<10x8x32xbf16>, vector<10x8x32xbf16>, vector<10x8x32xbf16> -> vector<10x8x96xbf16>
    %cst = arith.constant 0.000000e+00 : f32
    %11 = vector.broadcast %cst : f32 to vector<64x128xf32>
    %12 = vector.extract_strided_slice %10 {offsets = [0, 0, 0], sizes = [8, 8, 96], strides = [1, 1, 1]} : vector<10x8x96xbf16> to vector<8x8x96xbf16>
    %13 = vector.shape_cast %12 : vector<8x8x96xbf16> to vector<64x96xbf16>
    %c0_2 = arith.constant 0 : index
    %c0_3 = arith.constant 0 : index
    %c0_4 = arith.constant 0 : index
    %14 = vector.load %arg3[%c0_2, %c0_3, %c0_4] : memref<3x96x128xbf16, #tpu.memory_space<vmem>>, vector<1x96x128xbf16>
    %15 = vector.shape_cast %14 : vector<1x96x128xbf16> to vector<96x128xbf16>
    %cst_5 = arith.constant dense<0.000000e+00> : vector<64x128xf32>
    %16 = tpu.matmul %13, %15, %cst_5 {dimension_numbers = #tpu.dot_dimension_numbers<[1], [0], [0], [1], [0, 0, 1, 1], [], []>} : vector<64x96xbf16>, vector<96x128xbf16>, vector<64x128xf32> -> vector<64x128xf32>
    %17 = arith.addf %11, %16 : vector<64x128xf32>
    %18 = vector.extract_strided_slice %10 {offsets = [1, 0, 0], sizes = [8, 8, 96], strides = [1, 1, 1]} : vector<10x8x96xbf16> to vector<8x8x96xbf16>
    %19 = vector.shape_cast %18 : vector<8x8x96xbf16> to vector<64x96xbf16>
    %c1 = arith.constant 1 : index
    %c0_6 = arith.constant 0 : index
    %c0_7 = arith.constant 0 : index
    %20 = vector.load %arg3[%c1, %c0_6, %c0_7] : memref<3x96x128xbf16, #tpu.memory_space<vmem>>, vector<1x96x128xbf16>
    %21 = vector.shape_cast %20 : vector<1x96x128xbf16> to vector<96x128xbf16>
    %cst_8 = arith.constant dense<0.000000e+00> : vector<64x128xf32>
    %22 = tpu.matmul %19, %21, %cst_8 {dimension_numbers = #tpu.dot_dimension_numbers<[1], [0], [0], [1], [0, 0, 1, 1], [], []>} : vector<64x96xbf16>, vector<96x128xbf16>, vector<64x128xf32> -> vector<64x128xf32>
    %23 = arith.addf %17, %22 : vector<64x128xf32>
    %24 = vector.extract_strided_slice %10 {offsets = [2, 0, 0], sizes = [8, 8, 96], strides = [1, 1, 1]} : vector<10x8x96xbf16> to vector<8x8x96xbf16>
    %25 = vector.shape_cast %24 : vector<8x8x96xbf16> to vector<64x96xbf16>
    %c2 = arith.constant 2 : index
    %c0_9 = arith.constant 0 : index
    %c0_10 = arith.constant 0 : index
    %26 = vector.load %arg3[%c2, %c0_9, %c0_10] : memref<3x96x128xbf16, #tpu.memory_space<vmem>>, vector<1x96x128xbf16>
    %27 = vector.shape_cast %26 : vector<1x96x128xbf16> to vector<96x128xbf16>
    %cst_11 = arith.constant dense<0.000000e+00> : vector<64x128xf32>
    %28 = tpu.matmul %25, %27, %cst_11 {dimension_numbers = #tpu.dot_dimension_numbers<[1], [0], [0], [1], [0, 0, 1, 1], [], []>} : vector<64x96xbf16>, vector<96x128xbf16>, vector<64x128xf32> -> vector<64x128xf32>
    %29 = arith.addf %23, %28 : vector<64x128xf32>
    %c0_12 = arith.constant 0 : index
    %c0_13 = arith.constant 0 : index
    %30 = vector.load %arg4[%c0_12, %c0_13] : memref<1x128xf32, #tpu.memory_space<vmem>>, vector<1x128xf32>
    %31 = vector.broadcast %30 : vector<1x128xf32> to vector<64x128xf32>
    %32 = arith.addf %29, %31 : vector<64x128xf32>
    %cst_14 = arith.constant 0.000000e+00 : f32
    %33 = vector.broadcast %cst_14 : f32 to vector<64x128xf32>
    %34 = arith.cmpf ogt, %32, %33 : vector<64x128xf32>
    %cst_15 = arith.constant 0.00999999977 : f32
    %35 = vector.broadcast %cst_15 : f32 to vector<64x128xf32>
    %36 = arith.mulf %35, %32 : vector<64x128xf32>
    %37 = arith.select %34, %32, %36 : vector<64x128xi1>, vector<64x128xf32>
    %38 = vector.shape_cast %37 : vector<64x128xf32> to vector<4x2x4x2x128xf32>
    %39 = vector.extract_strided_slice %38 {offsets = [0, 0, 0, 0, 0], sizes = [4, 1, 4, 2, 128], strides = [1, 1, 1, 1, 1]} : vector<4x2x4x2x128xf32> to vector<4x1x4x2x128xf32>
    %40 = vector.shape_cast %39 : vector<4x1x4x2x128xf32> to vector<4x4x2x128xf32>
    %41 = vector.extract_strided_slice %38 {offsets = [0, 1, 0, 0, 0], sizes = [4, 1, 4, 2, 128], strides = [1, 1, 1, 1, 1]} : vector<4x2x4x2x128xf32> to vector<4x1x4x2x128xf32>
    %42 = vector.shape_cast %41 : vector<4x1x4x2x128xf32> to vector<4x4x2x128xf32>
    %43 = arith.maximumf %40, %42 : vector<4x4x2x128xf32>
    %44 = vector.extract_strided_slice %43 {offsets = [0, 0, 0, 0], sizes = [4, 4, 1, 128], strides = [1, 1, 1, 1]} : vector<4x4x2x128xf32> to vector<4x4x1x128xf32>
    %45 = vector.shape_cast %44 : vector<4x4x1x128xf32> to vector<4x4x128xf32>
    %46 = vector.extract_strided_slice %43 {offsets = [0, 0, 1, 0], sizes = [4, 4, 1, 128], strides = [1, 1, 1, 1]} : vector<4x4x2x128xf32> to vector<4x4x1x128xf32>
    %47 = vector.shape_cast %46 : vector<4x4x1x128xf32> to vector<4x4x128xf32>
    %48 = arith.maximumf %45, %47 : vector<4x4x128xf32>
    %49 = arith.truncf %48 : vector<4x4x128xf32> to vector<4x4x128xbf16>
    %c0_16 = arith.constant 0 : index
    %c0_17 = arith.constant 0 : index
    %c0_18 = arith.constant 0 : index
    %c0_19 = arith.constant 0 : index
    %50 = vector.load %arg5[%c0_16, %c0_17, %c0_18, %c0_19] : memref<1x4x4x128xbf16, #tpu.memory_space<vmem>>, vector<1x4x4x128xbf16>
    %51 = vector.shape_cast %50 : vector<1x4x4x128xbf16> to vector<4x4x128xbf16>
    %52 = vector.shape_cast %49 : vector<4x4x128xbf16> to vector<1x4x4x128xbf16>
    tpu.vector_store %arg5[%c0_16, %c0_17, %c0_18, %c0_19], %52 {strides = array<i32>} : memref<1x4x4x128xbf16, #tpu.memory_space<vmem>>, vector<1x4x4x128xbf16>,
    return
  }
  func.func @transform_0(%arg0: i32, %arg1: i32) -> (i32, i32, i32, i32) {
    %c0_i32 = arith.constant 0 : i32
    %c0_i32_0 = arith.constant 0 : i32
    %c0_i32_1 = arith.constant 0 : i32
    %c0_i32_2 = arith.constant 0 : i32
    return %arg0, %c0_i32, %c0_i32_0, %c0_i32_1 : i32, i32, i32, i32
  }
  func.func @transform_1(%arg0: i32, %arg1: i32) -> (i32, i32, i32) {
    %c0_i32 = arith.constant 0 : i32
    %c0_i32_0 = arith.constant 0 : i32
    %c0_i32_1 = arith.constant 0 : i32
    %c0_i32_2 = arith.constant 0 : i32
    return %c0_i32, %c0_i32_0, %c0_i32_1 : i32, i32, i32
  }
  func.func @transform_2(%arg0: i32, %arg1: i32) -> (i32, i32) {
    %c0_i32 = arith.constant 0 : i32
    %c0_i32_0 = arith.constant 0 : i32
    %c0_i32_1 = arith.constant 0 : i32
    return %c0_i32, %c0_i32_0 : i32, i32
  }
  func.func @transform_3(%arg0: i32, %arg1: i32) -> (i32, i32, i32, i32) {
    %c0_i32 = arith.constant 0 : i32
    %c0_i32_0 = arith.constant 0 : i32
    %c0_i32_1 = arith.constant 0 : i32
    return %arg0, %arg1, %c0_i32, %c0_i32_0 : i32, i32, i32, i32
  }
}

module attributes {stable_mosaic.version = 11 : i64} {
  func.func @conv_bn_lrelu_pool_kernel(%arg0: i32, %arg1: i32, %arg2: memref<1x16x16x1xbf16, #tpu.memory_space<vmem>>, %arg3: memref<3x3x32xbf16, #tpu.memory_space<vmem>>, %arg4: memref<1x32xf32, #tpu.memory_space<vmem>>, %arg5: memref<1x4x8x32xbf16, #tpu.memory_space<vmem>>, %arg6: memref<18x18x1xbf16, #tpu.memory_space<vmem>>) attributes {dimension_semantics = [#tpu.dimension_semantics<parallel>, #tpu.dimension_semantics<arbitrary>], iteration_bounds = array<i64: 2, 2>, scalar_prefetch = 0 : i64, scratch_operands = 1 : i64, tpu.core_type = #tpu.core_type<tc>, window_params = [{transform_indices = @transform_0, window_bounds = array<i64: 1, 16, 16, 1>}, {pipeline_mode = #tpu.pipeline_mode<synchronous>, transform_indices = @transform_1, window_bounds = array<i64: 3, 3, 32>}, {pipeline_mode = #tpu.pipeline_mode<synchronous>, transform_indices = @transform_2, window_bounds = array<i64: 1, 32>}, {transform_indices = @transform_3, window_bounds = array<i64: 1, 4, 8, 32>}]} {
    %c0_i32 = arith.constant 0 : i32
    %0 = arith.cmpi eq, %arg1, %c0_i32 : i32
    %1 = arith.extui %0 : i1 to i32
    %c0_i32_0 = arith.constant 0 : i32
    %2 = arith.cmpi ne, %1, %c0_i32_0 : i32
    scf.if %2 {
      %cst_20 = arith.constant 0.000000e+00 : bf16
      %53 = vector.broadcast %cst_20 : bf16 to vector<1x18x1xbf16>
      %c0_21 = arith.constant 0 : index
      %c0_22 = arith.constant 0 : index
      %c0_23 = arith.constant 0 : index
      %54 = vector.load %arg6[%c0_21, %c0_22, %c0_23] : memref<18x18x1xbf16, #tpu.memory_space<vmem>>, vector<1x18x1xbf16>
      tpu.vector_store %arg6[%c0_21, %c0_22, %c0_23], %53 {strides = array<i32>} : memref<18x18x1xbf16, #tpu.memory_space<vmem>>, vector<1x18x1xbf16>,
      %c17 = arith.constant 17 : index
      %c0_24 = arith.constant 0 : index
      %c0_25 = arith.constant 0 : index
      %55 = vector.load %arg6[%c17, %c0_24, %c0_25] : memref<18x18x1xbf16, #tpu.memory_space<vmem>>, vector<1x18x1xbf16>
      tpu.vector_store %arg6[%c17, %c0_24, %c0_25], %53 {strides = array<i32>} : memref<18x18x1xbf16, #tpu.memory_space<vmem>>, vector<1x18x1xbf16>,
      %cst_26 = arith.constant 0.000000e+00 : bf16
      %56 = vector.broadcast %cst_26 : bf16 to vector<16x1x1xbf16>
      %c1_27 = arith.constant 1 : index
      %c0_28 = arith.constant 0 : index
      %c0_29 = arith.constant 0 : index
      %57 = vector.load %arg6[%c1_27, %c0_28, %c0_29] : memref<18x18x1xbf16, #tpu.memory_space<vmem>>, vector<16x1x1xbf16>
      tpu.vector_store %arg6[%c1_27, %c0_28, %c0_29], %56 {strides = array<i32>} : memref<18x18x1xbf16, #tpu.memory_space<vmem>>, vector<16x1x1xbf16>,
      %c1_30 = arith.constant 1 : index
      %c17_31 = arith.constant 17 : index
      %c0_32 = arith.constant 0 : index
      %58 = vector.load %arg6[%c1_30, %c17_31, %c0_32] : memref<18x18x1xbf16, #tpu.memory_space<vmem>>, vector<16x1x1xbf16>
      tpu.vector_store %arg6[%c1_30, %c17_31, %c0_32], %56 {strides = array<i32>} : memref<18x18x1xbf16, #tpu.memory_space<vmem>>, vector<16x1x1xbf16>,
      %c0_33 = arith.constant 0 : index
      %c0_34 = arith.constant 0 : index
      %c0_35 = arith.constant 0 : index
      %c0_36 = arith.constant 0 : index
      %59 = vector.load %arg2[%c0_33, %c0_34, %c0_35, %c0_36] : memref<1x16x16x1xbf16, #tpu.memory_space<vmem>>, vector<1x16x16x1xbf16>
      %60 = vector.shape_cast %59 : vector<1x16x16x1xbf16> to vector<16x16x1xbf16>
      %c1_37 = arith.constant 1 : index
      %c1_38 = arith.constant 1 : index
      %c0_39 = arith.constant 0 : index
      %61 = vector.load %arg6[%c1_37, %c1_38, %c0_39] : memref<18x18x1xbf16, #tpu.memory_space<vmem>>, vector<16x16x1xbf16>
      tpu.vector_store %arg6[%c1_37, %c1_38, %c0_39], %60 {strides = array<i32>} : memref<18x18x1xbf16, #tpu.memory_space<vmem>>, vector<16x16x1xbf16>,
    } else {
    }
    %c8_i32 = arith.constant 8 : i32
    %3 = arith.muli %arg1, %c8_i32 : i32
    %4 = tpu.assume_multiple %3, 8 : i32
    %5 = arith.index_cast %4 : i32 to index
    %c0 = arith.constant 0 : index
    %c0_1 = arith.constant 0 : index
    %6 = vector.load %arg6[%5, %c0, %c0_1] : memref<18x18x1xbf16, #tpu.memory_space<vmem>>, vector<10x18x1xbf16>
    %7 = vector.extract_strided_slice %6 {offsets = [0, 0, 0], sizes = [10, 16, 1], strides = [1, 1, 1]} : vector<10x18x1xbf16> to vector<10x16x1xbf16>
    %8 = vector.extract_strided_slice %6 {offsets = [0, 1, 0], sizes = [10, 16, 1], strides = [1, 1, 1]} : vector<10x18x1xbf16> to vector<10x16x1xbf16>
    %9 = vector.extract_strided_slice %6 {offsets = [0, 2, 0], sizes = [10, 16, 1], strides = [1, 1, 1]} : vector<10x18x1xbf16> to vector<10x16x1xbf16>
    %10 = tpu.concatenate %7, %8, %9 in 2 : vector<10x16x1xbf16>, vector<10x16x1xbf16>, vector<10x16x1xbf16> -> vector<10x16x3xbf16>
    %cst = arith.constant 0.000000e+00 : f32
    %11 = vector.broadcast %cst : f32 to vector<128x32xf32>
    %12 = vector.extract_strided_slice %10 {offsets = [0, 0, 0], sizes = [8, 16, 3], strides = [1, 1, 1]} : vector<10x16x3xbf16> to vector<8x16x3xbf16>
    %13 = vector.shape_cast %12 : vector<8x16x3xbf16> to vector<128x3xbf16>
    %c0_2 = arith.constant 0 : index
    %c0_3 = arith.constant 0 : index
    %c0_4 = arith.constant 0 : index
    %14 = vector.load %arg3[%c0_2, %c0_3, %c0_4] : memref<3x3x32xbf16, #tpu.memory_space<vmem>>, vector<1x3x32xbf16>
    %15 = vector.shape_cast %14 : vector<1x3x32xbf16> to vector<3x32xbf16>
    %cst_5 = arith.constant dense<0.000000e+00> : vector<128x32xf32>
    %16 = tpu.matmul %13, %15, %cst_5 {dimension_numbers = #tpu.dot_dimension_numbers<[1], [0], [0], [1], [0, 0, 1, 1], [], []>} : vector<128x3xbf16>, vector<3x32xbf16>, vector<128x32xf32> -> vector<128x32xf32>
    %17 = arith.addf %11, %16 : vector<128x32xf32>
    %18 = vector.extract_strided_slice %10 {offsets = [1, 0, 0], sizes = [8, 16, 3], strides = [1, 1, 1]} : vector<10x16x3xbf16> to vector<8x16x3xbf16>
    %19 = vector.shape_cast %18 : vector<8x16x3xbf16> to vector<128x3xbf16>
    %c1 = arith.constant 1 : index
    %c0_6 = arith.constant 0 : index
    %c0_7 = arith.constant 0 : index
    %20 = vector.load %arg3[%c1, %c0_6, %c0_7] : memref<3x3x32xbf16, #tpu.memory_space<vmem>>, vector<1x3x32xbf16>
    %21 = vector.shape_cast %20 : vector<1x3x32xbf16> to vector<3x32xbf16>
    %cst_8 = arith.constant dense<0.000000e+00> : vector<128x32xf32>
    %22 = tpu.matmul %19, %21, %cst_8 {dimension_numbers = #tpu.dot_dimension_numbers<[1], [0], [0], [1], [0, 0, 1, 1], [], []>} : vector<128x3xbf16>, vector<3x32xbf16>, vector<128x32xf32> -> vector<128x32xf32>
    %23 = arith.addf %17, %22 : vector<128x32xf32>
    %24 = vector.extract_strided_slice %10 {offsets = [2, 0, 0], sizes = [8, 16, 3], strides = [1, 1, 1]} : vector<10x16x3xbf16> to vector<8x16x3xbf16>
    %25 = vector.shape_cast %24 : vector<8x16x3xbf16> to vector<128x3xbf16>
    %c2 = arith.constant 2 : index
    %c0_9 = arith.constant 0 : index
    %c0_10 = arith.constant 0 : index
    %26 = vector.load %arg3[%c2, %c0_9, %c0_10] : memref<3x3x32xbf16, #tpu.memory_space<vmem>>, vector<1x3x32xbf16>
    %27 = vector.shape_cast %26 : vector<1x3x32xbf16> to vector<3x32xbf16>
    %cst_11 = arith.constant dense<0.000000e+00> : vector<128x32xf32>
    %28 = tpu.matmul %25, %27, %cst_11 {dimension_numbers = #tpu.dot_dimension_numbers<[1], [0], [0], [1], [0, 0, 1, 1], [], []>} : vector<128x3xbf16>, vector<3x32xbf16>, vector<128x32xf32> -> vector<128x32xf32>
    %29 = arith.addf %23, %28 : vector<128x32xf32>
    %c0_12 = arith.constant 0 : index
    %c0_13 = arith.constant 0 : index
    %30 = vector.load %arg4[%c0_12, %c0_13] : memref<1x32xf32, #tpu.memory_space<vmem>>, vector<1x32xf32>
    %31 = vector.broadcast %30 : vector<1x32xf32> to vector<128x32xf32>
    %32 = arith.addf %29, %31 : vector<128x32xf32>
    %cst_14 = arith.constant 0.000000e+00 : f32
    %33 = vector.broadcast %cst_14 : f32 to vector<128x32xf32>
    %34 = arith.cmpf ogt, %32, %33 : vector<128x32xf32>
    %cst_15 = arith.constant 0.00999999977 : f32
    %35 = vector.broadcast %cst_15 : f32 to vector<128x32xf32>
    %36 = arith.mulf %35, %32 : vector<128x32xf32>
    %37 = arith.select %34, %32, %36 : vector<128x32xi1>, vector<128x32xf32>
    %38 = vector.shape_cast %37 : vector<128x32xf32> to vector<4x2x8x2x32xf32>
    %39 = vector.extract_strided_slice %38 {offsets = [0, 0, 0, 0, 0], sizes = [4, 1, 8, 2, 32], strides = [1, 1, 1, 1, 1]} : vector<4x2x8x2x32xf32> to vector<4x1x8x2x32xf32>
    %40 = vector.shape_cast %39 : vector<4x1x8x2x32xf32> to vector<4x8x2x32xf32>
    %41 = vector.extract_strided_slice %38 {offsets = [0, 1, 0, 0, 0], sizes = [4, 1, 8, 2, 32], strides = [1, 1, 1, 1, 1]} : vector<4x2x8x2x32xf32> to vector<4x1x8x2x32xf32>
    %42 = vector.shape_cast %41 : vector<4x1x8x2x32xf32> to vector<4x8x2x32xf32>
    %43 = arith.maximumf %40, %42 : vector<4x8x2x32xf32>
    %44 = vector.extract_strided_slice %43 {offsets = [0, 0, 0, 0], sizes = [4, 8, 1, 32], strides = [1, 1, 1, 1]} : vector<4x8x2x32xf32> to vector<4x8x1x32xf32>
    %45 = vector.shape_cast %44 : vector<4x8x1x32xf32> to vector<4x8x32xf32>
    %46 = vector.extract_strided_slice %43 {offsets = [0, 0, 1, 0], sizes = [4, 8, 1, 32], strides = [1, 1, 1, 1]} : vector<4x8x2x32xf32> to vector<4x8x1x32xf32>
    %47 = vector.shape_cast %46 : vector<4x8x1x32xf32> to vector<4x8x32xf32>
    %48 = arith.maximumf %45, %47 : vector<4x8x32xf32>
    %49 = arith.truncf %48 : vector<4x8x32xf32> to vector<4x8x32xbf16>
    %c0_16 = arith.constant 0 : index
    %c0_17 = arith.constant 0 : index
    %c0_18 = arith.constant 0 : index
    %c0_19 = arith.constant 0 : index
    %50 = vector.load %arg5[%c0_16, %c0_17, %c0_18, %c0_19] : memref<1x4x8x32xbf16, #tpu.memory_space<vmem>>, vector<1x4x8x32xbf16>
    %51 = vector.shape_cast %50 : vector<1x4x8x32xbf16> to vector<4x8x32xbf16>
    %52 = vector.shape_cast %49 : vector<4x8x32xbf16> to vector<1x4x8x32xbf16>
    tpu.vector_store %arg5[%c0_16, %c0_17, %c0_18, %c0_19], %52 {strides = array<i32>} : memref<1x4x8x32xbf16, #tpu.memory_space<vmem>>, vector<1x4x8x32xbf16>,
    return
  }
  func.func @transform_0(%arg0: i32, %arg1: i32) -> (i32, i32, i32, i32) {
    %c0_i32 = arith.constant 0 : i32
    %c0_i32_0 = arith.constant 0 : i32
    %c0_i32_1 = arith.constant 0 : i32
    %c0_i32_2 = arith.constant 0 : i32
    return %arg0, %c0_i32, %c0_i32_0, %c0_i32_1 : i32, i32, i32, i32
  }
  func.func @transform_1(%arg0: i32, %arg1: i32) -> (i32, i32, i32) {
    %c0_i32 = arith.constant 0 : i32
    %c0_i32_0 = arith.constant 0 : i32
    %c0_i32_1 = arith.constant 0 : i32
    %c0_i32_2 = arith.constant 0 : i32
    return %c0_i32, %c0_i32_0, %c0_i32_1 : i32, i32, i32
  }
  func.func @transform_2(%arg0: i32, %arg1: i32) -> (i32, i32) {
    %c0_i32 = arith.constant 0 : i32
    %c0_i32_0 = arith.constant 0 : i32
    %c0_i32_1 = arith.constant 0 : i32
    return %c0_i32, %c0_i32_0 : i32, i32
  }
  func.func @transform_3(%arg0: i32, %arg1: i32) -> (i32, i32, i32, i32) {
    %c0_i32 = arith.constant 0 : i32
    %c0_i32_0 = arith.constant 0 : i32
    %c0_i32_1 = arith.constant 0 : i32
    return %arg0, %arg1, %c0_i32, %c0_i32_0 : i32, i32, i32, i32
  }
}

module attributes {stable_mosaic.version = 11 : i64} {
  func.func @conv_bn_lrelu_pool_kernel(%arg0: i32, %arg1: i32, %arg2: memref<1x4x4x128xbf16, #tpu.memory_space<vmem>>, %arg3: memref<3x384x64xbf16, #tpu.memory_space<vmem>>, %arg4: memref<1x64xf32, #tpu.memory_space<vmem>>, %arg5: memref<1x2x2x64xbf16, #tpu.memory_space<vmem>>, %arg6: memref<6x6x128xbf16, #tpu.memory_space<vmem>>) attributes {dimension_semantics = [#tpu.dimension_semantics<parallel>, #tpu.dimension_semantics<arbitrary>], iteration_bounds = array<i64: 2, 1>, scalar_prefetch = 0 : i64, scratch_operands = 1 : i64, tpu.core_type = #tpu.core_type<tc>, window_params = [{transform_indices = @transform_0, window_bounds = array<i64: 1, 4, 4, 128>}, {pipeline_mode = #tpu.pipeline_mode<synchronous>, transform_indices = @transform_1, window_bounds = array<i64: 3, 384, 64>}, {pipeline_mode = #tpu.pipeline_mode<synchronous>, transform_indices = @transform_2, window_bounds = array<i64: 1, 64>}, {transform_indices = @transform_3, window_bounds = array<i64: 1, 2, 2, 64>}]} {
    %c0_i32 = arith.constant 0 : i32
    %0 = arith.cmpi eq, %arg1, %c0_i32 : i32
    %1 = arith.extui %0 : i1 to i32
    %c0_i32_0 = arith.constant 0 : i32
    %2 = arith.cmpi ne, %1, %c0_i32_0 : i32
    scf.if %2 {
      %cst_20 = arith.constant 0.000000e+00 : bf16
      %52 = vector.broadcast %cst_20 : bf16 to vector<1x6x128xbf16>
      %c0_21 = arith.constant 0 : index
      %c0_22 = arith.constant 0 : index
      %c0_23 = arith.constant 0 : index
      %53 = vector.load %arg6[%c0_21, %c0_22, %c0_23] : memref<6x6x128xbf16, #tpu.memory_space<vmem>>, vector<1x6x128xbf16>
      tpu.vector_store %arg6[%c0_21, %c0_22, %c0_23], %52 {strides = array<i32>} : memref<6x6x128xbf16, #tpu.memory_space<vmem>>, vector<1x6x128xbf16>,
      %c5 = arith.constant 5 : index
      %c0_24 = arith.constant 0 : index
      %c0_25 = arith.constant 0 : index
      %54 = vector.load %arg6[%c5, %c0_24, %c0_25] : memref<6x6x128xbf16, #tpu.memory_space<vmem>>, vector<1x6x128xbf16>
      tpu.vector_store %arg6[%c5, %c0_24, %c0_25], %52 {strides = array<i32>} : memref<6x6x128xbf16, #tpu.memory_space<vmem>>, vector<1x6x128xbf16>,
      %cst_26 = arith.constant 0.000000e+00 : bf16
      %55 = vector.broadcast %cst_26 : bf16 to vector<4x1x128xbf16>
      %c1_27 = arith.constant 1 : index
      %c0_28 = arith.constant 0 : index
      %c0_29 = arith.constant 0 : index
      %56 = vector.load %arg6[%c1_27, %c0_28, %c0_29] : memref<6x6x128xbf16, #tpu.memory_space<vmem>>, vector<4x1x128xbf16>
      tpu.vector_store %arg6[%c1_27, %c0_28, %c0_29], %55 {strides = array<i32>} : memref<6x6x128xbf16, #tpu.memory_space<vmem>>, vector<4x1x128xbf16>,
      %c1_30 = arith.constant 1 : index
      %c5_31 = arith.constant 5 : index
      %c0_32 = arith.constant 0 : index
      %57 = vector.load %arg6[%c1_30, %c5_31, %c0_32] : memref<6x6x128xbf16, #tpu.memory_space<vmem>>, vector<4x1x128xbf16>
      tpu.vector_store %arg6[%c1_30, %c5_31, %c0_32], %55 {strides = array<i32>} : memref<6x6x128xbf16, #tpu.memory_space<vmem>>, vector<4x1x128xbf16>,
      %c0_33 = arith.constant 0 : index
      %c0_34 = arith.constant 0 : index
      %c0_35 = arith.constant 0 : index
      %c0_36 = arith.constant 0 : index
      %58 = vector.load %arg2[%c0_33, %c0_34, %c0_35, %c0_36] : memref<1x4x4x128xbf16, #tpu.memory_space<vmem>>, vector<1x4x4x128xbf16>
      %59 = vector.shape_cast %58 : vector<1x4x4x128xbf16> to vector<4x4x128xbf16>
      %c1_37 = arith.constant 1 : index
      %c1_38 = arith.constant 1 : index
      %c0_39 = arith.constant 0 : index
      %60 = vector.load %arg6[%c1_37, %c1_38, %c0_39] : memref<6x6x128xbf16, #tpu.memory_space<vmem>>, vector<4x4x128xbf16>
      tpu.vector_store %arg6[%c1_37, %c1_38, %c0_39], %59 {strides = array<i32>} : memref<6x6x128xbf16, #tpu.memory_space<vmem>>, vector<4x4x128xbf16>,
    } else {
    }
    %c4_i32 = arith.constant 4 : i32
    %3 = arith.muli %arg1, %c4_i32 : i32
    %4 = arith.index_cast %3 : i32 to index
    %c0 = arith.constant 0 : index
    %c0_1 = arith.constant 0 : index
    %5 = vector.load %arg6[%4, %c0, %c0_1] : memref<6x6x128xbf16, #tpu.memory_space<vmem>>, vector<6x6x128xbf16>
    %6 = vector.extract_strided_slice %5 {offsets = [0, 0, 0], sizes = [6, 4, 128], strides = [1, 1, 1]} : vector<6x6x128xbf16> to vector<6x4x128xbf16>
    %7 = vector.extract_strided_slice %5 {offsets = [0, 1, 0], sizes = [6, 4, 128], strides = [1, 1, 1]} : vector<6x6x128xbf16> to vector<6x4x128xbf16>
    %8 = vector.extract_strided_slice %5 {offsets = [0, 2, 0], sizes = [6, 4, 128], strides = [1, 1, 1]} : vector<6x6x128xbf16> to vector<6x4x128xbf16>
    %9 = tpu.concatenate %6, %7, %8 in 2 : vector<6x4x128xbf16>, vector<6x4x128xbf16>, vector<6x4x128xbf16> -> vector<6x4x384xbf16>
    %cst = arith.constant 0.000000e+00 : f32
    %10 = vector.broadcast %cst : f32 to vector<16x64xf32>
    %11 = vector.extract_strided_slice %9 {offsets = [0, 0, 0], sizes = [4, 4, 384], strides = [1, 1, 1]} : vector<6x4x384xbf16> to vector<4x4x384xbf16>
    %12 = vector.shape_cast %11 : vector<4x4x384xbf16> to vector<16x384xbf16>
    %c0_2 = arith.constant 0 : index
    %c0_3 = arith.constant 0 : index
    %c0_4 = arith.constant 0 : index
    %13 = vector.load %arg3[%c0_2, %c0_3, %c0_4] : memref<3x384x64xbf16, #tpu.memory_space<vmem>>, vector<1x384x64xbf16>
    %14 = vector.shape_cast %13 : vector<1x384x64xbf16> to vector<384x64xbf16>
    %cst_5 = arith.constant dense<0.000000e+00> : vector<16x64xf32>
    %15 = tpu.matmul %12, %14, %cst_5 {dimension_numbers = #tpu.dot_dimension_numbers<[1], [0], [0], [1], [0, 0, 1, 1], [], []>} : vector<16x384xbf16>, vector<384x64xbf16>, vector<16x64xf32> -> vector<16x64xf32>
    %16 = arith.addf %10, %15 : vector<16x64xf32>
    %17 = vector.extract_strided_slice %9 {offsets = [1, 0, 0], sizes = [4, 4, 384], strides = [1, 1, 1]} : vector<6x4x384xbf16> to vector<4x4x384xbf16>
    %18 = vector.shape_cast %17 : vector<4x4x384xbf16> to vector<16x384xbf16>
    %c1 = arith.constant 1 : index
    %c0_6 = arith.constant 0 : index
    %c0_7 = arith.constant 0 : index
    %19 = vector.load %arg3[%c1, %c0_6, %c0_7] : memref<3x384x64xbf16, #tpu.memory_space<vmem>>, vector<1x384x64xbf16>
    %20 = vector.shape_cast %19 : vector<1x384x64xbf16> to vector<384x64xbf16>
    %cst_8 = arith.constant dense<0.000000e+00> : vector<16x64xf32>
    %21 = tpu.matmul %18, %20, %cst_8 {dimension_numbers = #tpu.dot_dimension_numbers<[1], [0], [0], [1], [0, 0, 1, 1], [], []>} : vector<16x384xbf16>, vector<384x64xbf16>, vector<16x64xf32> -> vector<16x64xf32>
    %22 = arith.addf %16, %21 : vector<16x64xf32>
    %23 = vector.extract_strided_slice %9 {offsets = [2, 0, 0], sizes = [4, 4, 384], strides = [1, 1, 1]} : vector<6x4x384xbf16> to vector<4x4x384xbf16>
    %24 = vector.shape_cast %23 : vector<4x4x384xbf16> to vector<16x384xbf16>
    %c2 = arith.constant 2 : index
    %c0_9 = arith.constant 0 : index
    %c0_10 = arith.constant 0 : index
    %25 = vector.load %arg3[%c2, %c0_9, %c0_10] : memref<3x384x64xbf16, #tpu.memory_space<vmem>>, vector<1x384x64xbf16>
    %26 = vector.shape_cast %25 : vector<1x384x64xbf16> to vector<384x64xbf16>
    %cst_11 = arith.constant dense<0.000000e+00> : vector<16x64xf32>
    %27 = tpu.matmul %24, %26, %cst_11 {dimension_numbers = #tpu.dot_dimension_numbers<[1], [0], [0], [1], [0, 0, 1, 1], [], []>} : vector<16x384xbf16>, vector<384x64xbf16>, vector<16x64xf32> -> vector<16x64xf32>
    %28 = arith.addf %22, %27 : vector<16x64xf32>
    %c0_12 = arith.constant 0 : index
    %c0_13 = arith.constant 0 : index
    %29 = vector.load %arg4[%c0_12, %c0_13] : memref<1x64xf32, #tpu.memory_space<vmem>>, vector<1x64xf32>
    %30 = vector.broadcast %29 : vector<1x64xf32> to vector<16x64xf32>
    %31 = arith.addf %28, %30 : vector<16x64xf32>
    %cst_14 = arith.constant 0.000000e+00 : f32
    %32 = vector.broadcast %cst_14 : f32 to vector<16x64xf32>
    %33 = arith.cmpf ogt, %31, %32 : vector<16x64xf32>
    %cst_15 = arith.constant 0.00999999977 : f32
    %34 = vector.broadcast %cst_15 : f32 to vector<16x64xf32>
    %35 = arith.mulf %34, %31 : vector<16x64xf32>
    %36 = arith.select %33, %31, %35 : vector<16x64xi1>, vector<16x64xf32>
    %37 = vector.shape_cast %36 : vector<16x64xf32> to vector<2x2x2x2x64xf32>
    %38 = vector.extract_strided_slice %37 {offsets = [0, 0, 0, 0, 0], sizes = [2, 1, 2, 2, 64], strides = [1, 1, 1, 1, 1]} : vector<2x2x2x2x64xf32> to vector<2x1x2x2x64xf32>
    %39 = vector.shape_cast %38 : vector<2x1x2x2x64xf32> to vector<2x2x2x64xf32>
    %40 = vector.extract_strided_slice %37 {offsets = [0, 1, 0, 0, 0], sizes = [2, 1, 2, 2, 64], strides = [1, 1, 1, 1, 1]} : vector<2x2x2x2x64xf32> to vector<2x1x2x2x64xf32>
    %41 = vector.shape_cast %40 : vector<2x1x2x2x64xf32> to vector<2x2x2x64xf32>
    %42 = arith.maximumf %39, %41 : vector<2x2x2x64xf32>
    %43 = vector.extract_strided_slice %42 {offsets = [0, 0, 0, 0], sizes = [2, 2, 1, 64], strides = [1, 1, 1, 1]} : vector<2x2x2x64xf32> to vector<2x2x1x64xf32>
    %44 = vector.shape_cast %43 : vector<2x2x1x64xf32> to vector<2x2x64xf32>
    %45 = vector.extract_strided_slice %42 {offsets = [0, 0, 1, 0], sizes = [2, 2, 1, 64], strides = [1, 1, 1, 1]} : vector<2x2x2x64xf32> to vector<2x2x1x64xf32>
    %46 = vector.shape_cast %45 : vector<2x2x1x64xf32> to vector<2x2x64xf32>
    %47 = arith.maximumf %44, %46 : vector<2x2x64xf32>
    %48 = arith.truncf %47 : vector<2x2x64xf32> to vector<2x2x64xbf16>
    %c0_16 = arith.constant 0 : index
    %c0_17 = arith.constant 0 : index
    %c0_18 = arith.constant 0 : index
    %c0_19 = arith.constant 0 : index
    %49 = vector.load %arg5[%c0_16, %c0_17, %c0_18, %c0_19] : memref<1x2x2x64xbf16, #tpu.memory_space<vmem>>, vector<1x2x2x64xbf16>
    %50 = vector.shape_cast %49 : vector<1x2x2x64xbf16> to vector<2x2x64xbf16>
    %51 = vector.shape_cast %48 : vector<2x2x64xbf16> to vector<1x2x2x64xbf16>
    tpu.vector_store %arg5[%c0_16, %c0_17, %c0_18, %c0_19], %51 {strides = array<i32>} : memref<1x2x2x64xbf16, #tpu.memory_space<vmem>>, vector<1x2x2x64xbf16>,
    return
  }
  func.func @transform_0(%arg0: i32, %arg1: i32) -> (i32, i32, i32, i32) {
    %c0_i32 = arith.constant 0 : i32
    %c0_i32_0 = arith.constant 0 : i32
    %c0_i32_1 = arith.constant 0 : i32
    %c0_i32_2 = arith.constant 0 : i32
    return %arg0, %c0_i32, %c0_i32_0, %c0_i32_1 : i32, i32, i32, i32
  }
  func.func @transform_1(%arg0: i32, %arg1: i32) -> (i32, i32, i32) {
    %c0_i32 = arith.constant 0 : i32
    %c0_i32_0 = arith.constant 0 : i32
    %c0_i32_1 = arith.constant 0 : i32
    %c0_i32_2 = arith.constant 0 : i32
    return %c0_i32, %c0_i32_0, %c0_i32_1 : i32, i32, i32
  }
  func.func @transform_2(%arg0: i32, %arg1: i32) -> (i32, i32) {
    %c0_i32 = arith.constant 0 : i32
    %c0_i32_0 = arith.constant 0 : i32
    %c0_i32_1 = arith.constant 0 : i32
    return %c0_i32, %c0_i32_0 : i32, i32
  }
  func.func @transform_3(%arg0: i32, %arg1: i32) -> (i32, i32, i32, i32) {
    %c0_i32 = arith.constant 0 : i32
    %c0_i32_0 = arith.constant 0 : i32
    %c0_i32_1 = arith.constant 0 : i32
    return %arg0, %arg1, %c0_i32, %c0_i32_0 : i32, i32, i32, i32
  }
}

module attributes {stable_mosaic.version = 11 : i64} {
  func.func @mlp_softmax_kernel(%arg0: i32, %arg1: memref<2x256xbf16, #tpu.memory_space<vmem>>, %arg2: memref<256x4096xbf16, #tpu.memory_space<vmem>>, %arg3: memref<1x4096xf32, #tpu.memory_space<vmem>>, %arg4: memref<4096x128xbf16, #tpu.memory_space<vmem>>, %arg5: memref<1x128xf32, #tpu.memory_space<vmem>>, %arg6: memref<2x128xf32, #tpu.memory_space<vmem>>, %arg7: memref<2x4096xf32, #tpu.memory_space<vmem>>) attributes {dimension_semantics = [#tpu.dimension_semantics<arbitrary>], iteration_bounds = array<i64: 1>, scalar_prefetch = 0 : i64, scratch_operands = 1 : i64, tpu.core_type = #tpu.core_type<tc>, window_params = [{transform_indices = @transform_0, window_bounds = array<i64: 2, 256>}, {transform_indices = @transform_1, window_bounds = array<i64: 256, 4096>}, {pipeline_mode = #tpu.pipeline_mode<synchronous>, transform_indices = @transform_2, window_bounds = array<i64: 1, 4096>}, {pipeline_mode = #tpu.pipeline_mode<synchronous>, transform_indices = @transform_3, window_bounds = array<i64: 4096, 128>}, {pipeline_mode = #tpu.pipeline_mode<synchronous>, transform_indices = @transform_4, window_bounds = array<i64: 1, 128>}, {pipeline_mode = #tpu.pipeline_mode<synchronous>, transform_indices = @transform_5, window_bounds = array<i64: 2, 128>}]} {
    %c0_i32 = arith.constant 0 : i32
    %0 = arith.cmpi eq, %arg0, %c0_i32 : i32
    %1 = arith.extui %0 : i1 to i32
    %c0_i32_0 = arith.constant 0 : i32
    %2 = arith.cmpi ne, %1, %c0_i32_0 : i32
    scf.if %2 {
      %cst_10 = arith.constant 0.000000e+00 : f32
      %12 = vector.broadcast %cst_10 : f32 to vector<2x4096xf32>
      %c0_11 = arith.constant 0 : index
      %c0_12 = arith.constant 0 : index
      %13 = vector.load %arg7[%c0_11, %c0_12] : memref<2x4096xf32, #tpu.memory_space<vmem>>, vector<2x4096xf32>
      tpu.vector_store %arg7[%c0_11, %c0_12], %12 {strides = array<i32>} : memref<2x4096xf32, #tpu.memory_space<vmem>>, vector<2x4096xf32>,
    } else {
    }
    %c0 = arith.constant 0 : index
    %c0_1 = arith.constant 0 : index
    %3 = vector.load %arg7[%c0, %c0_1] : memref<2x4096xf32, #tpu.memory_space<vmem>>, vector<2x4096xf32>
    %c0_2 = arith.constant 0 : index
    %c0_3 = arith.constant 0 : index
    %4 = vector.load %arg1[%c0_2, %c0_3] : memref<2x256xbf16, #tpu.memory_space<vmem>>, vector<2x256xbf16>
    %c0_4 = arith.constant 0 : index
    %c0_5 = arith.constant 0 : index
    %5 = vector.load %arg2[%c0_4, %c0_5] : memref<256x4096xbf16, #tpu.memory_space<vmem>>, vector<256x4096xbf16>
    %cst = arith.constant dense<0.000000e+00> : vector<2x4096xf32>
    %6 = tpu.matmul %4, %5, %cst {dimension_numbers = #tpu.dot_dimension_numbers<[1], [0], [0], [1], [0, 0, 1, 1], [], []>} : vector<2x256xbf16>, vector<256x4096xbf16>, vector<2x4096xf32> -> vector<2x4096xf32>
    %7 = arith.addf %3, %6 : vector<2x4096xf32>
    %c0_6 = arith.constant 0 : index
    %c0_7 = arith.constant 0 : index
    %8 = vector.load %arg7[%c0_6, %c0_7] : memref<2x4096xf32, #tpu.memory_space<vmem>>, vector<2x4096xf32>
    tpu.vector_store %arg7[%c0_6, %c0_7], %7 {strides = array<i32>} : memref<2x4096xf32, #tpu.memory_space<vmem>>, vector<2x4096xf32>,
    %c0_i32_8 = arith.constant 0 : i32
    %9 = arith.cmpi eq, %arg0, %c0_i32_8 : i32
    %10 = arith.extui %9 : i1 to i32
    %c0_i32_9 = arith.constant 0 : i32
    %11 = arith.cmpi ne, %10, %c0_i32_9 : i32
    scf.if %11 {
      %c0_10 = arith.constant 0 : index
      %c0_11 = arith.constant 0 : index
      %12 = vector.load %arg7[%c0_10, %c0_11] : memref<2x4096xf32, #tpu.memory_space<vmem>>, vector<2x4096xf32>
      %c0_12 = arith.constant 0 : index
      %c0_13 = arith.constant 0 : index
      %13 = vector.load %arg3[%c0_12, %c0_13] : memref<1x4096xf32, #tpu.memory_space<vmem>>, vector<1x4096xf32>
      %14 = vector.broadcast %13 : vector<1x4096xf32> to vector<2x4096xf32>
      %15 = arith.addf %12, %14 : vector<2x4096xf32>
      %cst_14 = arith.constant 0.000000e+00 : f32
      %16 = vector.broadcast %cst_14 : f32 to vector<2x4096xf32>
      %17 = arith.maximumf %15, %16 : vector<2x4096xf32>
      %18 = arith.truncf %17 : vector<2x4096xf32> to vector<2x4096xbf16>
      %c0_15 = arith.constant 0 : index
      %c0_16 = arith.constant 0 : index
      %19 = vector.load %arg4[%c0_15, %c0_16] : memref<4096x128xbf16, #tpu.memory_space<vmem>>, vector<4096x128xbf16>
      %cst_17 = arith.constant dense<0.000000e+00> : vector<2x128xf32>
      %20 = tpu.matmul %18, %19, %cst_17 {dimension_numbers = #tpu.dot_dimension_numbers<[1], [0], [0], [1], [0, 0, 1, 1], [], []>} : vector<2x4096xbf16>, vector<4096x128xbf16>, vector<2x128xf32> -> vector<2x128xf32>
      %c0_18 = arith.constant 0 : index
      %c0_19 = arith.constant 0 : index
      %21 = vector.load %arg5[%c0_18, %c0_19] : memref<1x128xf32, #tpu.memory_space<vmem>>, vector<1x128xf32>
      %22 = vector.broadcast %21 : vector<1x128xf32> to vector<2x128xf32>
      %23 = arith.addf %20, %22 : vector<2x128xf32>
      %cst_20 = arith.constant 0.000000e+00 : f32
      %24 = vector.broadcast %cst_20 : f32 to vector<2x128xf32>
      %25 = arith.maximumf %23, %24 : vector<2x128xf32>
      %26 = tpu.iota {dimensions = array<i32: 1>} : vector<2x128xi32>
      %c20_i32 = arith.constant 20 : i32
      %27 = vector.broadcast %c20_i32 : i32 to vector<2x128xi32>
      %28 = arith.cmpi slt, %26, %27 : vector<2x128xi32>
      %cst_21 = arith.constant -1.000000e+30 : f32
      %29 = vector.broadcast %cst_21 : f32 to vector<2x128xf32>
      %30 = arith.select %28, %25, %29 : vector<2x128xi1>, vector<2x128xf32>
      %cst_22 = arith.constant dense<0xFF800000> : vector<2xf32>
      %31 = vector.multi_reduction <maximumf>, %30, %cst_22 [1] : vector<2x128xf32> to vector<2xf32>
      %32 = vector.shape_cast %31 : vector<2xf32> to vector<2x1xf32>
      %33 = vector.broadcast %32 : vector<2x1xf32> to vector<2x128xf32>
      %34 = arith.subf %30, %33 : vector<2x128xf32>
      %35 = math.exp %34 : vector<2x128xf32>
      %cst_23 = arith.constant dense<0.000000e+00> : vector<2xf32>
      %36 = vector.multi_reduction <add>, %35, %cst_23 [1] : vector<2x128xf32> to vector<2xf32>
      %37 = vector.shape_cast %36 : vector<2xf32> to vector<2x1xf32>
      %38 = vector.broadcast %37 : vector<2x1xf32> to vector<2x128xf32>
      %39 = arith.divf %35, %38 : vector<2x128xf32>
      %c0_24 = arith.constant 0 : index
      %c0_25 = arith.constant 0 : index
      %40 = vector.load %arg6[%c0_24, %c0_25] : memref<2x128xf32, #tpu.memory_space<vmem>>, vector<2x128xf32>
      tpu.vector_store %arg6[%c0_24, %c0_25], %39 {strides = array<i32>} : memref<2x128xf32, #tpu.memory_space<vmem>>, vector<2x128xf32>,
    } else {
    }
    return
  }
  func.func @transform_0(%arg0: i32) -> (i32, i32) {
    %c0_i32 = arith.constant 0 : i32
    %c0_i32_0 = arith.constant 0 : i32
    return %c0_i32, %arg0 : i32, i32
  }
  func.func @transform_1(%arg0: i32) -> (i32, i32) {
    %c0_i32 = arith.constant 0 : i32
    %c0_i32_0 = arith.constant 0 : i32
    return %arg0, %c0_i32 : i32, i32
  }
  func.func @transform_2(%arg0: i32) -> (i32, i32) {
    %c0_i32 = arith.constant 0 : i32
    %c0_i32_0 = arith.constant 0 : i32
    %c0_i32_1 = arith.constant 0 : i32
    return %c0_i32, %c0_i32_0 : i32, i32
  }
  func.func @transform_3(%arg0: i32) -> (i32, i32) {
    %c0_i32 = arith.constant 0 : i32
    %c0_i32_0 = arith.constant 0 : i32
    %c0_i32_1 = arith.constant 0 : i32
    return %c0_i32, %c0_i32_0 : i32, i32
  }
  func.func @transform_4(%arg0: i32) -> (i32, i32) {
    %c0_i32 = arith.constant 0 : i32
    %c0_i32_0 = arith.constant 0 : i32
    %c0_i32_1 = arith.constant 0 : i32
    return %c0_i32, %c0_i32_0 : i32, i32
  }
  func.func @transform_5(%arg0: i32) -> (i32, i32) {
    %c0_i32 = arith.constant 0 : i32
    %c0_i32_0 = arith.constant 0 : i32
    %c0_i32_1 = arith.constant 0 : i32
    return %c0_i32, %c0_i32_0 : i32, i32
  }
}

</mosaic_0001>

<bundles_post_ra>
// kernel: _lambda_.5
= control target key start
LH: loop header
LB: loop body
LE: loop exit
PB: predicated region body
PF: predicated region fallthrough
CT: control target
= control target key end

     0   :  { %8 = vsyncpa [#allocation4], 0  ;;  %s2652_s0 = inlined_call_operand.vmem [shape: bf16[2,8,8,32], index: 0, kind: input, shape index: {}]   ;;  %s2653_s1 = inlined_call_operand.hbm [shape: bf16[3,96,128], index: 1, kind: input, shape index: {}]   ;;  %s2654_s2 = inlined_call_operand.hbm [shape: f32[1,128], index: 2, kind: input, shape index: {}]   ;;  %s2655_s3 = inlined_call_operand.vmem [shape: bf16[2,4,4,128], index: 3, kind: output, shape index: {}]  }
   0x1   :  { %9 = vsyncpa [#allocation6], 0  ;;  %s2233_s12 = smov 0   ;;  %s2235_s13 = smov 0  }
   0x2   :  { %s2237_s14 = smov 0  }
   0x3 LB: > { %s1833_s15 = sadd.s32 4294967295, %s2203_s14   ;;  %s27_s16 = sadd.s32 1, %s2199_s13  ;;  %s2203_s14 = sphi %s2237_s14, %s15_s14   ;;  %s2199_s13 = sphi %s2235_s13, %s2671_s13   ;;  %s2195_s12 = sphi %s2233_s12, %s2670_s12  }
   0x4   : > { %p29_p0 = scmp.ge.s32.totalorder %s27_s16, 2  ;;  %p1835_p1 = scmp.ge.s32.totalorder %s2203_s14, 1 }
   0x5   : > { %p128_p2 = scmp.lt.s32.totalorder %s2203_s14, 3  ;;  %p2258_p4 = scmp.eq.s32.totalorder %s1833_s15, 0 }
   0x6   : > { %s2673_s16 = smov (%p29_p0, %s27_s16), 0  ;;  %s2205_s19 = smov [#allocation3]  }
   0x7   : > { %p2254_p3 = pnand %p1835_p1, %p128_p2  ;;  %s140_s20 = sshll.u32 %s2205_s19, 4  ;;  %s141_s20 = int_to_ptr.vmem [resolvable:$true] %s140_s20 }
   0x8   : > { %s2660_s18 = scalar_select %p2258_p4, 1, 0 }
   0x9   : > { %s2659_s17 = scalar_select %p2254_p3, 1, 0 }
   0xa   : > { %p2046_p5 = pneg %p2254_p3  ;;  %s2206_s22 = smov [#allocation5]  }
   0xb   : > { %s154_s23 = sshll.u32 %s2206_s22, 4  ;;  %s2117_s26 = scalar_lea.hbm %s2653_s1, 2304  ;;  %s2270_s23 = int_to_ptr.vmem [resolvable:$true] %s154_s23 }
   0xc   : > { %p2266_p6 = pnand %p2258_p4, %p2046_p5  ;;  %p2118_p7 = scmp.ne.s32.totalorder %s2653_s1, %s2117_s26 }
   0xd   : > { %p2124_p11 = scmp.lt.u32.totalorder %s2117_s26, %s2653_s1 }
   0xe   : > { %p2119_p8 = pneg %p2266_p6 }
  0x10   : > { %p2120_p9 = pnand %p2119_p8, %p2118_p7 }
  0x12   : > { %p2121_p10 = pneg %p2120_p9 }
  0x14   : > { %p2126_p12 = pnand %p2124_p11, %p2121_p10 }
  0x16   : > { %2129 = shalt.err (!%p2126_p12)
}
  0x17   : > { %s2130_s4 = scalar_lea.vmem %s141_s20, 2304  ;;  %p2138_p2 = scmp.lt.s32.totalorder %s141_s20, %s141_s20 }
  0x18   : > { %p2131_p13 = scmp.ne.s32.totalorder %s141_s20, %s2130_s4  ;;  %p2139_p5 = scmp.lt.s32.totalorder %s2130_s4, %s2130_s4 }
  0x1a   : > { %p2133_p0 = pnand %p2131_p13, %p2119_p8  ;;  %p2140_p4 = por %p2139_p5, %p2138_p2 }
  0x1c   : > { %p2134_p1 = pneg %p2133_p0 }
  0x1e   : > { %p2141_p3 = pnand %p2140_p4, %p2134_p1 }
  0x20   : > { %2144 = shalt.err (!%p2141_p3)
}
  0x21   : > { %s2207_s5 = smov 64   ;;  %s2208_s6 = smov 4  }
  0x22   : > { %2049 = dma.hbm_to_vmem [thread:$0]  (!%p2266_p6), %s2653_s1, 2304, %s141_s20, [#allocation4], %s2207_s5, %s2207_s5, %s2208_s6  }
  0x23   : > { %s2145_s11 = scalar_lea.hbm %s2654_s2, 16 }
  0x24   : > { %p2146_p7 = scmp.ne.s32.totalorder %s2654_s2, %s2145_s11  ;;  %p2152_p9 = scmp.lt.u32.totalorder %s2145_s11, %s2654_s2 }
  0x26   : > { %p2148_p3 = pnand %p2146_p7, %p2119_p8 }
  0x28   : > { %p2149_p4 = pneg %p2148_p3 }
  0x2a   : > { %p2154_p10 = pnand %p2152_p9, %p2149_p4 }
  0x2c   : > { %2157 = shalt.err (!%p2154_p10)
}
  0x2d   : > { %s2158_s20 = scalar_lea.vmem %s2270_s23, 16  ;;  %s2165_s25 = scalar_lea.vmem %s2270_s23, 32 }
  0x2e   : > { %p2159_p11 = scmp.ne.s32.totalorder %s2270_s23, %s2158_s20  ;;  %p2166_p0 = scmp.lt.s32.totalorder %s2270_s23, %s2270_s23 }
  0x2f   : > { %p2167_p1 = scmp.lt.s32.totalorder %s2165_s25, %s2158_s20 }
  0x30   : > { %p2161_p12 = pnand %p2159_p11, %p2119_p8 }
  0x31   : > { %p2168_p2 = por %p2167_p1, %p2166_p0 }
  0x32   : > { %p2162_p13 = pneg %p2161_p12 }
  0x34   : > { %p2169_p5 = pnand %p2168_p2, %p2162_p13 }
  0x36   : > { %2172 = shalt.err (!%p2169_p5)
}
  0x37   : > { %2052 = dma.hbm_to_vmem [thread:$0]  (!%p2266_p6), %s2654_s2, 16, %s2270_s23, [#allocation6]  }
  0x38   : > { %p2662_p7 = scmp.ne.s32.totalorder %s2659_s17, 0 }
  0x39   : > { %p2663_p8 = scmp.ne.s32.totalorder (!%p2662_p7), %s2660_s18, 0 }
  0x3a   : > { %175 = sbr.rel (%p2662_p7) target bundleno = 543 (0x21f), region = 32 }
  0x41   : > { %2186 = dma.done.wait (%p2663_p8), [#allocation4], 2304  }
  0x42   : > { %2188 = vsyncadd (%p2663_p8), [#allocation4], 4294964992 }
  0x43   : > { %2190 = dma.done.wait (%p2663_p8), [#allocation6], 16  }
  0x44   : > { %2192 = vsyncadd (%p2663_p8), [#allocation6], 4294967280  ;;  %vm227_vm0 = vcmask 257024   ;;  %vm229_vm1 = vcmask 253952   ;;  %v2209_v0 = vmov 0   ;;  %p207_p6 = scmp.lt.s32.totalorder %s2195_s12, 1 }
  0x45   : > { %228 = vst.msk [vmem:[#allocation2] sm:$0xf] %vm227_vm0, %v2209_v0  ;;  %vm236_vm2 = vsmask.f32 256  ;;  %232 = vst.msk [vmem:[#allocation2 + $0x48] sm:$0xf] %vm227_vm0, %v2209_v0 }
  0x46   : > { %230 = vst.msk [vmem:[#allocation2 + $0x4] sm:$0x1] %vm229_vm1, %v2209_v0  ;;  %233 = vst.msk [vmem:[#allocation2 + $0x4c] sm:$0x1] %vm229_vm1, %v2209_v0  ;;  %vm262_vm3 = vsmask.f32 7938 }
  0x47   : > { %s2675_s12 = smov (!%p207_p6, %s2195_s12), 1  ;;  %vm2336_vm4 = vmand %vm229_vm1, %vm236_vm2  ;;  %v241_v3 = vld [vmem:[#allocation2 + $0x10] sm:$0x1]  ;;  %v267_v4 = vld [vmem:[#allocation2 + $0x14] sm:$0x1]  ;;  %s2210_s28 = smov 64  }
  0x48   : > { %vm2341_vm5 = vmand %vm229_vm1, %vm262_vm3  ;;  %s1918_s17 = sshll.u32 %s2675_s12, 5  ;;  %v242_v8 = vsel %vm2336_vm4, 0, %v241_v3  ;;  %v238_v13 = vld [vmem:[#allocation2 + $0x8] sm:$0x1]  ;;  %v264_v14 = vld [vmem:[#allocation2 + $0xc] sm:$0x1] }
  0x49   : > { %s2349_s23 = scalar_lea.vmem %s2652_s0, %s1918_s17  ;;  %v268_v9 = vsel %vm2341_vm5, 0, %v267_v4  ;;  %243 = vst [vmem:[#allocation2 + $0x10] sm:$0x1] %v242_v8  ;;  %v239_v15 = vsel %vm2336_vm4, 0, %v238_v13  ;;  %v265_v16 = vsel %vm2341_vm5, 0, %v264_v14  ;;  %v2099_v34 = vld [vmem:[#allocation3 + $0x30] sm:$0xff]   ;;  %vm2372_vm6 = vmand %vm227_vm0, %vm262_vm3 }
  0x4a   : > { %v289_v5 = vld [vmem:[%s2349_s23 + $0x4] sm:$0xf]  ;;  %269 = vst [vmem:[#allocation2 + $0x14] sm:$0x1] %v268_v9  ;;  %v288_v17 = vld [vmem:[%s2349_s23] sm:$0xf]  ;;  %1950 = vmatprep.subr.bf16.mxu1 %v2099_v34 }
  0x4b   : > { %v305_v11 = vshrl.u32 %v289_v5, 16  ;;  %v308_v12 = vshll.u32 %v289_v5, 16  ;;  %v247_v18 = vld [vmem:[#allocation2 + $0x20] sm:$0x1]  ;;  %240 = vst [vmem:[#allocation2 + $0x8] sm:$0x1] %v239_v15  ;;  %1951 = vmatpush3.bf16.msra.mxu1 %v2099_v34 }
  0x4c   : > { %v2352_v6 = vld [vmem:[#allocation2] sm:$0xf]  ;;  %266 = vst [vmem:[#allocation2 + $0xc] sm:$0x1] %v265_v16  ;;  %v273_v23 = vld [vmem:[#allocation2 + $0x24] sm:$0x1] }
  0x4d   : > { %v431_v7 = vld [vmem:[#allocation2 + $0x4] sm:$0x1]  ;;  %v307_v22 = vrot.slane %v305_v11, 7  ;;  %v297_v24 = vshrl.u32 %v288_v17, 16  ;;  %v300_v25 = vshll.u32 %v288_v17, 16  ;;  %v248_v26 = vsel %vm2336_vm4, 0, %v247_v18 }
  0x4e   : > { %v1846_v10 = vcombine.low %v2352_v6, %v431_v7  ;;  %v274_v27 = vsel %vm2341_vm5, 0, %v273_v23  ;;  %v291_v28 = vld [vmem:[%s2349_s23 + $0xc] sm:$0xf]  ;;  %249 = vst [vmem:[#allocation2 + $0x20] sm:$0x1] %v248_v26  ;;  %v2100_v40 = vld [vmem:[#allocation3] sm:$0xff]  }
  0x4f   : > { %v310_v30 = vor.u32 %v308_v12, %v307_v22  ;;  %v311_v31 = vrot.slane %v307_v22, 4  ;;  %275 = vst [vmem:[#allocation2 + $0x24] sm:$0x1] %v274_v27  ;;  %v321_v32 = vshrl.u32 %v291_v28, 16  ;;  %v244_v33 = vld [vmem:[#allocation2 + $0x18] sm:$0x1]  ;;  %1970 = vmatprep.subr.bf16.mxu0 %v2100_v40 }
  0x50   : > { %v501_v19 = vshrl.u32 %v1846_v10, 16  ;;  %v503_v20 = vshll.u32 %v1846_v10, 16  ;;  %v590_v21 = vrot.slane %v1846_v10, 1  ;;  %v299_v36 = vrot.slane %v297_v24, 7  ;;  %v270_v39 = vld [vmem:[#allocation2 + $0x1c] sm:$0x1]  ;;  %1971 = vmatpush3.bf16.msra.mxu0 %v2100_v40 }
  0x51   : > { %v324_v37 = vshll.u32 %v291_v28, 16  ;;  %v245_v38 = vsel %vm2336_vm4, 0, %v244_v33  ;;  %v323_v42 = vrot.slane %v321_v32, 7  ;;  %v271_v43 = vsel %vm2341_vm5, 0, %v270_v39  ;;  %v290_v44 = vld [vmem:[%s2349_s23 + $0x8] sm:$0xf] }
  0x52   : > { %v505_v29 = vrot.slane %v503_v20, 1  ;;  %600 = vrot.lane.b32.xlu1 %v590_v21, %s2210_s28  ;;  %246 = vst [vmem:[#allocation2 + $0x18] sm:$0x1] %v245_v38  ;;  %v253_v45 = vld [vmem:[#allocation2 + $0x30] sm:$0x1]  ;;  %v302_v48 = vor.u32 %v300_v25, %v299_v36  ;;  %v303_v49 = vrot.slane %v299_v36, 4 }
  0x53   : > { %v384_v46 = vld [vmem:[#allocation2 + $0x10] sm:$0xf]  ;;  %v387_v47 = vld [vmem:[#allocation2 + $0x14] sm:$0x1]  ;;  %272 = vst [vmem:[#allocation2 + $0x1c] sm:$0x1] %v271_v43  ;;  %v326_v53 = vor.u32 %v324_v37, %v323_v42 }
  0x54   : > { %v506_v41 = vor.u32 %v505_v29, %v501_v19  ;;  %v313_v50 = vshrl.u32 %v290_v44, 16  ;;  %s2211_s29 = smov 32   ;;  %v385_v51 = vsel %vm2372_vm6, %v310_v30, %v384_v46  ;;  %v388_v52 = vsel %vm2336_vm4, %v311_v31, %v387_v47  ;;  %v279_v55 = vld [vmem:[#allocation2 + $0x34] sm:$0x1]  ;;  %v2101_v57 = vld [vmem:[#allocation3 + $0x38] sm:$0xff]   ;;  %v2102_v27 = vld [vmem:[#allocation3 + $0x8] sm:$0xff]  }
  0x55   : > { %v327_v54 = vrot.slane %v323_v42, 4  ;;  %v293_v56 = vld [vmem:[%s2349_s23 + $0x14] sm:$0xf]  ;;  %386 = vst [vmem:[#allocation2 + $0x10] sm:$0xf] %v385_v51  ;;  %v316_v61 = vshll.u32 %v290_v44, 16  ;;  %1952 = vmatprep.subr.bf16.mxu1 %v2101_v57  ;;  %1972 = vmatprep.subr.bf16.mxu0 %v2102_v27 }
  0x56   : > { %570 = vrot.lane.b32.xlu0 %v506_v41, %s2211_s29  ;;  %389 = vst [vmem:[#allocation2 + $0x14] sm:$0x1] %v388_v52  ;;  %v378_v58 = vld [vmem:[#allocation2 + $0x8] sm:$0xf]  ;;  %v381_v59 = vld [vmem:[#allocation2 + $0xc] sm:$0x1]  ;;  %1953 = vmatpush3.bf16.msra.mxu1 %v2101_v57 }
  0x57   : > { %v315_v60 = vrot.slane %v313_v50, 7  ;;  %v379_v62 = vsel %vm2372_vm6, %v302_v48, %v378_v58  ;;  %v382_v63 = vsel %vm2336_vm4, %v303_v49, %v381_v59  ;;  %v254_v0 = vsel %vm2336_vm4, 0, %v253_v45  ;;  %v250_v4 = vld [vmem:[#allocation2 + $0x28] sm:$0x1]  ;;  %v276_v5 = vld [vmem:[#allocation2 + $0x2c] sm:$0x1]  ;;  %1973 = vmatpush3.bf16.msra.mxu0 %v2102_v27 }
  0x58   : > { %v280_v3 = vsel %vm2341_vm5, 0, %v279_v55  ;;  %380 = vst [vmem:[#allocation2 + $0x8] sm:$0xf] %v379_v62  ;;  %383 = vst [vmem:[#allocation2 + $0xc] sm:$0x1] %v382_v63  ;;  %v337_v11 = vshrl.u32 %v293_v56, 16 }
  0x59   : > { %v396_v7 = vld [vmem:[#allocation2 + $0x20] sm:$0xf]  ;;  %v399_v8 = vld [vmem:[#allocation2 + $0x24] sm:$0x1]  ;;  %v318_v9 = vor.u32 %v316_v61, %v315_v60  ;;  %v319_v10 = vrot.slane %v315_v60, 4  ;;  %v340_v14 = vshll.u32 %v293_v56, 16 }
  0x5a   : > { %255 = vst [vmem:[#allocation2 + $0x30] sm:$0x1] %v254_v0  ;;  %281 = vst [vmem:[#allocation2 + $0x34] sm:$0x1] %v280_v3  ;;  %v397_v12 = vsel %vm2372_vm6, %v326_v53, %v396_v7  ;;  %v400_v13 = vsel %vm2336_vm4, %v327_v54, %v399_v8  ;;  %v251_v15 = vsel %vm2336_vm4, 0, %v250_v4  ;;  %v339_v19 = vrot.slane %v337_v11, 7 }
  0x5b   : > { %v292_v16 = vld [vmem:[%s2349_s23 + $0x10] sm:$0xf]  ;;  %v259_v17 = vld [vmem:[#allocation2 + $0x40] sm:$0x1]  ;;  %398 = vst [vmem:[#allocation2 + $0x20] sm:$0xf] %v397_v12 }
  0x5c   : > { %401 = vst [vmem:[#allocation2 + $0x24] sm:$0x1] %v400_v13  ;;  %v390_v18 = vld [vmem:[#allocation2 + $0x18] sm:$0xf]  ;;  %252 = vst [vmem:[#allocation2 + $0x28] sm:$0x1] %v251_v15  ;;  %v342_v33 = vor.u32 %v340_v14, %v339_v19 }
  0x5d   : > { %v277_v20 = vsel %vm2341_vm5, 0, %v276_v5  ;;  %v329_v21 = vshrl.u32 %v292_v16, 16  ;;  %v332_v22 = vshll.u32 %v292_v16, 16  ;;  %v391_v23 = vsel %vm2372_vm6, %v318_v9, %v390_v18  ;;  %v393_v24 = vld [vmem:[#allocation2 + $0x1c] sm:$0x1]  ;;  %v2103_v50 = vld [vmem:[#allocation3 + $0x40] sm:$0xff]  }
  0x5e   : > { %278 = vst [vmem:[#allocation2 + $0x2c] sm:$0x1] %v277_v20  ;;  %v260_v25 = vsel %vm2336_vm4, 0, %v259_v17  ;;  %v285_v26 = vld [vmem:[#allocation2 + $0x44] sm:$0x1]  ;;  %v394_v28 = vsel %vm2336_vm4, %v319_v10, %v393_v24  ;;  %v343_v34 = vrot.slane %v339_v19, 4  ;;  %1954 = vmatprep.subr.bf16.mxu1 %v2103_v50 }
  0x5f   : > { %392 = vst [vmem:[#allocation2 + $0x18] sm:$0xf] %v391_v23  ;;  %v331_v29 = vrot.slane %v329_v21, 7  ;;  %261 = vst [vmem:[#allocation2 + $0x40] sm:$0x1] %v260_v25  ;;  %v286_v36 = vsel %vm2341_vm5, 0, %v285_v26  ;;  %1955 = vmatpush3.bf16.msra.mxu1 %v2103_v50 }
  0x60   : > { %v295_v30 = vld [vmem:[%s2349_s23 + $0x1c] sm:$0xf]  ;;  %v2411_v31 = vld [vmem:[#allocation2 + $0x10] sm:$0xf]  ;;  %v435_v32 = vld [vmem:[#allocation2 + $0x14] sm:$0x1] }
  0x61   : > { %395 = vst [vmem:[#allocation2 + $0x1c] sm:$0x1] %v394_v28  ;;  %v1848_v37 = vcombine.low %v2411_v31, %v435_v32  ;;  %v335_v38 = vrot.slane %v331_v29, 4  ;;  %287 = vst [vmem:[#allocation2 + $0x44] sm:$0x1] %v286_v36  ;;  %v353_v39 = vshrl.u32 %v295_v30, 16  ;;  %v334_v44 = vor.u32 %v332_v22, %v331_v29 }
  0x62   : > { %v356_v40 = vshll.u32 %v295_v30, 16  ;;  %v2416_v41 = vld [vmem:[#allocation2 + $0x8] sm:$0xf]  ;;  %v433_v42 = vld [vmem:[#allocation2 + $0xc] sm:$0x1]  ;;  %v2104_v63 = vld [vmem:[#allocation3 + $0x10] sm:$0xff]  }
  0x63   : > { %v408_v43 = vld [vmem:[#allocation2 + $0x30] sm:$0xf]  ;;  %v592_v45 = vrot.slane %v1848_v37, 1  ;;  %v2419_v46 = vcombine.low %v2416_v41, %v433_v42  ;;  %v515_v47 = vshrl.u32 %v1848_v37, 16  ;;  %v517_v48 = vshll.u32 %v1848_v37, 16  ;;  %1974 = vmatprep.subr.bf16.mxu0 %v2104_v63  ;;  %v2105_v14 = vld [vmem:[#allocation3 + $0x48] sm:$0xff]  }
  0x64   : > { %v411_v49 = vld [vmem:[#allocation2 + $0x34] sm:$0x1]  ;;  %v2421_v51 = vld [vmem:[#allocation2 + $0x20] sm:$0xf]  ;;  %v439_v52 = vld [vmem:[#allocation2 + $0x24] sm:$0x1]  ;;  %v409_v53 = vsel %vm2372_vm6, %v342_v33, %v408_v43  ;;  %1975 = vmatpush3.bf16.msra.mxu0 %v2104_v63  ;;  %1956 = vmatprep.subr.bf16.mxu1 %v2105_v14 }
  0x65   : > { %v412_v54 = vsel %vm2336_vm4, %v343_v34, %v411_v49  ;;  %v402_v55 = vld [vmem:[#allocation2 + $0x28] sm:$0xf]  ;;  %v256_v56 = vld [vmem:[#allocation2 + $0x38] sm:$0x1]  ;;  %v282_v57 = vld [vmem:[#allocation2 + $0x3c] sm:$0x1]  ;;  %604 = vrot.lane.b32.xlu1 %v592_v45, %s2210_s28  ;;  %v2430_v59 = vcombine.low %v2421_v51, %v439_v52  ;;  %1957 = vmatpush3.bf16.msra.mxu1 %v2105_v14 }
  0x66   : > { %v591_v58 = vrot.slane %v2419_v46, 1  ;;  %v519_v60 = vrot.slane %v517_v48, 1  ;;  %v508_v61 = vshrl.u32 %v2419_v46, 16  ;;  %410 = vst [vmem:[#allocation2 + $0x30] sm:$0xf] %v409_v53  ;;  %v510_v3 = vshll.u32 %v2419_v46, 16 }
  0x67   : > { %413 = vst [vmem:[#allocation2 + $0x34] sm:$0x1] %v412_v54  ;;  %v405_v62 = vld [vmem:[#allocation2 + $0x2c] sm:$0x1]  ;;  %v2433_v0 = vld [vmem:[#allocation2 + $0x18] sm:$0xf]  ;;  %v403_v4 = vsel %vm2372_vm6, %v334_v44, %v402_v55 }
  0x68   : > { %v406_v5 = vsel %vm2336_vm4, %v335_v38, %v405_v62  ;;  %v355_v7 = vrot.slane %v353_v39, 7  ;;  %v294_v8 = vld [vmem:[%s2349_s23 + $0x18] sm:$0xf]  ;;  %602 = vrot.lane.b32.xlu0 %v591_v58, %s2210_s28  ;;  %v594_v9 = vrot.slane %v2430_v59, 1  ;;  %v437_v10 = vld [vmem:[#allocation2 + $0x1c] sm:$0x1]  ;;  %v520_v11 = vor.u32 %v519_v60, %v515_v47 }
  0x69   : > { %v529_v12 = vshrl.u32 %v2430_v59, 16  ;;  %v531_v13 = vshll.u32 %v2430_v59, 16  ;;  %404 = vst [vmem:[#allocation2 + $0x28] sm:$0xf] %v403_v4  ;;  %407 = vst [vmem:[#allocation2 + $0x2c] sm:$0x1] %v406_v5  ;;  %v1849_v15 = vcombine.low %v2433_v0, %v437_v10 }
  0x6a   : > { %v512_v16 = vrot.slane %v510_v3, 1  ;;  %v358_v17 = vor.u32 %v356_v40, %v355_v7  ;;  %v359_v18 = vrot.slane %v355_v7, 4  ;;  %v420_v19 = vld [vmem:[#allocation2 + $0x40] sm:$0xf]  ;;  %v423_v20 = vld [vmem:[#allocation2 + $0x44] sm:$0x1]  ;;  %608 = vrot.lane.b32.xlu1 %v594_v9, %s2210_s28 }
  0x6b   : > { %v533_v21 = vrot.slane %v531_v13, 1  ;;  %v257_v22 = vsel %vm2336_vm4, 0, %v256_v56  ;;  %v283_v23 = vsel %vm2341_vm5, 0, %v282_v57  ;;  %v345_v24 = vshrl.u32 %v294_v8, 16  ;;  %v2106_v28 = vld [vmem:[#allocation3 + $0x18] sm:$0xff]   ;;  %v2107_v33 = vld [vmem:[#allocation3 + $0x50] sm:$0xff]  }
  0x6c   : > { %v593_v25 = vrot.slane %v1849_v15, 1  ;;  %v522_v26 = vshrl.u32 %v1849_v15, 16  ;;  %v524_v27 = vshll.u32 %v1849_v15, 16  ;;  %258 = vst [vmem:[#allocation2 + $0x38] sm:$0x1] %v257_v22  ;;  %v421_v29 = vsel %vm2372_vm6, %v358_v17, %v420_v19  ;;  %1976 = vmatprep.subr.bf16.mxu0 %v2106_v28  ;;  %v2108_v40 = vld [vmem:[#allocation3 + $0x20] sm:$0xff]   ;;  %1958 = vmatprep.subr.bf16.mxu1 %v2107_v33 }
  0x6d   : > { %284 = vst [vmem:[#allocation2 + $0x3c] sm:$0x1] %v283_v23  ;;  %v424_v30 = vsel %vm2336_vm4, %v359_v18, %v423_v20  ;;  %v347_v32 = vrot.slane %v345_v24, 7  ;;  %v513_v2 = vor.u32 %v512_v16, %v508_v61  ;;  %v2456_v36 = vld [vmem:[#allocation2 + $0x30] sm:$0xf]  ;;  %v348_v38 = vshll.u32 %v294_v8, 16  ;;  %1977 = vmatpush3.bf16.msra.mxu0 %v2106_v28  ;;  %1959 = vmatpush3.bf16.msra.mxu1 %v2107_v33 }
  0x6e   : > { %606 = vrot.lane.b32.xlu0 %v593_v25, %s2210_s28  ;;  %v526_v34 = vrot.slane %v524_v27, 1  ;;  %v443_v37 = vld [vmem:[#allocation2 + $0x34] sm:$0x1]  ;;  %422 = vst [vmem:[#allocation2 + $0x40] sm:$0xf] %v421_v29  ;;  %574 = vrot.lane.b32.xlu1 %v520_v11, %s2211_s29  ;;  %v2109_v49 = vld [vmem:[#allocation3 + $0x58] sm:$0xff]   ;;  %v534_v50 = vor.u32 %v533_v21, %v529_v12 }
  0x6f   : > { %425 = vst [vmem:[#allocation2 + $0x44] sm:$0x1] %v424_v30  ;;  %v1852_v39 = vcombine.low %v2456_v36, %v443_v37  ;;  %v350_v45 = vor.u32 %v348_v38, %v347_v32  ;;  %v351_v48 = vrot.slane %v347_v32, 4  ;;  %1978 = vmatprep.subr.bf16.mxu0 %v2108_v40  ;;  %1960 = vmatprep.subr.bf16.mxu1 %v2109_v49  ;;  %v2110_v4 = vld [vmem:[#allocation3 + $0x28] sm:$0xff]   ;;  %v2474_v9 = vld [vmem:[#allocation2 + $0x48] sm:$0xf] }
  0x70   : > { %v527_v42 = vor.u32 %v526_v34, %v522_v26  ;;  %v2460_v43 = vld [vmem:[#allocation2 + $0x28] sm:$0xf]  ;;  %v441_v44 = vld [vmem:[#allocation2 + $0x2c] sm:$0x1]  ;;  %v2477_v12 = vld [vmem:[#allocation3 + $0x60] sm:$0xff]   ;;  %vm620_vm7 = vcmask 261120  }
  0x71   : > { %v1851_v46 = vcombine.low %v2460_v43, %v441_v44  ;;  %v545_v47 = vshll.u32 %v1852_v39, 16  ;;  %v596_v52 = vrot.slane %v1852_v39, 1  ;;  %v543_v53 = vshrl.u32 %v1852_v39, 16  ;;  %1979 = vmatpush3.bf16.msra.mxu0 %v2108_v40  ;;  %1961 = vmatpush3.bf16.msra.mxu1 %v2109_v49  ;;  %v449_v10 = vld [vmem:[#allocation2 + $0x4c] sm:$0x1]  ;;  %s1919_s30 = sshll.u32 %s2675_s12, 3 }
  0x72   : > { %572 = vrot.lane.b32.xlu0 %v513_v2, %s2211_s29  ;;  %576 = vrot.lane.b32.xlu1 %v527_v42, %s2211_s29  ;;  %v1855_v17 = vcombine.low %v2474_v9, %v449_v10  ;;  %vm651_vm8 = vcmask 523264   ;;  %vm753_vm9 = vcmask 785408   ;;  %vm1662_vm1 = vcmask 1041409   ;;  %s2592_s12 = scalar_lea.vmem %s2655_s3, %s1919_s30 }
  0x73   : > { %v595_v54 = vrot.slane %v1851_v46, 1  ;;  %v547_v55 = vrot.slane %v545_v47, 1  ;;  %v536_v56 = vshrl.u32 %v1851_v46, 16  ;;  %v538_v57 = vshll.u32 %v1851_v46, 16  ;;  %v414_v58 = vld [vmem:[#allocation2 + $0x38] sm:$0xf]  ;;  %1980 = vmatprep.subr.bf16.mxu0 %v2110_v4  ;;  %2010 = vmatprep.subr.bf16.mxu1 %v2477_v12 }
  0x74   : > { %v415_v59 = vsel %vm2372_vm6, %v350_v45, %v414_v58  ;;  %v417_v60 = vld [vmem:[#allocation2 + $0x3c] sm:$0x1]  ;;  %v566_v22 = vshll.u32 %v1855_v17, 16  ;;  %v599_v23 = vrot.slane %v1855_v17, 1  ;;  %v564_v26 = vshrl.u32 %v1855_v17, 16 }
  0x75   : > { %v540_v61 = vrot.slane %v538_v57, 1  ;;  %v2467_v62 = vld [vmem:[#allocation2 + $0x40] sm:$0xf]  ;;  %416 = vst [vmem:[#allocation2 + $0x38] sm:$0xf] %v415_v59  ;;  %v418_v3 = vsel %vm2336_vm4, %v351_v48, %v417_v60  ;;  %v548_v35 = vor.u32 %v547_v55, %v543_v53  ;;  %1981 = vmatpush3.bf16.msra.mxu0 %v2110_v4  ;;  %v2112_v53 = vld [vmem:[#allocation3 + $0x68] sm:$0xff]  }
  0x76   : > { %v447_v63 = vld [vmem:[#allocation2 + $0x44] sm:$0x1]  ;;  %578 = vrot.lane.b32.xlu0 %v534_v50, %s2211_s29  ;;  %419 = vst [vmem:[#allocation2 + $0x3c] sm:$0x1] %v418_v3  ;;  %612 = vrot.lane.b32.xlu1 %v596_v52, %s2210_s28  ;;  %v568_v27 = vrot.slane %v566_v22, 1  ;;  %vm1665_vm2 = vcmask 1042434  }
  0x77   : > { %v1854_v5 = vcombine.low %v2467_v62, %v447_v63  ;;  %v541_v1 = vor.u32 %v540_v61, %v536_v56  ;;  %1990 = vmatprep.subr.bf16.mxu0 %v2477_v12  ;;  %v2113_v57 = vld [vmem:[#allocation3 + $0x70] sm:$0xff]   ;;  %v2114_v61 = vld [vmem:[#allocation3 + $0x78] sm:$0xff]   ;;  %vm1668_vm3 = vcmask 1043459  }
  0x78   : > { %v569_v28 = vor.u32 %v568_v27, %v564_v26 }
  0x79   : > { %v557_v7 = vshrl.u32 %v1854_v5, 16  ;;  %v559_v8 = vshll.u32 %v1854_v5, 16  ;;  %v598_v18 = vrot.slane %v1854_v5, 1 }
  0x7a   : > { %610 = vrot.lane.b32.xlu0 %v595_v54, %s2210_s28  ;;  %582 = vrot.lane.b32.xlu1 %v548_v35, %s2211_s29 }
  0x7b   : > { %v561_v11 = vrot.slane %v559_v8, 1 }
  0x7c   : > { %v2480_v14 = vld [vmem:[#allocation2 + $0x38] sm:$0xf] }
  0x7d   : > { %v562_v13 = vor.u32 %v561_v11, %v557_v7  ;;  %v445_v15 = vld [vmem:[#allocation2 + $0x3c] sm:$0x1] }
  0x7e   : > { %580 = vrot.lane.b32.xlu0 %v541_v1, %s2211_s29  ;;  %v1853_v16 = vcombine.low %v2480_v14, %v445_v15 }
  0x7f   : > { %586 = vrot.lane.b32.xlu1 %v562_v13, %s2211_s29 }
  0x80   : > { %v550_v19 = vshrl.u32 %v1853_v16, 16  ;;  %v552_v20 = vshll.u32 %v1853_v16, 16  ;;  %v597_v25 = vrot.slane %v1853_v16, 1 }
  0x82   : > { %v554_v21 = vrot.slane %v552_v20, 1 }
  0x83   : > { %616 = vrot.lane.b32.xlu1 %v598_v18, %s2210_s28 }
  0x84   : > { %v555_v24 = vor.u32 %v554_v21, %v550_v19 }
  0x86   : > { %584 = vrot.lane.b32.xlu0 %v555_v24, %s2211_s29 }
  0x87   : > { %618 = vrot.lane.b32.xlu1 %v599_v23, %s2210_s28 }
  0x8a   : > { %614 = vrot.lane.b32.xlu0 %v597_v25, %s2210_s28 }
  0x8e   : > { %588 = vrot.lane.b32.xlu0 %v569_v28, %s2211_s29 }
  0xc4   : > { %v601_v29 = vpop.permute.xlu1 %600 }
  0xc8   : > { %v571_v30 = vpop.permute.xlu0 %570 }
  0xc9   : > { %v623_v39 = vsel %vm620_vm7, %v2352_v6, %v571_v30 }
  0xca   : > { %v653_v46 = vsel %vm651_vm8, %v623_v39, %v601_v29 }
  0xd7   : > { %v605_v32 = vpop.permute.xlu1 %604 }
  0xda   : > { %v603_v33 = vpop.permute.xlu0 %602 }
  0xdc   : > { %v609_v2 = vpop.permute.xlu1 %608 }
  0xe0   : > { %v607_v34 = vpop.permute.xlu0 %606  ;;  %v575_v37 = vpop.permute.xlu1 %574 }
  0xe1   : > { %v629_v38 = vsel %vm620_vm7, %v2411_v31, %v575_v37 }
  0xe2   : > { %v657_v42 = vsel %vm651_vm8, %v629_v38, %v605_v32  ;;  %v2212_v32 = vmov 1983009808  }
  0xe4   : > { %v573_v40 = vpop.permute.xlu0 %572  ;;  %v577_v45 = vpop.permute.xlu1 %576 }
  0xe5   : > { %v626_v44 = vsel %vm620_vm7, %v2416_v41, %v573_v40  ;;  %v632_v47 = vsel %vm620_vm7, %v2433_v0, %v577_v45  ;;  %v1895_v45 = vld [vmem:[#allocation5] ss:$0 sm:$0xff] }
  0xe6   : > { %v655_v48 = vsel %vm651_vm8, %v626_v44, %v603_v33  ;;  %v659_v31 = vsel %vm651_vm8, %v632_v47, %v607_v34  ;;  %v1127_v33 = vunpack.c.l.s4 %v2212_v32 }
  0xe7   : > { %v1856_v49 = vcombine.low %v655_v48, %v657_v42  ;;  %v1870_v6 = vcombine.low %v653_v46, %v655_v48  ;;  %v1871_v52 = vcombine.low %v657_v42, %v659_v31 }
  0xe8   : > { %v579_v50 = vpop.permute.xlu0 %578  ;;  %v613_v41 = vpop.permute.xlu1 %612  ;;  %v1128_v40 = vunpack.c.0.s8 %v1127_v33 }
  0xe9   : > { %v635_v54 = vsel %vm620_vm7, %v2421_v51, %v579_v50  ;;  %1962 = vmatprep.mubr.msk.bf16.mxu1 %vm753_vm9, %v1856_v49  ;;  %1982 = vmatprep.mubr.msk.bf16.mxu0 %vm753_vm9, %v1870_v6 }
  0xea   : > { %v661_v0 = vsel %vm651_vm8, %v635_v54, %v609_v2  ;;  %1983 = vmatmul.mubr.msk.bf16.vlgmr.msra.gmra.mrb[0].mxu0 %vm753_vm9, %v1871_v52  ;;  %v1129_v2 = vlaneseq }
  0xeb   : > { %v1857_v55 = vcombine.low %v659_v31, %v661_v0  ;;  %1991 = vmatpush3.bf16.msra.mxu0 %v2477_v12 }
  0xec   : > { %v611_v56 = vpop.permute.xlu0 %610  ;;  %1992 = vmatprep.subr.bf16.mxu0 %v2112_v53  ;;  %v583_v58 = vpop.permute.xlu1 %582  ;;  %v1130_v42 = vshrl.u32 %v1129_v2, 7 }
  0xed   : > { %1963 = vmatmul.mubr.msk.bf16.vlgmr.msra.gmra.mrb[0].mxu1 %vm753_vm9, %v1857_v55  ;;  %v641_v51 = vsel %vm620_vm7, %v2456_v36, %v583_v58  ;;  %v2115_v36 = vld [vmem:[#allocation3 + $0x80] sm:$0xff]  }
  0xee   : > { %2016 = vmatpush3.bf16.msra.mxu1 %v2477_v12  ;;  %v665_v59 = vsel %vm651_vm8, %v641_v51, %v613_v41  ;;  %v2537_v6 = vsub.s32 %v1128_v40, %v1130_v42 }
  0xef   : > { %2011 = vmatprep.subr.bf16.mxu1 %v2112_v53  ;;  %1993 = vmatpush3.bf16.msra.mxu0 %v2112_v53 }
  0xf0   : > { %v581_v60 = vpop.permute.xlu0 %580  ;;  %1994 = vmatprep.subr.bf16.mxu0 %v2113_v57 }
  0xf1   : > { %v638_v63 = vsel %vm620_vm7, %v2460_v43, %v581_v60  ;;  %v587_v4 = vpop.permute.xlu1 %586  ;;  %v2116_v43 = vld [vmem:[#allocation3 + $0x88] sm:$0xff]  }
  0xf2   : > { %v663_v3 = vsel %vm651_vm8, %v638_v63, %v611_v56  ;;  %2017 = vmatpush3.bf16.msra.mxu1 %v2112_v53  ;;  %v647_v10 = vsel %vm620_vm7, %v2467_v62, %v587_v4 }
  0xf3   : > { %v1858_v5 = vcombine.low %v663_v3, %v665_v59  ;;  %v1872_v35 = vcombine.low %v661_v0, %v663_v3  ;;  %2012 = vmatprep.subr.bf16.mxu1 %v2113_v57  ;;  %1995 = vmatpush3.bf16.msra.mxu0 %v2113_v57 }
  0xf4   : > { %1996 = vmatprep.subr.bf16.mxu0 %v2114_v61 }
  0xf5   : > { %1966 = vmatprep.mubr.msk.bf16.mxu1 %vm753_vm9, %v1858_v5  ;;  %1986 = vmatprep.mubr.msk.bf16.mxu0 %vm753_vm9, %v1872_v35  ;;  %v617_v8 = vpop.permute.xlu1 %616 }
  0xf6   : > { %2018 = vmatpush3.bf16.msra.mxu1 %v2113_v57  ;;  %v669_v1 = vsel %vm651_vm8, %v647_v10, %v617_v8 }
  0xf7   : > { %2013 = vmatprep.subr.bf16.mxu1 %v2114_v61  ;;  %1997 = vmatpush3.bf16.msra.mxu0 %v2114_v61 }
  0xf8   : > { %v585_v7 = vpop.permute.xlu0 %584  ;;  %1998 = vmatprep.subr.bf16.mxu0 %v2115_v36 }
  0xf9   : > { %v644_v11 = vsel %vm620_vm7, %v2480_v14, %v585_v7  ;;  %v619_v17 = vpop.permute.xlu1 %618 }
  0xfa   : > { %2019 = vmatpush3.bf16.msra.mxu1 %v2114_v61 }
  0xfb   : > { %2014 = vmatprep.subr.bf16.mxu1 %v2115_v36  ;;  %1999 = vmatpush3.bf16.msra.mxu0 %v2115_v36 }
  0xfc   : > { %v615_v12 = vpop.permute.xlu0 %614  ;;  %2000 = vmatprep.subr.bf16.mxu0 %v2116_v43 }
  0xfd   : > { %v667_v13 = vsel %vm651_vm8, %v644_v11, %v615_v12 }
  0xfe   : > { %v1859_v15 = vcombine.low %v667_v13, %v669_v1  ;;  %v1873_v16 = vcombine.low %v665_v59, %v667_v13  ;;  %2020 = vmatpush3.bf16.msra.mxu1 %v2115_v36 }
  0xff   : > { %2015 = vmatprep.subr.bf16.mxu1 %v2116_v43  ;;  %2001 = vmatpush3.bf16.msra.mxu0 %v2116_v43 }
 0x100   : > { %1967 = vmatmul.mubr.msk.bf16.gmra.mrb[4].mxu1 %vm753_vm9, %v1859_v15  ;;  %1987 = vmatmul.mubr.msk.bf16.gmra.mrb[4].mxu0 %vm753_vm9, %v1873_v16  ;;  %v589_v62 = vpop.permute.xlu0 %588 }
 0x101   : > { %v650_v18 = vsel %vm620_vm7, %v2474_v9, %v589_v62  ;;  %2002 = vmatprep.mubr.msk.bf16.mxu0 %vm753_vm9, %v1871_v52  ;;  %2006 = vmatprep.mubr.msk.bf16.mxu1 %vm753_vm9, %v1873_v16 }
 0x102   : > { %2021 = vmatpush3.bf16.msra.mxu1 %v2116_v43  ;;  %v671_v14 = vsel %vm651_vm8, %v650_v18, %v619_v17 }
 0x103   : > { %v1884_v19 = vcombine.low %v669_v1, %v671_v14 }
 0x108   : > { %2003 = vmatmul.mubr.msk.bf16.vlgmr.msra.gmra.mrb[0].mxu0 %vm753_vm9, %v1872_v35  ;;  %2007 = vmatmul.mubr.msk.bf16.vlgmr.msra.gmra.mrb[8].mxu1 %vm753_vm9, %v1884_v19 }
 0x1c0   : > { %v1964_v20 = vpop.f32.mrb[0].mxu1 }
 0x1c1   : > { %v800_v21 = vpop.f32.mrb[1].mxu1 }
 0x1c2   : > { %v1965_v22 = vpop.f32.mrb[2].mxu1 }
 0x1c3   : > { %v803_v23 = vpop.f32.mrb[3].mxu1 }
 0x1d3   : > { %v1968_v24 = vpop.f32.mrb[4].mxu1  ;;  %v1988_v25 = vpop.f32.mrb[4].mxu0 }
 0x1d4   : > { %v944_v26 = vadd.f32 %v1988_v25, %v1968_v24  ;;  %v816_v9 = vpop.f32.mrb[5].mxu1  ;;  %v935_v27 = vpop.f32.mrb[5].mxu0 }
 0x1d5   : > { %v936_v28 = vadd.f32 %v935_v27, %v816_v9  ;;  %v1969_v29 = vpop.f32.mrb[6].mxu1  ;;  %v1989_v30 = vpop.f32.mrb[6].mxu0 }
 0x1d6   : > { %v947_v34 = vadd.f32 %v1989_v30, %v1969_v29  ;;  %v819_v37 = vpop.f32.mrb[7].mxu1  ;;  %v938_v38 = vpop.f32.mrb[7].mxu0 }
 0x1d7   : > { %v939_v39 = vadd.f32 %v938_v38, %v819_v37 }
 0x1db   : > { %v2004_v44 = vpop.f32.mrb[0].mxu0  ;;  %v2008_v46 = vpop.f32.mrb[8].mxu1 }
 0x1dc   : > { %v2022_v47 = vadd.f32 %v2004_v44, %v1964_v20  ;;  %v1076_v48 = vadd.f32 %v2008_v46, %v944_v26  ;;  %v1039_v31 = vpop.f32.mrb[1].mxu0  ;;  %v1055_v49 = vpop.f32.mrb[9].mxu1 }
 0x1dd   : > { %v2023_v50 = vadd.f32 %v1039_v31, %v800_v21  ;;  %v1074_v52 = vadd.f32 %v1055_v49, %v936_v28  ;;  %v2005_v53 = vpop.f32.mrb[2].mxu0  ;;  %v2009_v54 = vpop.f32.mrb[10].mxu1 }
 0x1de   : > { %v1087_v41 = vadd.f32 %v2022_v47, %v1895_v45  ;;  %v1091_v0 = vadd.f32 %v1895_v45, %v1076_v48  ;;  %v2024_v55 = vadd.f32 %v2005_v53, %v1965_v22  ;;  %v1077_v56 = vadd.f32 %v2009_v54, %v947_v34  ;;  %v1042_v57 = vpop.f32.mrb[3].mxu0  ;;  %v1058_v58 = vpop.f32.mrb[11].mxu1 }
 0x1df   : > { %v1085_v51 = vadd.f32 %v2023_v50, %v1895_v45  ;;  %v1089_v59 = vadd.f32 %v1895_v45, %v1074_v52  ;;  %v2025_v60 = vadd.f32 %v1042_v57, %v803_v23  ;;  %v1075_v61 = vadd.f32 %v1058_v58, %v939_v39 }
 0x1e0   : > { %vm1095_vm10 = vcmp.gt.f32.partialorder %v1087_v41, 0.0  ;;  %v1103_v63 = vmul.f32 0.01, %v1087_v41  ;;  %vm1099_vm11 = vcmp.gt.f32.partialorder %v1091_v0, 0.0  ;;  %v1107_v3 = vmul.f32 0.01, %v1091_v0 }
 0x1e1   : > { %vm1093_vm12 = vcmp.gt.f32.partialorder %v1085_v51, 0.0  ;;  %v1101_v4 = vmul.f32 0.01, %v1085_v51  ;;  %vm1097_vm13 = vcmp.gt.f32.partialorder %v1089_v59, 0.0  ;;  %v1105_v5 = vmul.f32 0.01, %v1089_v59 }
 0x1e2   : > { %v1111_v35 = vsel %vm1095_vm10, %v1087_v41, %v1103_v63  ;;  %v1115_v36 = vsel %vm1099_vm11, %v1091_v0, %v1107_v3  ;;  %v1088_v7 = vadd.f32 %v2024_v55, %v1895_v45  ;;  %v1092_v8 = vadd.f32 %v1895_v45, %v1077_v56 }
 0x1e3   : > { %v1159_v43 = vcombine.high %v1111_v35, %v1111_v35  ;;  %v1166_v10 = vrot.slane %v1111_v35, %v2537_v6  ;;  %v1227_v1 = vcombine.high %v1115_v36, %v1115_v36  ;;  %v1234_v11 = vrot.slane %v1115_v36, %v2537_v6 }
 0x1e4   : > { %v1109_v12 = vsel %vm1093_vm12, %v1085_v51, %v1101_v4  ;;  %v2541_v13 = vsel %vm1097_vm13, %v1089_v59, %v1105_v5  ;;  %vm1096_vm14 = vcmp.gt.f32.partialorder %v1088_v7, 0.0  ;;  %v1104_v15 = vmul.f32 0.01, %v1088_v7 }
 0x1e5   : > { %v1173_v16 = vrot.slane %v1159_v43, %v2537_v6  ;;  %v1241_v62 = vrot.slane %v1227_v1, %v2537_v6  ;;  %v1125_v17 = vcombine.high %v1109_v12, %v1109_v12  ;;  %v2546_v18 = vrot.slane %v1109_v12, %v2537_v6 }
 0x1e6   : > { %v1174_v14 = vcombine.high %v1166_v10, %v1166_v10  ;;  %v1242_v19 = vcombine.high %v1234_v11, %v1234_v11  ;;  %v1193_v20 = vcombine.high %v2541_v13, %v2541_v13  ;;  %v1112_v21 = vsel %vm1096_vm14, %v1088_v7, %v1104_v15 }
 0x1e7   : > { %v1175_v22 = vcombine.high %v1173_v16, %v1173_v16  ;;  %v2551_v23 = vrot.slane %v1125_v17, %v2537_v6  ;;  %v2555_v24 = vrot.slane %v2541_v13, %v2537_v6  ;;  %vm1100_vm15 = vcmp.gt.f32.partialorder %v1092_v8, 0.0 }
 0x1e8   : > { %v1176_v25 = vcombine.high %v1112_v21, %v1112_v21  ;;  %v1183_v26 = vrot.slane %v1112_v21, %v2537_v6  ;;  %v1108_v9 = vmul.f32 0.01, %v1092_v8  ;;  %v1086_v27 = vadd.f32 %v2025_v60, %v1895_v45 }
 0x1e9   : > { %v1243_v28 = vcombine.high %v1241_v62, %v1241_v62  ;;  %v1140_v29 = vcombine.high %v2546_v18, %v2546_v18  ;;  %v1141_v30 = vcombine.high %v2551_v23, %v2551_v23  ;;  %v2562_v32 = vadd.f32 %v1895_v45, %v1075_v61 }
 0x1ea   : > { %v1190_v33 = vrot.slane %v1176_v25, %v2537_v6  ;;  %v1191_v2 = vcombine.high %v1183_v26, %v1183_v26  ;;  %v1297_v34 = vmax.f32 %v1166_v10, %v1183_v26  ;;  %v1116_v37 = vsel %vm1100_vm15, %v1092_v8, %v1108_v9 }
 0x1eb   : > { %v1244_v38 = vcombine.high %v1116_v37, %v1116_v37  ;;  %v1251_v39 = vrot.slane %v1116_v37, %v2537_v6  ;;  %vm1094_vm0 = vcmp.gt.f32.partialorder %v1086_v27, 0.0  ;;  %v1102_v40 = vmul.f32 0.01, %v1086_v27 }
 0x1ec   : > { %v1192_v42 = vcombine.high %v1190_v33, %v1190_v33  ;;  %v1298_v44 = vmax.f32 %v1174_v14, %v1191_v2  ;;  %v1299_v46 = vmax.f32 %v1173_v16, %v1190_v33  ;;  %v1900_v47 = vrot.slane %v1297_v34, 9 }
 0x1ed   : > { %v1258_v48 = vrot.slane %v1244_v38, %v2537_v6  ;;  %v1259_v31 = vcombine.high %v1251_v39, %v1251_v39  ;;  %v1305_v49 = vmax.f32 %v1234_v11, %v1251_v39  ;;  %v1110_v45 = vsel %vm1094_vm0, %v1086_v27, %v1102_v40 }
 0x1ee   : > { %v1300_v50 = vmax.f32 %v1175_v22, %v1192_v42  ;;  %v1901_v52 = vrot.slane %v1298_v44, 9  ;;  %v1902_v53 = vrot.slane %v1299_v46, 9  ;;  %v1377_v54 = vmax.f32 %v1297_v34, %v1900_v47 }
 0x1ef   : > { %v1260_v41 = vcombine.high %v1258_v48, %v1258_v48  ;;  %v1306_v0 = vmax.f32 %v1242_v19, %v1259_v31  ;;  %v1307_v55 = vmax.f32 %v1241_v62, %v1258_v48  ;;  %v1908_v56 = vrot.slane %v1305_v49, 9 }
 0x1f0   : > { %v1903_v57 = vrot.slane %v1300_v50, 9  ;;  %v1378_v58 = vmax.f32 %v1298_v44, %v1901_v52  ;;  %v1379_v51 = vmax.f32 %v1299_v46, %v1902_v53  ;;  %v1393_v59 = vpack.c.bf16 %v1377_v54, %v1377_v54 }
 0x1f1   : > { %v1308_v60 = vmax.f32 %v1243_v28, %v1260_v41  ;;  %v1909_v61 = vrot.slane %v1306_v0, 9  ;;  %v1910_v63 = vrot.slane %v1307_v55, 9  ;;  %v1385_v3 = vmax.f32 %v1305_v49, %v1908_v56 }
 0x1f2   : > { %v1380_v4 = vmax.f32 %v1300_v50, %v1903_v57  ;;  %v1394_v5 = vpack.c.bf16 %v1378_v58, %v1378_v58  ;;  %v1395_v35 = vpack.c.bf16 %v1379_v51, %v1379_v51  ;;  %v1455_v36 = vrot.slane %v1393_v59, %v2537_v6 }
 0x1f3   : > { %v1911_v7 = vrot.slane %v1308_v60, 9  ;;  %v1386_v8 = vmax.f32 %v1306_v0, %v1909_v61  ;;  %v1387_v43 = vmax.f32 %v1307_v55, %v1910_v63  ;;  %v1401_v10 = vpack.c.bf16 %v1385_v3, %v1385_v3 }
 0x1f4   : > { %v1396_v1 = vpack.c.bf16 %v1380_v4, %v1380_v4  ;;  %v1462_v11 = vrot.slane %v1394_v5, %v2537_v6  ;;  %v1469_v12 = vrot.slane %v1395_v35, %v2537_v6  ;;  %v1567_v15 = vrot.slane %v1455_v36, %v2537_v6 }
 0x1f5   : > { %v1388_v16 = vmax.f32 %v1308_v60, %v1911_v7  ;;  %v1402_v62 = vpack.c.bf16 %v1386_v8, %v1386_v8  ;;  %v1403_v17 = vpack.c.bf16 %v1387_v43, %v1387_v43  ;;  %v1511_v14 = vrot.slane %v1401_v10, %v2537_v6 }
 0x1f6   : > { %v1476_v19 = vrot.slane %v1396_v1, %v2537_v6  ;;  %v1574_v21 = vrot.slane %v1462_v11, %v2537_v6  ;;  %v1581_v22 = vrot.slane %v1469_v12, %v2537_v6  ;;  %v1649_v25 = vunpack.c.l.b16 %v1567_v15 }
 0x1f7   : > { %v1404_v26 = vpack.c.bf16 %v1388_v16, %v1388_v16  ;;  %v1518_v9 = vrot.slane %v1402_v62, %v2537_v6  ;;  %v1525_v27 = vrot.slane %v1403_v17, %v2537_v6  ;;  %v1623_v28 = vrot.slane %v1511_v14, %v2537_v6 }
 0x1f8   : > { %v1588_v33 = vrot.slane %v1476_v19, %v2537_v6  ;;  %v1650_v2 = vunpack.c.l.b16 %v1574_v21  ;;  %v1651_v34 = vunpack.c.l.b16 %v1581_v22  ;;  %v1142_v37 = vcombine.high %v1110_v45, %v1110_v45 }
 0x1f9   : > { %v1532_v38 = vrot.slane %v1404_v26, %v2537_v6  ;;  %v1630_v39 = vrot.slane %v1518_v9, %v2537_v6  ;;  %v1637_v40 = vrot.slane %v1525_v27, %v2537_v6  ;;  %v1657_v42 = vunpack.c.l.b16 %v1623_v28 }
 0x1fa   : > { %v1652_v44 = vunpack.c.l.b16 %v1588_v33  ;;  %v1670_v46 = vrot.slane %v1650_v2, 7  ;;  %v1672_v47 = vrot.slane %v1651_v34, 6  ;;  %v1149_v48 = vrot.slane %v1110_v45, %v2537_v6 }
 0x1fb   : > { %v1644_v31 = vrot.slane %v1532_v38, %v2537_v6  ;;  %v1658_v49 = vunpack.c.l.b16 %v1630_v39  ;;  %v1659_v50 = vunpack.c.l.b16 %v1637_v40  ;;  %v1156_v52 = vrot.slane %v1142_v37, %v2537_v6 }
 0x1fc   : > { %v1671_v53 = vsel %vm1662_vm1, %v1670_v46, %v1649_v25  ;;  %v1674_v54 = vrot.slane %v1652_v44, 5  ;;  %v1157_v41 = vcombine.high %v1149_v48, %v1149_v48  ;;  %v1293_v0 = vmax.f32 %v2546_v18, %v1149_v48 }
 0x1fd   : > { %v1673_v55 = vsel %vm1665_vm2, %v1672_v47, %v1671_v53  ;;  %v1660_v56 = vunpack.c.l.b16 %v1644_v31  ;;  %v1682_v57 = vrot.slane %v1658_v49, 7  ;;  %v1684_v58 = vrot.slane %v1659_v50, 6 }
 0x1fe   : > { %v1675_v45 = vsel %vm1668_vm3, %v1674_v54, %v1673_v55  ;;  %v1158_v51 = vcombine.high %v1156_v52, %v1156_v52  ;;  %v1294_v59 = vmax.f32 %v1140_v29, %v1157_v41  ;;  %v1295_v60 = vmax.f32 %v2551_v23, %v1156_v52 }
 0x1ff   : > { %v1689_v61 = vpack.c.b16 %v1675_v45, %v1675_v45  ;;  %v1683_v63 = vsel %vm1662_vm1, %v1682_v57, %v1657_v42  ;;  %v1686_v3 = vrot.slane %v1660_v56, 5  ;;  %v1896_v4 = vrot.slane %v1293_v0, 9 }
 0x200   : > { %v1685_v5 = vsel %vm1665_vm2, %v1684_v58, %v1683_v63  ;;  %v1296_v35 = vmax.f32 %v1141_v30, %v1158_v51  ;;  %v1897_v36 = vrot.slane %v1294_v59, 9  ;;  %v1898_v7 = vrot.slane %v1295_v60, 9 }
 0x201   : > { %1913 = vst.sshfl [vmem:[%s2592_s12 + $0x2] sm:$0x3 pattern:$0x76325410] %v1689_v61  ;;  %v1687_v18 = vsel %vm1668_vm3, %v1686_v3, %v1685_v5  ;;  %v1373_v29 = vmax.f32 %v1293_v0, %v1896_v4  ;;  %vm1098_vm4 = vcmp.gt.f32.partialorder %v2562_v32, 0.0  ;;  %v1207_v23 = vrot.slane %v1193_v20, %v2537_v6 }
 0x202   : > { %v1106_v8 = vmul.f32 0.01, %v2562_v32  ;;  %v1691_v43 = vpack.c.b16 %v1687_v18, %v1687_v18  ;;  %v1899_v10 = vrot.slane %v1296_v35, 9  ;;  %v1374_v1 = vmax.f32 %v1294_v59, %v1897_v36 }
 0x203   : > { %v1375_v11 = vmax.f32 %v1295_v60, %v1898_v7  ;;  %v1389_v30 = vpack.c.bf16 %v1373_v29, %v1373_v29  ;;  %v1208_v14 = vcombine.high %v2555_v24, %v2555_v24 }
 0x204   : > { %v1114_v12 = vsel %vm1098_vm4, %v2562_v32, %v1106_v8  ;;  %1915 = vst.sshfl [vmem:[%s2592_s12 + $0x6] sm:$0x3 pattern:$0x76325410] %v1691_v43  ;;  %v1376_v15 = vmax.f32 %v1296_v35, %v1899_v10  ;;  %v1390_v16 = vpack.c.bf16 %v1374_v1, %v1374_v1  ;;  %v1209_v32 = vcombine.high %v1207_v23, %v1207_v23 }
 0x205   : > { %v1391_v62 = vpack.c.bf16 %v1375_v11, %v1375_v11  ;;  %v1210_v17 = vcombine.high %v1114_v12, %v1114_v12  ;;  %v1427_v19 = vrot.slane %v1389_v30, %v2537_v6  ;;  %v1217_v21 = vrot.slane %v1114_v12, %v2537_v6 }
 0x206   : > { %v1392_v22 = vpack.c.bf16 %v1376_v15, %v1376_v15  ;;  %v1434_v25 = vrot.slane %v1390_v16, %v2537_v6 }
 0x207   : > { %v1441_v13 = vrot.slane %v1391_v62, %v2537_v6  ;;  %v1224_v20 = vrot.slane %v1210_v17, %v2537_v6  ;;  %v1539_v26 = vrot.slane %v1427_v19, %v2537_v6  ;;  %v1225_v9 = vcombine.high %v1217_v21, %v1217_v21 }
 0x208   : > { %v1301_v27 = vmax.f32 %v2555_v24, %v1217_v21  ;;  %v1448_v28 = vrot.slane %v1392_v22, %v2537_v6  ;;  %v1546_v33 = vrot.slane %v1434_v25, %v2537_v6 }
 0x209   : > { %v1553_v2 = vrot.slane %v1441_v13, %v2537_v6  ;;  %v1226_v34 = vcombine.high %v1224_v20, %v1224_v20  ;;  %v1302_v37 = vmax.f32 %v1208_v14, %v1225_v9  ;;  %v1303_v38 = vmax.f32 %v1207_v23, %v1224_v20 }
 0x20a   : > { %v1904_v39 = vrot.slane %v1301_v27, 9  ;;  %v1560_v40 = vrot.slane %v1448_v28, %v2537_v6  ;;  %v1646_v42 = vunpack.c.l.b16 %v1546_v33  ;;  %v1645_v47 = vunpack.c.l.b16 %v1539_v26 }
 0x20b   : > { %v1647_v44 = vunpack.c.l.b16 %v1553_v2  ;;  %v1304_v46 = vmax.f32 %v1209_v32, %v1226_v34  ;;  %v1905_v48 = vrot.slane %v1302_v37, 9  ;;  %v1906_v31 = vrot.slane %v1303_v38, 9 }
 0x20c   : > { %v1381_v49 = vmax.f32 %v1301_v27, %v1904_v39  ;;  %v1648_v24 = vunpack.c.l.b16 %v1560_v40  ;;  %v1661_v50 = vrot.slane %v1646_v42, 7 }
 0x20d   : > { %v1664_v52 = vrot.slane %v1647_v44, 6  ;;  %v1907_v53 = vrot.slane %v1304_v46, 9  ;;  %v1382_v54 = vmax.f32 %v1302_v37, %v1905_v48  ;;  %v1383_v41 = vmax.f32 %v1303_v38, %v1906_v31 }
 0x20e   : > { %v1397_v0 = vpack.c.bf16 %v1381_v49, %v1381_v49  ;;  %v1663_v55 = vsel %vm1662_vm1, %v1661_v50, %v1645_v47  ;;  %v1667_v56 = vrot.slane %v1648_v24, 5 }
 0x20f   : > { %v1384_v57 = vmax.f32 %v1304_v46, %v1907_v53  ;;  %v1666_v58 = vsel %vm1665_vm2, %v1664_v52, %v1663_v55  ;;  %v1398_v45 = vpack.c.bf16 %v1382_v54, %v1382_v54  ;;  %v1399_v51 = vpack.c.bf16 %v1383_v41, %v1383_v41 }
 0x210   : > { %v1483_v59 = vrot.slane %v1397_v0, %v2537_v6  ;;  %v1669_v60 = vsel %vm1668_vm3, %v1667_v56, %v1666_v58 }
 0x211   : > { %v1400_v61 = vpack.c.bf16 %v1384_v57, %v1384_v57  ;;  %v1688_v63 = vpack.c.b16 %v1669_v60, %v1669_v60  ;;  %v1490_v3 = vrot.slane %v1398_v45, %v2537_v6  ;;  %v1497_v4 = vrot.slane %v1399_v51, %v2537_v6 }
 0x212   : > { %v1595_v35 = vrot.slane %v1483_v59, %v2537_v6 }
 0x213   : > { %v1504_v5 = vrot.slane %v1400_v61, %v2537_v6  ;;  %1912 = vst.sshfl [vmem:[%s2592_s12] sm:$0x3 pattern:$0x76325410] %v1688_v63  ;;  %v1602_v36 = vrot.slane %v1490_v3, %v2537_v6  ;;  %v1609_v7 = vrot.slane %v1497_v4, %v2537_v6 }
 0x214   : > { %v1653_v10 = vunpack.c.l.b16 %v1595_v35 }
 0x215   : > { %v1616_v18 = vrot.slane %v1504_v5, %v2537_v6  ;;  %v1654_v29 = vunpack.c.l.b16 %v1602_v36  ;;  %v1655_v8 = vunpack.c.l.b16 %v1609_v7 }
 0x217   : > { %v1656_v43 = vunpack.c.l.b16 %v1616_v18  ;;  %v1676_v1 = vrot.slane %v1654_v29, 7  ;;  %v1678_v11 = vrot.slane %v1655_v8, 6 }
 0x219   : > { %v1680_v23 = vrot.slane %v1656_v43, 5  ;;  %v1677_v30 = vsel %vm1662_vm1, %v1676_v1, %v1653_v10 }
 0x21a   : > { %v1679_v12 = vsel %vm1665_vm2, %v1678_v11, %v1677_v30 }
 0x21b   : > { %v1681_v15 = vsel %vm1668_vm3, %v1680_v23, %v1679_v12 }
 0x21c   : > { %v1690_v16 = vpack.c.b16 %v1681_v15, %v1681_v15 }
 0x21e   : > { %1914 = vst.sshfl [vmem:[%s2592_s12 + $0x4] sm:$0x3 pattern:$0x76325410] %v1690_v16 }
 0x21f PF: > { %s15_s14 = sadd.s32 1, %s2203_s14   ;;  %s2670_s12 = smov %s2199_s13 }
 0x220   : > { %p12_p3 = scmp.ge.s32.totalorder %s15_s14, 4   ;;  %s2671_s13 = smov %s2673_s16 }
 0x222   :  { %14 = sbr.rel (!%p12_p3) target bundleno = 3 (0x3), region = 80 }
 0x229   :  { %1758 = vsyncpa [#allocation4], 1 }
 0x22a   :  { %1760 = vsyncpa [#allocation4 + $0x1], 1 }
 0x22b   :  { %1761 = vsyncpa [#allocation6], 1 }

// kernel: _lambda_.4
= control target key start
LH: loop header
LB: loop body
LE: loop exit
PB: predicated region body
PF: predicated region fallthrough
CT: control target
= control target key end

     0   :  { %8 = vsyncpa [#allocation4], 0  ;;  %s3659_s0 = inlined_call_operand.vmem [shape: bf16[2,16,16,1], index: 0, kind: input, shape index: {}]   ;;  %s3660_s1 = inlined_call_operand.hbm [shape: bf16[3,3,32], index: 1, kind: input, shape index: {}]   ;;  %s3661_s2 = inlined_call_operand.hbm [shape: f32[1,32], index: 2, kind: input, shape index: {}]   ;;  %s3662_s3 = inlined_call_operand.vmem [shape: bf16[2,8,8,32], index: 3, kind: output, shape index: {}]  }
   0x1   :  { %9 = vsyncpa [#allocation6], 0  ;;  %s2958_s12 = smov 0   ;;  %s2960_s13 = smov 0  }
   0x2   :  { %s2962_s14 = smov 0   ;;  %s2964_s15 = smov 0  }
   0x3   :  { %s2966_s16 = smov 0  }
   0x4 LB: > { %s2459_s17 = sadd.s32 4294967295, %s2927_s16   ;;  %s24_s18 = sadd.s32 1, %s2919_s14  ;;  %s2927_s16 = sphi %s2966_s16, %s15_s16   ;;  %s2923_s15 = sphi %s2964_s15, %s3682_s15   ;;  %s2919_s14 = sphi %s2962_s14, %s3681_s14   ;;  %s2915_s13 = sphi %s2960_s13, %s3680_s13   ;;  %s2911_s12 = sphi %s2958_s12, %s3679_s12  }
   0x5   : > { %p25_p0 = scmp.ge.s32.totalorder %s24_s18, 2  ;;  %s27_s19 = sadd.s32 1, %s2923_s15 }
   0x6   : > { %p2461_p1 = scmp.ge.s32.totalorder %s2927_s16, 1  ;;  %p128_p2 = scmp.lt.s32.totalorder %s2927_s16, 5 }
   0x7   : > { %s3684_s18 = smov (%p25_p0, %s24_s18), 0  ;;  %s3686_s19 = smov (!%p25_p0, %s27_s19), %s2923_s15 }
   0x8   : > { %p2991_p3 = pnand %p2461_p1, %p128_p2  ;;  %p29_p4 = scmp.ge.s32.totalorder %s3686_s19, 2 }
   0x9   : > { %p2995_p5 = scmp.eq.s32.totalorder %s2459_s17, 0  ;;  %s2929_s22 = smov [#allocation3]  }
   0xa   : > { %s3666_s20 = scalar_select %p2991_p3, 1, 0 }
   0xb   : > { %s3667_s21 = scalar_select %p2995_p5, 1, 0 }
   0xc   : > { %p2745_p6 = pneg %p2991_p3  ;;  %s3688_s19 = smov (%p29_p4, %s3686_s19), 0 }
   0xd   : > { %s140_s23 = sshll.u32 %s2929_s22, 4  ;;  %s2825_s27 = scalar_lea.hbm %s3660_s1, 96  ;;  %s141_s23 = int_to_ptr.vmem [resolvable:$true] %s140_s23 }
   0xe   : > { %p3005_p7 = pnand %p2995_p5, %p2745_p6  ;;  %p2826_p8 = scmp.ne.s32.totalorder %s3660_s1, %s2825_s27 }
   0xf   : > { %p2832_p12 = scmp.lt.u32.totalorder %s2825_s27, %s3660_s1 }
  0x10   : > { %p2827_p9 = pneg %p3005_p7 }
  0x12   : > { %p2828_p10 = pnand %p2827_p9, %p2826_p8 }
  0x14   : > { %p2829_p11 = pneg %p2828_p10 }
  0x16   : > { %p2834_p13 = pnand %p2832_p12, %p2829_p11 }
  0x18   : > { %2837 = shalt.err (!%p2834_p13)
}
  0x19   : > { %s2838_s5 = scalar_lea.vmem %s141_s23, 96  ;;  %p2846_p4 = scmp.lt.s32.totalorder %s141_s23, %s141_s23 }
  0x1a   : > { %p2839_p0 = scmp.ne.s32.totalorder %s141_s23, %s2838_s5  ;;  %p2847_p6 = scmp.lt.s32.totalorder %s2838_s5, %s2838_s5 }
  0x1c   : > { %p2841_p1 = pnand %p2839_p0, %p2827_p9  ;;  %p2848_p5 = por %p2847_p6, %p2846_p4 }
  0x1e   : > { %p2842_p2 = pneg %p2841_p1 }
  0x20   : > { %p2849_p3 = pnand %p2848_p5, %p2842_p2 }
  0x22   : > { %2852 = shalt.err (!%p2849_p3)
}
  0x23   : > { %s2930_s6 = smov 32   ;;  %s2931_s7 = smov 2  }
  0x24   : > { %2748 = dma.hbm_to_vmem [thread:$0]  (!%p3005_p7), %s3660_s1, 96, %s141_s23, [#allocation4], %s2930_s6, %s2930_s6, %s2931_s7  }
  0x25   : > { %s2932_s10 = smov [#allocation5]   ;;  %s2853_s25 = scalar_lea.hbm %s3661_s2, 16 }
  0x26   : > { %s154_s11 = sshll.u32 %s2932_s10, 4  ;;  %p2854_p3 = scmp.ne.s32.totalorder %s3661_s2, %s2853_s25  ;;  %s155_s11 = int_to_ptr.vmem [resolvable:$true] %s154_s11 }
  0x27   : > { %p2860_p10 = scmp.lt.u32.totalorder %s2853_s25, %s3661_s2 }
  0x28   : > { %p2856_p5 = pnand %p2854_p3, %p2827_p9 }
  0x2a   : > { %p2857_p8 = pneg %p2856_p5 }
  0x2c   : > { %p2862_p11 = pnand %p2860_p10, %p2857_p8 }
  0x2e   : > { %2865 = shalt.err (!%p2862_p11)
}
  0x2f   : > { %s2866_s23 = scalar_lea.vmem %s155_s11, 16  ;;  %s2873_s30 = scalar_lea.vmem %s155_s11, 32 }
  0x30   : > { %p2867_p12 = scmp.ne.s32.totalorder %s155_s11, %s2866_s23  ;;  %p2874_p1 = scmp.lt.s32.totalorder %s155_s11, %s155_s11 }
  0x31   : > { %p2875_p2 = scmp.lt.s32.totalorder %s2873_s30, %s2866_s23 }
  0x32   : > { %p2869_p13 = pnand %p2867_p12, %p2827_p9 }
  0x33   : > { %p2876_p4 = por %p2875_p2, %p2874_p1 }
  0x34   : > { %p2870_p0 = pneg %p2869_p13 }
  0x36   : > { %p2877_p6 = pnand %p2876_p4, %p2870_p0 }
  0x38   : > { %2880 = shalt.err (!%p2877_p6)
}
  0x39   : > { %2751 = dma.hbm_to_vmem [thread:$0]  (!%p3005_p7), %s3661_s2, 16, %s155_s11, [#allocation6]  }
  0x3a   : > { %p3669_p3 = scmp.ne.s32.totalorder %s3666_s20, 0 }
  0x3b   : > { %p3670_p5 = scmp.ne.s32.totalorder (!%p3669_p3), %s3667_s21, 0 }
  0x3c   : > { %175 = sbr.rel (%p3669_p3) target bundleno = 641 (0x281), region = 32 }
  0x43   : > { %2902 = dma.done.wait (%p3670_p5), [#allocation4], 96  }
  0x44   : > { %2904 = vsyncadd (%p3670_p5), [#allocation4], 4294967200 }
  0x45   : > { %2906 = dma.done.wait (%p3670_p5), [#allocation6], 16  }
  0x46   : > { %2908 = vsyncadd (%p3670_p5), [#allocation6], 4294967280  ;;  %p207_p9 = scmp.lt.s32.totalorder %s2915_s13, 1  ;;  %s2470_s24 = sshll.u32 %s2911_s12, 2 }
  0x47   : > { %p215_p7 = scmp.lt.s32.totalorder %s2470_s24, 7  ;;  %p2473_p8 = scmp.ne.s32.totalorder %s2911_s12, 0 }
  0x48   : > { %s3690_s13 = smov (!%p207_p9, %s2915_s13), 1  ;;  %vm230_vm0 = vcmask (!%p2473_p8), 0   ;;  %vm238_vm1 = vsmask.f32 (!%p2473_p8), 256  ;;  %v240_v0 = vld [vmem:[#allocation2 + $0xc] sm:$0x1] (!%p2473_p8) }
  0x49   : > { %s3692_s24 = smov (!%p215_p7, %s2470_s24), 7  ;;  %s2588_s20 = sshll.u32 %s3690_s13, 7  ;;  %vm227_vm2 = vcmask (!%p2473_p8), 3072   ;;  %vm3077_vm3 = vmand (!%p2473_p8), %vm230_vm0, %vm238_vm1  ;;  %v243_v2 = vld [vmem:[#allocation2 + $0x18] sm:$0x1] (!%p2473_p8)  ;;  %v2933_v11 = vmov (!%p2473_p8), 0  }
  0x4a   : > { %s2471_s6 = sshll.u32 %s3690_s13, 3  ;;  %s3067_s9 = scalar_lea.vmem %s3659_s0, %s2588_s20  ;;  %v246_v3 = vld [vmem:[#allocation2 + $0x24] sm:$0x1] (!%p2473_p8)  ;;  %vm288_vm4 = vsmask.f32 (!%p2473_p8), 7938  ;;  %v241_v4 = vsel (!%p2473_p8), %vm3077_vm3, 0, %v240_v0 }
  0x4b   : > { %s218_s10 = sadd.s32 %s2471_s6, %s3692_s24  ;;  %226 = sbr.rel (%p2473_p8) target bundleno = 169 (0xa9), region = 44  ;;  %v244_v5 = vsel (!%p2473_p8), %vm3077_vm3, 0, %v243_v2  ;;  %v247_v6 = vsel (!%p2473_p8), %vm3077_vm3, 0, %v246_v3  ;;  %v249_v7 = vld [vmem:[#allocation2 + $0x30] sm:$0x1] (!%p2473_p8)  ;;  %vm3113_vm5 = vmand (!%p2473_p8), %vm230_vm0, %vm288_vm4 }
  0x4c   : > { %s2472_s11 = sshll.u32 %s218_s10, 2  ;;  %242 = vst [vmem:[#allocation2 + $0xc] sm:$0x1] (!%p2473_p8), %v241_v4  ;;  %245 = vst [vmem:[#allocation2 + $0x18] sm:$0x1] (!%p2473_p8), %v244_v5  ;;  %v250_v8 = vsel (!%p2473_p8), %vm3077_vm3, 0, %v249_v7 }
  0x4d   : > { %s3072_s22 = scalar_lea.vmem %s3662_s3, %s2472_s11  ;;  %248 = vst [vmem:[#allocation2 + $0x24] sm:$0x1] (!%p2473_p8), %v247_v6  ;;  %v252_v9 = vld [vmem:[#allocation2 + $0x3c] sm:$0x1] (!%p2473_p8)  ;;  %v255_v10 = vld [vmem:[#allocation2 + $0x48] sm:$0x1] (!%p2473_p8)  ;;  %vm3162_vm7 = vmand (!%p2473_p8), %vm227_vm2, %vm288_vm4 }
  0x4e   : > { %228 = vst.msk [vmem:[#allocation2] sm:$0xf] (!%p2473_p8), %vm227_vm2, %v2933_v11  ;;  %229 = vst.msk [vmem:[#allocation2 + $0x4] sm:$0xf] (!%p2473_p8), %vm227_vm2, %v2933_v11  ;;  %v253_v12 = vsel (!%p2473_p8), %vm3077_vm3, 0, %v252_v9  ;;  %v256_v13 = vsel (!%p2473_p8), %vm3077_vm3, 0, %v255_v10 }
  0x4f   : > { %231 = vst.msk [vmem:[#allocation2 + $0x8] sm:$0x1] (!%p2473_p8), %vm230_vm0, %v2933_v11  ;;  %235 = vst.msk [vmem:[#allocation2 + $0xd4] sm:$0x1] (!%p2473_p8), %vm230_vm0, %v2933_v11  ;;  %v258_v14 = vld [vmem:[#allocation2 + $0x54] sm:$0x1] (!%p2473_p8) }
  0x50   : > { %233 = vst.msk [vmem:[#allocation2 + $0xcc] sm:$0xf] (!%p2473_p8), %vm227_vm2, %v2933_v11  ;;  %234 = vst.msk [vmem:[#allocation2 + $0xd0] sm:$0xf] (!%p2473_p8), %vm227_vm2, %v2933_v11  ;;  %v261_v15 = vld [vmem:[#allocation2 + $0x60] sm:$0x1] (!%p2473_p8) }
  0x51   : > { %251 = vst [vmem:[#allocation2 + $0x30] sm:$0x1] (!%p2473_p8), %v250_v8  ;;  %254 = vst [vmem:[#allocation2 + $0x3c] sm:$0x1] (!%p2473_p8), %v253_v12  ;;  %v259_v16 = vsel (!%p2473_p8), %vm3077_vm3, 0, %v258_v14  ;;  %v262_v17 = vsel (!%p2473_p8), %vm3077_vm3, 0, %v261_v15 }
  0x52   : > { %257 = vst [vmem:[#allocation2 + $0x48] sm:$0x1] %v256_v13  ;;  %v264_v18 = vld [vmem:[#allocation2 + $0x6c] sm:$0x1]  ;;  %v267_v19 = vld [vmem:[#allocation2 + $0x78] sm:$0x1] }
  0x53   : > { %260 = vst [vmem:[#allocation2 + $0x54] sm:$0x1] %v259_v16  ;;  %263 = vst [vmem:[#allocation2 + $0x60] sm:$0x1] %v262_v17  ;;  %v265_v20 = vsel %vm3077_vm3, 0, %v264_v18  ;;  %v268_v21 = vsel %vm3077_vm3, 0, %v267_v19 }
  0x54   : > { %v270_v22 = vld [vmem:[#allocation2 + $0x84] sm:$0x1]  ;;  %v273_v23 = vld [vmem:[#allocation2 + $0x90] sm:$0x1]  ;;  %266 = vst [vmem:[#allocation2 + $0x6c] sm:$0x1] %v265_v20 }
  0x55   : > { %269 = vst [vmem:[#allocation2 + $0x78] sm:$0x1] %v268_v21  ;;  %v271_v24 = vsel %vm3077_vm3, 0, %v270_v22  ;;  %v274_v25 = vsel %vm3077_vm3, 0, %v273_v23  ;;  %v276_v26 = vld [vmem:[#allocation2 + $0x9c] sm:$0x1] }
  0x56   : > { %v279_v27 = vld [vmem:[#allocation2 + $0xa8] sm:$0x1]  ;;  %272 = vst [vmem:[#allocation2 + $0x84] sm:$0x1] %v271_v24  ;;  %275 = vst [vmem:[#allocation2 + $0x90] sm:$0x1] %v274_v25 }
  0x57   : > { %v277_v29 = vsel %vm3077_vm3, 0, %v276_v26  ;;  %v280_v30 = vsel %vm3077_vm3, 0, %v279_v27  ;;  %v282_v31 = vld [vmem:[#allocation2 + $0xb4] sm:$0x1]  ;;  %v285_v32 = vld [vmem:[#allocation2 + $0xc0] sm:$0x1] }
  0x58   : > { %278 = vst [vmem:[#allocation2 + $0x9c] sm:$0x1] %v277_v29  ;;  %281 = vst [vmem:[#allocation2 + $0xa8] sm:$0x1] %v280_v30  ;;  %v283_v33 = vsel %vm3077_vm3, 0, %v282_v31  ;;  %v286_v34 = vsel %vm3077_vm3, 0, %v285_v32 }
  0x59   : > { %v290_v35 = vld [vmem:[#allocation2 + $0x14] sm:$0x1]  ;;  %v293_v36 = vld [vmem:[#allocation2 + $0x20] sm:$0x1]  ;;  %284 = vst [vmem:[#allocation2 + $0xb4] sm:$0x1] %v283_v33 }
  0x5a   : > { %287 = vst [vmem:[#allocation2 + $0xc0] sm:$0x1] %v286_v34  ;;  %v291_v37 = vsel %vm3113_vm5, 0, %v290_v35  ;;  %v294_v38 = vsel %vm3113_vm5, 0, %v293_v36  ;;  %v296_v39 = vld [vmem:[#allocation2 + $0x2c] sm:$0x1] }
  0x5b   : > { %v299_v40 = vld [vmem:[#allocation2 + $0x38] sm:$0x1]  ;;  %292 = vst [vmem:[#allocation2 + $0x14] sm:$0x1] %v291_v37  ;;  %295 = vst [vmem:[#allocation2 + $0x20] sm:$0x1] %v294_v38 }
  0x5c   : > { %v297_v41 = vsel %vm3113_vm5, 0, %v296_v39  ;;  %v300_v42 = vsel %vm3113_vm5, 0, %v299_v40  ;;  %v302_v43 = vld [vmem:[#allocation2 + $0x44] sm:$0x1]  ;;  %v305_v44 = vld [vmem:[#allocation2 + $0x50] sm:$0x1] }
  0x5d   : > { %298 = vst [vmem:[#allocation2 + $0x2c] sm:$0x1] %v297_v41  ;;  %301 = vst [vmem:[#allocation2 + $0x38] sm:$0x1] %v300_v42  ;;  %v303_v45 = vsel %vm3113_vm5, 0, %v302_v43  ;;  %v306_v46 = vsel %vm3113_vm5, 0, %v305_v44 }
  0x5e   : > { %v308_v47 = vld [vmem:[#allocation2 + $0x5c] sm:$0x1]  ;;  %v311_v48 = vld [vmem:[#allocation2 + $0x68] sm:$0x1]  ;;  %304 = vst [vmem:[#allocation2 + $0x44] sm:$0x1] %v303_v45 }
  0x5f   : > { %307 = vst [vmem:[#allocation2 + $0x50] sm:$0x1] %v306_v46  ;;  %v309_v49 = vsel %vm3113_vm5, 0, %v308_v47  ;;  %v312_v50 = vsel %vm3113_vm5, 0, %v311_v48  ;;  %v314_v51 = vld [vmem:[#allocation2 + $0x74] sm:$0x1] }
  0x60   : > { %v317_v52 = vld [vmem:[#allocation2 + $0x80] sm:$0x1]  ;;  %310 = vst [vmem:[#allocation2 + $0x5c] sm:$0x1] %v309_v49  ;;  %313 = vst [vmem:[#allocation2 + $0x68] sm:$0x1] %v312_v50 }
  0x61   : > { %v315_v53 = vsel %vm3113_vm5, 0, %v314_v51  ;;  %v318_v54 = vsel %vm3113_vm5, 0, %v317_v52  ;;  %v320_v55 = vld [vmem:[#allocation2 + $0x8c] sm:$0x1]  ;;  %v323_v56 = vld [vmem:[#allocation2 + $0x98] sm:$0x1] }
  0x62   : > { %316 = vst [vmem:[#allocation2 + $0x74] sm:$0x1] %v315_v53  ;;  %319 = vst [vmem:[#allocation2 + $0x80] sm:$0x1] %v318_v54  ;;  %v321_v57 = vsel %vm3113_vm5, 0, %v320_v55  ;;  %v324_v58 = vsel %vm3113_vm5, 0, %v323_v56 }
  0x63   : > { %v326_v59 = vld [vmem:[#allocation2 + $0xa4] sm:$0x1]  ;;  %v329_v60 = vld [vmem:[#allocation2 + $0xb0] sm:$0x1]  ;;  %322 = vst [vmem:[#allocation2 + $0x8c] sm:$0x1] %v321_v57 }
  0x64   : > { %325 = vst [vmem:[#allocation2 + $0x98] sm:$0x1] %v324_v58  ;;  %v327_v61 = vsel %vm3113_vm5, 0, %v326_v59  ;;  %v330_v62 = vsel %vm3113_vm5, 0, %v329_v60  ;;  %v332_v63 = vld [vmem:[#allocation2 + $0xbc] sm:$0x1] }
  0x65   : > { %v335_v0 = vld [vmem:[#allocation2 + $0xc8] sm:$0x1]  ;;  %328 = vst [vmem:[#allocation2 + $0xa4] sm:$0x1] %v327_v61  ;;  %331 = vst [vmem:[#allocation2 + $0xb0] sm:$0x1] %v330_v62 }
  0x66   : > { %v333_v2 = vsel %vm3113_vm5, 0, %v332_v63  ;;  %v336_v3 = vsel %vm3113_vm5, 0, %v335_v0  ;;  %v338_v4 = vld [vmem:[%s3067_s9] sm:$0xf]  ;;  %v339_v7 = vld [vmem:[%s3067_s9 + $0x4] sm:$0xf] }
  0x67   : > { %334 = vst [vmem:[#allocation2 + $0xbc] sm:$0x1] %v333_v2  ;;  %337 = vst [vmem:[#allocation2 + $0xc8] sm:$0x1] %v336_v3  ;;  %v373_v5 = vshrl.u32 %v338_v4, 16  ;;  %v376_v6 = vshll.u32 %v338_v4, 16 }
  0x68   : > { %vm370_vm6 = vsmask.f32 4368  ;;  %v381_v8 = vshrl.u32 %v339_v7, 16  ;;  %v384_v9 = vshll.u32 %v339_v7, 16  ;;  %v340_v10 = vld [vmem:[%s3067_s9 + $0x8] sm:$0xf] }
  0x69   : > { %v375_v11 = vrot.slane %v373_v5, 7  ;;  %v694_v12 = vld [vmem:[#allocation2 + $0xc] sm:$0xf]  ;;  %v390_v13 = vshrl.u32 %v340_v10, 16  ;;  %v393_v14 = vshll.u32 %v340_v10, 16  ;;  %vm3168_vm8 = vmor %vm238_vm1, %vm370_vm6 }
  0x6a   : > { %v383_v16 = vrot.slane %v381_v8, 7  ;;  %v698_v17 = vld [vmem:[#allocation2 + $0x14] sm:$0x1]  ;;  %v341_v18 = vld [vmem:[%s3067_s9 + $0xc] sm:$0xf] }
  0x6b   : > { %v378_v19 = vor.u32 %v376_v6, %v375_v11  ;;  %v379_v21 = vrot.slane %v375_v11, 4  ;;  %v392_v22 = vrot.slane %v390_v13, 7  ;;  %v398_v23 = vshrl.u32 %v341_v18, 16  ;;  %v342_v24 = vld [vmem:[%s3067_s9 + $0x10] sm:$0xf] }
  0x6c   : > { %v386_v25 = vor.u32 %v384_v9, %v383_v16  ;;  %v388_v26 = vrot.slane %v383_v16, 4  ;;  %v701_v27 = vld [vmem:[#allocation2 + $0x18] sm:$0xf]  ;;  %v401_v28 = vshll.u32 %v341_v18, 16  ;;  %v407_v29 = vshrl.u32 %v342_v24, 16 }
  0x6d   : > { %v695_v30 = vsel %vm3162_vm7, %v378_v19, %v694_v12  ;;  %v395_v31 = vor.u32 %v393_v14, %v392_v22  ;;  %v396_v32 = vrot.slane %v392_v22, 4  ;;  %v400_v33 = vrot.slane %v398_v23, 7  ;;  %v343_v34 = vld [vmem:[%s3067_s9 + $0x14] sm:$0xf]  ;;  %v705_v37 = vld [vmem:[#allocation2 + $0x20] sm:$0x1] }
  0x6e   : > { %696 = vst [vmem:[#allocation2 + $0xc] sm:$0xf] %v695_v30  ;;  %v387_v35 = vsel %vm3168_vm8, %v379_v21, %v386_v25  ;;  %v699_v36 = vsel %vm3077_vm3, %v388_v26, %v698_v17  ;;  %v409_v38 = vrot.slane %v407_v29, 7  ;;  %v410_v39 = vshll.u32 %v342_v24, 16  ;;  %v344_v40 = vld [vmem:[%s3067_s9 + $0x18] sm:$0xf] }
  0x6f   : > { %697 = vst.msk [vmem:[#allocation2 + $0x10] sm:$0xf] %vm227_vm2, %v387_v35  ;;  %700 = vst [vmem:[#allocation2 + $0x14] sm:$0x1] %v699_v36  ;;  %v702_v41 = vsel %vm3162_vm7, %v395_v31, %v701_v27  ;;  %v403_v42 = vor.u32 %v401_v28, %v400_v33  ;;  %v405_v43 = vrot.slane %v400_v33, 4  ;;  %v415_v45 = vshrl.u32 %v343_v34, 16 }
  0x70   : > { %v708_v44 = vld [vmem:[#allocation2 + $0x24] sm:$0xf]  ;;  %v345_v46 = vld [vmem:[%s3067_s9 + $0x1c] sm:$0xf]  ;;  %703 = vst [vmem:[#allocation2 + $0x18] sm:$0xf] %v702_v41  ;;  %v412_v47 = vor.u32 %v410_v39, %v409_v38 }
  0x71   : > { %v413_v48 = vrot.slane %v409_v38, 4  ;;  %v418_v49 = vshll.u32 %v343_v34, 16  ;;  %v424_v50 = vshrl.u32 %v344_v40, 16  ;;  %v346_v51 = vld [vmem:[%s3067_s9 + $0x20] sm:$0xf]  ;;  %v404_v52 = vsel %vm3168_vm8, %v396_v32, %v403_v42 }
  0x72   : > { %v706_v53 = vsel %vm3077_vm3, %v405_v43, %v705_v37  ;;  %v417_v54 = vrot.slane %v415_v45, 7  ;;  %v427_v55 = vshll.u32 %v344_v40, 16  ;;  %v347_v56 = vld [vmem:[%s3067_s9 + $0x24] sm:$0xf]  ;;  %704 = vst.msk [vmem:[#allocation2 + $0x1c] sm:$0xf] %vm227_vm2, %v404_v52  ;;  %v709_v57 = vsel %vm3162_vm7, %v412_v47, %v708_v44 }
  0x73   : > { %707 = vst [vmem:[#allocation2 + $0x20] sm:$0x1] %v706_v53  ;;  %v712_v58 = vld [vmem:[#allocation2 + $0x2c] sm:$0x1]  ;;  %v426_v59 = vrot.slane %v424_v50, 7  ;;  %v432_v60 = vshrl.u32 %v345_v46, 16 }
  0x74   : > { %v435_v61 = vshll.u32 %v345_v46, 16  ;;  %710 = vst [vmem:[#allocation2 + $0x24] sm:$0xf] %v709_v57  ;;  %v420_v62 = vor.u32 %v418_v49, %v417_v54  ;;  %v422_v63 = vrot.slane %v417_v54, 4  ;;  %v715_v0 = vld [vmem:[#allocation2 + $0x30] sm:$0xf] }
  0x75   : > { %v441_v2 = vshrl.u32 %v346_v51, 16  ;;  %v444_v3 = vshll.u32 %v346_v51, 16  ;;  %v429_v4 = vor.u32 %v427_v55, %v426_v59  ;;  %v430_v5 = vrot.slane %v426_v59, 4  ;;  %v348_v8 = vld [vmem:[%s3067_s9 + $0x28] sm:$0xf] }
  0x76   : > { %v434_v6 = vrot.slane %v432_v60, 7  ;;  %v449_v7 = vshrl.u32 %v347_v56, 16  ;;  %v421_v9 = vsel %vm3168_vm8, %v413_v48, %v420_v62  ;;  %v713_v10 = vsel %vm3077_vm3, %v422_v63, %v712_v58  ;;  %v719_v11 = vld [vmem:[#allocation2 + $0x38] sm:$0x1]  ;;  %v722_v13 = vld [vmem:[#allocation2 + $0x3c] sm:$0xf] }
  0x77   : > { %v443_v12 = vrot.slane %v441_v2, 7  ;;  %v452_v14 = vshll.u32 %v347_v56, 16  ;;  %711 = vst.msk [vmem:[#allocation2 + $0x28] sm:$0xf] %vm227_vm2, %v421_v9  ;;  %714 = vst [vmem:[#allocation2 + $0x2c] sm:$0x1] %v713_v10  ;;  %v716_v16 = vsel %vm3162_vm7, %v429_v4, %v715_v0 }
  0x78   : > { %v437_v17 = vor.u32 %v435_v61, %v434_v6  ;;  %v439_v18 = vrot.slane %v434_v6, 4  ;;  %v451_v19 = vrot.slane %v449_v7, 7  ;;  %v726_v21 = vld [vmem:[#allocation2 + $0x44] sm:$0x1]  ;;  %v349_v22 = vld [vmem:[%s3067_s9 + $0x2c] sm:$0xf] }
  0x79   : > { %717 = vst [vmem:[#allocation2 + $0x30] sm:$0xf] %v716_v16  ;;  %v446_v23 = vor.u32 %v444_v3, %v443_v12  ;;  %v447_v24 = vrot.slane %v443_v12, 4  ;;  %v458_v25 = vshrl.u32 %v348_v8, 16  ;;  %v461_v26 = vshll.u32 %v348_v8, 16 }
  0x7a   : > { %v350_v27 = vld [vmem:[%s3067_s9 + $0x30] sm:$0xf]  ;;  %v438_v28 = vsel %vm3168_vm8, %v430_v5, %v437_v17  ;;  %v720_v29 = vsel %vm3077_vm3, %v439_v18, %v719_v11  ;;  %v454_v30 = vor.u32 %v452_v14, %v451_v19  ;;  %v456_v31 = vrot.slane %v451_v19, 4  ;;  %v351_v32 = vld [vmem:[%s3067_s9 + $0x34] sm:$0xf] }
  0x7b   : > { %718 = vst.msk [vmem:[#allocation2 + $0x34] sm:$0xf] %vm227_vm2, %v438_v28  ;;  %721 = vst [vmem:[#allocation2 + $0x38] sm:$0x1] %v720_v29  ;;  %v723_v33 = vsel %vm3162_vm7, %v446_v23, %v722_v13  ;;  %v460_v34 = vrot.slane %v458_v25, 7  ;;  %v466_v35 = vshrl.u32 %v349_v22, 16 }
  0x7c   : > { %v469_v36 = vshll.u32 %v349_v22, 16  ;;  %v352_v37 = vld [vmem:[%s3067_s9 + $0x38] sm:$0xf]  ;;  %724 = vst [vmem:[#allocation2 + $0x3c] sm:$0xf] %v723_v33  ;;  %v455_v38 = vsel %vm3168_vm8, %v447_v24, %v454_v30  ;;  %v727_v39 = vsel %vm3077_vm3, %v456_v31, %v726_v21  ;;  %v475_v41 = vshrl.u32 %v350_v27, 16 }
  0x7d   : > { %v729_v40 = vld [vmem:[#allocation2 + $0x48] sm:$0xf]  ;;  %v478_v42 = vshll.u32 %v350_v27, 16  ;;  %725 = vst.msk [vmem:[#allocation2 + $0x40] sm:$0xf] %vm227_vm2, %v455_v38  ;;  %v463_v43 = vor.u32 %v461_v26, %v460_v34  ;;  %v464_v44 = vrot.slane %v460_v34, 4 }
  0x7e   : > { %728 = vst [vmem:[#allocation2 + $0x44] sm:$0x1] %v727_v39  ;;  %v468_v45 = vrot.slane %v466_v35, 7  ;;  %v483_v46 = vshrl.u32 %v351_v32, 16  ;;  %v353_v47 = vld [vmem:[%s3067_s9 + $0x3c] sm:$0xf] }
  0x7f   : > { %v733_v48 = vld [vmem:[#allocation2 + $0x50] sm:$0x1]  ;;  %v477_v49 = vrot.slane %v475_v41, 7  ;;  %v486_v50 = vshll.u32 %v351_v32, 16  ;;  %v492_v51 = vshrl.u32 %v352_v37, 16  ;;  %v495_v52 = vshll.u32 %v352_v37, 16 }
  0x80   : > { %v730_v53 = vsel %vm3162_vm7, %v463_v43, %v729_v40  ;;  %v471_v54 = vor.u32 %v469_v36, %v468_v45  ;;  %v473_v55 = vrot.slane %v468_v45, 4  ;;  %v736_v56 = vld [vmem:[#allocation2 + $0x54] sm:$0xf]  ;;  %v485_v57 = vrot.slane %v483_v46, 7  ;;  %v740_v58 = vld [vmem:[#allocation2 + $0x5c] sm:$0x1] }
  0x81   : > { %731 = vst [vmem:[#allocation2 + $0x48] sm:$0xf] %v730_v53  ;;  %v480_v59 = vor.u32 %v478_v42, %v477_v49  ;;  %v481_v60 = vrot.slane %v477_v49, 4  ;;  %v494_v61 = vrot.slane %v492_v51, 7  ;;  %v500_v62 = vshrl.u32 %v353_v47, 16 }
  0x82   : > { %v354_v63 = vld [vmem:[%s3067_s9 + $0x40] sm:$0xf]  ;;  %v472_v0 = vsel %vm3168_vm8, %v464_v44, %v471_v54  ;;  %v734_v2 = vsel %vm3077_vm3, %v473_v55, %v733_v48  ;;  %v488_v3 = vor.u32 %v486_v50, %v485_v57  ;;  %v490_v4 = vrot.slane %v485_v57, 4  ;;  %v355_v6 = vld [vmem:[%s3067_s9 + $0x44] sm:$0xf] }
  0x83   : > { %v743_v5 = vld [vmem:[#allocation2 + $0x60] sm:$0xf]  ;;  %732 = vst.msk [vmem:[#allocation2 + $0x4c] sm:$0xf] %vm227_vm2, %v472_v0  ;;  %735 = vst [vmem:[#allocation2 + $0x50] sm:$0x1] %v734_v2  ;;  %v737_v7 = vsel %vm3162_vm7, %v480_v59, %v736_v56  ;;  %v497_v8 = vor.u32 %v495_v52, %v494_v61 }
  0x84   : > { %v498_v9 = vrot.slane %v494_v61, 4  ;;  %v502_v10 = vrot.slane %v500_v62, 7  ;;  %v356_v11 = vld [vmem:[%s3067_s9 + $0x48] sm:$0xf]  ;;  %738 = vst [vmem:[#allocation2 + $0x54] sm:$0xf] %v737_v7  ;;  %v489_v12 = vsel %vm3168_vm8, %v481_v60, %v488_v3  ;;  %v741_v13 = vsel %vm3077_vm3, %v490_v4, %v740_v58 }
  0x85   : > { %v503_v14 = vshll.u32 %v353_v47, 16  ;;  %v747_v16 = vld [vmem:[#allocation2 + $0x68] sm:$0x1]  ;;  %v509_v17 = vshrl.u32 %v354_v63, 16  ;;  %v357_v18 = vld [vmem:[%s3067_s9 + $0x4c] sm:$0xf]  ;;  %v744_v19 = vsel %vm3162_vm7, %v497_v8, %v743_v5 }
  0x86   : > { %739 = vst.msk [vmem:[#allocation2 + $0x58] sm:$0xf] %vm227_vm2, %v489_v12  ;;  %742 = vst [vmem:[#allocation2 + $0x5c] sm:$0x1] %v741_v13  ;;  %v507_v21 = vrot.slane %v502_v10, 4  ;;  %v512_v22 = vshll.u32 %v354_v63, 16 }
  0x87   : > { %v517_v23 = vshrl.u32 %v355_v6, 16  ;;  %745 = vst [vmem:[#allocation2 + $0x60] sm:$0xf] %v744_v19  ;;  %v505_v24 = vor.u32 %v503_v14, %v502_v10  ;;  %v511_v25 = vrot.slane %v509_v17, 7  ;;  %v750_v26 = vld [vmem:[#allocation2 + $0x6c] sm:$0xf] }
  0x88   : > { %v520_v27 = vshll.u32 %v355_v6, 16  ;;  %v526_v28 = vshrl.u32 %v356_v11, 16  ;;  %v748_v29 = vsel %vm3077_vm3, %v507_v21, %v747_v16  ;;  %v529_v31 = vshll.u32 %v356_v11, 16  ;;  %v358_v33 = vld [vmem:[%s3067_s9 + $0x50] sm:$0xf] }
  0x89   : > { %v519_v30 = vrot.slane %v517_v23, 7  ;;  %v534_v32 = vshrl.u32 %v357_v18, 16  ;;  %v506_v34 = vsel %vm3168_vm8, %v498_v9, %v505_v24  ;;  %749 = vst [vmem:[#allocation2 + $0x68] sm:$0x1] %v748_v29  ;;  %v514_v35 = vor.u32 %v512_v22, %v511_v25  ;;  %v754_v37 = vld [vmem:[#allocation2 + $0x74] sm:$0x1] }
  0x8a   : > { %v515_v36 = vrot.slane %v511_v25, 4  ;;  %v528_v38 = vrot.slane %v526_v28, 7  ;;  %v757_v39 = vld [vmem:[#allocation2 + $0x78] sm:$0xf]  ;;  %746 = vst.msk [vmem:[#allocation2 + $0x64] sm:$0xf] %vm227_vm2, %v506_v34 }
  0x8b   : > { %v522_v40 = vor.u32 %v520_v27, %v519_v30  ;;  %v524_v41 = vrot.slane %v519_v30, 4  ;;  %v536_v42 = vrot.slane %v534_v32, 7  ;;  %v537_v43 = vshll.u32 %v357_v18, 16  ;;  %v359_v44 = vld [vmem:[%s3067_s9 + $0x54] sm:$0xf] }
  0x8c   : > { %v751_v45 = vsel %vm3162_vm7, %v514_v35, %v750_v26  ;;  %v531_v46 = vor.u32 %v529_v31, %v528_v38  ;;  %v532_v47 = vrot.slane %v528_v38, 4  ;;  %v761_v48 = vld [vmem:[#allocation2 + $0x80] sm:$0x1]  ;;  %v543_v49 = vshrl.u32 %v358_v33, 16  ;;  %v360_v50 = vld [vmem:[%s3067_s9 + $0x58] sm:$0xf] }
  0x8d   : > { %752 = vst [vmem:[#allocation2 + $0x6c] sm:$0xf] %v751_v45  ;;  %v523_v51 = vsel %vm3168_vm8, %v515_v36, %v522_v40  ;;  %v755_v52 = vsel %vm3077_vm3, %v524_v41, %v754_v37  ;;  %v539_v53 = vor.u32 %v537_v43, %v536_v42  ;;  %v541_v54 = vrot.slane %v536_v42, 4  ;;  %v361_v55 = vld [vmem:[%s3067_s9 + $0x5c] sm:$0xf] }
  0x8e   : > { %753 = vst.msk [vmem:[#allocation2 + $0x70] sm:$0xf] %vm227_vm2, %v523_v51  ;;  %756 = vst [vmem:[#allocation2 + $0x74] sm:$0x1] %v755_v52  ;;  %v758_v56 = vsel %vm3162_vm7, %v531_v46, %v757_v39  ;;  %v545_v57 = vrot.slane %v543_v49, 7  ;;  %v546_v58 = vshll.u32 %v358_v33, 16 }
  0x8f   : > { %v551_v59 = vshrl.u32 %v359_v44, 16  ;;  %v362_v60 = vld [vmem:[%s3067_s9 + $0x60] sm:$0xf]  ;;  %759 = vst [vmem:[#allocation2 + $0x78] sm:$0xf] %v758_v56  ;;  %v540_v61 = vsel %vm3168_vm8, %v532_v47, %v539_v53  ;;  %v762_v62 = vsel %vm3077_vm3, %v541_v54, %v761_v48  ;;  %v554_v0 = vshll.u32 %v359_v44, 16 }
  0x90   : > { %v764_v63 = vld [vmem:[#allocation2 + $0x84] sm:$0xf]  ;;  %v560_v2 = vshrl.u32 %v360_v50, 16  ;;  %760 = vst.msk [vmem:[#allocation2 + $0x7c] sm:$0xf] %vm227_vm2, %v540_v61  ;;  %v548_v3 = vor.u32 %v546_v58, %v545_v57  ;;  %v549_v4 = vrot.slane %v545_v57, 4 }
  0x91   : > { %763 = vst [vmem:[#allocation2 + $0x80] sm:$0x1] %v762_v62  ;;  %v553_v5 = vrot.slane %v551_v59, 7  ;;  %v768_v6 = vld [vmem:[#allocation2 + $0x8c] sm:$0x1]  ;;  %v563_v7 = vshll.u32 %v360_v50, 16 }
  0x92   : > { %v562_v8 = vrot.slane %v560_v2, 7  ;;  %v568_v9 = vshrl.u32 %v361_v55, 16  ;;  %v571_v10 = vshll.u32 %v361_v55, 16  ;;  %v577_v11 = vshrl.u32 %v362_v60, 16  ;;  %v363_v12 = vld [vmem:[%s3067_s9 + $0x64] sm:$0xf] }
  0x93   : > { %v765_v13 = vsel %vm3162_vm7, %v548_v3, %v764_v63  ;;  %v556_v14 = vor.u32 %v554_v0, %v553_v5  ;;  %v558_v16 = vrot.slane %v553_v5, 4  ;;  %v771_v17 = vld [vmem:[#allocation2 + $0x90] sm:$0xf]  ;;  %v775_v18 = vld [vmem:[#allocation2 + $0x98] sm:$0x1]  ;;  %v580_v19 = vshll.u32 %v362_v60, 16 }
  0x94   : > { %766 = vst [vmem:[#allocation2 + $0x84] sm:$0xf] %v765_v13  ;;  %v565_v21 = vor.u32 %v563_v7, %v562_v8  ;;  %v566_v22 = vrot.slane %v562_v8, 4  ;;  %v570_v23 = vrot.slane %v568_v9, 7  ;;  %v579_v24 = vrot.slane %v577_v11, 7 }
  0x95   : > { %v364_v25 = vld [vmem:[%s3067_s9 + $0x68] sm:$0xf]  ;;  %v557_v26 = vsel %vm3168_vm8, %v549_v4, %v556_v14  ;;  %v769_v27 = vsel %vm3077_vm3, %v558_v16, %v768_v6  ;;  %v778_v28 = vld [vmem:[#allocation2 + $0x9c] sm:$0xf]  ;;  %v585_v29 = vshrl.u32 %v363_v12, 16  ;;  %v588_v30 = vshll.u32 %v363_v12, 16 }
  0x96   : > { %v365_v31 = vld [vmem:[%s3067_s9 + $0x6c] sm:$0xf]  ;;  %767 = vst.msk [vmem:[#allocation2 + $0x88] sm:$0xf] %vm227_vm2, %v557_v26  ;;  %770 = vst [vmem:[#allocation2 + $0x8c] sm:$0x1] %v769_v27  ;;  %v772_v32 = vsel %vm3162_vm7, %v565_v21, %v771_v17  ;;  %v573_v33 = vor.u32 %v571_v10, %v570_v23  ;;  %v582_v35 = vor.u32 %v580_v19, %v579_v24 }
  0x97   : > { %v575_v34 = vrot.slane %v570_v23, 4  ;;  %v366_v36 = vld [vmem:[%s3067_s9 + $0x70] sm:$0xf]  ;;  %773 = vst [vmem:[#allocation2 + $0x90] sm:$0xf] %v772_v32  ;;  %v583_v37 = vrot.slane %v579_v24, 4 }
  0x98   : > { %v587_v38 = vrot.slane %v585_v29, 7  ;;  %v594_v39 = vshrl.u32 %v364_v25, 16  ;;  %v597_v40 = vshll.u32 %v364_v25, 16  ;;  %v367_v41 = vld [vmem:[%s3067_s9 + $0x74] sm:$0xf]  ;;  %v574_v42 = vsel %vm3168_vm8, %v566_v22, %v573_v33 }
  0x99   : > { %v776_v43 = vsel %vm3077_vm3, %v575_v34, %v775_v18  ;;  %v779_v44 = vsel %vm3162_vm7, %v582_v35, %v778_v28  ;;  %v782_v45 = vld [vmem:[#allocation2 + $0xa4] sm:$0x1]  ;;  %v602_v46 = vshrl.u32 %v365_v31, 16  ;;  %774 = vst.msk [vmem:[#allocation2 + $0x94] sm:$0xf] %vm227_vm2, %v574_v42  ;;  %v605_v51 = vshll.u32 %v365_v31, 16 }
  0x9a   : > { %777 = vst [vmem:[#allocation2 + $0x98] sm:$0x1] %v776_v43  ;;  %780 = vst [vmem:[#allocation2 + $0x9c] sm:$0xf] %v779_v44  ;;  %v590_v47 = vor.u32 %v588_v30, %v587_v38  ;;  %v592_v48 = vrot.slane %v587_v38, 4  ;;  %v596_v49 = vrot.slane %v594_v39, 7 }
  0x9b   : > { %v785_v50 = vld [vmem:[#allocation2 + $0xa8] sm:$0xf]  ;;  %v604_v52 = vrot.slane %v602_v46, 7  ;;  %v611_v53 = vshrl.u32 %v366_v36, 16  ;;  %v614_v54 = vshll.u32 %v366_v36, 16  ;;  %v619_v55 = vshrl.u32 %v367_v41, 16 }
  0x9c   : > { %v368_v56 = vld [vmem:[%s3067_s9 + $0x78] sm:$0xf]  ;;  %v591_v57 = vsel %vm3168_vm8, %v583_v37, %v590_v47  ;;  %v783_v58 = vsel %vm3077_vm3, %v592_v48, %v782_v45  ;;  %v599_v59 = vor.u32 %v597_v40, %v596_v49  ;;  %v600_v60 = vrot.slane %v596_v49, 4  ;;  %v789_v61 = vld [vmem:[#allocation2 + $0xb0] sm:$0x1] }
  0x9d   : > { %781 = vst.msk [vmem:[#allocation2 + $0xa0] sm:$0xf] %vm227_vm2, %v591_v57  ;;  %784 = vst [vmem:[#allocation2 + $0xa4] sm:$0x1] %v783_v58  ;;  %v607_v62 = vor.u32 %v605_v51, %v604_v52  ;;  %v609_v63 = vrot.slane %v604_v52, 4  ;;  %v613_v0 = vrot.slane %v611_v53, 7 }
  0x9e   : > { %v621_v2 = vrot.slane %v619_v55, 7  ;;  %v369_v3 = vld [vmem:[%s3067_s9 + $0x7c] sm:$0xf]  ;;  %v786_v4 = vsel %vm3162_vm7, %v599_v59, %v785_v50  ;;  %v792_v5 = vld [vmem:[#allocation2 + $0xb4] sm:$0xf]  ;;  %v622_v6 = vshll.u32 %v367_v41, 16 }
  0x9f   : > { %v628_v7 = vshrl.u32 %v368_v56, 16  ;;  %v631_v8 = vshll.u32 %v368_v56, 16  ;;  %787 = vst [vmem:[#allocation2 + $0xa8] sm:$0xf] %v786_v4  ;;  %v608_v9 = vsel %vm3168_vm8, %v600_v60, %v607_v62  ;;  %v790_v10 = vsel %vm3077_vm3, %v609_v63, %v789_v61  ;;  %v796_v13 = vld [vmem:[#allocation2 + $0xbc] sm:$0x1] }
  0xa0   : > { %v616_v11 = vor.u32 %v614_v54, %v613_v0  ;;  %v617_v12 = vrot.slane %v613_v0, 4  ;;  %788 = vst.msk [vmem:[#allocation2 + $0xac] sm:$0xf] %vm227_vm2, %v608_v9  ;;  %791 = vst [vmem:[#allocation2 + $0xb0] sm:$0x1] %v790_v10  ;;  %v624_v14 = vor.u32 %v622_v6, %v621_v2  ;;  %v626_v16 = vrot.slane %v621_v2, 4 }
  0xa1   : > { %v630_v17 = vrot.slane %v628_v7, 7  ;;  %v636_v18 = vshrl.u32 %v369_v3, 16  ;;  %v799_v21 = vld [vmem:[#allocation2 + $0xc0] sm:$0xf]  ;;  %v639_v22 = vshll.u32 %v369_v3, 16 }
  0xa2   : > { %v793_v19 = vsel %vm3162_vm7, %v616_v11, %v792_v5  ;;  %v625_v23 = vsel %vm3168_vm8, %v617_v12, %v624_v14  ;;  %v797_v24 = vsel %vm3077_vm3, %v626_v16, %v796_v13  ;;  %v803_v29 = vld [vmem:[#allocation2 + $0xc8] sm:$0x1] }
  0xa3   : > { %794 = vst [vmem:[#allocation2 + $0xb4] sm:$0xf] %v793_v19  ;;  %v633_v25 = vor.u32 %v631_v8, %v630_v17  ;;  %795 = vst.msk [vmem:[#allocation2 + $0xb8] sm:$0xf] %vm227_vm2, %v625_v23  ;;  %v634_v26 = vrot.slane %v630_v17, 4  ;;  %v638_v27 = vrot.slane %v636_v18, 7 }
  0xa4   : > { %798 = vst [vmem:[#allocation2 + $0xbc] sm:$0x1] %v797_v24 }
  0xa5   : > { %v800_v28 = vsel %vm3162_vm7, %v633_v25, %v799_v21  ;;  %v641_v30 = vor.u32 %v639_v22, %v638_v27  ;;  %v643_v31 = vrot.slane %v638_v27, 4 }
  0xa6   : > { %801 = vst [vmem:[#allocation2 + $0xc0] sm:$0xf] %v800_v28 }
  0xa7   : > { %v642_v32 = vsel %vm3168_vm8, %v634_v26, %v641_v30  ;;  %v804_v33 = vsel %vm3077_vm3, %v643_v31, %v803_v29 }
  0xa8   : > { %802 = vst.msk [vmem:[#allocation2 + $0xc4] sm:$0xf] %vm227_vm2, %v642_v32  ;;  %805 = vst [vmem:[#allocation2 + $0xc8] sm:$0x1] %v804_v33 }
  0xa9 PF: > { %s2589_s13 = smul.u32 96, %s2911_s12  ;;  %vm1061_vm9 = vcmask 1046528   ;;  %vm920_vm10 = vsmask.f32 7424  ;;  %s2934_s12 = smov 2   ;;  %vm1174_vm11 = vcmask 1040384  }
  0xaa   : > { %s2935_s26 = smov 1   ;;  %vm1175_vm12 = vcmask 1041408   ;;  %vm1112_vm13 = vcmask 7168   ;;  %vm1133_vm14 = vcmask 15360   ;;  %vm1157_vm15 = vcmask 23552  }
  0xab   : > { %s3313_s25 = scalar_lea.vmem [#allocation2], %s2589_s13  ;;  %vm2276_vm4 = vcmask 1041409   ;;  %vm2279_vm5 = vcmask 1042434   ;;  %vm2282_vm6 = vcmask 1043459   ;;  %vm2285_vm7 = vcmask 1044484  }
  0xac   : > { %vm2288_vm8 = vcmask 1045509  }
  0xaf   : > { %v3316_v15 = vld [vmem:[%s3313_s25] sm:$0xff]   ;;  %v2806_v20 = vld [vmem:[%s3313_s25 + $0x8] ss:$0 sps:$4 sm:$0x11]   ;;  %v3320_v1 = vld [vmem:[%s3313_s25 + $0x18] sm:$0xff]  }
  0xb0   : > { %v1062_v34 = vrot.slane %v3316_v15, 1  ;;  %v1063_v35 = vrot.slane %v2806_v20, 1  ;;  %v922_v36 = vshrl.u32 %v3316_v15, 16  ;;  %v924_v37 = vshll.u32 %v3316_v15, 16  ;;  %v3330_v44 = vld [vmem:[%s3313_s25 + $0xc] sm:$0xff]   ;;  %v3343_v62 = vld [vmem:[%s3313_s25 + $0x24] sm:$0xff]  }
  0xb1   : > { %v929_v38 = vshll.u32 %v2806_v20, 16  ;;  %v2808_v39 = vld [vmem:[%s3313_s25 + $0x20] ss:$0 sps:$4 sm:$0x11]   ;;  %v946_v40 = vshrl.u32 %v3320_v1, 16  ;;  %v948_v41 = vshll.u32 %v3320_v1, 16 }
  0xb2   : > { %v1064_v42 = vsel %vm1061_vm9, %v1062_v34, %v1063_v35  ;;  %v926_v43 = vrot.slane %v924_v37, 1  ;;  %v953_v47 = vshll.u32 %v2808_v39, 16  ;;  %v2810_v48 = vld [vmem:[%s3313_s25 + $0x14] ss:$0 sps:$4 sm:$0x11]   ;;  %v934_v50 = vshrl.u32 %v3330_v44, 16 }
  0xb3   : > { %1092 = vrot.lane.b32.xlu1 %v1064_v42, %s2934_s12  ;;  %v931_v45 = vrot.slane %v929_v38, 1  ;;  %v950_v46 = vrot.slane %v948_v41, 1  ;;  %v936_v51 = vshll.u32 %v3330_v44, 16  ;;  %v1068_v52 = vrot.slane %v3320_v1, 1  ;;  %v3338_v53 = vld [vmem:[%s3313_s25 + $0x30] sm:$0xff]   ;;  %v3349_v3 = vld [vmem:[%s3313_s25 + $0x48] sm:$0xff]  }
  0xb4   : > { %v927_v49 = vor.u32 %v926_v43, %v922_v36  ;;  %v955_v55 = vrot.slane %v953_v47, 1  ;;  %v941_v56 = vshll.u32 %v2810_v48, 16  ;;  %v1069_v57 = vrot.slane %v2808_v39, 1  ;;  %v2812_v2 = vld [vmem:[%s3313_s25 + $0x38] ss:$0 sps:$4 sm:$0x11]  }
  0xb5   : > { %v951_v54 = vor.u32 %v950_v46, %v946_v40  ;;  %v938_v59 = vrot.slane %v936_v51, 1  ;;  %v1065_v60 = vrot.slane %v3330_v44, 1  ;;  %v1066_v61 = vrot.slane %v2810_v48, 1  ;;  %v2814_v10 = vld [vmem:[%s3313_s25 + $0x2c] ss:$0 sps:$4 sm:$0x11]  }
  0xb6   : > { %v932_v58 = vsel %vm920_vm10, %v927_v49, %v931_v45  ;;  %v943_v0 = vrot.slane %v941_v56, 1  ;;  %v970_v5 = vshrl.u32 %v3338_v53, 16  ;;  %v972_v6 = vshll.u32 %v3338_v53, 16  ;;  %v3361_v16 = vld [vmem:[%s3313_s25 + $0x3c] sm:$0xff]   ;;  %v3382_v43 = vld [vmem:[%s3313_s25 + $0x54] sm:$0xff]  }
  0xb7   : > { %1041 = vrot.lane.b32.xlu0 %v932_v58, %s2935_s26  ;;  %v956_v63 = vsel %vm920_vm10, %v951_v54, %v955_v55  ;;  %v939_v4 = vor.u32 %v938_v59, %v934_v50  ;;  %v1070_v7 = vsel %vm1061_vm9, %v1068_v52, %v1069_v57  ;;  %v1067_v8 = vsel %vm1061_vm9, %v1065_v60, %v1066_v61  ;;  %v2816_v27 = vld [vmem:[%s3313_s25 + $0x50] ss:$0 sps:$4 sm:$0x11]   ;;  %v2818_v20 = vld [vmem:[%s3313_s25 + $0x44] ss:$0 sps:$4 sm:$0x11]  }
  0xb8   : > { %1045 = vrot.lane.b32.xlu1 %v956_v63, %s2935_s26  ;;  %v977_v9 = vshll.u32 %v2812_v2, 16  ;;  %v974_v12 = vrot.slane %v972_v6, 1  ;;  %v958_v13 = vshrl.u32 %v3343_v62, 16  ;;  %v960_v14 = vshll.u32 %v3343_v62, 16  ;;  %v3379_v38 = vld [vmem:[%s3313_s25 + $0x60] sm:$0xff]   ;;  %v3401_v6 = vld [vmem:[%s3313_s25 + $0x6c] sm:$0xff]  }
  0xb9   : > { %v944_v11 = vsel %vm920_vm10, %v939_v4, %v943_v0  ;;  %v965_v18 = vshll.u32 %v2814_v10, 16  ;;  %v1074_v19 = vrot.slane %v3338_v53, 1  ;;  %v1075_v21 = vrot.slane %v2812_v2, 1  ;;  %v2820_v45 = vld [vmem:[%s3313_s25 + $0x68] ss:$0 sps:$4 sm:$0x11]  }
  0xba   : > { %v979_v17 = vrot.slane %v977_v9, 1  ;;  %v975_v22 = vor.u32 %v974_v12, %v970_v5  ;;  %v962_v23 = vrot.slane %v960_v14, 1  ;;  %v1071_v24 = vrot.slane %v3343_v62, 1  ;;  %v2822_v56 = vld [vmem:[%s3313_s25 + $0x5c] ss:$0 sps:$4 sm:$0x11]  }
  0xbb   : > { %1043 = vrot.lane.b32.xlu0 %v944_v11, %s2935_s26  ;;  %v1072_v25 = vrot.slane %v2814_v10, 1  ;;  %v967_v26 = vrot.slane %v965_v18, 1  ;;  %v994_v28 = vshrl.u32 %v3349_v3, 16  ;;  %v996_v29 = vshll.u32 %v3349_v3, 16  ;;  %v1156_v10 = vld [vmem:[#allocation3 + $0x2] sm:$0x3] }
  0xbc   : > { %1096 = vrot.lane.b32.xlu1 %v1070_v7, %s2934_s12  ;;  %v980_v30 = vsel %vm920_vm10, %v975_v22, %v979_v17  ;;  %v963_v31 = vor.u32 %v962_v23, %v958_v13  ;;  %v1001_v33 = vshll.u32 %v2816_v27, 16  ;;  %v984_v34 = vshll.u32 %v3361_v16, 16  ;;  %v1154_v11 = vld [vmem:[#allocation3] sm:$0x3]  ;;  %v1381_v14 = vld [vmem:[#allocation3 + $0x4] sm:$0x3] }
  0xbd   : > { %v998_v32 = vrot.slane %v996_v29, 1  ;;  %v1076_v36 = vsel %vm1061_vm9, %v1074_v19, %v1075_v21  ;;  %v982_v37 = vshrl.u32 %v3361_v16, 16  ;;  %v989_v42 = vshll.u32 %v2818_v20, 16  ;;  %v2824_v19 = vld [vmem:[%s3313_s25 + $0x74] ss:$0 sps:$4 sm:$0x11]  }
  0xbe   : > { %v968_v35 = vsel %vm920_vm10, %v963_v31, %v967_v26  ;;  %v1003_v40 = vrot.slane %v1001_v33, 1  ;;  %v986_v41 = vrot.slane %v984_v34, 1  ;;  %v1073_v46 = vsel %vm1061_vm9, %v1071_v24, %v1072_v25 }
  0xbf   : > { %1094 = vrot.lane.b32.xlu0 %v1067_v8, %s2934_s12  ;;  %v999_v39 = vor.u32 %v998_v32, %v994_v28  ;;  %v1080_v47 = vrot.slane %v3349_v3, 1  ;;  %v991_v49 = vrot.slane %v989_v42, 1  ;;  %v1081_v50 = vrot.slane %v2816_v27, 1 }
  0xc0   : > { %1049 = vrot.lane.b32.xlu1 %v980_v30, %s2935_s26  ;;  %v987_v48 = vor.u32 %v986_v41, %v982_v37  ;;  %v1020_v51 = vshll.u32 %v3379_v38, 16  ;;  %v1018_v54 = vshrl.u32 %v3379_v38, 16  ;;  %v1025_v55 = vshll.u32 %v2820_v45, 16 }
  0xc1   : > { %v1004_v52 = vsel %vm920_vm10, %v999_v39, %v1003_v40  ;;  %v1008_v57 = vshll.u32 %v3382_v43, 16  ;;  %v1077_v59 = vrot.slane %v3361_v16, 1  ;;  %v1078_v60 = vrot.slane %v2818_v20, 1 }
  0xc2   : > { %v1022_v58 = vrot.slane %v1020_v51, 1  ;;  %v2936_v61 = vmov 65535   ;;  %v992_v0 = vsel %vm920_vm10, %v987_v48, %v991_v49  ;;  %v1006_v2 = vshrl.u32 %v3382_v43, 16 }
  0xc3   : > { %1047 = vrot.lane.b32.xlu0 %v968_v35, %s2935_s26  ;;  %v1176_v63 = vsel %vm1174_vm11, 4294967295, %v2936_v61  ;;  %v1010_v4 = vrot.slane %v1008_v57, 1  ;;  %v1013_v5 = vshll.u32 %v2822_v56, 16  ;;  %v1082_v7 = vsel %vm1061_vm9, %v1080_v47, %v1081_v50 }
  0xc4   : > { %1100 = vrot.lane.b32.xlu1 %v1076_v36, %s2934_s12  ;;  %v1023_v8 = vor.u32 %v1022_v58, %v1018_v54  ;;  %v1027_v9 = vrot.slane %v1025_v55, 1  ;;  %v1079_v12 = vsel %vm1061_vm9, %v1077_v59, %v1078_v60  ;;  %v1177_v13 = vsel %vm1175_vm12, %v1176_v63, 0 }
  0xc5   : > { %v1011_v17 = vor.u32 %v1010_v4, %v1006_v2  ;;  %v1015_v18 = vrot.slane %v1013_v5, 1  ;;  %v1032_v21 = vshll.u32 %v3401_v6, 16  ;;  %v1179_v22 = vand.u32 %v1177_v13, %v1156_v10 }
  0xc6   : > { %v1028_v23 = vsel %vm920_vm10, %v1023_v8, %v1027_v9  ;;  %v1086_v24 = vrot.slane %v3379_v38, 1  ;;  %v1087_v25 = vrot.slane %v2820_v45, 1  ;;  %v1281_v26 = vand.u32 %v1177_v13, %v1154_v11 }
  0xc7   : > { %1098 = vrot.lane.b32.xlu0 %v1073_v46, %s2934_s12  ;;  %2649 = vmatprep.subr.bf16.mxu1 %v1179_v22  ;;  %v1385_v27 = vand.u32 %v1381_v14, %v1177_v13  ;;  %v1083_v28 = vrot.slane %v3382_v43, 1  ;;  %v1030_v29 = vshrl.u32 %v3401_v6, 16  ;;  %v1016_v30 = vsel %vm920_vm10, %v1011_v17, %v1015_v18 }
  0xc8   : > { %1053 = vrot.lane.b32.xlu1 %v1004_v52, %s2935_s26  ;;  %2667 = vmatprep.subr.bf16.mxu0 %v1281_v26  ;;  %v1084_v31 = vrot.slane %v2822_v56, 1  ;;  %v1034_v32 = vrot.slane %v1032_v21, 1  ;;  %v1037_v33 = vshll.u32 %v2824_v19, 16  ;;  %v1088_v20 = vsel %vm1061_vm9, %v1086_v24, %v1087_v25 }
  0xc9   : > { %2650 = vmatpush3.bf16.msra.mxu1 %v1179_v22  ;;  %v1089_v34 = vrot.slane %v3401_v6, 1  ;;  %v1090_v35 = vrot.slane %v2824_v19, 1  ;;  %2668 = vmatpush3.bf16.msra.mxu0 %v1281_v26  ;;  %vm2346_vm12 = vcmask 257024  }
  0xca   : > { %2703 = vmatprep.subr.bf16.mxu1 %v1281_v26  ;;  %2685 = vmatprep.subr.bf16.mxu0 %v1385_v27  ;;  %v1085_v36 = vsel %vm1061_vm9, %v1083_v28, %v1084_v31  ;;  %v1035_v37 = vor.u32 %v1034_v32, %v1030_v29  ;;  %v1039_v39 = vrot.slane %v1037_v33, 1  ;;  %v1591_v28 = vlaneseq }
  0xcb   : > { %1051 = vrot.lane.b32.xlu0 %v992_v0, %s2935_s26  ;;  %v1091_v40 = vsel %vm1061_vm9, %v1089_v34, %v1090_v35  ;;  %vm2291_vm9 = vcmask 1046534  }
  0xcc   : > { %1104 = vrot.lane.b32.xlu1 %v1082_v7, %s2934_s12  ;;  %v1040_v41 = vsel %vm920_vm10, %v1035_v37, %v1039_v39  ;;  %v1592_v32 = vshrl.u32 %v1591_v28, 7  ;;  %vm2294_vm10 = vcmask 1047559  }
  0xcf   : > { %1102 = vrot.lane.b32.xlu0 %v1079_v12, %s2934_s12 }
  0xd0   : > { %1057 = vrot.lane.b32.xlu1 %v1028_v23, %s2935_s26 }
  0xd3   : > { %1055 = vrot.lane.b32.xlu0 %v1016_v30, %s2935_s26  ;;  %v3487_v30 = vld [vmem:[#allocation5] ss:$0 sm:$0xff] }
  0xd4   : > { %1108 = vrot.lane.b32.xlu1 %v1088_v20, %s2934_s12 }
  0xd7   : > { %1106 = vrot.lane.b32.xlu0 %v1085_v36, %s2934_s12 }
  0xd8   : > { %1110 = vrot.lane.b32.xlu1 %v1091_v40, %s2934_s12 }
  0xdb   : > { %1059 = vrot.lane.b32.xlu0 %v1040_v41, %s2935_s26 }
 0x125   : > { %v1093_v42 = vpop.permute.xlu1 %1092 }
 0x129   : > { %v1042_v45 = vpop.permute.xlu0 %1041 }
 0x12a   : > { %v1114_v46 = vsel %vm1112_vm13, %v3316_v15, %v1042_v45  ;;  %v1046_v47 = vpop.permute.xlu1 %1045 }
 0x12b   : > { %v1135_v48 = vsel %vm1133_vm14, %v1114_v46, %v1093_v42  ;;  %v1118_v51 = vsel %vm1112_vm13, %v3320_v1, %v1046_v47 }
 0x12c   : > { %2669 = vmatprep.mubr.msk.bf16.mxu0 %vm1157_vm15, %v1135_v48 }
 0x12d   : > { %v1044_v49 = vpop.permute.xlu0 %1043 }
 0x12e   : > { %v1097_v50 = vpop.permute.xlu1 %1096  ;;  %v1116_v52 = vsel %vm1112_vm13, %v3330_v44, %v1044_v49 }
 0x12f   : > { %v1139_v57 = vsel %vm1133_vm14, %v1118_v51, %v1097_v50 }
 0x131   : > { %v1095_v54 = vpop.permute.xlu0 %1094 }
 0x132   : > { %v1050_v55 = vpop.permute.xlu1 %1049  ;;  %v1137_v56 = vsel %vm1133_vm14, %v1116_v52, %v1095_v54 }
 0x133   : > { %2651 = vmatprep.mubr.msk.bf16.mxu1 %vm1157_vm15, %v1137_v56  ;;  %2670 = vmatmul.mubr.msk.bf16.vlgmr.msra.gmra.mrb[0].mxu0 %vm1157_vm15, %v1137_v56  ;;  %v1122_v44 = vsel %vm1112_vm13, %v3338_v53, %v1050_v55 }
 0x134   : > { %2652 = vmatmul.mubr.msk.bf16.vlgmr.msra.gmra.mrb[0].mxu1 %vm1157_vm15, %v1139_v57  ;;  %2673 = vmatprep.mubr.msk.bf16.mxu0 %vm1157_vm15, %v1139_v57 }
 0x135   : > { %2704 = vmatpush3.bf16.msra.mxu1 %v1281_v26  ;;  %2686 = vmatpush3.bf16.msra.mxu0 %v1385_v27  ;;  %v1048_v15 = vpop.permute.xlu0 %1047  ;;  %v2937_v27 = vmov 1983009808  }
 0x136   : > { %v1101_v1 = vpop.permute.xlu1 %1100  ;;  %v1120_v58 = vsel %vm1112_vm13, %v3343_v62, %v1048_v15 }
 0x137   : > { %v1143_v63 = vsel %vm1133_vm14, %v1122_v44, %v1101_v1 }
 0x139   : > { %v1099_v59 = vpop.permute.xlu0 %1098 }
 0x13a   : > { %v1141_v60 = vsel %vm1133_vm14, %v1120_v58, %v1099_v59  ;;  %v1054_v61 = vpop.permute.xlu1 %1053 }
 0x13b   : > { %2655 = vmatprep.mubr.msk.bf16.mxu1 %vm1157_vm15, %v1141_v60  ;;  %2674 = vmatmul.mubr.msk.bf16.gmra.mrb[4].mxu0 %vm1157_vm15, %v1141_v60  ;;  %v1126_v53 = vsel %vm1112_vm13, %v3349_v3, %v1054_v61 }
 0x13c   : > { %2656 = vmatmul.mubr.msk.bf16.gmra.mrb[4].mxu1 %vm1157_vm15, %v1143_v63  ;;  %2687 = vmatprep.mubr.msk.bf16.mxu0 %vm1157_vm15, %v1139_v57 }
 0x13d   : > { %v1052_v0 = vpop.permute.xlu0 %1051 }
 0x13e   : > { %v1105_v2 = vpop.permute.xlu1 %1104  ;;  %v1124_v62 = vsel %vm1112_vm13, %v3361_v16, %v1052_v0 }
 0x13f   : > { %v1147_v8 = vsel %vm1133_vm14, %v1126_v53, %v1105_v2 }
 0x141   : > { %v1103_v4 = vpop.permute.xlu0 %1102 }
 0x142   : > { %v1145_v5 = vsel %vm1133_vm14, %v1124_v62, %v1103_v4  ;;  %v1058_v7 = vpop.permute.xlu1 %1057 }
 0x143   : > { %2659 = vmatprep.mubr.msk.bf16.mxu1 %vm1157_vm15, %v1145_v5  ;;  %2688 = vmatmul.mubr.msk.bf16.vlgmr.msra.gmra.mrb[0].mxu0 %vm1157_vm15, %v1141_v60  ;;  %v1130_v3 = vsel %vm1112_vm13, %v3379_v38, %v1058_v7 }
 0x144   : > { %2660 = vmatmul.mubr.msk.bf16.gmra.mrb[8].mxu1 %vm1157_vm15, %v1147_v8  ;;  %2691 = vmatprep.mubr.msk.bf16.mxu0 %vm1157_vm15, %v1143_v63 }
 0x145   : > { %v1056_v9 = vpop.permute.xlu0 %1055 }
 0x146   : > { %v1109_v10 = vpop.permute.xlu1 %1108  ;;  %v1128_v16 = vsel %vm1112_vm13, %v3382_v43, %v1056_v9 }
 0x147   : > { %v1151_v13 = vsel %vm1133_vm14, %v1130_v3, %v1109_v10 }
 0x149   : > { %v1107_v11 = vpop.permute.xlu0 %1106 }
 0x14a   : > { %v1149_v12 = vsel %vm1133_vm14, %v1128_v16, %v1107_v11  ;;  %v1111_v14 = vpop.permute.xlu1 %1110 }
 0x14b   : > { %2663 = vmatprep.mubr.msk.bf16.mxu1 %vm1157_vm15, %v1149_v12  ;;  %2692 = vmatmul.mubr.msk.bf16.gmra.mrb[4].mxu0 %vm1157_vm15, %v1145_v5 }
 0x14c   : > { %2664 = vmatmul.mubr.msk.bf16.gmra.mrb[12].mxu1 %vm1157_vm15, %v1151_v13  ;;  %2695 = vmatprep.mubr.msk.bf16.mxu0 %vm1157_vm15, %v1147_v8 }
 0x14d   : > { %2677 = vmatprep.mubr.msk.bf16.mxu1 %vm1157_vm15, %v1143_v63  ;;  %v1060_v38 = vpop.permute.xlu0 %1059 }
 0x14e   : > { %v1132_v43 = vsel %vm1112_vm13, %v3401_v6, %v1060_v38  ;;  %v1589_v6 = vunpack.c.l.s4 %v2937_v27 }
 0x14f   : > { %v1153_v17 = vsel %vm1133_vm14, %v1132_v43, %v1111_v14 }
 0x150   : > { %v1590_v31 = vunpack.c.0.s8 %v1589_v6 }
 0x152   : > { %v3490_v40 = vsub.s32 %v1590_v31, %v1592_v32 }
 0x153   : > { %2696 = vmatmul.mubr.msk.bf16.gmra.mrb[8].mxu0 %vm1157_vm15, %v1149_v12 }
 0x154   : > { %2678 = vmatmul.mubr.msk.bf16.vlgmr.msra.gmra.mrb[8].mxu1 %vm1157_vm15, %v1145_v5  ;;  %2699 = vmatprep.mubr.msk.bf16.mxu0 %vm1157_vm15, %v1151_v13 }
 0x155   : > { %2681 = vmatprep.mubr.msk.bf16.mxu1 %vm1157_vm15, %v1147_v8 }
 0x15b   : > { %2700 = vmatmul.mubr.msk.bf16.gmra.mrb[12].mxu0 %vm1157_vm15, %v1153_v17 }
 0x15c   : > { %2682 = vmatmul.mubr.msk.bf16.gmra.mrb[12].mxu1 %vm1157_vm15, %v1149_v12 }
 0x207   : > { %v2653_v18 = vpop.f32.mrb[0].mxu1 }
 0x208   : > { %v1215_v19 = vpop.f32.mrb[1].mxu1 }
 0x209   : > { %v2654_v21 = vpop.f32.mrb[2].mxu1 }
 0x20a   : > { %v1218_v22 = vpop.f32.mrb[3].mxu1 }
 0x20f   : > { %v2657_v23 = vpop.f32.mrb[4].mxu1 }
 0x210   : > { %v3481_v24 = vpop.f32.mrb[5].mxu1 }
 0x211   : > { %v3483_v25 = vpop.f32.mrb[6].mxu1 }
 0x212   : > { %v3485_v26 = vpop.f32.mrb[7].mxu1 }
 0x216   : > { %v2689_v29 = vpop.f32.mrb[0].mxu0 }
 0x217   : > { %v2705_v33 = vadd.f32 %v2689_v29, %v2653_v18  ;;  %v1421_v20 = vpop.f32.mrb[1].mxu0 }
 0x218   : > { %v2706_v34 = vadd.f32 %v1421_v20, %v1215_v19  ;;  %v2690_v35 = vpop.f32.mrb[2].mxu0 }
 0x219   : > { %v1509_v36 = vadd.f32 %v2705_v33, %v3487_v30  ;;  %v2707_v37 = vadd.f32 %v2690_v35, %v2654_v21  ;;  %v1424_v39 = vpop.f32.mrb[3].mxu0 }
 0x21a   : > { %v1507_v41 = vadd.f32 %v2706_v34, %v3487_v30  ;;  %v2708_v42 = vadd.f32 %v1424_v39, %v1218_v22 }
 0x21b   : > { %vm1525_vm0 = vcmp.gt.f32.partialorder %v1509_v36, 0.0  ;;  %v1541_v45 = vmul.f32 0.01, %v1509_v36  ;;  %v1510_v46 = vadd.f32 %v2707_v37, %v3487_v30 }
 0x21c   : > { %vm1523_vm1 = vcmp.gt.f32.partialorder %v1507_v41, 0.0  ;;  %v1539_v47 = vmul.f32 0.01, %v1507_v41  ;;  %v1508_v48 = vadd.f32 %v2708_v42, %v3487_v30 }
 0x21d   : > { %v1557_v49 = vsel %vm1525_vm0, %v1509_v36, %v1541_v45  ;;  %vm1526_vm2 = vcmp.gt.f32.partialorder %v1510_v46, 0.0  ;;  %v1542_v50 = vmul.f32 0.01, %v1510_v46 }
 0x21e   : > { %v1621_v51 = vcombine.high %v1557_v49, %v1557_v49  ;;  %v1628_v52 = vrot.slane %v1557_v49, %v3490_v40  ;;  %v1555_v54 = vsel %vm1523_vm1, %v1507_v41, %v1539_v47  ;;  %vm1524_vm3 = vcmp.gt.f32.partialorder %v1508_v48, 0.0  ;;  %v2693_v55 = vpop.f32.mrb[4].mxu0 }
 0x21f   : > { %v1587_v56 = vcombine.high %v1555_v54, %v1555_v54  ;;  %v1594_v57 = vrot.slane %v1555_v54, %v3490_v40  ;;  %v1558_v15 = vsel %vm1526_vm2, %v1510_v46, %v1542_v50  ;;  %v1540_v1 = vmul.f32 0.01, %v1508_v48  ;;  %v3497_v44 = vpop.f32.mrb[5].mxu0 }
 0x220   : > { %v1635_v58 = vrot.slane %v1621_v51, %v3490_v40  ;;  %v1636_v59 = vcombine.high %v1628_v52, %v1628_v52  ;;  %v1638_v60 = vcombine.high %v1558_v15, %v1558_v15  ;;  %v1645_v61 = vrot.slane %v1558_v15, %v3490_v40  ;;  %v3501_v63 = vpop.f32.mrb[6].mxu0 }
 0x221   : > { %v1601_v0 = vrot.slane %v1587_v56, %v3490_v40  ;;  %v1602_v2 = vcombine.high %v1594_v57, %v1594_v57  ;;  %v1923_v53 = vmax.f32 %v1594_v57, %v1628_v52  ;;  %v1556_v62 = vsel %vm1524_vm3, %v1508_v48, %v1540_v1  ;;  %v3504_v4 = vpop.f32.mrb[7].mxu0 }
 0x222   : > { %v1637_v5 = vcombine.high %v1635_v58, %v1635_v58  ;;  %v1652_v7 = vrot.slane %v1638_v60, %v3490_v40  ;;  %v1653_v8 = vcombine.high %v1645_v61, %v1645_v61  ;;  %v1604_v9 = vcombine.high %v1556_v62, %v1556_v62 }
 0x223   : > { %v1603_v3 = vcombine.high %v1601_v0, %v1601_v0  ;;  %v1924_v10 = vmax.f32 %v1602_v2, %v1636_v59  ;;  %v1925_v16 = vmax.f32 %v1601_v0, %v1635_v58  ;;  %v2522_v11 = vrot.slane %v1923_v53, 9 }
 0x224   : > { %v1654_v12 = vcombine.high %v1652_v7, %v1652_v7  ;;  %v1611_v13 = vrot.slane %v1556_v62, %v3490_v40  ;;  %v1618_v38 = vrot.slane %v1604_v9, %v3490_v40  ;;  %v2709_v43 = vadd.f32 %v2693_v55, %v2657_v23 }
 0x225   : > { %v1926_v14 = vmax.f32 %v1603_v3, %v1637_v5  ;;  %v2523_v17 = vrot.slane %v1924_v10, 9  ;;  %v2524_v18 = vrot.slane %v1925_v16, 9  ;;  %v2083_v19 = vmax.f32 %v1923_v53, %v2522_v11 }
 0x226   : > { %v1619_v21 = vcombine.high %v1611_v13, %v1611_v13  ;;  %v1620_v22 = vcombine.high %v1618_v38, %v1618_v38  ;;  %v1927_v27 = vmax.f32 %v1611_v13, %v1645_v61  ;;  %v1929_v6 = vmax.f32 %v1618_v38, %v1652_v7  ;;  %v3509_v28 = vpop.f32.mrb[8].mxu0 }
 0x227   : > { %v2525_v29 = vrot.slane %v1926_v14, 9  ;;  %v2084_v31 = vmax.f32 %v1924_v10, %v2523_v17  ;;  %v2085_v32 = vmax.f32 %v1925_v16, %v2524_v18  ;;  %v2590_v33 = vpack.c.bf16 %v2083_v19, %v2083_v19  ;;  %v3511_v20 = vpop.f32.mrb[8].mxu1  ;;  %v3513_v23 = vpop.f32.mrb[9].mxu0 }
 0x228   : > { %v1928_v34 = vmax.f32 %v1619_v21, %v1653_v8  ;;  %v1930_v35 = vmax.f32 %v1620_v22, %v1654_v12  ;;  %v2526_v36 = vrot.slane %v1927_v27, 9  ;;  %v2528_v37 = vrot.slane %v1929_v6, 9  ;;  %v3515_v39 = vpop.f32.mrb[9].mxu1  ;;  %v3517_v41 = vpop.f32.mrb[10].mxu0 }
 0x229   : > { %v2086_v42 = vmax.f32 %v1926_v14, %v2525_v29  ;;  %v2591_v45 = vpack.c.bf16 %v2084_v31, %v2084_v31  ;;  %v2592_v46 = vpack.c.bf16 %v2085_v32, %v2085_v32  ;;  %v2243_v47 = vunpack.c.l.b16 %v2590_v33  ;;  %v3519_v48 = vpop.f32.mrb[10].mxu1  ;;  %v3521_v49 = vpop.f32.mrb[11].mxu0 }
 0x22a   : > { %v2527_v50 = vrot.slane %v1928_v34, 9  ;;  %v2529_v51 = vrot.slane %v1930_v35, 9  ;;  %v2087_v52 = vmax.f32 %v1927_v27, %v2526_v36  ;;  %v2089_v54 = vmax.f32 %v1929_v6, %v2528_v37  ;;  %v3523_v55 = vpop.f32.mrb[11].mxu1 }
 0x22b   : > { %v2593_v56 = vpack.c.bf16 %v2086_v42, %v2086_v42  ;;  %v2244_v57 = vunpack.c.l.b16 %v2591_v45  ;;  %v2245_v15 = vunpack.c.l.b16 %v2592_v46  ;;  %v1513_v1 = vadd.f32 %v2709_v43, %v3487_v30 }
 0x22c   : > { %v2088_v58 = vmax.f32 %v1928_v34, %v2527_v50  ;;  %v2090_v59 = vmax.f32 %v1930_v35, %v2529_v51  ;;  %v2594_v60 = vpack.c.bf16 %v2087_v52, %v2087_v52  ;;  %v2596_v61 = vpack.c.bf16 %v2089_v54, %v2089_v54 }
 0x22d   : > { %v2246_v0 = vunpack.c.l.b16 %v2593_v56  ;;  %v2275_v2 = vrot.slane %v2244_v57, 7  ;;  %v2278_v53 = vrot.slane %v2245_v15, 6  ;;  %vm1529_vm11 = vcmp.gt.f32.partialorder %v1513_v1, 0.0 }
 0x22e   : > { %v2595_v62 = vpack.c.bf16 %v2088_v58, %v2088_v58  ;;  %v2597_v5 = vpack.c.bf16 %v2090_v59, %v2090_v59  ;;  %v2247_v7 = vunpack.c.l.b16 %v2594_v60  ;;  %v2249_v8 = vunpack.c.l.b16 %v2596_v61  ;;  %v3526_v9 = vpop.f32.mrb[12].mxu0 }
 0x22f   : > { %v2277_v3 = vsel %vm2276_vm4, %v2275_v2, %v2243_v47  ;;  %v2281_v10 = vrot.slane %v2246_v0, 5  ;;  %v1545_v16 = vmul.f32 0.01, %v1513_v1  ;;  %v2710_v11 = vadd.f32 %v3497_v44, %v3481_v24  ;;  %v3531_v12 = vpop.f32.mrb[12].mxu1  ;;  %v3533_v13 = vpop.f32.mrb[13].mxu0 }
 0x230   : > { %v2280_v38 = vsel %vm2279_vm5, %v2278_v53, %v2277_v3  ;;  %v2248_v43 = vunpack.c.l.b16 %v2595_v62  ;;  %v2250_v14 = vunpack.c.l.b16 %v2597_v5  ;;  %v2284_v17 = vrot.slane %v2247_v7, 4  ;;  %v3536_v18 = vpop.f32.mrb[13].mxu1  ;;  %v3538_v19 = vpop.f32.mrb[14].mxu0 }
 0x231   : > { %v2283_v21 = vsel %vm2282_vm6, %v2281_v10, %v2280_v38  ;;  %v2290_v22 = vrot.slane %v2249_v8, 2  ;;  %v1561_v27 = vsel %vm1529_vm11, %v1513_v1, %v1545_v16  ;;  %v1511_v24 = vadd.f32 %v2710_v11, %v3487_v30  ;;  %v3543_v44 = vpop.f32.mrb[14].mxu1  ;;  %v3545_v6 = vpop.f32.mrb[15].mxu0 }
 0x232   : > { %v2286_v29 = vsel %vm2285_vm7, %v2284_v17, %v2283_v21  ;;  %v2287_v31 = vrot.slane %v2248_v43, 3  ;;  %v2293_v32 = vrot.slane %v2250_v14, 1  ;;  %v1689_v33 = vcombine.high %v1561_v27, %v1561_v27  ;;  %v3548_v34 = vpop.f32.mrb[15].mxu1 }
 0x233   : > { %v1696_v35 = vrot.slane %v1561_v27, %v3490_v40  ;;  %vm1527_vm13 = vcmp.gt.f32.partialorder %v1511_v24, 0.0  ;;  %v1543_v36 = vmul.f32 0.01, %v1511_v24  ;;  %v2711_v37 = vadd.f32 %v3501_v63, %v3483_v25 }
 0x234   : > { %v2289_v42 = vsel %vm2288_vm8, %v2287_v31, %v2286_v29  ;;  %v1703_v45 = vrot.slane %v1689_v33, %v3490_v40  ;;  %v2712_v46 = vadd.f32 %v3504_v4, %v3485_v26  ;;  %v2713_v47 = vadd.f32 %v3509_v28, %v3511_v20 }
 0x235   : > { %v2292_v50 = vsel %vm2291_vm9, %v2290_v22, %v2289_v42  ;;  %v1704_v51 = vcombine.high %v1696_v35, %v1696_v35  ;;  %v1559_v52 = vsel %vm1527_vm13, %v1511_v24, %v1543_v36  ;;  %v1514_v54 = vadd.f32 %v2711_v37, %v3487_v30 }
 0x236   : > { %v2295_v56 = vsel %vm2294_vm10, %v2293_v32, %v2292_v50  ;;  %v1705_v25 = vcombine.high %v1703_v45, %v1703_v45  ;;  %v1655_v63 = vcombine.high %v1559_v52, %v1559_v52  ;;  %v1662_v57 = vrot.slane %v1559_v52, %v3490_v40 }
 0x237   : > { %v2338_v15 = vpack.c.b16 %v2295_v56, %v2295_v56  ;;  %vm1530_vm14 = vcmp.gt.f32.partialorder %v1514_v54, 0.0  ;;  %v1546_v1 = vmul.f32 0.01, %v1514_v54  ;;  %v1512_v26 = vadd.f32 %v2712_v46, %v3487_v30 }
 0x238   : > { %v1669_v4 = vrot.slane %v1655_v63, %v3490_v40  ;;  %v1670_v28 = vcombine.high %v1662_v57, %v1662_v57  ;;  %v1931_v20 = vmax.f32 %v1662_v57, %v1696_v35  ;;  %v1517_v58 = vadd.f32 %v2713_v47, %v3487_v30 }
 0x239   : > { %2347 = vst.msk [vmem:[%s3072_s22] sm:$0xf] %vm2346_vm12, %v2338_v15  ;;  %v1562_v59 = vsel %vm1530_vm14, %v1514_v54, %v1546_v1  ;;  %vm1528_vm15 = vcmp.gt.f32.partialorder %v1512_v26, 0.0  ;;  %v1544_v60 = vmul.f32 0.01, %v1512_v26  ;;  %v3570_v61 = vadd.f32 %v3513_v23, %v3515_v39 }
 0x23a   : > { %v1671_v0 = vcombine.high %v1669_v4, %v1669_v4  ;;  %v1932_v2 = vmax.f32 %v1670_v28, %v1704_v51  ;;  %v1933_v53 = vmax.f32 %v1669_v4, %v1703_v45  ;;  %v2530_v62 = vrot.slane %v1931_v20, 9 }
 0x23b   : > { %v1706_v5 = vcombine.high %v1562_v59, %v1562_v59  ;;  %v1713_v7 = vrot.slane %v1562_v59, %v3490_v40  ;;  %v1560_v8 = vsel %vm1528_vm15, %v1512_v26, %v1544_v60  ;;  %vm1533_vm0 = vcmp.gt.f32.partialorder %v1517_v58, 0.0 }
 0x23c   : > { %v1934_v3 = vmax.f32 %v1671_v0, %v1705_v25  ;;  %v2531_v10 = vrot.slane %v1932_v2, 9  ;;  %v2532_v16 = vrot.slane %v1933_v53, 9  ;;  %v2091_v11 = vmax.f32 %v1931_v20, %v2530_v62 }
 0x23d   : > { %v1720_v38 = vrot.slane %v1706_v5, %v3490_v40  ;;  %v1721_v43 = vcombine.high %v1713_v7, %v1713_v7  ;;  %v1672_v14 = vcombine.high %v1560_v8, %v1560_v8  ;;  %v1679_v23 = vrot.slane %v1560_v8, %v3490_v40 }
 0x23e   : > { %v2533_v39 = vrot.slane %v1934_v3, 9  ;;  %v2092_v17 = vmax.f32 %v1932_v2, %v2531_v10  ;;  %v2093_v21 = vmax.f32 %v1933_v53, %v2532_v16  ;;  %v2598_v22 = vpack.c.bf16 %v2091_v11, %v2091_v11 }
 0x23f   : > { %v1722_v27 = vcombine.high %v1720_v38, %v1720_v38  ;;  %v1686_v24 = vrot.slane %v1672_v14, %v3490_v40  ;;  %v1687_v29 = vcombine.high %v1679_v23, %v1679_v23  ;;  %v1935_v31 = vmax.f32 %v1679_v23, %v1713_v7 }
 0x240   : > { %v2094_v32 = vmax.f32 %v1934_v3, %v2533_v39  ;;  %v2599_v33 = vpack.c.bf16 %v2092_v17, %v2092_v17  ;;  %v2600_v35 = vpack.c.bf16 %v2093_v21, %v2093_v21  ;;  %v2251_v36 = vunpack.c.l.b16 %v2598_v22 }
 0x241   : > { %v1688_v37 = vcombine.high %v1686_v24, %v1686_v24  ;;  %v1936_v42 = vmax.f32 %v1687_v29, %v1721_v43  ;;  %v1937_v45 = vmax.f32 %v1686_v24, %v1720_v38  ;;  %v2534_v46 = vrot.slane %v1935_v31, 9 }
 0x242   : > { %v2601_v47 = vpack.c.bf16 %v2094_v32, %v2094_v32  ;;  %v2252_v50 = vunpack.c.l.b16 %v2599_v33  ;;  %v2253_v51 = vunpack.c.l.b16 %v2600_v35  ;;  %v1549_v52 = vmul.f32 0.01, %v1517_v58 }
 0x243   : > { %v1938_v54 = vmax.f32 %v1688_v37, %v1722_v27  ;;  %v2535_v56 = vrot.slane %v1936_v42, 9  ;;  %v2536_v25 = vrot.slane %v1937_v45, 9  ;;  %v2095_v63 = vmax.f32 %v1935_v31, %v2534_v46 }
 0x244   : > { %v2254_v57 = vunpack.c.l.b16 %v2601_v47  ;;  %v2296_v15 = vrot.slane %v2252_v50, 7  ;;  %v2298_v1 = vrot.slane %v2253_v51, 6  ;;  %v1565_v26 = vsel %vm1533_vm0, %v1517_v58, %v1549_v52 }
 0x245   : > { %v2537_v4 = vrot.slane %v1938_v54, 9  ;;  %v2096_v28 = vmax.f32 %v1936_v42, %v2535_v56  ;;  %v2097_v20 = vmax.f32 %v1937_v45, %v2536_v25  ;;  %v2602_v59 = vpack.c.bf16 %v2095_v63, %v2095_v63 }
 0x246   : > { %v2297_v60 = vsel %vm2276_vm4, %v2296_v15, %v2251_v36  ;;  %v2300_v0 = vrot.slane %v2254_v57, 5  ;;  %v1757_v2 = vcombine.high %v1565_v26, %v1565_v26  ;;  %v1764_v53 = vrot.slane %v1565_v26, %v3490_v40 }
 0x247   : > { %v2299_v62 = vsel %vm2279_vm5, %v2298_v1, %v2297_v60  ;;  %v2098_v5 = vmax.f32 %v1938_v54, %v2537_v4  ;;  %v2603_v7 = vpack.c.bf16 %v2096_v28, %v2096_v28  ;;  %v2604_v8 = vpack.c.bf16 %v2097_v20, %v2097_v20 }
 0x248   : > { %v2255_v3 = vunpack.c.l.b16 %v2602_v59  ;;  %v2301_v10 = vsel %vm2282_vm6, %v2300_v0, %v2299_v62  ;;  %v1771_v58 = vrot.slane %v1757_v2, %v3490_v40  ;;  %v1772_v16 = vcombine.high %v1764_v53, %v1764_v53 }
 0x249   : > { %v2605_v11 = vpack.c.bf16 %v2098_v5, %v2098_v5  ;;  %v2256_v38 = vunpack.c.l.b16 %v2603_v7  ;;  %v2257_v43 = vunpack.c.l.b16 %v2604_v8  ;;  %v1515_v14 = vadd.f32 %v3570_v61, %v3487_v30 }
 0x24a   : > { %v2302_v23 = vrot.slane %v2255_v3, 4  ;;  %v1773_v39 = vcombine.high %v1771_v58, %v1771_v58  ;;  %v2715_v17 = vadd.f32 %v3517_v41, %v3519_v48  ;;  %v2716_v21 = vadd.f32 %v3521_v49, %v3523_v55 }
 0x24b   : > { %v2258_v22 = vunpack.c.l.b16 %v2605_v11  ;;  %v2304_v27 = vrot.slane %v2256_v38, 3  ;;  %v2306_v24 = vrot.slane %v2257_v43, 2  ;;  %vm1531_vm1 = vcmp.gt.f32.partialorder %v1515_v14, 0.0 }
 0x24c   : > { %v2303_v29 = vsel %vm2285_vm7, %v2302_v23, %v2301_v10  ;;  %v1547_v31 = vmul.f32 0.01, %v1515_v14  ;;  %v1518_v32 = vadd.f32 %v2715_v17, %v3487_v30  ;;  %v1516_v33 = vadd.f32 %v2716_v21, %v3487_v30 }
 0x24d   : > { %v2305_v61 = vsel %vm2288_vm8, %v2304_v27, %v2303_v29  ;;  %v2308_v35 = vrot.slane %v2258_v22, 1  ;;  %v2717_v41 = vadd.f32 %v3526_v9, %v3531_v12  ;;  %v3596_v48 = vadd.f32 %v3533_v13, %v3536_v18 }
 0x24e   : > { %v2307_v49 = vsel %vm2291_vm9, %v2306_v24, %v2305_v61  ;;  %v1563_v55 = vsel %vm1531_vm1, %v1515_v14, %v1547_v31  ;;  %vm1534_vm2 = vcmp.gt.f32.partialorder %v1518_v32, 0.0  ;;  %v1550_v36 = vmul.f32 0.01, %v1518_v32 }
 0x24f   : > { %v2309_v37 = vsel %vm2294_vm10, %v2308_v35, %v2307_v49  ;;  %v1723_v42 = vcombine.high %v1563_v55, %v1563_v55  ;;  %v1730_v45 = vrot.slane %v1563_v55, %v3490_v40  ;;  %vm1532_vm3 = vcmp.gt.f32.partialorder %v1516_v33, 0.0 }
 0x250   : > { %v2339_v46 = vpack.c.b16 %v2309_v37, %v2309_v37  ;;  %v1566_v47 = vsel %vm1534_vm2, %v1518_v32, %v1550_v36  ;;  %v1548_v50 = vmul.f32 0.01, %v1516_v33  ;;  %v1521_v9 = vadd.f32 %v2717_v41, %v3487_v30 }
 0x251   : > { %v1737_v12 = vrot.slane %v1723_v42, %v3490_v40  ;;  %v1738_v13 = vcombine.high %v1730_v45, %v1730_v45  ;;  %v1939_v18 = vmax.f32 %v1730_v45, %v1764_v53  ;;  %v1774_v51 = vcombine.high %v1566_v47, %v1566_v47 }
 0x252   : > { %2348 = vst.msk [vmem:[%s3072_s22 + $0x4] sm:$0xf] %vm2346_vm12, %v2339_v46  ;;  %v1781_v52 = vrot.slane %v1566_v47, %v3490_v40  ;;  %v1564_v54 = vsel %vm1532_vm3, %v1516_v33, %v1548_v50  ;;  %vm1537_vm11 = vcmp.gt.f32.partialorder %v1521_v9, 0.0  ;;  %v1553_v23 = vmul.f32 0.01, %v1521_v9 }
 0x253   : > { %v1739_v56 = vcombine.high %v1737_v12, %v1737_v12  ;;  %v1940_v25 = vmax.f32 %v1738_v13, %v1772_v16  ;;  %v1941_v63 = vmax.f32 %v1737_v12, %v1771_v58  ;;  %v2538_v57 = vrot.slane %v1939_v18, 9 }
 0x254   : > { %v1788_v15 = vrot.slane %v1774_v51, %v3490_v40  ;;  %v1789_v1 = vcombine.high %v1781_v52, %v1781_v52  ;;  %v1740_v26 = vcombine.high %v1564_v54, %v1564_v54  ;;  %v1747_v4 = vrot.slane %v1564_v54, %v3490_v40 }
 0x255   : > { %v1942_v28 = vmax.f32 %v1739_v56, %v1773_v39  ;;  %v2539_v20 = vrot.slane %v1940_v25, 9  ;;  %v2540_v59 = vrot.slane %v1941_v63, 9  ;;  %v2099_v60 = vmax.f32 %v1939_v18, %v2538_v57 }
 0x256   : > { %v1790_v0 = vcombine.high %v1788_v15, %v1788_v15  ;;  %v1754_v2 = vrot.slane %v1740_v26, %v3490_v40  ;;  %v1755_v53 = vcombine.high %v1747_v4, %v1747_v4  ;;  %v1943_v62 = vmax.f32 %v1747_v4, %v1781_v52 }
 0x257   : > { %v2541_v5 = vrot.slane %v1942_v28, 9  ;;  %v2100_v7 = vmax.f32 %v1940_v25, %v2539_v20  ;;  %v2101_v8 = vmax.f32 %v1941_v63, %v2540_v59  ;;  %v2606_v3 = vpack.c.bf16 %v2099_v60, %v2099_v60 }
 0x258   : > { %v1756_v10 = vcombine.high %v1754_v2, %v1754_v2  ;;  %v1944_v58 = vmax.f32 %v1755_v53, %v1789_v1  ;;  %v1945_v16 = vmax.f32 %v1754_v2, %v1788_v15  ;;  %v2542_v11 = vrot.slane %v1943_v62, 9 }
 0x259   : > { %v2102_v38 = vmax.f32 %v1942_v28, %v2541_v5  ;;  %v2607_v43 = vpack.c.bf16 %v2100_v7, %v2100_v7  ;;  %v2608_v14 = vpack.c.bf16 %v2101_v8, %v2101_v8  ;;  %v2259_v24 = vunpack.c.l.b16 %v2606_v3 }
 0x25a   : > { %v1946_v39 = vmax.f32 %v1756_v10, %v1790_v0  ;;  %v2543_v17 = vrot.slane %v1944_v58, 9  ;;  %v2544_v21 = vrot.slane %v1945_v16, 9  ;;  %v2103_v22 = vmax.f32 %v1943_v62, %v2542_v11 }
 0x25b   : > { %v2609_v27 = vpack.c.bf16 %v2102_v38, %v2102_v38  ;;  %v2260_v29 = vunpack.c.l.b16 %v2607_v43  ;;  %v2261_v31 = vunpack.c.l.b16 %v2608_v14  ;;  %v1569_v36 = vsel %vm1537_vm11, %v1521_v9, %v1553_v23 }
 0x25c   : > { %v2545_v32 = vrot.slane %v1946_v39, 9  ;;  %v2104_v33 = vmax.f32 %v1944_v58, %v2543_v17  ;;  %v2105_v61 = vmax.f32 %v1945_v16, %v2544_v21  ;;  %v2610_v35 = vpack.c.bf16 %v2103_v22, %v2103_v22 }
 0x25d   : > { %v2262_v41 = vunpack.c.l.b16 %v2609_v27  ;;  %v2310_v49 = vrot.slane %v2260_v29, 7  ;;  %v2312_v55 = vrot.slane %v2261_v31, 6  ;;  %v1825_v56 = vcombine.high %v1569_v36, %v1569_v36 }
 0x25e   : > { %v2106_v37 = vmax.f32 %v1946_v39, %v2545_v32  ;;  %v2611_v42 = vpack.c.bf16 %v2104_v33, %v2104_v33  ;;  %v2612_v45 = vpack.c.bf16 %v2105_v61, %v2105_v61  ;;  %v2263_v46 = vunpack.c.l.b16 %v2610_v35 }
 0x25f   : > { %v2311_v47 = vsel %vm2276_vm4, %v2310_v49, %v2259_v24  ;;  %v2314_v50 = vrot.slane %v2262_v41, 5  ;;  %v1832_v9 = vrot.slane %v1569_v36, %v3490_v40  ;;  %v1519_v57 = vadd.f32 %v3596_v48, %v3487_v30 }
 0x260   : > { %v2313_v12 = vsel %vm2279_vm5, %v2312_v55, %v2311_v47  ;;  %v2613_v13 = vpack.c.bf16 %v2106_v37, %v2106_v37  ;;  %v2264_v18 = vunpack.c.l.b16 %v2611_v42  ;;  %v2265_v51 = vunpack.c.l.b16 %v2612_v45 }
 0x261   : > { %v2315_v52 = vsel %vm2282_vm6, %v2314_v50, %v2313_v12  ;;  %v2316_v54 = vrot.slane %v2263_v46, 4  ;;  %v2719_v26 = vadd.f32 %v3538_v19, %v3543_v44  ;;  %v2720_v4 = vadd.f32 %v3545_v6, %v3548_v34 }
 0x262   : > { %v2266_v25 = vunpack.c.l.b16 %v2613_v13  ;;  %v2318_v63 = vrot.slane %v2264_v18, 3  ;;  %v2320_v1 = vrot.slane %v2265_v51, 2  ;;  %vm1535_vm13 = vcmp.gt.f32.partialorder %v1519_v57, 0.0 }
 0x263   : > { %v2317_v15 = vsel %vm2285_vm7, %v2316_v54, %v2315_v52  ;;  %v1551_v59 = vmul.f32 0.01, %v1519_v57  ;;  %v1839_v0 = vrot.slane %v1825_v56, %v3490_v40  ;;  %v1522_v48 = vadd.f32 %v2719_v26, %v3487_v30 }
 0x264   : > { %v2319_v28 = vsel %vm2288_vm8, %v2318_v63, %v2317_v15  ;;  %v2322_v20 = vrot.slane %v2266_v25, 1  ;;  %v1520_v2 = vadd.f32 %v2720_v4, %v3487_v30  ;;  %v1840_v19 = vcombine.high %v1832_v9, %v1832_v9 }
 0x265   : > { %v2321_v60 = vsel %vm2291_vm9, %v2320_v1, %v2319_v28  ;;  %v1567_v44 = vsel %vm1535_vm13, %v1519_v57, %v1551_v59  ;;  %vm1538_vm14 = vcmp.gt.f32.partialorder %v1522_v48, 0.0  ;;  %v1554_v5 = vmul.f32 0.01, %v1522_v48 }
 0x266   : > { %v2323_v53 = vsel %vm2294_vm10, %v2322_v20, %v2321_v60  ;;  %v1791_v6 = vcombine.high %v1567_v44, %v1567_v44  ;;  %v1798_v34 = vrot.slane %v1567_v44, %v3490_v40  ;;  %vm1536_vm15 = vcmp.gt.f32.partialorder %v1520_v2, 0.0 }
 0x267   : > { %v2340_v62 = vpack.c.b16 %v2323_v53, %v2323_v53  ;;  %v1552_v7 = vmul.f32 0.01, %v1520_v2  ;;  %v1841_v8 = vcombine.high %v1839_v0, %v1839_v0  ;;  %v1570_v30 = vsel %vm1538_vm14, %v1522_v48, %v1554_v5 }
 0x268   : > { %v1805_v3 = vrot.slane %v1791_v6, %v3490_v40  ;;  %v1806_v10 = vcombine.high %v1798_v34, %v1798_v34  ;;  %v1947_v58 = vmax.f32 %v1798_v34, %v1832_v9  ;;  %v1842_v23 = vcombine.high %v1570_v30, %v1570_v30 }
 0x269   : > { %2349 = vst.msk [vmem:[%s3072_s22 + $0x8] sm:$0xf] %vm2346_vm12, %v2340_v62  ;;  %v1568_v16 = vsel %vm1536_vm15, %v1520_v2, %v1552_v7  ;;  %v1849_v39 = vrot.slane %v1570_v30, %v3490_v40 }
 0x26a   : > { %v1807_v11 = vcombine.high %v1805_v3, %v1805_v3  ;;  %v1948_v38 = vmax.f32 %v1806_v10, %v1840_v19  ;;  %v1949_v43 = vmax.f32 %v1805_v3, %v1839_v0  ;;  %v2546_v14 = vrot.slane %v1947_v58, 9 }
 0x26b   : > { %v1808_v17 = vcombine.high %v1568_v16, %v1568_v16  ;;  %v1815_v21 = vrot.slane %v1568_v16, %v3490_v40  ;;  %v1856_v31 = vrot.slane %v1842_v23, %v3490_v40  ;;  %v1857_v32 = vcombine.high %v1849_v39, %v1849_v39 }
 0x26c   : > { %v1950_v22 = vmax.f32 %v1807_v11, %v1841_v8  ;;  %v2547_v27 = vrot.slane %v1948_v38, 9  ;;  %v2548_v24 = vrot.slane %v1949_v43, 9  ;;  %v2107_v29 = vmax.f32 %v1947_v58, %v2546_v14 }
 0x26d   : > { %v1822_v33 = vrot.slane %v1808_v17, %v3490_v40  ;;  %v1823_v61 = vcombine.high %v1815_v21, %v1815_v21  ;;  %v1858_v55 = vcombine.high %v1856_v31, %v1856_v31  ;;  %v1951_v37 = vmax.f32 %v1815_v21, %v1849_v39 }
 0x26e   : > { %v2549_v35 = vrot.slane %v1950_v22, 9  ;;  %v2108_v41 = vmax.f32 %v1948_v38, %v2547_v27  ;;  %v2109_v49 = vmax.f32 %v1949_v43, %v2548_v24  ;;  %v2614_v46 = vpack.c.bf16 %v2107_v29, %v2107_v29 }
 0x26f   : > { %v1824_v36 = vcombine.high %v1822_v33, %v1822_v33  ;;  %v1952_v42 = vmax.f32 %v1823_v61, %v1857_v32  ;;  %v1953_v12 = vmax.f32 %v1822_v33, %v1856_v31  ;;  %v2550_v18 = vrot.slane %v1951_v37, 9 }
 0x270   : > { %v2110_v45 = vmax.f32 %v1950_v22, %v2549_v35  ;;  %v2615_v47 = vpack.c.bf16 %v2108_v41, %v2108_v41  ;;  %v2616_v50 = vpack.c.bf16 %v2109_v49, %v2109_v49  ;;  %v2267_v57 = vunpack.c.l.b16 %v2614_v46 }
 0x271   : > { %v1954_v13 = vmax.f32 %v1824_v36, %v1858_v55  ;;  %v2551_v51 = vrot.slane %v1952_v42, 9  ;;  %v2552_v40 = vrot.slane %v1953_v12, 9  ;;  %v2111_v63 = vmax.f32 %v1951_v37, %v2550_v18 }
 0x272   : > { %v2617_v52 = vpack.c.bf16 %v2110_v45, %v2110_v45  ;;  %v2268_v54 = vunpack.c.l.b16 %v2615_v47  ;;  %v2269_v56 = vunpack.c.l.b16 %v2616_v50 }
 0x273   : > { %v2553_v25 = vrot.slane %v1954_v13, 9  ;;  %v2112_v9 = vmax.f32 %v1952_v42, %v2551_v51  ;;  %v2113_v4 = vmax.f32 %v1953_v12, %v2552_v40  ;;  %v2618_v20 = vpack.c.bf16 %v2111_v63, %v2111_v63 }
 0x274   : > { %v2270_v15 = vunpack.c.l.b16 %v2617_v52  ;;  %v2324_v1 = vrot.slane %v2268_v54, 7  ;;  %v2326_v26 = vrot.slane %v2269_v56, 6 }
 0x275   : > { %v2114_v28 = vmax.f32 %v1954_v13, %v2553_v25  ;;  %v2619_v59 = vpack.c.bf16 %v2112_v9, %v2112_v9  ;;  %v2620_v2 = vpack.c.bf16 %v2113_v4, %v2113_v4  ;;  %v2271_v19 = vunpack.c.l.b16 %v2618_v20 }
 0x276   : > { %v2325_v60 = vsel %vm2276_vm4, %v2324_v1, %v2267_v57  ;;  %v2328_v0 = vrot.slane %v2270_v15, 5 }
 0x277   : > { %v2327_v48 = vsel %vm2279_vm5, %v2326_v26, %v2325_v60  ;;  %v2621_v53 = vpack.c.bf16 %v2114_v28, %v2114_v28  ;;  %v2272_v44 = vunpack.c.l.b16 %v2619_v59  ;;  %v2273_v6 = vunpack.c.l.b16 %v2620_v2 }
 0x278   : > { %v2329_v62 = vsel %vm2282_vm6, %v2328_v0, %v2327_v48  ;;  %v2330_v5 = vrot.slane %v2271_v19, 4 }
 0x279   : > { %v2274_v34 = vunpack.c.l.b16 %v2621_v53  ;;  %v2332_v7 = vrot.slane %v2272_v44, 3  ;;  %v2334_v3 = vrot.slane %v2273_v6, 2 }
 0x27a   : > { %v2331_v8 = vsel %vm2285_vm7, %v2330_v5, %v2329_v62 }
 0x27b   : > { %v2333_v10 = vsel %vm2288_vm8, %v2332_v7, %v2331_v8  ;;  %v2336_v58 = vrot.slane %v2274_v34, 1 }
 0x27c   : > { %v2335_v30 = vsel %vm2291_vm9, %v2334_v3, %v2333_v10 }
 0x27d   : > { %v2337_v16 = vsel %vm2294_vm10, %v2336_v58, %v2335_v30 }
 0x27e   : > { %v2341_v11 = vpack.c.b16 %v2337_v16, %v2337_v16 }
 0x280   : > { %2350 = vst.msk [vmem:[%s3072_s22 + $0xc] sm:$0xf] %vm2346_vm12, %v2341_v11 }
 0x281 PF: > { %s15_s16 = sadd.s32 1, %s2927_s16   ;;  %s3679_s12 = smov %s2919_s14 }
 0x282   : > { %p12_p10 = scmp.ge.s32.totalorder %s15_s16, 6   ;;  %s3680_s13 = smov %s2923_s15 }
 0x283   : > { %s3681_s14 = smov %s3684_s18  ;;  %s3682_s15 = smov %s3688_s19 }
 0x284   :  { %14 = sbr.rel (!%p12_p10) target bundleno = 4 (0x4), region = 80 }
 0x28b   :  { %2381 = vsyncpa [#allocation4], 1 }
 0x28c   :  { %2383 = vsyncpa [#allocation4 + $0x1], 1 }
 0x28d   :  { %2384 = vsyncpa [#allocation6], 1 }

// kernel: _lambda_.6
= control target key start
LH: loop header
LB: loop body
LE: loop exit
PB: predicated region body
PF: predicated region fallthrough
CT: control target
= control target key end

     0   :  { %8 = vsyncpa [#allocation4], 0  ;;  %s2555_s0 = inlined_call_operand.vmem [shape: bf16[2,4,4,128], index: 0, kind: input, shape index: {}]   ;;  %s2556_s1 = inlined_call_operand.hbm [shape: bf16[3,384,64], index: 1, kind: input, shape index: {}]   ;;  %s2557_s2 = inlined_call_operand.hbm [shape: f32[1,64], index: 2, kind: input, shape index: {}]   ;;  %s2558_s3 = inlined_call_operand.vmem [shape: bf16[2,2,2,64], index: 3, kind: output, shape index: {}]  }
   0x1   :  { %9 = vsyncpa [#allocation6], 0  ;;  %s2297_s12 = smov 0   ;;  %s2299_s13 = smov 0  }
   0x2   :  { %s2301_s14 = smov 0  }
   0x3 LB: > { %s1783_s15 = sadd.s32 4294967295, %s2265_s14   ;;  %s27_s16 = sadd.s32 1, %s2261_s13  ;;  %s2265_s14 = sphi %s2301_s14, %s15_s14   ;;  %s2261_s13 = sphi %s2299_s13, %s2574_s13   ;;  %s2257_s12 = sphi %s2297_s12, %s2573_s12  }
   0x4   : > { %p29_p0 = scmp.ge.s32.totalorder %s27_s16, 2  ;;  %p1785_p1 = scmp.ge.s32.totalorder %s2265_s14, 1 }
   0x5   : > { %p128_p2 = scmp.lt.s32.totalorder %s2265_s14, 3  ;;  %p2322_p4 = scmp.eq.s32.totalorder %s1783_s15, 0 }
   0x6   : > { %s2576_s16 = smov (%p29_p0, %s27_s16), 0  ;;  %s2267_s19 = smov [#allocation3]  }
   0x7   : > { %p2318_p3 = pnand %p1785_p1, %p128_p2  ;;  %s140_s20 = sshll.u32 %s2267_s19, 4  ;;  %s141_s20 = int_to_ptr.vmem [resolvable:$true] %s140_s20 }
   0x8   : > { %s2563_s18 = scalar_select %p2322_p4, 1, 0 }
   0x9   : > { %s2562_s17 = scalar_select %p2318_p3, 1, 0 }
   0xa   : > { %p2056_p5 = pneg %p2318_p3  ;;  %s2268_s22 = smov [#allocation5]  }
   0xb   : > { %s154_s23 = sshll.u32 %s2268_s22, 4  ;;  %s2179_s26 = scalar_lea.hbm %s2556_s1, 9216  ;;  %s2334_s23 = int_to_ptr.vmem [resolvable:$true] %s154_s23 }
   0xc   : > { %p2330_p6 = pnand %p2322_p4, %p2056_p5  ;;  %p2180_p7 = scmp.ne.s32.totalorder %s2556_s1, %s2179_s26 }
   0xd   : > { %p2186_p11 = scmp.lt.u32.totalorder %s2179_s26, %s2556_s1 }
   0xe   : > { %p2181_p8 = pneg %p2330_p6 }
  0x10   : > { %p2182_p9 = pnand %p2181_p8, %p2180_p7 }
  0x12   : > { %p2183_p10 = pneg %p2182_p9 }
  0x14   : > { %p2188_p12 = pnand %p2186_p11, %p2183_p10 }
  0x16   : > { %2191 = shalt.err (!%p2188_p12)
}
  0x17   : > { %s2192_s4 = scalar_lea.vmem %s141_s20, 9216  ;;  %p2200_p2 = scmp.lt.s32.totalorder %s141_s20, %s141_s20 }
  0x18   : > { %p2193_p13 = scmp.ne.s32.totalorder %s141_s20, %s2192_s4  ;;  %p2201_p5 = scmp.lt.s32.totalorder %s2192_s4, %s2192_s4 }
  0x1a   : > { %p2195_p0 = pnand %p2193_p13, %p2181_p8  ;;  %p2202_p4 = por %p2201_p5, %p2200_p2 }
  0x1c   : > { %p2196_p1 = pneg %p2195_p0 }
  0x1e   : > { %p2203_p3 = pnand %p2202_p4, %p2196_p1 }
  0x20   : > { %2206 = shalt.err (!%p2203_p3)
}
  0x21   : > { %s2269_s5 = smov 64   ;;  %s2270_s6 = smov 4  }
  0x22   : > { %2059 = dma.hbm_to_vmem [thread:$0]  (!%p2330_p6), %s2556_s1, 9216, %s141_s20, [#allocation4], %s2269_s5, %s2269_s5, %s2270_s6  }
  0x23   : > { %s2207_s11 = scalar_lea.hbm %s2557_s2, 16 }
  0x24   : > { %p2208_p7 = scmp.ne.s32.totalorder %s2557_s2, %s2207_s11  ;;  %p2214_p9 = scmp.lt.u32.totalorder %s2207_s11, %s2557_s2 }
  0x26   : > { %p2210_p3 = pnand %p2208_p7, %p2181_p8 }
  0x28   : > { %p2211_p4 = pneg %p2210_p3 }
  0x2a   : > { %p2216_p10 = pnand %p2214_p9, %p2211_p4 }
  0x2c   : > { %2219 = shalt.err (!%p2216_p10)
}
  0x2d   : > { %s2220_s20 = scalar_lea.vmem %s2334_s23, 16  ;;  %s2227_s25 = scalar_lea.vmem %s2334_s23, 32 }
  0x2e   : > { %p2221_p11 = scmp.ne.s32.totalorder %s2334_s23, %s2220_s20  ;;  %p2228_p0 = scmp.lt.s32.totalorder %s2334_s23, %s2334_s23 }
  0x2f   : > { %p2229_p1 = scmp.lt.s32.totalorder %s2227_s25, %s2220_s20 }
  0x30   : > { %p2223_p12 = pnand %p2221_p11, %p2181_p8 }
  0x31   : > { %p2230_p2 = por %p2229_p1, %p2228_p0 }
  0x32   : > { %p2224_p13 = pneg %p2223_p12 }
  0x34   : > { %p2231_p5 = pnand %p2230_p2, %p2224_p13 }
  0x36   : > { %2234 = shalt.err (!%p2231_p5)
}
  0x37   : > { %2062 = dma.hbm_to_vmem [thread:$0]  (!%p2330_p6), %s2557_s2, 16, %s2334_s23, [#allocation6]  }
  0x38   : > { %p2565_p7 = scmp.ne.s32.totalorder %s2562_s17, 0 }
  0x39   : > { %p2566_p8 = scmp.ne.s32.totalorder (!%p2565_p7), %s2563_s18, 0 }
  0x3a   : > { %175 = sbr.rel (%p2565_p7) target bundleno = 447 (0x1bf), region = 32 }
  0x41   : > { %2248 = dma.done.wait (%p2566_p8), [#allocation4], 9216  }
  0x42   : > { %2250 = vsyncadd (%p2566_p8), [#allocation4], 4294958080 }
  0x43   : > { %2252 = dma.done.wait (%p2566_p8), [#allocation6], 16  }
  0x44   : > { %2254 = vsyncadd (%p2566_p8), [#allocation6], 4294967280  ;;  %v2271_v0 = vmov 0.0   ;;  %vm2272_vm0 = vmmov 0   ;;  %v2273_v1 = vmov 0   ;;  %v2101_v2 = vld [vmem:[#allocation3 + $0x100] sm:$0xff]  }
  0x45   : > { %1988 = vmatprep.subr.bf16.mxu1 %v2271_v0  ;;  %2004 = vmatprep.mubr.msk.bf16.mxu1 %vm2272_vm0, %v2271_v0  ;;  %225 = vst [vmem:[#allocation2] sm:$0x7] %v2273_v1  ;;  %227 = vst [vmem:[#allocation2 + $0x14] sm:$0x7] %v2273_v1  ;;  %v2102_v3 = vld [vmem:[#allocation3 + $0xc0] sm:$0xff]   ;;  %v2104_v5 = vld [vmem:[#allocation3 + $0x108] sm:$0xff]  }
  0x46   : > { %1895 = vmatprep.subr.bf16.mxu0 %v2101_v2  ;;  %v2103_v4 = vld [vmem:[#allocation3 + $0x140] sm:$0xff]   ;;  %vm230_vm1 = vsmask.f32 256  ;;  %v2105_v6 = vld [vmem:[#allocation3 + $0xc8] sm:$0xff]   ;;  %v2107_v8 = vld [vmem:[#allocation3 + $0x110] sm:$0xff]   ;;  %vm229_vm2 = vcmask 1040384  }
  0x47   : > { %1896 = vmatpush3.bf16.msra.mxu0 %v2102_v3  ;;  %1989 = vmatpush3.bf16.msra.mxu1 %v2103_v4  ;;  %v2106_v7 = vld [vmem:[#allocation3 + $0x148] sm:$0xff]   ;;  %v2108_v9 = vld [vmem:[#allocation3 + $0xd0] sm:$0xff]   ;;  %v2110_v11 = vld [vmem:[#allocation3 + $0x118] sm:$0xff]   ;;  %p206_p6 = scmp.lt.s32.totalorder %s2257_s12, 1  ;;  %vm245_vm3 = vsmask.f32 7946 }
  0x48   : > { %1897 = vmatprep.subr.bf16.mxu0 %v2104_v5  ;;  %1990 = vmatprep.subr.bf16.mxu1 %v2271_v0  ;;  %v2109_v10 = vld [vmem:[#allocation3 + $0x150] sm:$0xff]   ;;  %v2111_v12 = vld [vmem:[#allocation3 + $0xd8] sm:$0xff]   ;;  %v2113_v14 = vld [vmem:[#allocation3 + $0x120] sm:$0xff]   ;;  %vm244_vm5 = vcmask 1042434   ;;  %vm328_vm7 = vsmask.f32 2306 }
  0x49   : > { %v2112_v13 = vld [vmem:[#allocation3 + $0x158] sm:$0xff]   ;;  %v2114_v15 = vld [vmem:[#allocation3 + $0xe0] sm:$0xff]   ;;  %vm2402_vm4 = vmand %vm229_vm2, %vm230_vm1  ;;  %s2578_s12 = smov (!%p206_p6, %s2257_s12), 1  ;;  %vm327_vm8 = vcmask 1042432   ;;  %vm1645_vm12 = vcmask 1041409   ;;  %vm1681_vm13 = vcmask 516096  }
  0x4a   : > { %v2115_v17 = vld [vmem:[#allocation3 + $0x160] sm:$0xff]   ;;  %v2116_v18 = vld [vmem:[#allocation3 + $0x128] sm:$0xff]   ;;  %vm2407_vm6 = vmand %vm244_vm5, %vm245_vm3  ;;  %s1894_s17 = sshll.u32 %s2578_s12, 3  ;;  %s1794_s28 = sshll.u32 %s2578_s12, 1 }
  0x4b   : > { %1898 = vmatpush3.bf16.msra.mxu0 %v2105_v6  ;;  %1991 = vmatpush3.bf16.msra.mxu1 %v2106_v7  ;;  %v2117_v20 = vld [vmem:[#allocation3 + $0xe8] sm:$0xff]   ;;  %v2119_v22 = vld [vmem:[#allocation3 + $0x130] sm:$0xff]   ;;  %v2122_v25 = vld [vmem:[#allocation3 + $0x138] sm:$0xff]   ;;  %s2422_s23 = scalar_lea.vmem %s2555_s0, %s1894_s17  ;;  %s218_s4 = scalar_lea.vmem %s2558_s3, %s1794_s28 }
  0x4c   : > { %1899 = vmatprep.subr.bf16.mxu0 %v2107_v8  ;;  %1992 = vmatprep.subr.bf16.mxu1 %v2271_v0  ;;  %v2118_v21 = vld [vmem:[#allocation3 + $0x168] sm:$0xff]   ;;  %v2120_v23 = vld [vmem:[#allocation3 + $0xf0] sm:$0xff]   ;;  %v2123_v29 = vld [vmem:[#allocation3 + $0xf8] sm:$0xff]  }
  0x4d   : > { %v2121_v24 = vld [vmem:[#allocation3 + $0x170] sm:$0xff]   ;;  %v232_v26 = vld [vmem:[#allocation2 + $0x4] sm:$0x1]  ;;  %v241_v33 = vld [vmem:[#allocation2 + $0x10] sm:$0x1] }
  0x4e   : > { %v235_v27 = vld [vmem:[#allocation2 + $0x8] sm:$0x1]  ;;  %v238_v28 = vld [vmem:[#allocation2 + $0xc] sm:$0x1]  ;;  %v233_v30 = vsel %vm2402_vm4, 0, %v232_v26  ;;  %v2124_v34 = vld [vmem:[#allocation3 + $0x178] sm:$0xff]  }
  0x4f   : > { %1900 = vmatpush3.bf16.msra.mxu0 %v2108_v9  ;;  %1993 = vmatpush3.bf16.msra.mxu1 %v2109_v10  ;;  %v236_v31 = vsel %vm2402_vm4, 0, %v235_v27  ;;  %v239_v32 = vsel %vm2402_vm4, 0, %v238_v28  ;;  %234 = vst [vmem:[#allocation2 + $0x4] sm:$0x1] %v233_v30  ;;  %v242_v35 = vsel %vm2402_vm4, 0, %v241_v33  ;;  %v2129_v38 = vld [vmem:[#allocation3 + $0x40] sm:$0xff]   ;;  %vm2447_vm9 = vmand %vm327_vm8, %vm328_vm7 }
  0x50   : > { %1901 = vmatprep.subr.bf16.mxu0 %v2110_v11  ;;  %1994 = vmatprep.subr.bf16.mxu1 %v2271_v0  ;;  %237 = vst [vmem:[#allocation2 + $0x8] sm:$0x1] %v236_v31  ;;  %240 = vst [vmem:[#allocation2 + $0xc] sm:$0x1] %v239_v32  ;;  %v247_v36 = vld [vmem:[#allocation2 + $0x4] sm:$0x4] }
  0x51   : > { %v250_v37 = vld [vmem:[#allocation2 + $0x8] sm:$0x4]  ;;  %243 = vst [vmem:[#allocation2 + $0x10] sm:$0x1] %v242_v35  ;;  %v248_v39 = vsel %vm2407_vm6, 0, %v247_v36  ;;  %v2131_v61 = vld [vmem:[#allocation3 + $0x80] sm:$0xff]  }
  0x52   : > { %v251_v40 = vsel %vm2407_vm6, 0, %v250_v37  ;;  %v253_v41 = vld [vmem:[#allocation2 + $0xc] sm:$0x4]  ;;  %v256_v42 = vld [vmem:[#allocation2 + $0x10] sm:$0x4] }
  0x53   : > { %1902 = vmatpush3.bf16.msra.mxu0 %v2111_v12  ;;  %1995 = vmatpush3.bf16.msra.mxu1 %v2112_v13  ;;  %249 = vst [vmem:[#allocation2 + $0x4] sm:$0x4] %v248_v39  ;;  %252 = vst [vmem:[#allocation2 + $0x8] sm:$0x4] %v251_v40  ;;  %v254_v43 = vsel %vm2407_vm6, 0, %v253_v41  ;;  %v257_v44 = vsel %vm2407_vm6, 0, %v256_v42  ;;  %v421_v13 = vlaneseq }
  0x54   : > { %1903 = vmatprep.subr.bf16.mxu0 %v2113_v14  ;;  %1996 = vmatprep.subr.bf16.mxu1 %v2271_v0  ;;  %v1795_v45 = vld.sshfl [vmem:[%s2422_s23] sm:$0x3 pattern:$0x76325410]  ;;  %255 = vst [vmem:[#allocation2 + $0xc] sm:$0x4] %v254_v43 }
  0x55   : > { %258 = vst [vmem:[#allocation2 + $0x10] sm:$0x4] %v257_v44  ;;  %v1796_v46 = vld.sshfl [vmem:[%s2422_s23 + $0x2] sm:$0x3 pattern:$0x76325410] }
  0x56   : > { %v296_v47 = vshrl.u32 %v1795_v45, 16  ;;  %v299_v48 = vshll.u32 %v1795_v45, 16  ;;  %v1797_v49 = vld.sshfl [vmem:[%s2422_s23 + $0x4] sm:$0x3 pattern:$0x76325410] }
  0x57   : > { %1904 = vmatpush3.bf16.msra.mxu0 %v2114_v15  ;;  %1997 = vmatpush3.bf16.msra.mxu1 %v2115_v17  ;;  %v303_v50 = vshrl.u32 %v1796_v46, 16  ;;  %v306_v51 = vshll.u32 %v1796_v46, 16  ;;  %v1798_v52 = vld.sshfl [vmem:[%s2422_s23 + $0x6] sm:$0x3 pattern:$0x76325410] }
  0x58   : > { %1905 = vmatprep.subr.bf16.mxu0 %v2116_v18  ;;  %1998 = vmatprep.subr.bf16.mxu1 %v2271_v0  ;;  %v298_v53 = vrot.slane %v296_v47, 7  ;;  %v310_v54 = vshrl.u32 %v1797_v49, 16  ;;  %v313_v56 = vshll.u32 %v1797_v49, 16  ;;  %v317_v57 = vshrl.u32 %v1798_v52, 16 }
  0x59   : > { %v305_v55 = vrot.slane %v303_v50, 7  ;;  %v320_v58 = vshll.u32 %v1798_v52, 16  ;;  %v2274_v11 = vmov 1983009808   ;;  %v2460_v15 = vshrl.u32 %v421_v13, 7  ;;  %v2137_v13 = vld [vmem:[#allocation3 + $0x90] sm:$0xff]  }
  0x5a   : > { %v301_v59 = vor.u32 %v299_v48, %v298_v53  ;;  %v312_v60 = vrot.slane %v310_v54, 7  ;;  %v319_v63 = vrot.slane %v317_v57, 7  ;;  %v330_v2 = vld [vmem:[#allocation2 + $0x4] sm:$0x7]  ;;  %v333_v3 = vld [vmem:[#allocation2 + $0x8] sm:$0x7]  ;;  %v419_v12 = vunpack.c.l.s4 %v2274_v11 }
  0x5b   : > { %1906 = vmatpush3.bf16.msra.mxu0 %v2117_v20  ;;  %1999 = vmatpush3.bf16.msra.mxu1 %v2118_v21  ;;  %v308_v62 = vor.u32 %v306_v51, %v305_v55  ;;  %v336_v7 = vld [vmem:[#allocation2 + $0xc] sm:$0x7] }
  0x5c   : > { %1907 = vmatprep.subr.bf16.mxu0 %v2119_v22  ;;  %2000 = vmatprep.subr.bf16.mxu1 %v2271_v0  ;;  %v315_v1 = vor.u32 %v313_v56, %v312_v60  ;;  %v322_v4 = vor.u32 %v320_v58, %v319_v63  ;;  %v331_v5 = vsel %vm2447_vm9, %v301_v59, %v330_v2  ;;  %v339_v8 = vld [vmem:[#allocation2 + $0x10] sm:$0x7]  ;;  %v420_v14 = vunpack.c.0.s8 %v419_v12  ;;  %v2132_v12 = vld [vmem:[#allocation3 + $0x48] sm:$0xff]  }
  0x5d   : > { %v334_v6 = vsel %vm2447_vm9, %v308_v62, %v333_v3  ;;  %332 = vst [vmem:[#allocation2 + $0x4] sm:$0x7] %v331_v5  ;;  %v345_v3 = vld [vmem:[#allocation2] sm:$0x7] }
  0x5e   : > { %335 = vst [vmem:[#allocation2 + $0x8] sm:$0x7] %v334_v6  ;;  %v337_v9 = vsel %vm2447_vm9, %v315_v1, %v336_v7  ;;  %v340_v10 = vsel %vm2447_vm9, %v322_v4, %v339_v8  ;;  %v2134_v5 = vld [vmem:[#allocation3 + $0x88] sm:$0xff]   ;;  %v1799_v6 = vcombine.low %v345_v3, %v345_v3  ;;  %v2130_v7 = vld [vmem:[#allocation3] sm:$0xff]  }
  0x5f   : > { %1908 = vmatpush3.bf16.msra.mxu0 %v2120_v23  ;;  %2001 = vmatpush3.bf16.msra.mxu1 %v2121_v24  ;;  %338 = vst [vmem:[#allocation2 + $0xc] sm:$0x7] %v337_v9  ;;  %341 = vst [vmem:[#allocation2 + $0x10] sm:$0x7] %v340_v10  ;;  %v2463_v23 = vsub.s32 %v420_v14, %v2460_v15 }
  0x60   : > { %1909 = vmatprep.subr.bf16.mxu0 %v2122_v25  ;;  %2002 = vmatprep.subr.bf16.mxu1 %v2271_v0  ;;  %v370_v10 = vshrl.u32 %v1799_v6, 16  ;;  %v372_v11 = vshll.u32 %v1799_v6, 16 }
  0x62   : > { %v374_v14 = vrot.slane %v372_v11, 1  ;;  %v2163_v11 = vld [vmem:[#allocation3 + $0x1d8] sm:$0xff]  }
  0x63   : > { %1910 = vmatpush3.bf16.msra.mxu0 %v2123_v29  ;;  %2003 = vmatpush3.bf16.msra.mxu1 %v2124_v34 }
  0x64   : > { %1926 = vmatprep.subr.bf16.mxu0 %v2129_v38  ;;  %2008 = vmatprep.subr.bf16.mxu1 %v2271_v0  ;;  %v346_v16 = vld [vmem:[#allocation2 + $0x4] sm:$0x7] }
  0x65   : > { %v347_v17 = vld [vmem:[#allocation2 + $0x8] sm:$0x7]  ;;  %v1800_v19 = vcombine.low %v346_v16, %v346_v16 }
  0x66   : > { %v348_v18 = vld [vmem:[#allocation2 + $0xc] sm:$0x7]  ;;  %v1801_v20 = vcombine.low %v347_v17, %v347_v17  ;;  %v349_v21 = vld [vmem:[#allocation2 + $0x10] sm:$0x7] }
  0x67   : > { %v1802_v22 = vcombine.low %v348_v18, %v348_v18  ;;  %v1803_v24 = vcombine.low %v349_v21, %v349_v21  ;;  %v377_v25 = vshrl.u32 %v1800_v19, 16  ;;  %v379_v26 = vshll.u32 %v1800_v19, 16 }
  0x68   : > { %v384_v27 = vshrl.u32 %v1801_v20, 16  ;;  %v386_v28 = vshll.u32 %v1801_v20, 16  ;;  %v412_v31 = vrot.slane %v1800_v19, 1  ;;  %v413_v35 = vrot.slane %v1801_v20, 1  ;;  %v2140_v20 = vld [vmem:[#allocation3 + $0x98] sm:$0xff]  }
  0x69   : > { %v391_v29 = vshrl.u32 %v1802_v22, 16  ;;  %v393_v30 = vshll.u32 %v1802_v22, 16  ;;  %v381_v32 = vrot.slane %v379_v26, 1  ;;  %v398_v33 = vshrl.u32 %v1803_v24, 16 }
  0x6a   : > { %v400_v34 = vshll.u32 %v1803_v24, 16  ;;  %v388_v36 = vrot.slane %v386_v28, 1  ;;  %v414_v38 = vrot.slane %v1802_v22, 1  ;;  %v415_v39 = vrot.slane %v1803_v24, 1  ;;  %v2136_v22 = vld [vmem:[#allocation3 + $0x10] sm:$0xff]   ;;  %v2143_v28 = vld [vmem:[#allocation3 + $0xa0] sm:$0xff]  }
  0x6b   : > { %v395_v37 = vrot.slane %v393_v30, 1  ;;  %v382_v40 = vor.u32 %v381_v32, %v377_v25  ;;  %v2466_v42 = vrot.slane %v412_v31, %v2463_v23  ;;  %v2469_v43 = vrot.slane %v413_v35, %v2463_v23  ;;  %v2138_v25 = vld [vmem:[#allocation3 + $0x58] sm:$0xff]   ;;  %v2141_v32 = vld [vmem:[#allocation3 + $0x60] sm:$0xff]  }
  0x6c   : > { %v402_v41 = vrot.slane %v400_v34, 1  ;;  %v389_v44 = vor.u32 %v388_v36, %v384_v27  ;;  %v2472_v46 = vrot.slane %v414_v38, %v2463_v23  ;;  %v2475_v47 = vrot.slane %v415_v39, %v2463_v23  ;;  %v2139_v30 = vld [vmem:[#allocation3 + $0x18] sm:$0xff]   ;;  %v2146_v34 = vld [vmem:[#allocation3 + $0xa8] sm:$0xff]   ;;  %v2142_v36 = vld [vmem:[#allocation3 + $0x20] sm:$0xff]  }
  0x6d   : > { %v396_v45 = vor.u32 %v395_v37, %v391_v29  ;;  %v433_v49 = vcombine.low %v346_v16, %v382_v40  ;;  %v1806_v50 = vcombine.low %v2466_v42, %v2469_v43  ;;  %v2133_v16 = vld [vmem:[#allocation3 + $0x8] sm:$0xff]   ;;  %v411_v26 = vrot.slane %v1799_v6, 1  ;;  %v2149_v40 = vld [vmem:[#allocation3 + $0xb0] sm:$0xff]  }
  0x6e   : > { %v403_v48 = vor.u32 %v402_v41, %v398_v33  ;;  %v449_v51 = vcombine.low %v347_v17, %v389_v44  ;;  %v1808_v53 = vcombine.low %v2472_v46, %v2475_v47  ;;  %v375_v17 = vor.u32 %v374_v14, %v370_v10  ;;  %v2144_v37 = vld [vmem:[#allocation3 + $0x68] sm:$0xff]   ;;  %v2147_v44 = vld [vmem:[#allocation3 + $0x70] sm:$0xff]   ;;  %v2166_v14 = vld [vmem:[#allocation3 + $0x1e0] sm:$0xff]  }
  0x6f   : > { %v465_v52 = vcombine.low %v348_v18, %v396_v45  ;;  %v440_v54 = vrot.slane %v433_v49, %v2463_v23  ;;  %v611_v56 = vrot.slane %v1806_v50, %v2463_v23  ;;  %v2135_v18 = vld [vmem:[#allocation3 + $0x50] sm:$0xff]   ;;  %v431_v33 = vrot.slane %v411_v26, %v2463_v23  ;;  %v2145_v41 = vld [vmem:[#allocation3 + $0x28] sm:$0xff]   ;;  %v2152_v49 = vld [vmem:[#allocation3 + $0xb8] sm:$0xff]  }
  0x70   : > { %v529_v55 = vcombine.low %v349_v21, %v403_v48  ;;  %v456_v57 = vrot.slane %v449_v51, %v2463_v23  ;;  %v625_v59 = vrot.slane %v1808_v53, %v2463_v23  ;;  %v417_v21 = vcombine.low %v345_v3, %v375_v17  ;;  %v350_v50 = vld [vmem:[#allocation2 + $0x14] sm:$0x7]  ;;  %v2162_v3 = vld [vmem:[#allocation3 + $0x210] sm:$0xff]   ;;  %v2171_v17 = vld [vmem:[#allocation3 + $0x228] sm:$0xff]  }
  0x71   : > { %v472_v58 = vrot.slane %v465_v52, %v2463_v23  ;;  %v1834_v38 = vcombine.low %v431_v33, %v2466_v42  ;;  %v1836_v39 = vcombine.low %v2469_v43, %v2472_v46  ;;  %v1804_v42 = vcombine.low %v350_v50, %v350_v50  ;;  %v2148_v43 = vld [vmem:[#allocation3 + $0x30] sm:$0xff]   ;;  %v2150_v46 = vld [vmem:[#allocation3 + $0x78] sm:$0xff]  }
  0x72   : > { %v2487_v60 = vrot.slane %v529_v55, %v2463_v23  ;;  %v1805_v62 = vcombine.low %v440_v54, %v456_v57  ;;  %v628_v63 = vcombine.low %v611_v56, %v625_v59  ;;  %v424_v24 = vrot.slane %v417_v21, %v2463_v23  ;;  %v2151_v56 = vld [vmem:[#allocation3 + $0x38] sm:$0xff]   ;;  %v2159_v59 = vld [vmem:[#allocation3 + $0x208] sm:$0xff]   ;;  %v2160_v6 = vld [vmem:[#allocation3 + $0x1d0] sm:$0xff]  }
  0x73   : > { %v1835_v19 = vcombine.low %v456_v57, %v472_v58  ;;  %v875_v45 = vrot.slane %v1834_v38, %v2463_v23  ;;  %v2512_v48 = vrot.slane %v1836_v39, %v2463_v23  ;;  %v405_v52 = vshrl.u32 %v1804_v42, 16  ;;  %v2154_v57 = vld [vmem:[#allocation3 + $0x1c0] sm:$0xff]   ;;  %v2161_v10 = vld [vmem:[#allocation3 + $0x190] sm:$0xff]   ;;  %v2177_v26 = vld [vmem:[#allocation3 + $0x238] sm:$0xff]  }
  0x74   : > { %v1807_v1 = vcombine.low %v472_v58, %v2487_v60  ;;  %v604_v2 = vrot.slane %v1805_v62, %v2463_v23  ;;  %2005 = vmatmul.mubr.bf16.vlgmr.msra.gmra.mrb[0].mxu1 %v628_v63  ;;  %v1833_v29 = vcombine.low %v424_v24, %v440_v54  ;;  %v407_v53 = vshll.u32 %v1804_v42, 16  ;;  %v2156_v54 = vld [vmem:[#allocation3 + $0x200] sm:$0xff]   ;;  %v2174_v21 = vld [vmem:[#allocation3 + $0x230] sm:$0xff]  }
  0x75   : > { %2009 = vmatpush3.bf16.msra.mxu1 %v2131_v61  ;;  %2024 = vmatprep.mubr.msk.bf16.mxu1 %vm2272_vm0, %v2271_v0  ;;  %v2499_v27 = vrot.slane %v1835_v19, %v2463_v23  ;;  %v892_v51 = vcombine.low %v875_v45, %v2512_v48  ;;  %v2155_v63 = vld [vmem:[#allocation3 + $0x180] sm:$0xff]   ;;  %v2169_v19 = vld [vmem:[#allocation3 + $0x1e8] sm:$0xff]   ;;  %v2172_v24 = vld [vmem:[#allocation3 + $0x1f0] sm:$0xff]  }
  0x76   : > { %v618_v4 = vrot.slane %v1807_v1, %v2463_v23  ;;  %2010 = vmatprep.subr.bf16.mxu1 %v2271_v0  ;;  %v868_v31 = vrot.slane %v1833_v29, %v2463_v23  ;;  %v409_v55 = vrot.slane %v407_v53, 1  ;;  %v2157_v1 = vld [vmem:[#allocation3 + $0x1c8] sm:$0xff]   ;;  %v2175_v29 = vld [vmem:[#allocation3 + $0x1f8] sm:$0xff]  }
  0x78   : > { %v627_v8 = vcombine.high %v604_v2, %v618_v4  ;;  %v626_v9 = vcombine.low %v604_v2, %v618_v4  ;;  %v891_v35 = vcombine.high %v868_v31, %v2499_v27  ;;  %v410_v58 = vor.u32 %v409_v55, %v405_v52 }
  0x79   : > { %2011 = vmatpush3.bf16.msra.mxu1 %v2134_v5  ;;  %v890_v61 = vcombine.low %v868_v31, %v2499_v27  ;;  %v2158_v5 = vld [vmem:[#allocation3 + $0x188] sm:$0xff]  }
  0x7a   : > { %808 = vmatprep.mubr.bf16.mxu0 %v627_v8  ;;  %2012 = vmatprep.subr.bf16.mxu1 %v2271_v0  ;;  %v1122_v62 = vcombine.low %v350_v50, %v410_v58  ;;  %v2165_v8 = vld [vmem:[#allocation3 + $0x218] sm:$0xff]  }
  0x7b   : > { %809 = vmatmul.mubr.bf16.vlgmr.msra.gmra.mrb[0].mxu0 %v626_v9 }
  0x7c   : > { %1927 = vmatpush3.bf16.msra.mxu0 %v2130_v7  ;;  %1072 = vmatprep.mubr.bf16.mxu0 %v891_v35  ;;  %v1129_v2 = vrot.slane %v1122_v62, %v2463_v23 }
  0x7d   : > { %1928 = vmatprep.subr.bf16.mxu0 %v2132_v12  ;;  %2013 = vmatpush3.bf16.msra.mxu1 %v2137_v13  ;;  %v416_v12 = vrot.slane %v1804_v42, 1  ;;  %v2164_v13 = vld [vmem:[#allocation3 + $0x198] sm:$0xff]  }
  0x7e   : > { %2014 = vmatprep.subr.bf16.mxu1 %v2271_v0  ;;  %v1861_v4 = vcombine.low %v2487_v60, %v1129_v2  ;;  %v2168_v60 = vld [vmem:[#allocation3 + $0x220] sm:$0xff]  }
  0x80   : > { %1929 = vmatpush3.bf16.msra.mxu0 %v2133_v16  ;;  %v1195_v7 = vrot.slane %v1861_v4, %v2463_v23  ;;  %v1136_v16 = vrot.slane %v416_v12, %v2463_v23 }
  0x81   : > { %1930 = vmatprep.subr.bf16.mxu0 %v2135_v18  ;;  %2015 = vmatpush3.bf16.msra.mxu1 %v2140_v20  ;;  %v2167_v18 = vld [vmem:[#allocation3 + $0x1a0] sm:$0xff]  }
  0x82   : > { %2016 = vmatprep.subr.bf16.mxu1 %v2271_v0  ;;  %v1204_v9 = vcombine.high %v2499_v27, %v1195_v7  ;;  %v1862_v20 = vcombine.low %v2475_v47, %v1136_v16  ;;  %v1203_v31 = vcombine.low %v2499_v27, %v1195_v7 }
  0x84   : > { %1931 = vmatpush3.bf16.msra.mxu0 %v2136_v22  ;;  %v2170_v22 = vld [vmem:[#allocation3 + $0x1a8] sm:$0xff]  }
  0x85   : > { %1932 = vmatprep.subr.bf16.mxu0 %v2138_v25  ;;  %2017 = vmatpush3.bf16.msra.mxu1 %v2143_v28  ;;  %v1202_v25 = vrot.slane %v1862_v20, %v2463_v23  ;;  %v2173_v28 = vld [vmem:[#allocation3 + $0x1b0] sm:$0xff]  }
  0x86   : > { %2018 = vmatprep.subr.bf16.mxu1 %v2271_v0 }
  0x87   : > { %v1205_v47 = vcombine.low %v2512_v48, %v1202_v25  ;;  %v2276_v25 = vmov 1935823168  }
  0x88   : > { %1933 = vmatpush3.bf16.msra.mxu0 %v2139_v30  ;;  %v2176_v30 = vld [vmem:[#allocation3 + $0x1b8] sm:$0xff]  }
  0x89   : > { %1934 = vmatprep.subr.bf16.mxu0 %v2141_v32  ;;  %2019 = vmatpush3.bf16.msra.mxu1 %v2146_v34 }
  0x8a   : > { %2020 = vmatprep.subr.bf16.mxu1 %v2271_v0 }
  0x8c   : > { %1935 = vmatpush3.bf16.msra.mxu0 %v2142_v36 }
  0x8d   : > { %1936 = vmatprep.subr.bf16.mxu0 %v2144_v37  ;;  %2021 = vmatpush3.bf16.msra.mxu1 %v2149_v40 }
  0x8e   : > { %2022 = vmatprep.subr.bf16.mxu1 %v2271_v0 }
  0x90   : > { %1937 = vmatpush3.bf16.msra.mxu0 %v2145_v41 }
  0x91   : > { %1938 = vmatprep.subr.bf16.mxu0 %v2147_v44  ;;  %2023 = vmatpush3.bf16.msra.mxu1 %v2152_v49 }
  0x92   : > { %2028 = vmatprep.subr.bf16.mxu1 %v2271_v0 }
  0x94   : > { %1939 = vmatpush3.bf16.msra.mxu0 %v2148_v43  ;;  %2025 = vmatmul.mubr.bf16.vlgmr.msra.gmra.mrb[4].mxu1 %v892_v51 }
  0x95   : > { %1940 = vmatprep.subr.bf16.mxu0 %v2150_v46  ;;  %2029 = vmatpush3.bf16.msra.mxu1 %v2156_v54 }
  0x96   : > { %2044 = vmatprep.mubr.msk.bf16.mxu1 %vm2272_vm0, %v2271_v0  ;;  %2030 = vmatprep.subr.bf16.mxu1 %v2271_v0 }
  0x98   : > { %1941 = vmatpush3.bf16.msra.mxu0 %v2151_v56 }
  0x99   : > { %1957 = vmatprep.subr.bf16.mxu0 %v2154_v57  ;;  %2031 = vmatpush3.bf16.msra.mxu1 %v2159_v59 }
  0x9a   : > { %2032 = vmatprep.subr.bf16.mxu1 %v2271_v0 }
  0x9b   : > { %1073 = vmatmul.mubr.bf16.vlgmr.msra.gmra.mrb[4].mxu0 %v890_v61 }
  0x9c   : > { %1958 = vmatpush3.bf16.msra.mxu0 %v2155_v63  ;;  %1385 = vmatprep.mubr.bf16.mxu0 %v1204_v9 }
  0x9d   : > { %1959 = vmatprep.subr.bf16.mxu0 %v2157_v1  ;;  %2033 = vmatpush3.bf16.msra.mxu1 %v2162_v3 }
  0x9e   : > { %2034 = vmatprep.subr.bf16.mxu1 %v2271_v0 }
  0xa0   : > { %1960 = vmatpush3.bf16.msra.mxu0 %v2158_v5 }
  0xa1   : > { %1961 = vmatprep.subr.bf16.mxu0 %v2160_v6  ;;  %2035 = vmatpush3.bf16.msra.mxu1 %v2165_v8  ;;  %v1887_v6 = vld [vmem:[#allocation5] ss:$0 sm:$0xff] }
  0xa2   : > { %2036 = vmatprep.subr.bf16.mxu1 %v2271_v0 }
  0xa4   : > { %1962 = vmatpush3.bf16.msra.mxu0 %v2161_v10 }
  0xa5   : > { %1963 = vmatprep.subr.bf16.mxu0 %v2163_v11  ;;  %2037 = vmatpush3.bf16.msra.mxu1 %v2168_v60 }
  0xa6   : > { %2038 = vmatprep.subr.bf16.mxu1 %v2271_v0 }
  0xa8   : > { %1964 = vmatpush3.bf16.msra.mxu0 %v2164_v13  ;;  %v2275_v13 = vmov 1966171168  }
  0xa9   : > { %1965 = vmatprep.subr.bf16.mxu0 %v2166_v14  ;;  %2039 = vmatpush3.bf16.msra.mxu1 %v2171_v17  ;;  %v1529_v14 = vunpack.c.l.s4 %v2275_v13 }
  0xaa   : > { %2040 = vmatprep.subr.bf16.mxu1 %v2271_v0 }
  0xac   : > { %1966 = vmatpush3.bf16.msra.mxu0 %v2167_v18 }
  0xad   : > { %1967 = vmatprep.subr.bf16.mxu0 %v2169_v19  ;;  %2041 = vmatpush3.bf16.msra.mxu1 %v2174_v21 }
  0xae   : > { %2042 = vmatprep.subr.bf16.mxu1 %v2271_v0 }
  0xb0   : > { %1968 = vmatpush3.bf16.msra.mxu0 %v2170_v22 }
  0xb1   : > { %1969 = vmatprep.subr.bf16.mxu0 %v2172_v24  ;;  %2043 = vmatpush3.bf16.msra.mxu1 %v2177_v26  ;;  %v1530_v24 = vunpack.c.0.s8 %v1529_v14  ;;  %v1585_v26 = vunpack.c.l.s4 %v2276_v25 }
  0xb4   : > { %1970 = vmatpush3.bf16.msra.mxu0 %v2173_v28  ;;  %2045 = vmatmul.mubr.bf16.vlgmr.msra.gmra.mrb[8].mxu1 %v1205_v47 }
  0xb5   : > { %1971 = vmatprep.subr.bf16.mxu0 %v2175_v29 }
  0xb8   : > { %1972 = vmatpush3.bf16.msra.mxu0 %v2176_v30 }
  0xbb   : > { %1386 = vmatmul.mubr.bf16.vlgmr.msra.gmra.mrb[8].mxu0 %v1203_v31 }
 0x147   : > { %v851_v32 = vpop.f32.mrb[0].mxu1 }
 0x148   : > { %v2006_v33 = vpop.f32.mrb[1].mxu1 }
 0x149   : > { %v854_v34 = vpop.f32.mrb[2].mxu1 }
 0x14a   : > { %v2007_v35 = vpop.f32.mrb[3].mxu1 }
 0x14e   : > { %v1911_v0 = vpop.f32.mrb[0].mxu0 }
 0x14f   : > { %v1912_v36 = vpop.f32.mrb[1].mxu0 }
 0x150   : > { %v1913_v37 = vadd.f32 %v1912_v36, %v1911_v0  ;;  %v1914_v38 = vpop.f32.mrb[2].mxu0  ;;  %v1533_v0 = vsub.s32 %v1530_v24, %v2460_v15  ;;  %v1586_v36 = vunpack.c.0.s8 %v1585_v26 }
 0x151   : > { %v1915_v39 = vpop.f32.mrb[3].mxu0 }
 0x152   : > { %v852_v40 = vadd.f32 %v1913_v37, %v851_v32  ;;  %v1916_v41 = vadd.f32 %v1915_v39, %v1914_v38 }
 0x154   : > { %v855_v44 = vadd.f32 %v1916_v41, %v854_v34 }
 0x167   : > { %v1115_v45 = vpop.f32.mrb[4].mxu1 }
 0x168   : > { %v2026_v48 = vpop.f32.mrb[5].mxu1 }
 0x169   : > { %v1118_v49 = vpop.f32.mrb[6].mxu1 }
 0x16a   : > { %v2027_v50 = vpop.f32.mrb[7].mxu1 }
 0x16e   : > { %v1942_v42 = vpop.f32.mrb[4].mxu0 }
 0x16f   : > { %v1943_v27 = vpop.f32.mrb[5].mxu0 }
 0x170   : > { %v1944_v43 = vadd.f32 %v1943_v27, %v1942_v42  ;;  %v1945_v46 = vpop.f32.mrb[6].mxu0 }
 0x171   : > { %v1946_v51 = vpop.f32.mrb[7].mxu0 }
 0x172   : > { %v1075_v52 = vadd.f32 %v1944_v43, %v852_v40  ;;  %v1947_v53 = vadd.f32 %v1946_v51, %v1945_v46 }
 0x174   : > { %v1116_v54 = vadd.f32 %v1115_v45, %v1075_v52  ;;  %v1078_v55 = vadd.f32 %v1947_v53, %v855_v44 }
 0x176   : > { %v1119_v56 = vadd.f32 %v1118_v49, %v1078_v55  ;;  %v1589_v49 = vsub.s32 %v1586_v36, %v2460_v15 }
 0x187   : > { %v1428_v57 = vpop.f32.mrb[8].mxu1 }
 0x188   : > { %v2046_v58 = vpop.f32.mrb[9].mxu1 }
 0x189   : > { %v1431_v59 = vpop.f32.mrb[10].mxu1 }
 0x18a   : > { %v2047_v61 = vpop.f32.mrb[11].mxu1 }
 0x18e   : > { %v1973_v62 = vpop.f32.mrb[8].mxu0 }
 0x18f   : > { %v1974_v63 = vpop.f32.mrb[9].mxu0 }
 0x190   : > { %v1975_v1 = vadd.f32 %v1974_v63, %v1973_v62  ;;  %v1976_v2 = vpop.f32.mrb[10].mxu0 }
 0x191   : > { %v1977_v3 = vpop.f32.mrb[11].mxu0 }
 0x192   : > { %v1429_v4 = vadd.f32 %v1975_v1, %v1428_v57  ;;  %v1978_v5 = vadd.f32 %v1977_v3, %v1976_v2 }
 0x194   : > { %v1435_v7 = vadd.f32 %v1429_v4, %v1116_v54  ;;  %v1432_v8 = vadd.f32 %v1978_v5, %v1431_v59 }
 0x196   : > { %v1444_v9 = vadd.f32 %v1887_v6, %v1435_v7  ;;  %v1436_v10 = vadd.f32 %v1432_v8, %v1119_v56 }
 0x198   : > { %vm1446_vm10 = vcmp.gt.f32.partialorder %v1444_v9, 0.0  ;;  %v1448_v11 = vmul.f32 0.01, %v1444_v9  ;;  %v1445_v12 = vadd.f32 %v1887_v6, %v1436_v10 }
 0x19a   : > { %v1450_v60 = vsel %vm1446_vm10, %v1444_v9, %v1448_v11  ;;  %vm1447_vm11 = vcmp.gt.f32.partialorder %v1445_v12, 0.0  ;;  %v1449_v16 = vmul.f32 0.01, %v1445_v12 }
 0x19b   : > { %v1454_v17 = vcombine.high %v1450_v60, %v1450_v60  ;;  %v1461_v18 = vrot.slane %v1450_v60, %v2463_v23 }
 0x19c   : > { %v1451_v19 = vsel %vm1447_vm11, %v1445_v12, %v1449_v16 }
 0x19d   : > { %v1468_v20 = vrot.slane %v1454_v17, %v2463_v23  ;;  %v1471_v21 = vcombine.high %v1451_v19, %v1451_v19  ;;  %v1478_v22 = vrot.slane %v1451_v19, %v2463_v23  ;;  %v1469_v28 = vcombine.high %v1461_v18, %v1461_v18 }
 0x19f   : > { %v1470_v29 = vcombine.high %v1468_v20, %v1468_v20  ;;  %v1496_v47 = vmax.f32 %v1461_v18, %v1468_v20  ;;  %v1485_v30 = vrot.slane %v1471_v21, %v2463_v23  ;;  %v1486_v31 = vcombine.high %v1478_v22, %v1478_v22 }
 0x1a1   : > { %v1497_v32 = vmax.f32 %v1469_v28, %v1470_v29  ;;  %v1888_v33 = vrot.slane %v1496_v47, 9  ;;  %v1487_v34 = vcombine.high %v1485_v30, %v1485_v30  ;;  %v1498_v35 = vmax.f32 %v1478_v22, %v1485_v30 }
 0x1a3   : > { %v1889_v37 = vrot.slane %v1497_v32, 9  ;;  %v1516_v38 = vmax.f32 %v1496_v47, %v1888_v33  ;;  %v1499_v39 = vmax.f32 %v1486_v31, %v1487_v34  ;;  %v1890_v40 = vrot.slane %v1498_v35, 9 }
 0x1a5   : > { %v1517_v41 = vmax.f32 %v1497_v32, %v1889_v37  ;;  %v1520_v44 = vpack.c.bf16 %v1516_v38, %v1516_v38  ;;  %v1891_v45 = vrot.slane %v1499_v39, 9  ;;  %v1518_v48 = vmax.f32 %v1498_v35, %v1890_v40 }
 0x1a7   : > { %v1521_v50 = vpack.c.bf16 %v1517_v41, %v1517_v41  ;;  %v1534_v23 = vrot.slane %v1520_v44, %v1533_v0  ;;  %v1519_v42 = vmax.f32 %v1499_v39, %v1891_v45  ;;  %v1522_v27 = vpack.c.bf16 %v1518_v48, %v1518_v48 }
 0x1a9   : > { %v1541_v43 = vrot.slane %v1534_v23, %v1533_v0  ;;  %v1548_v46 = vrot.slane %v1521_v50, %v1533_v0  ;;  %v1523_v51 = vpack.c.bf16 %v1519_v42, %v1519_v42  ;;  %v1562_v52 = vrot.slane %v1522_v27, %v1533_v0 }
 0x1ab   : > { %v1555_v53 = vrot.slane %v1548_v46, %v1533_v0  ;;  %v1590_v54 = vrot.slane %v1541_v43, %v1589_v49  ;;  %v1569_v55 = vrot.slane %v1562_v52, %v1533_v0  ;;  %v1576_v56 = vrot.slane %v1523_v51, %v1533_v0 }
 0x1ad   : > { %v1604_v57 = vrot.slane %v1555_v53, %v1589_v49  ;;  %v1583_v58 = vrot.slane %v1576_v56, %v1533_v0  ;;  %v1618_v59 = vrot.slane %v1569_v55, %v1589_v49  ;;  %v1597_v61 = vrot.slane %v1590_v54, %v1589_v49 }
 0x1af   : > { %v1611_v62 = vrot.slane %v1604_v57, %v1589_v49  ;;  %v1632_v63 = vrot.slane %v1583_v58, %v1589_v49  ;;  %v1625_v1 = vrot.slane %v1618_v59, %v1589_v49  ;;  %v1640_v3 = vunpack.c.l.b16 %v1597_v61 }
 0x1b1   : > { %v1641_v15 = vunpack.c.l.b16 %v1611_v62  ;;  %v1639_v2 = vrot.slane %v1632_v63, %v1589_v49  ;;  %v1642_v7 = vunpack.c.l.b16 %v1625_v1 }
 0x1b3   : > { %v1644_v4 = vrot.slane %v1641_v15, 7  ;;  %v1643_v5 = vunpack.c.l.b16 %v1639_v2 }
 0x1b5   : > { %v1646_v6 = vsel %vm1645_vm12, %v1644_v4, %v1640_v3  ;;  %v1647_v8 = vrot.slane %v1643_v5, 7 }
 0x1b6   : > { %v1649_v9 = vpack.c.b16 %v1646_v6, %v1646_v6 }
 0x1b7   : > { %v1648_v10 = vsel %vm1645_vm12, %v1647_v8, %v1642_v7 }
 0x1b8   : > { %v1657_v11 = vrot.slane %v1649_v9, %v1533_v0  ;;  %v1650_v12 = vpack.c.b16 %v1648_v10, %v1648_v10 }
 0x1ba   : > { %v1664_v60 = vrot.slane %v1657_v11, %v1533_v0  ;;  %v1671_v13 = vrot.slane %v1650_v12, %v1533_v0 }
 0x1bc   : > { %1682 = vst.msk [vmem:[%s218_s4] sm:$0x1] %vm1681_vm13, %v1664_v60  ;;  %v1678_v14 = vrot.slane %v1671_v13, %v1533_v0 }
 0x1be   : > { %1683 = vst.msk [vmem:[%s218_s4 + $0x1] sm:$0x1] %vm1681_vm13, %v1678_v14 }
 0x1bf PF: > { %s15_s14 = sadd.s32 1, %s2265_s14   ;;  %s2573_s12 = smov %s2261_s13 }
 0x1c0   : > { %p12_p3 = scmp.ge.s32.totalorder %s15_s14, 4   ;;  %s2574_s13 = smov %s2576_s16 }
 0x1c2   :  { %14 = sbr.rel (!%p12_p3) target bundleno = 3 (0x3), region = 80 }
 0x1c9   :  { %1712 = vsyncpa [#allocation4], 1 }
 0x1ca   :  { %1714 = vsyncpa [#allocation4 + $0x1], 1 }
 0x1cb   :  { %1715 = vsyncpa [#allocation6], 1 }

// kernel: _lambda_.7
= control target key start
LH: loop header
LB: loop body
LE: loop exit
PB: predicated region body
PF: predicated region fallthrough
CT: control target
= control target key end

     0   :  { %v8639_v35 = vmov 1966171168   ;;  %v567_v37 = vlaneseq  ;;  %s11359_s0 = inlined_call_operand.vmem [shape: bf16[2,256], index: 0, kind: input, shape index: {}]   ;;  %s11360_s1 = inlined_call_operand.vmem [shape: bf16[256,4096], index: 1, kind: input, shape index: {}]   ;;  %s11361_s2 = inlined_call_operand.vmem [shape: f32[1,4096], index: 2, kind: input, shape index: {}]   ;;  %s11362_s3 = inlined_call_operand.vmem [shape: bf16[4096,128], index: 3, kind: input, shape index: {}]   ;;  %s11363_s4 = inlined_call_operand.vmem [shape: f32[1,128], index: 4, kind: input, shape index: {}]   ;;  %s11364_s5 = inlined_call_operand.hbm [shape: f32[2,128], index: 5, kind: output, shape index: {}]  }
   0x1   :  { %v43_v0 = vld [vmem:[%s11360_s1] sm:$0xff]  ;;  %v44_v2 = vld [vmem:[%s11360_s1 + $0x8] sm:$0xff]  ;;  %v565_v36 = vunpack.c.l.s4 %v8639_v35 }
   0x2   :  { %v59_v1 = vld [vmem:[%s11360_s1 + $0x80] sm:$0xff]  ;;  %v60_v4 = vld [vmem:[%s11360_s1 + $0x88] sm:$0xff]  ;;  %v8745_v47 = vshrl.u32 %v567_v37, 7 }
   0x3   :  { %v7232_v3 = vcombine.high %v43_v0, %v59_v1  ;;  %v7231_v5 = vcombine.low %v43_v0, %v59_v1  ;;  %v75_v6 = vld [vmem:[%s11360_s1 + $0x100] sm:$0xff]  ;;  %v7234_v8 = vcombine.high %v44_v2, %v60_v4  ;;  %v7233_v9 = vcombine.low %v44_v2, %v60_v4  ;;  %v76_v11 = vld [vmem:[%s11360_s1 + $0x108] sm:$0xff] }
   0x4   :  { %v91_v7 = vld [vmem:[%s11360_s1 + $0x180] sm:$0xff]  ;;  %v92_v12 = vld [vmem:[%s11360_s1 + $0x188] sm:$0xff]  ;;  %v566_v46 = vunpack.c.0.s8 %v565_v36 }
   0x5   :  { %v7264_v10 = vcombine.high %v75_v6, %v91_v7  ;;  %v107_v13 = vld [vmem:[%s11360_s1 + $0x200] sm:$0xff]  ;;  %3140 = vmatprep.subr.bf16.mxu0 %v7232_v3  ;;  %v7266_v14 = vcombine.high %v76_v11, %v92_v12  ;;  %v108_v16 = vld [vmem:[%s11360_s1 + $0x208] sm:$0xff]  ;;  %3181 = vmatprep.subr.bf16.mxu1 %v7234_v8  ;;  %v7263_v18 = vcombine.low %v75_v6, %v91_v7 }
   0x6   :  { %v123_v15 = vld [vmem:[%s11360_s1 + $0x280] sm:$0xff]  ;;  %v124_v17 = vld [vmem:[%s11360_s1 + $0x288] sm:$0xff]  ;;  %3141 = vmatpush1.bf16.msra.mxu0 %v7231_v5  ;;  %3182 = vmatpush1.bf16.msra.mxu1 %v7233_v9  ;;  %v7265_v19 = vcombine.low %v76_v11, %v92_v12  ;;  %v8760_v56 = vsub.s32 %v566_v46, %v8745_v47 }
   0x7   :  { %3142 = vmatprep.subr.bf16.mxu0 %v7264_v10  ;;  %v7296_v20 = vcombine.high %v107_v13, %v123_v15  ;;  %3183 = vmatprep.subr.bf16.mxu1 %v7266_v14  ;;  %v7298_v21 = vcombine.high %v108_v16, %v124_v17  ;;  %v139_v22 = vld [vmem:[%s11360_s1 + $0x300] sm:$0xff]  ;;  %v140_v24 = vld [vmem:[%s11360_s1 + $0x308] sm:$0xff]  ;;  %v7295_v26 = vcombine.low %v107_v13, %v123_v15 }
   0x8   :  { %v155_v23 = vld [vmem:[%s11360_s1 + $0x380] sm:$0xff]  ;;  %v156_v25 = vld [vmem:[%s11360_s1 + $0x388] sm:$0xff]  ;;  %v7297_v27 = vcombine.low %v108_v16, %v124_v17 }
   0x9   :  { %v7328_v28 = vcombine.high %v139_v22, %v155_v23  ;;  %v7330_v29 = vcombine.high %v140_v24, %v156_v25  ;;  %v171_v30 = vld [vmem:[%s11360_s1 + $0x400] sm:$0xff]  ;;  %v172_v32 = vld [vmem:[%s11360_s1 + $0x408] sm:$0xff]  ;;  %v7327_v34 = vcombine.low %v139_v22, %v155_v23  ;;  %v7329_v38 = vcombine.low %v140_v24, %v156_v25 }
   0xa   :  { %3143 = vmatpush1.bf16.msra.mxu0 %v7263_v18  ;;  %3184 = vmatpush1.bf16.msra.mxu1 %v7265_v19  ;;  %v187_v31 = vld [vmem:[%s11360_s1 + $0x480] sm:$0xff]  ;;  %v188_v33 = vld [vmem:[%s11360_s1 + $0x488] sm:$0xff] }
   0xb   :  { %3144 = vmatprep.subr.bf16.mxu0 %v7296_v20  ;;  %3185 = vmatprep.subr.bf16.mxu1 %v7298_v21  ;;  %v7360_v39 = vcombine.high %v171_v30, %v187_v31  ;;  %v7362_v40 = vcombine.high %v172_v32, %v188_v33  ;;  %v203_v41 = vld [vmem:[%s11360_s1 + $0x500] sm:$0xff]  ;;  %v204_v43 = vld [vmem:[%s11360_s1 + $0x508] sm:$0xff]  ;;  %v7359_v45 = vcombine.low %v171_v30, %v187_v31 }
   0xc   :  { %v219_v42 = vld [vmem:[%s11360_s1 + $0x580] sm:$0xff]  ;;  %v220_v44 = vld [vmem:[%s11360_s1 + $0x588] sm:$0xff]  ;;  %v7361_v48 = vcombine.low %v172_v32, %v188_v33 }
   0xd   :  { %v7392_v49 = vcombine.high %v203_v41, %v219_v42  ;;  %v7394_v50 = vcombine.high %v204_v43, %v220_v44  ;;  %v235_v51 = vld [vmem:[%s11360_s1 + $0x600] sm:$0xff]  ;;  %v236_v53 = vld [vmem:[%s11360_s1 + $0x608] sm:$0xff]  ;;  %v7391_v55 = vcombine.low %v203_v41, %v219_v42  ;;  %v7393_v57 = vcombine.low %v204_v43, %v220_v44 }
   0xe   :  { %3145 = vmatpush1.bf16.msra.mxu0 %v7295_v26  ;;  %3186 = vmatpush1.bf16.msra.mxu1 %v7297_v27  ;;  %v251_v52 = vld [vmem:[%s11360_s1 + $0x680] sm:$0xff]  ;;  %v252_v54 = vld [vmem:[%s11360_s1 + $0x688] sm:$0xff] }
   0xf   :  { %3146 = vmatprep.subr.bf16.mxu0 %v7328_v28  ;;  %3187 = vmatprep.subr.bf16.mxu1 %v7330_v29  ;;  %v7424_v58 = vcombine.high %v235_v51, %v251_v52  ;;  %v8765_v59 = vld.sshfl [vmem:[%s11359_s0] sm:$0x11 pattern:$0x75316420]  ;;  %v7426_v60 = vcombine.high %v236_v53, %v252_v54  ;;  %v268_v0 = vld [vmem:[%s11360_s1 + $0x708] sm:$0xff]  ;;  %v7423_v2 = vcombine.low %v235_v51, %v251_v52 }
  0x10   :  { %v267_v61 = vld [vmem:[%s11360_s1 + $0x700] sm:$0xff]  ;;  %v563_v63 = vcombine.high %v8765_v59, %v8765_v59  ;;  %v284_v1 = vld [vmem:[%s11360_s1 + $0x788] sm:$0xff]  ;;  %v7425_v4 = vcombine.low %v236_v53, %v252_v54 }
  0x11   :  { %v283_v62 = vld [vmem:[%s11360_s1 + $0x780] sm:$0xff]  ;;  %v7458_v6 = vcombine.high %v268_v0, %v284_v1  ;;  %v300_v9 = vld [vmem:[%s11360_s1 + $0x808] sm:$0xff]  ;;  %v7457_v12 = vcombine.low %v268_v0, %v284_v1 }
  0x12   :  { %3147 = vmatpush1.bf16.msra.mxu0 %v7327_v34  ;;  %3188 = vmatpush1.bf16.msra.mxu1 %v7329_v38  ;;  %v8782_v3 = vrot.slane %v563_v63, %v8760_v56  ;;  %v7456_v5 = vcombine.high %v267_v61, %v283_v62  ;;  %v299_v7 = vld [vmem:[%s11360_s1 + $0x800] sm:$0xff]  ;;  %v316_v10 = vld [vmem:[%s11360_s1 + $0x888] sm:$0xff]  ;;  %v7455_v11 = vcombine.low %v267_v61, %v283_v62 }
  0x13   :  { %3148 = vmatprep.subr.bf16.mxu0 %v7360_v39  ;;  %3189 = vmatprep.subr.bf16.mxu1 %v7362_v40  ;;  %v315_v8 = vld [vmem:[%s11360_s1 + $0x880] sm:$0xff]  ;;  %v7490_v14 = vcombine.high %v300_v9, %v316_v10  ;;  %v332_v17 = vld [vmem:[%s11360_s1 + $0x908] sm:$0xff]  ;;  %v7489_v20 = vcombine.low %v300_v9, %v316_v10 }
  0x14   :  { %3172 = vmatprep.mubr.bf16.mxu0 %v8782_v3  ;;  %3213 = vmatprep.mubr.bf16.mxu1 %v8782_v3  ;;  %v7488_v13 = vcombine.high %v299_v7, %v315_v8  ;;  %v331_v15 = vld [vmem:[%s11360_s1 + $0x900] sm:$0xff]  ;;  %v348_v18 = vld [vmem:[%s11360_s1 + $0x988] sm:$0xff]  ;;  %v7487_v19 = vcombine.low %v299_v7, %v315_v8 }
  0x15   :  { %v347_v16 = vld [vmem:[%s11360_s1 + $0x980] sm:$0xff]  ;;  %v7522_v22 = vcombine.high %v332_v17, %v348_v18  ;;  %v364_v25 = vld [vmem:[%s11360_s1 + $0xa08] sm:$0xff]  ;;  %v7521_v28 = vcombine.low %v332_v17, %v348_v18 }
  0x16   :  { %3149 = vmatpush1.bf16.msra.mxu0 %v7359_v45  ;;  %3190 = vmatpush1.bf16.msra.mxu1 %v7361_v48  ;;  %v7520_v21 = vcombine.high %v331_v15, %v347_v16  ;;  %v363_v23 = vld [vmem:[%s11360_s1 + $0xa00] sm:$0xff]  ;;  %v380_v26 = vld [vmem:[%s11360_s1 + $0xa88] sm:$0xff]  ;;  %v7519_v27 = vcombine.low %v331_v15, %v347_v16  ;;  %v62_v15 = vld [vmem:[%s11360_s1 + $0x98] sm:$0xff] }
  0x17   :  { %3150 = vmatprep.subr.bf16.mxu0 %v7392_v49  ;;  %3191 = vmatprep.subr.bf16.mxu1 %v7394_v50  ;;  %v379_v24 = vld [vmem:[%s11360_s1 + $0xa80] sm:$0xff]  ;;  %v7554_v30 = vcombine.high %v364_v25, %v380_v26  ;;  %v396_v33 = vld [vmem:[%s11360_s1 + $0xb08] sm:$0xff]  ;;  %v7553_v36 = vcombine.low %v364_v25, %v380_v26 }
  0x18   :  { %v7552_v29 = vcombine.high %v363_v23, %v379_v24  ;;  %v395_v31 = vld [vmem:[%s11360_s1 + $0xb00] sm:$0xff]  ;;  %v412_v34 = vld [vmem:[%s11360_s1 + $0xb88] sm:$0xff]  ;;  %v7551_v35 = vcombine.low %v363_v23, %v379_v24  ;;  %v78_v23 = vld [vmem:[%s11360_s1 + $0x118] sm:$0xff] }
  0x19   :  { %v411_v32 = vld [vmem:[%s11360_s1 + $0xb80] sm:$0xff]  ;;  %v7586_v39 = vcombine.high %v396_v33, %v412_v34  ;;  %v428_v42 = vld [vmem:[%s11360_s1 + $0xc08] sm:$0xff]  ;;  %v7585_v45 = vcombine.low %v396_v33, %v412_v34  ;;  %v94_v24 = vld [vmem:[%s11360_s1 + $0x198] sm:$0xff] }
  0x1a   :  { %3151 = vmatpush1.bf16.msra.mxu0 %v7391_v55  ;;  %3192 = vmatpush1.bf16.msra.mxu1 %v7393_v57  ;;  %v7584_v38 = vcombine.high %v395_v31, %v411_v32  ;;  %v427_v40 = vld [vmem:[%s11360_s1 + $0xc00] sm:$0xff]  ;;  %v444_v43 = vld [vmem:[%s11360_s1 + $0xc88] sm:$0xff]  ;;  %v7583_v44 = vcombine.low %v395_v31, %v411_v32  ;;  %v7269_v32 = vcombine.low %v78_v23, %v94_v24  ;;  %v141_v34 = vld [vmem:[%s11360_s1 + $0x310] sm:$0xff] }
  0x1b   :  { %3152 = vmatprep.subr.bf16.mxu0 %v7424_v58  ;;  %3193 = vmatprep.subr.bf16.mxu1 %v7426_v60  ;;  %v443_v41 = vld [vmem:[%s11360_s1 + $0xc80] sm:$0xff]  ;;  %v7618_v48 = vcombine.high %v428_v42, %v444_v43  ;;  %v460_v51 = vld [vmem:[%s11360_s1 + $0xd08] sm:$0xff]  ;;  %v7617_v54 = vcombine.low %v428_v42, %v444_v43  ;;  %v173_v43 = vld [vmem:[%s11360_s1 + $0x410] sm:$0xff] }
  0x1c   :  { %v7616_v46 = vcombine.high %v427_v40, %v443_v41  ;;  %v459_v49 = vld [vmem:[%s11360_s1 + $0xd00] sm:$0xff]  ;;  %v476_v52 = vld [vmem:[%s11360_s1 + $0xd88] sm:$0xff]  ;;  %v7615_v53 = vcombine.low %v427_v40, %v443_v41 }
  0x1d   :  { %v475_v50 = vld [vmem:[%s11360_s1 + $0xd80] sm:$0xff]  ;;  %v7650_v57 = vcombine.high %v460_v51, %v476_v52  ;;  %v492_v61 = vld [vmem:[%s11360_s1 + $0xe08] sm:$0xff]  ;;  %v7649_v0 = vcombine.low %v460_v51, %v476_v52  ;;  %v205_v52 = vld [vmem:[%s11360_s1 + $0x510] sm:$0xff] }
  0x1e   :  { %3153 = vmatpush1.bf16.msra.mxu0 %v7423_v2  ;;  %3194 = vmatpush1.bf16.msra.mxu1 %v7425_v4  ;;  %v7648_v55 = vcombine.high %v459_v49, %v475_v50  ;;  %v491_v58 = vld [vmem:[%s11360_s1 + $0xe00] sm:$0xff]  ;;  %v508_v62 = vld [vmem:[%s11360_s1 + $0xe88] sm:$0xff]  ;;  %v7647_v63 = vcombine.low %v459_v49, %v475_v50 }
  0x1f   :  { %3154 = vmatprep.subr.bf16.mxu0 %v7456_v5  ;;  %3195 = vmatprep.subr.bf16.mxu1 %v7458_v6  ;;  %v507_v60 = vld [vmem:[%s11360_s1 + $0xe80] sm:$0xff]  ;;  %v7682_v2 = vcombine.high %v492_v61, %v508_v62  ;;  %v524_v6 = vld [vmem:[%s11360_s1 + $0xf08] sm:$0xff]  ;;  %v7681_v9 = vcombine.low %v492_v61, %v508_v62  ;;  %v237_v62 = vld [vmem:[%s11360_s1 + $0x610] sm:$0xff] }
  0x20   :  { %v7680_v1 = vcombine.high %v491_v58, %v507_v60  ;;  %v523_v4 = vld [vmem:[%s11360_s1 + $0xf00] sm:$0xff]  ;;  %v540_v7 = vld [vmem:[%s11360_s1 + $0xf88] sm:$0xff]  ;;  %v7679_v8 = vcombine.low %v491_v58, %v507_v60 }
  0x21   :  { %v539_v5 = vld [vmem:[%s11360_s1 + $0xf80] sm:$0xff]  ;;  %v7713_v17 = vcombine.low %v524_v6, %v540_v7 }
  0x22   :  { %3155 = vmatpush1.bf16.msra.mxu0 %v7455_v11  ;;  %3196 = vmatpush1.bf16.msra.mxu1 %v7457_v12  ;;  %v7712_v10 = vcombine.high %v523_v4, %v539_v5  ;;  %v7714_v11 = vcombine.high %v524_v6, %v540_v7  ;;  %v45_v12 = vld [vmem:[%s11360_s1 + $0x10] sm:$0xff]  ;;  %v7711_v16 = vcombine.low %v523_v4, %v539_v5 }
  0x23   :  { %3156 = vmatprep.subr.bf16.mxu0 %v7488_v13  ;;  %3197 = vmatprep.subr.bf16.mxu1 %v7490_v14  ;;  %v61_v13 = vld [vmem:[%s11360_s1 + $0x90] sm:$0xff]  ;;  %v46_v14 = vld [vmem:[%s11360_s1 + $0x18] sm:$0xff] }
  0x24   :  { %v7236_v18 = vcombine.high %v45_v12, %v61_v13  ;;  %v7235_v25 = vcombine.low %v45_v12, %v61_v13  ;;  %v7237_v26 = vcombine.low %v46_v14, %v62_v15  ;;  %v269_v7 = vld [vmem:[%s11360_s1 + $0x710] sm:$0xff] }
  0x26   :  { %3157 = vmatpush1.bf16.msra.mxu0 %v7487_v19  ;;  %3198 = vmatpush1.bf16.msra.mxu1 %v7489_v20  ;;  %v7238_v19 = vcombine.high %v46_v14, %v62_v15  ;;  %v77_v20 = vld [vmem:[%s11360_s1 + $0x110] sm:$0xff] }
  0x27   :  { %3158 = vmatprep.subr.bf16.mxu0 %v7520_v21  ;;  %3199 = vmatprep.subr.bf16.mxu1 %v7522_v22  ;;  %v93_v21 = vld [vmem:[%s11360_s1 + $0x190] sm:$0xff]  ;;  %v8902_v22 = vrot.slane %v8765_v59, %v8760_v56  ;;  %v110_v59 = vld [vmem:[%s11360_s1 + $0x218] sm:$0xff] }
  0x28   :  { %v125_v56 = vld [vmem:[%s11360_s1 + $0x290] sm:$0xff]  ;;  %v7267_v31 = vcombine.low %v77_v20, %v93_v21 }
  0x29   :  { %v301_v15 = vld [vmem:[%s11360_s1 + $0x810] sm:$0xff] }
  0x2a   :  { %3159 = vmatpush1.bf16.msra.mxu0 %v7519_v27  ;;  %3200 = vmatpush1.bf16.msra.mxu1 %v7521_v28  ;;  %v7268_v27 = vcombine.high %v77_v20, %v93_v21  ;;  %v109_v28 = vld [vmem:[%s11360_s1 + $0x210] sm:$0xff] }
  0x2b   :  { %3160 = vmatprep.subr.bf16.mxu0 %v7552_v29  ;;  %3201 = vmatprep.subr.bf16.mxu1 %v7554_v30  ;;  %v7270_v29 = vcombine.high %v78_v23, %v94_v24  ;;  %v126_v30 = vld [vmem:[%s11360_s1 + $0x298] sm:$0xff]  ;;  %v7300_v33 = vcombine.high %v109_v28, %v125_v56  ;;  %v7299_v40 = vcombine.low %v109_v28, %v125_v56  ;;  %v333_v24 = vld [vmem:[%s11360_s1 + $0x910] sm:$0xff] }
  0x2c   :  { %v7301_v41 = vcombine.low %v110_v59, %v126_v30  ;;  %v350_v28 = vld [vmem:[%s11360_s1 + $0x998] sm:$0xff] }
  0x2e   :  { %3161 = vmatpush1.bf16.msra.mxu0 %v7551_v35  ;;  %3202 = vmatpush1.bf16.msra.mxu1 %v7553_v36  ;;  %v157_v35 = vld [vmem:[%s11360_s1 + $0x390] sm:$0xff]  ;;  %v142_v36 = vld [vmem:[%s11360_s1 + $0x318] sm:$0xff] }
  0x2f   :  { %3162 = vmatprep.subr.bf16.mxu0 %v7584_v38  ;;  %3203 = vmatprep.subr.bf16.mxu1 %v7586_v39  ;;  %v7302_v38 = vcombine.high %v110_v59, %v126_v30  ;;  %v158_v39 = vld [vmem:[%s11360_s1 + $0x398] sm:$0xff]  ;;  %v7332_v42 = vcombine.high %v141_v34, %v157_v35  ;;  %v7331_v49 = vcombine.low %v141_v34, %v157_v35  ;;  %v365_v30 = vld [vmem:[%s11360_s1 + $0xa10] sm:$0xff] }
  0x30   :  { %v7333_v50 = vcombine.low %v142_v36, %v158_v39  ;;  %v382_v34 = vld [vmem:[%s11360_s1 + $0xa98] sm:$0xff] }
  0x32   :  { %3163 = vmatpush1.bf16.msra.mxu0 %v7583_v44  ;;  %3204 = vmatpush1.bf16.msra.mxu1 %v7585_v45  ;;  %v189_v44 = vld [vmem:[%s11360_s1 + $0x490] sm:$0xff]  ;;  %v174_v45 = vld [vmem:[%s11360_s1 + $0x418] sm:$0xff] }
  0x33   :  { %3164 = vmatprep.subr.bf16.mxu0 %v7616_v46  ;;  %3205 = vmatprep.subr.bf16.mxu1 %v7618_v48  ;;  %v7334_v46 = vcombine.high %v142_v36, %v158_v39  ;;  %v190_v48 = vld [vmem:[%s11360_s1 + $0x498] sm:$0xff]  ;;  %v7364_v51 = vcombine.high %v173_v43, %v189_v44  ;;  %v7363_v58 = vcombine.low %v173_v43, %v189_v44  ;;  %v397_v39 = vld [vmem:[%s11360_s1 + $0xb10] sm:$0xff] }
  0x34   :  { %v7365_v60 = vcombine.low %v174_v45, %v190_v48  ;;  %v414_v43 = vld [vmem:[%s11360_s1 + $0xb98] sm:$0xff] }
  0x36   :  { %3165 = vmatpush1.bf16.msra.mxu0 %v7615_v53  ;;  %3206 = vmatpush1.bf16.msra.mxu1 %v7617_v54  ;;  %v221_v53 = vld [vmem:[%s11360_s1 + $0x590] sm:$0xff]  ;;  %v206_v54 = vld [vmem:[%s11360_s1 + $0x518] sm:$0xff] }
  0x37   :  { %3166 = vmatprep.subr.bf16.mxu0 %v7648_v55  ;;  %3207 = vmatprep.subr.bf16.mxu1 %v7650_v57  ;;  %v7366_v55 = vcombine.high %v174_v45, %v190_v48  ;;  %v222_v57 = vld [vmem:[%s11360_s1 + $0x598] sm:$0xff]  ;;  %v7396_v61 = vcombine.high %v205_v52, %v221_v53  ;;  %v7395_v4 = vcombine.low %v205_v52, %v221_v53  ;;  %v429_v48 = vld [vmem:[%s11360_s1 + $0xc10] sm:$0xff] }
  0x38   :  { %v7397_v5 = vcombine.low %v206_v54, %v222_v57  ;;  %v446_v52 = vld [vmem:[%s11360_s1 + $0xc98] sm:$0xff] }
  0x3a   :  { %3167 = vmatpush1.bf16.msra.mxu0 %v7647_v63  ;;  %3208 = vmatpush1.bf16.msra.mxu1 %v7649_v0  ;;  %v253_v63 = vld [vmem:[%s11360_s1 + $0x690] sm:$0xff]  ;;  %v238_v0 = vld [vmem:[%s11360_s1 + $0x618] sm:$0xff] }
  0x3b   :  { %3168 = vmatprep.subr.bf16.mxu0 %v7680_v1  ;;  %3209 = vmatprep.subr.bf16.mxu1 %v7682_v2  ;;  %v7398_v1 = vcombine.high %v206_v54, %v222_v57  ;;  %v254_v2 = vld [vmem:[%s11360_s1 + $0x698] sm:$0xff]  ;;  %v7428_v6 = vcombine.high %v237_v62, %v253_v63  ;;  %v7427_v12 = vcombine.low %v237_v62, %v253_v63  ;;  %v461_v57 = vld [vmem:[%s11360_s1 + $0xd10] sm:$0xff] }
  0x3c   :  { %v7429_v13 = vcombine.low %v238_v0, %v254_v2  ;;  %v478_v62 = vld [vmem:[%s11360_s1 + $0xd98] sm:$0xff] }
  0x3e   :  { %3169 = vmatpush1.bf16.msra.mxu0 %v7679_v8  ;;  %3210 = vmatpush1.bf16.msra.mxu1 %v7681_v9  ;;  %v285_v8 = vld [vmem:[%s11360_s1 + $0x790] sm:$0xff]  ;;  %v270_v9 = vld [vmem:[%s11360_s1 + $0x718] sm:$0xff] }
  0x3f   :  { %3170 = vmatprep.subr.bf16.mxu0 %v7712_v10  ;;  %3211 = vmatprep.subr.bf16.mxu1 %v7714_v11  ;;  %v7430_v10 = vcombine.high %v238_v0, %v254_v2  ;;  %v286_v11 = vld [vmem:[%s11360_s1 + $0x798] sm:$0xff]  ;;  %v7460_v14 = vcombine.high %v269_v7, %v285_v8  ;;  %v7459_v20 = vcombine.low %v269_v7, %v285_v8  ;;  %v493_v2 = vld [vmem:[%s11360_s1 + $0xe10] sm:$0xff] }
  0x40   :  { %v7461_v21 = vcombine.low %v270_v9, %v286_v11  ;;  %v510_v7 = vld [vmem:[%s11360_s1 + $0xe98] sm:$0xff] }
  0x42   :  { %3171 = vmatpush1.bf16.msra.mxu0 %v7711_v16  ;;  %3212 = vmatpush1.bf16.msra.mxu1 %v7713_v17  ;;  %v317_v16 = vld [vmem:[%s11360_s1 + $0x890] sm:$0xff]  ;;  %v302_v17 = vld [vmem:[%s11360_s1 + $0x818] sm:$0xff] }
  0x43   :  { %3222 = vmatprep.subr.bf16.mxu0 %v7236_v18  ;;  %3263 = vmatprep.subr.bf16.mxu1 %v7238_v19  ;;  %v7462_v18 = vcombine.high %v270_v9, %v286_v11  ;;  %v318_v19 = vld [vmem:[%s11360_s1 + $0x898] sm:$0xff]  ;;  %v7492_v23 = vcombine.high %v301_v15, %v317_v16  ;;  %v7491_v56 = vcombine.low %v301_v15, %v317_v16  ;;  %v525_v11 = vld [vmem:[%s11360_s1 + $0xf10] sm:$0xff] }
  0x44   :  { %v7493_v59 = vcombine.low %v302_v17, %v318_v19  ;;  %v542_v15 = vld [vmem:[%s11360_s1 + $0xf98] sm:$0xff] }
  0x45   :  { %3173 = vmatmul.mubr.bf16.vlgmr.msra.gmra.mrb[0].mxu0 %v8902_v22  ;;  %3214 = vmatmul.mubr.bf16.vlgmr.msra.gmra.mrb[0].mxu1 %v8902_v22 }
  0x46   :  { %3223 = vmatpush1.bf16.msra.mxu0 %v7235_v25  ;;  %3264 = vmatpush1.bf16.msra.mxu1 %v7237_v26  ;;  %v349_v25 = vld [vmem:[%s11360_s1 + $0x990] sm:$0xff]  ;;  %v334_v26 = vld [vmem:[%s11360_s1 + $0x918] sm:$0xff] }
  0x47   :  { %3224 = vmatprep.subr.bf16.mxu0 %v7268_v27  ;;  %3265 = vmatprep.subr.bf16.mxu1 %v7270_v29  ;;  %v7494_v27 = vcombine.high %v302_v17, %v318_v19  ;;  %v7524_v29 = vcombine.high %v333_v24, %v349_v25  ;;  %v7523_v35 = vcombine.low %v333_v24, %v349_v25  ;;  %v47_v19 = vld [vmem:[%s11360_s1 + $0x20] sm:$0xff]  ;;  %v64_v24 = vld [vmem:[%s11360_s1 + $0xa8] sm:$0xff] }
  0x48   :  { %3254 = vmatprep.mubr.bf16.mxu0 %v8782_v3  ;;  %3295 = vmatprep.mubr.bf16.mxu1 %v8782_v3  ;;  %v7525_v36 = vcombine.low %v334_v26, %v350_v28 }
  0x4a   :  { %3225 = vmatpush1.bf16.msra.mxu0 %v7267_v31  ;;  %3266 = vmatpush1.bf16.msra.mxu1 %v7269_v32  ;;  %v381_v31 = vld [vmem:[%s11360_s1 + $0xa90] sm:$0xff]  ;;  %v366_v32 = vld [vmem:[%s11360_s1 + $0xa18] sm:$0xff] }
  0x4b   :  { %3226 = vmatprep.subr.bf16.mxu0 %v7300_v33  ;;  %3267 = vmatprep.subr.bf16.mxu1 %v7302_v38  ;;  %v7526_v33 = vcombine.high %v334_v26, %v350_v28  ;;  %v7556_v38 = vcombine.high %v365_v30, %v381_v31  ;;  %v7555_v44 = vcombine.low %v365_v30, %v381_v31  ;;  %v79_v28 = vld [vmem:[%s11360_s1 + $0x120] sm:$0xff]  ;;  %v96_v30 = vld [vmem:[%s11360_s1 + $0x1a8] sm:$0xff] }
  0x4c   :  { %v7557_v45 = vcombine.low %v366_v32, %v382_v34 }
  0x4e   :  { %3227 = vmatpush1.bf16.msra.mxu0 %v7299_v40  ;;  %3268 = vmatpush1.bf16.msra.mxu1 %v7301_v41  ;;  %v413_v40 = vld [vmem:[%s11360_s1 + $0xb90] sm:$0xff]  ;;  %v398_v41 = vld [vmem:[%s11360_s1 + $0xb18] sm:$0xff] }
  0x4f   :  { %3228 = vmatprep.subr.bf16.mxu0 %v7332_v42  ;;  %3269 = vmatprep.subr.bf16.mxu1 %v7334_v46  ;;  %v7558_v42 = vcombine.high %v366_v32, %v382_v34  ;;  %v7588_v46 = vcombine.high %v397_v39, %v413_v40  ;;  %v7587_v53 = vcombine.low %v397_v39, %v413_v40  ;;  %v111_v34 = vld [vmem:[%s11360_s1 + $0x220] sm:$0xff]  ;;  %v128_v39 = vld [vmem:[%s11360_s1 + $0x2a8] sm:$0xff] }
  0x50   :  { %v7589_v54 = vcombine.low %v398_v41, %v414_v43 }
  0x52   :  { %3229 = vmatpush1.bf16.msra.mxu0 %v7331_v49  ;;  %3270 = vmatpush1.bf16.msra.mxu1 %v7333_v50  ;;  %v445_v49 = vld [vmem:[%s11360_s1 + $0xc90] sm:$0xff]  ;;  %v430_v50 = vld [vmem:[%s11360_s1 + $0xc18] sm:$0xff] }
  0x53   :  { %3230 = vmatprep.subr.bf16.mxu0 %v7364_v51  ;;  %3271 = vmatprep.subr.bf16.mxu1 %v7366_v55  ;;  %v7590_v51 = vcombine.high %v398_v41, %v414_v43  ;;  %v7620_v55 = vcombine.high %v429_v48, %v445_v49  ;;  %v7619_v63 = vcombine.low %v429_v48, %v445_v49  ;;  %v143_v43 = vld [vmem:[%s11360_s1 + $0x320] sm:$0xff]  ;;  %v160_v48 = vld [vmem:[%s11360_s1 + $0x3a8] sm:$0xff] }
  0x54   :  { %v7621_v0 = vcombine.low %v430_v50, %v446_v52 }
  0x56   :  { %3231 = vmatpush1.bf16.msra.mxu0 %v7363_v58  ;;  %3272 = vmatpush1.bf16.msra.mxu1 %v7365_v60  ;;  %v477_v58 = vld [vmem:[%s11360_s1 + $0xd90] sm:$0xff]  ;;  %v462_v60 = vld [vmem:[%s11360_s1 + $0xd18] sm:$0xff] }
  0x57   :  { %3232 = vmatprep.subr.bf16.mxu0 %v7396_v61  ;;  %3273 = vmatprep.subr.bf16.mxu1 %v7398_v1  ;;  %v7622_v61 = vcombine.high %v430_v50, %v446_v52  ;;  %v7652_v1 = vcombine.high %v461_v57, %v477_v58  ;;  %v7651_v8 = vcombine.low %v461_v57, %v477_v58  ;;  %v175_v52 = vld [vmem:[%s11360_s1 + $0x420] sm:$0xff]  ;;  %v192_v57 = vld [vmem:[%s11360_s1 + $0x4a8] sm:$0xff] }
  0x58   :  { %v7653_v9 = vcombine.low %v462_v60, %v478_v62 }
  0x5a   :  { %3233 = vmatpush1.bf16.msra.mxu0 %v7395_v4  ;;  %3274 = vmatpush1.bf16.msra.mxu1 %v7397_v5  ;;  %v509_v4 = vld [vmem:[%s11360_s1 + $0xe90] sm:$0xff]  ;;  %v494_v5 = vld [vmem:[%s11360_s1 + $0xe18] sm:$0xff] }
  0x5b   :  { %3234 = vmatprep.subr.bf16.mxu0 %v7428_v6  ;;  %3275 = vmatprep.subr.bf16.mxu1 %v7430_v10  ;;  %v7654_v6 = vcombine.high %v462_v60, %v478_v62  ;;  %v7684_v10 = vcombine.high %v493_v2, %v509_v4  ;;  %v7683_v16 = vcombine.low %v493_v2, %v509_v4  ;;  %v207_v62 = vld [vmem:[%s11360_s1 + $0x520] sm:$0xff]  ;;  %v224_v2 = vld [vmem:[%s11360_s1 + $0x5a8] sm:$0xff] }
  0x5c   :  { %v7685_v17 = vcombine.low %v494_v5, %v510_v7 }
  0x5e   :  { %3235 = vmatpush1.bf16.msra.mxu0 %v7427_v12  ;;  %3276 = vmatpush1.bf16.msra.mxu1 %v7429_v13  ;;  %v541_v12 = vld [vmem:[%s11360_s1 + $0xf90] sm:$0xff]  ;;  %v526_v13 = vld [vmem:[%s11360_s1 + $0xf18] sm:$0xff] }
  0x5f   :  { %3236 = vmatprep.subr.bf16.mxu0 %v7460_v14  ;;  %3277 = vmatprep.subr.bf16.mxu1 %v7462_v18  ;;  %v7686_v14 = vcombine.high %v494_v5, %v510_v7  ;;  %v7716_v18 = vcombine.high %v525_v11, %v541_v12  ;;  %v7715_v25 = vcombine.low %v525_v11, %v541_v12  ;;  %v239_v7 = vld [vmem:[%s11360_s1 + $0x620] sm:$0xff]  ;;  %v256_v11 = vld [vmem:[%s11360_s1 + $0x6a8] sm:$0xff] }
  0x60   :  { %v7717_v26 = vcombine.low %v526_v13, %v542_v15 }
  0x62   :  { %3237 = vmatpush1.bf16.msra.mxu0 %v7459_v20  ;;  %3278 = vmatpush1.bf16.msra.mxu1 %v7461_v21  ;;  %v63_v20 = vld [vmem:[%s11360_s1 + $0xa0] sm:$0xff]  ;;  %v48_v21 = vld [vmem:[%s11360_s1 + $0x28] sm:$0xff] }
  0x63   :  { %3238 = vmatprep.subr.bf16.mxu0 %v7492_v23  ;;  %3279 = vmatprep.subr.bf16.mxu1 %v7494_v27  ;;  %v7718_v23 = vcombine.high %v526_v13, %v542_v15  ;;  %v7240_v27 = vcombine.high %v47_v19, %v63_v20  ;;  %v7239_v31 = vcombine.low %v47_v19, %v63_v20  ;;  %v271_v15 = vld [vmem:[%s11360_s1 + $0x720] sm:$0xff]  ;;  %v288_v19 = vld [vmem:[%s11360_s1 + $0x7a8] sm:$0xff] }
  0x64   :  { %v7241_v32 = vcombine.low %v48_v21, %v64_v24 }
  0x66   :  { %3239 = vmatpush1.bf16.msra.mxu0 %v7491_v56  ;;  %3280 = vmatpush1.bf16.msra.mxu1 %v7493_v59  ;;  %v95_v56 = vld [vmem:[%s11360_s1 + $0x1a0] sm:$0xff]  ;;  %v80_v59 = vld [vmem:[%s11360_s1 + $0x128] sm:$0xff] }
  0x67   :  { %3240 = vmatprep.subr.bf16.mxu0 %v7524_v29  ;;  %3281 = vmatprep.subr.bf16.mxu1 %v7526_v33  ;;  %v7242_v29 = vcombine.high %v48_v21, %v64_v24  ;;  %v7272_v33 = vcombine.high %v79_v28, %v95_v56  ;;  %v7271_v40 = vcombine.low %v79_v28, %v95_v56  ;;  %v303_v24 = vld [vmem:[%s11360_s1 + $0x820] sm:$0xff]  ;;  %v320_v28 = vld [vmem:[%s11360_s1 + $0x8a8] sm:$0xff] }
  0x68   :  { %v7273_v41 = vcombine.low %v80_v59, %v96_v30 }
  0x6a   :  { %3241 = vmatpush1.bf16.msra.mxu0 %v7523_v35  ;;  %3282 = vmatpush1.bf16.msra.mxu1 %v7525_v36  ;;  %v127_v35 = vld [vmem:[%s11360_s1 + $0x2a0] sm:$0xff]  ;;  %v112_v36 = vld [vmem:[%s11360_s1 + $0x228] sm:$0xff] }
  0x6b   :  { %3242 = vmatprep.subr.bf16.mxu0 %v7556_v38  ;;  %3283 = vmatprep.subr.bf16.mxu1 %v7558_v42  ;;  %v7274_v38 = vcombine.high %v80_v59, %v96_v30  ;;  %v7304_v42 = vcombine.high %v111_v34, %v127_v35  ;;  %v7303_v49 = vcombine.low %v111_v34, %v127_v35  ;;  %v335_v30 = vld [vmem:[%s11360_s1 + $0x920] sm:$0xff]  ;;  %v352_v34 = vld [vmem:[%s11360_s1 + $0x9a8] sm:$0xff] }
  0x6c   :  { %v7305_v50 = vcombine.low %v112_v36, %v128_v39 }
  0x6e   :  { %3243 = vmatpush1.bf16.msra.mxu0 %v7555_v44  ;;  %3284 = vmatpush1.bf16.msra.mxu1 %v7557_v45  ;;  %v159_v44 = vld [vmem:[%s11360_s1 + $0x3a0] sm:$0xff]  ;;  %v144_v45 = vld [vmem:[%s11360_s1 + $0x328] sm:$0xff] }
  0x6f   :  { %3244 = vmatprep.subr.bf16.mxu0 %v7588_v46  ;;  %3285 = vmatprep.subr.bf16.mxu1 %v7590_v51  ;;  %v7306_v46 = vcombine.high %v112_v36, %v128_v39  ;;  %v7336_v51 = vcombine.high %v143_v43, %v159_v44  ;;  %v7335_v58 = vcombine.low %v143_v43, %v159_v44  ;;  %v367_v39 = vld [vmem:[%s11360_s1 + $0xa20] sm:$0xff]  ;;  %v384_v43 = vld [vmem:[%s11360_s1 + $0xaa8] sm:$0xff] }
  0x70   :  { %v7337_v60 = vcombine.low %v144_v45, %v160_v48 }
  0x72   :  { %3245 = vmatpush1.bf16.msra.mxu0 %v7587_v53  ;;  %3286 = vmatpush1.bf16.msra.mxu1 %v7589_v54  ;;  %v191_v53 = vld [vmem:[%s11360_s1 + $0x4a0] sm:$0xff]  ;;  %v176_v54 = vld [vmem:[%s11360_s1 + $0x428] sm:$0xff] }
  0x73   :  { %3246 = vmatprep.subr.bf16.mxu0 %v7620_v55  ;;  %3287 = vmatprep.subr.bf16.mxu1 %v7622_v61  ;;  %v7338_v55 = vcombine.high %v144_v45, %v160_v48  ;;  %v7368_v61 = vcombine.high %v175_v52, %v191_v53  ;;  %v7367_v4 = vcombine.low %v175_v52, %v191_v53  ;;  %v399_v48 = vld [vmem:[%s11360_s1 + $0xb20] sm:$0xff]  ;;  %v416_v52 = vld [vmem:[%s11360_s1 + $0xba8] sm:$0xff] }
  0x74   :  { %v7369_v5 = vcombine.low %v176_v54, %v192_v57 }
  0x76   :  { %3247 = vmatpush1.bf16.msra.mxu0 %v7619_v63  ;;  %3288 = vmatpush1.bf16.msra.mxu1 %v7621_v0  ;;  %v223_v63 = vld [vmem:[%s11360_s1 + $0x5a0] sm:$0xff]  ;;  %v208_v0 = vld [vmem:[%s11360_s1 + $0x528] sm:$0xff] }
  0x77   :  { %3248 = vmatprep.subr.bf16.mxu0 %v7652_v1  ;;  %3289 = vmatprep.subr.bf16.mxu1 %v7654_v6  ;;  %v7370_v1 = vcombine.high %v176_v54, %v192_v57  ;;  %v7400_v6 = vcombine.high %v207_v62, %v223_v63  ;;  %v7399_v12 = vcombine.low %v207_v62, %v223_v63  ;;  %v431_v57 = vld [vmem:[%s11360_s1 + $0xc20] sm:$0xff]  ;;  %v448_v62 = vld [vmem:[%s11360_s1 + $0xca8] sm:$0xff] }
  0x78   :  { %v7401_v13 = vcombine.low %v208_v0, %v224_v2 }
  0x7a   :  { %3249 = vmatpush1.bf16.msra.mxu0 %v7651_v8  ;;  %3290 = vmatpush1.bf16.msra.mxu1 %v7653_v9  ;;  %v255_v8 = vld [vmem:[%s11360_s1 + $0x6a0] sm:$0xff]  ;;  %v240_v9 = vld [vmem:[%s11360_s1 + $0x628] sm:$0xff] }
  0x7b   :  { %3250 = vmatprep.subr.bf16.mxu0 %v7684_v10  ;;  %3291 = vmatprep.subr.bf16.mxu1 %v7686_v14  ;;  %v7402_v10 = vcombine.high %v208_v0, %v224_v2  ;;  %v7432_v14 = vcombine.high %v239_v7, %v255_v8  ;;  %v7431_v20 = vcombine.low %v239_v7, %v255_v8  ;;  %v463_v2 = vld [vmem:[%s11360_s1 + $0xd20] sm:$0xff]  ;;  %v480_v7 = vld [vmem:[%s11360_s1 + $0xda8] sm:$0xff] }
  0x7c   :  { %v7433_v21 = vcombine.low %v240_v9, %v256_v11 }
  0x7e   :  { %3251 = vmatpush1.bf16.msra.mxu0 %v7683_v16  ;;  %3292 = vmatpush1.bf16.msra.mxu1 %v7685_v17  ;;  %v7434_v16 = vcombine.high %v240_v9, %v256_v11  ;;  %v287_v17 = vld [vmem:[%s11360_s1 + $0x7a0] sm:$0xff] }
  0x7f   :  { %3252 = vmatprep.subr.bf16.mxu0 %v7716_v18  ;;  %3293 = vmatprep.subr.bf16.mxu1 %v7718_v23  ;;  %v272_v18 = vld [vmem:[%s11360_s1 + $0x728] sm:$0xff]  ;;  %v7464_v23 = vcombine.high %v271_v15, %v287_v17  ;;  %v7463_v56 = vcombine.low %v271_v15, %v287_v17  ;;  %v495_v11 = vld [vmem:[%s11360_s1 + $0xe20] sm:$0xff] }
  0x80   :  { %v7465_v59 = vcombine.low %v272_v18, %v288_v19  ;;  %v512_v15 = vld [vmem:[%s11360_s1 + $0xea8] sm:$0xff] }
  0x82   :  { %3253 = vmatpush1.bf16.msra.mxu0 %v7715_v25  ;;  %3294 = vmatpush1.bf16.msra.mxu1 %v7717_v26  ;;  %v319_v25 = vld [vmem:[%s11360_s1 + $0x8a0] sm:$0xff]  ;;  %v304_v26 = vld [vmem:[%s11360_s1 + $0x828] sm:$0xff] }
  0x83   :  { %3304 = vmatprep.subr.bf16.mxu0 %v7240_v27  ;;  %3345 = vmatprep.subr.bf16.mxu1 %v7242_v29  ;;  %v7466_v27 = vcombine.high %v272_v18, %v288_v19  ;;  %v7496_v29 = vcombine.high %v303_v24, %v319_v25  ;;  %v7495_v35 = vcombine.low %v303_v24, %v319_v25  ;;  %v527_v19 = vld [vmem:[%s11360_s1 + $0xf20] sm:$0xff]  ;;  %v544_v24 = vld [vmem:[%s11360_s1 + $0xfa8] sm:$0xff] }
  0x84   :  { %v7497_v36 = vcombine.low %v304_v26, %v320_v28 }
  0x85   :  { %3255 = vmatmul.mubr.bf16.vlgmr.msra.gmra.mrb[4].mxu0 %v8902_v22  ;;  %3296 = vmatmul.mubr.bf16.vlgmr.msra.gmra.mrb[4].mxu1 %v8902_v22 }
  0x86   :  { %3305 = vmatpush1.bf16.msra.mxu0 %v7239_v31  ;;  %3346 = vmatpush1.bf16.msra.mxu1 %v7241_v32  ;;  %v351_v31 = vld [vmem:[%s11360_s1 + $0x9a0] sm:$0xff]  ;;  %v336_v32 = vld [vmem:[%s11360_s1 + $0x928] sm:$0xff] }
  0x87   :  { %3306 = vmatprep.subr.bf16.mxu0 %v7272_v33  ;;  %3347 = vmatprep.subr.bf16.mxu1 %v7274_v38  ;;  %v7498_v33 = vcombine.high %v304_v26, %v320_v28  ;;  %v7528_v38 = vcombine.high %v335_v30, %v351_v31  ;;  %v7527_v44 = vcombine.low %v335_v30, %v351_v31  ;;  %v49_v28 = vld [vmem:[%s11360_s1 + $0x30] sm:$0xff]  ;;  %v66_v30 = vld [vmem:[%s11360_s1 + $0xb8] sm:$0xff] }
  0x88   :  { %3336 = vmatprep.mubr.bf16.mxu0 %v8782_v3  ;;  %3377 = vmatprep.mubr.bf16.mxu1 %v8782_v3  ;;  %v7529_v45 = vcombine.low %v336_v32, %v352_v34 }
  0x8a   :  { %3307 = vmatpush1.bf16.msra.mxu0 %v7271_v40  ;;  %3348 = vmatpush1.bf16.msra.mxu1 %v7273_v41  ;;  %v383_v40 = vld [vmem:[%s11360_s1 + $0xaa0] sm:$0xff]  ;;  %v368_v41 = vld [vmem:[%s11360_s1 + $0xa28] sm:$0xff] }
  0x8b   :  { %3308 = vmatprep.subr.bf16.mxu0 %v7304_v42  ;;  %3349 = vmatprep.subr.bf16.mxu1 %v7306_v46  ;;  %v7530_v42 = vcombine.high %v336_v32, %v352_v34  ;;  %v7560_v46 = vcombine.high %v367_v39, %v383_v40  ;;  %v7559_v53 = vcombine.low %v367_v39, %v383_v40  ;;  %v81_v34 = vld [vmem:[%s11360_s1 + $0x130] sm:$0xff]  ;;  %v98_v39 = vld [vmem:[%s11360_s1 + $0x1b8] sm:$0xff] }
  0x8c   :  { %v7561_v54 = vcombine.low %v368_v41, %v384_v43 }
  0x8e   :  { %3309 = vmatpush1.bf16.msra.mxu0 %v7303_v49  ;;  %3350 = vmatpush1.bf16.msra.mxu1 %v7305_v50  ;;  %v415_v49 = vld [vmem:[%s11360_s1 + $0xba0] sm:$0xff]  ;;  %v400_v50 = vld [vmem:[%s11360_s1 + $0xb28] sm:$0xff] }
  0x8f   :  { %3310 = vmatprep.subr.bf16.mxu0 %v7336_v51  ;;  %3351 = vmatprep.subr.bf16.mxu1 %v7338_v55  ;;  %v7562_v51 = vcombine.high %v368_v41, %v384_v43  ;;  %v7592_v55 = vcombine.high %v399_v48, %v415_v49  ;;  %v7591_v63 = vcombine.low %v399_v48, %v415_v49  ;;  %v113_v43 = vld [vmem:[%s11360_s1 + $0x230] sm:$0xff]  ;;  %v130_v48 = vld [vmem:[%s11360_s1 + $0x2b8] sm:$0xff] }
  0x90   :  { %v7593_v0 = vcombine.low %v400_v50, %v416_v52 }
  0x92   :  { %3311 = vmatpush1.bf16.msra.mxu0 %v7335_v58  ;;  %3352 = vmatpush1.bf16.msra.mxu1 %v7337_v60  ;;  %v447_v58 = vld [vmem:[%s11360_s1 + $0xca0] sm:$0xff]  ;;  %v432_v60 = vld [vmem:[%s11360_s1 + $0xc28] sm:$0xff] }
  0x93   :  { %3312 = vmatprep.subr.bf16.mxu0 %v7368_v61  ;;  %3353 = vmatprep.subr.bf16.mxu1 %v7370_v1  ;;  %v7594_v61 = vcombine.high %v400_v50, %v416_v52  ;;  %v7624_v1 = vcombine.high %v431_v57, %v447_v58  ;;  %v7623_v8 = vcombine.low %v431_v57, %v447_v58  ;;  %v145_v52 = vld [vmem:[%s11360_s1 + $0x330] sm:$0xff]  ;;  %v162_v57 = vld [vmem:[%s11360_s1 + $0x3b8] sm:$0xff] }
  0x94   :  { %v7625_v9 = vcombine.low %v432_v60, %v448_v62 }
  0x96   :  { %3313 = vmatpush1.bf16.msra.mxu0 %v7367_v4  ;;  %3354 = vmatpush1.bf16.msra.mxu1 %v7369_v5  ;;  %v479_v4 = vld [vmem:[%s11360_s1 + $0xda0] sm:$0xff]  ;;  %v464_v5 = vld [vmem:[%s11360_s1 + $0xd28] sm:$0xff] }
  0x97   :  { %3314 = vmatprep.subr.bf16.mxu0 %v7400_v6  ;;  %3355 = vmatprep.subr.bf16.mxu1 %v7402_v10  ;;  %v7626_v6 = vcombine.high %v432_v60, %v448_v62  ;;  %v7656_v10 = vcombine.high %v463_v2, %v479_v4  ;;  %v7657_v17 = vcombine.low %v464_v5, %v480_v7  ;;  %v177_v62 = vld [vmem:[%s11360_s1 + $0x430] sm:$0xff] }
  0x9a   :  { %3315 = vmatpush1.bf16.msra.mxu0 %v7399_v12  ;;  %3356 = vmatpush1.bf16.msra.mxu1 %v7401_v13  ;;  %v511_v12 = vld [vmem:[%s11360_s1 + $0xea0] sm:$0xff]  ;;  %v496_v13 = vld [vmem:[%s11360_s1 + $0xe28] sm:$0xff] }
  0x9b   :  { %3316 = vmatprep.subr.bf16.mxu0 %v7432_v14  ;;  %3357 = vmatprep.subr.bf16.mxu1 %v7434_v16  ;;  %v7658_v14 = vcombine.high %v464_v5, %v480_v7  ;;  %v7655_v16 = vcombine.low %v463_v2, %v479_v4  ;;  %v7688_v18 = vcombine.high %v495_v11, %v511_v12  ;;  %v194_v2 = vld [vmem:[%s11360_s1 + $0x4b8] sm:$0xff]  ;;  %v209_v7 = vld [vmem:[%s11360_s1 + $0x530] sm:$0xff] }
  0x9c   :  { %v7687_v25 = vcombine.low %v495_v11, %v511_v12  ;;  %v7689_v26 = vcombine.low %v496_v13, %v512_v15  ;;  %v226_v11 = vld [vmem:[%s11360_s1 + $0x5b8] sm:$0xff] }
  0x9e   :  { %3317 = vmatpush1.bf16.msra.mxu0 %v7431_v20  ;;  %3358 = vmatpush1.bf16.msra.mxu1 %v7433_v21  ;;  %v543_v20 = vld [vmem:[%s11360_s1 + $0xfa0] sm:$0xff]  ;;  %v528_v21 = vld [vmem:[%s11360_s1 + $0xf28] sm:$0xff] }
  0x9f   :  { %3318 = vmatprep.subr.bf16.mxu0 %v7464_v23  ;;  %3359 = vmatprep.subr.bf16.mxu1 %v7466_v27  ;;  %v7690_v23 = vcombine.high %v496_v13, %v512_v15  ;;  %v7720_v27 = vcombine.high %v527_v19, %v543_v20  ;;  %v7719_v31 = vcombine.low %v527_v19, %v543_v20  ;;  %v241_v15 = vld [vmem:[%s11360_s1 + $0x630] sm:$0xff]  ;;  %v258_v19 = vld [vmem:[%s11360_s1 + $0x6b8] sm:$0xff] }
  0xa0   :  { %v7721_v32 = vcombine.low %v528_v21, %v544_v24 }
  0xa2   :  { %3319 = vmatpush1.bf16.msra.mxu0 %v7463_v56  ;;  %3360 = vmatpush1.bf16.msra.mxu1 %v7465_v59  ;;  %v65_v56 = vld [vmem:[%s11360_s1 + $0xb0] sm:$0xff]  ;;  %v50_v59 = vld [vmem:[%s11360_s1 + $0x38] sm:$0xff] }
  0xa3   :  { %3320 = vmatprep.subr.bf16.mxu0 %v7496_v29  ;;  %3361 = vmatprep.subr.bf16.mxu1 %v7498_v33  ;;  %v7722_v29 = vcombine.high %v528_v21, %v544_v24  ;;  %v7244_v33 = vcombine.high %v49_v28, %v65_v56  ;;  %v7243_v40 = vcombine.low %v49_v28, %v65_v56  ;;  %v273_v24 = vld [vmem:[%s11360_s1 + $0x730] sm:$0xff]  ;;  %v290_v28 = vld [vmem:[%s11360_s1 + $0x7b8] sm:$0xff] }
  0xa4   :  { %v7245_v41 = vcombine.low %v50_v59, %v66_v30 }
  0xa6   :  { %3321 = vmatpush1.bf16.msra.mxu0 %v7495_v35  ;;  %3362 = vmatpush1.bf16.msra.mxu1 %v7497_v36  ;;  %v97_v35 = vld [vmem:[%s11360_s1 + $0x1b0] sm:$0xff]  ;;  %v82_v36 = vld [vmem:[%s11360_s1 + $0x138] sm:$0xff] }
  0xa7   :  { %3322 = vmatprep.subr.bf16.mxu0 %v7528_v38  ;;  %3363 = vmatprep.subr.bf16.mxu1 %v7530_v42  ;;  %v7246_v38 = vcombine.high %v50_v59, %v66_v30  ;;  %v7276_v42 = vcombine.high %v81_v34, %v97_v35  ;;  %v7275_v49 = vcombine.low %v81_v34, %v97_v35  ;;  %v305_v30 = vld [vmem:[%s11360_s1 + $0x830] sm:$0xff]  ;;  %v322_v34 = vld [vmem:[%s11360_s1 + $0x8b8] sm:$0xff] }
  0xa8   :  { %v7277_v50 = vcombine.low %v82_v36, %v98_v39 }
  0xaa   :  { %3323 = vmatpush1.bf16.msra.mxu0 %v7527_v44  ;;  %3364 = vmatpush1.bf16.msra.mxu1 %v7529_v45  ;;  %v129_v44 = vld [vmem:[%s11360_s1 + $0x2b0] sm:$0xff]  ;;  %v114_v45 = vld [vmem:[%s11360_s1 + $0x238] sm:$0xff] }
  0xab   :  { %3324 = vmatprep.subr.bf16.mxu0 %v7560_v46  ;;  %3365 = vmatprep.subr.bf16.mxu1 %v7562_v51  ;;  %v7278_v46 = vcombine.high %v82_v36, %v98_v39  ;;  %v7308_v51 = vcombine.high %v113_v43, %v129_v44  ;;  %v7307_v58 = vcombine.low %v113_v43, %v129_v44  ;;  %v337_v39 = vld [vmem:[%s11360_s1 + $0x930] sm:$0xff]  ;;  %v354_v43 = vld [vmem:[%s11360_s1 + $0x9b8] sm:$0xff] }
  0xac   :  { %v7309_v60 = vcombine.low %v114_v45, %v130_v48 }
  0xae   :  { %3325 = vmatpush1.bf16.msra.mxu0 %v7559_v53  ;;  %3366 = vmatpush1.bf16.msra.mxu1 %v7561_v54  ;;  %v161_v53 = vld [vmem:[%s11360_s1 + $0x3b0] sm:$0xff]  ;;  %v146_v54 = vld [vmem:[%s11360_s1 + $0x338] sm:$0xff] }
  0xaf   :  { %3326 = vmatprep.subr.bf16.mxu0 %v7592_v55  ;;  %3367 = vmatprep.subr.bf16.mxu1 %v7594_v61  ;;  %v7310_v55 = vcombine.high %v114_v45, %v130_v48  ;;  %v7340_v61 = vcombine.high %v145_v52, %v161_v53  ;;  %v7339_v4 = vcombine.low %v145_v52, %v161_v53  ;;  %v369_v48 = vld [vmem:[%s11360_s1 + $0xa30] sm:$0xff]  ;;  %v386_v52 = vld [vmem:[%s11360_s1 + $0xab8] sm:$0xff] }
  0xb0   :  { %v7341_v5 = vcombine.low %v146_v54, %v162_v57 }
  0xb2   :  { %3327 = vmatpush1.bf16.msra.mxu0 %v7591_v63  ;;  %3368 = vmatpush1.bf16.msra.mxu1 %v7593_v0  ;;  %v193_v63 = vld [vmem:[%s11360_s1 + $0x4b0] sm:$0xff]  ;;  %v178_v0 = vld [vmem:[%s11360_s1 + $0x438] sm:$0xff] }
  0xb3   :  { %3328 = vmatprep.subr.bf16.mxu0 %v7624_v1  ;;  %3369 = vmatprep.subr.bf16.mxu1 %v7626_v6  ;;  %v7342_v1 = vcombine.high %v146_v54, %v162_v57  ;;  %v7372_v6 = vcombine.high %v177_v62, %v193_v63  ;;  %v7371_v12 = vcombine.low %v177_v62, %v193_v63  ;;  %v401_v57 = vld [vmem:[%s11360_s1 + $0xb30] sm:$0xff]  ;;  %v418_v62 = vld [vmem:[%s11360_s1 + $0xbb8] sm:$0xff] }
  0xb4   :  { %v7373_v13 = vcombine.low %v178_v0, %v194_v2 }
  0xb6   :  { %3329 = vmatpush1.bf16.msra.mxu0 %v7623_v8  ;;  %3370 = vmatpush1.bf16.msra.mxu1 %v7625_v9  ;;  %v225_v8 = vld [vmem:[%s11360_s1 + $0x5b0] sm:$0xff]  ;;  %v210_v9 = vld [vmem:[%s11360_s1 + $0x538] sm:$0xff] }
  0xb7   :  { %3330 = vmatprep.subr.bf16.mxu0 %v7656_v10  ;;  %3371 = vmatprep.subr.bf16.mxu1 %v7658_v14  ;;  %v7374_v10 = vcombine.high %v178_v0, %v194_v2  ;;  %v7404_v14 = vcombine.high %v209_v7, %v225_v8  ;;  %v7403_v20 = vcombine.low %v209_v7, %v225_v8  ;;  %v433_v2 = vld [vmem:[%s11360_s1 + $0xc30] sm:$0xff]  ;;  %v450_v7 = vld [vmem:[%s11360_s1 + $0xcb8] sm:$0xff] }
  0xb8   :  { %v7405_v21 = vcombine.low %v210_v9, %v226_v11 }
  0xba   :  { %3331 = vmatpush1.bf16.msra.mxu0 %v7655_v16  ;;  %3372 = vmatpush1.bf16.msra.mxu1 %v7657_v17  ;;  %v257_v16 = vld [vmem:[%s11360_s1 + $0x6b0] sm:$0xff]  ;;  %v242_v17 = vld [vmem:[%s11360_s1 + $0x638] sm:$0xff] }
  0xbb   :  { %3332 = vmatprep.subr.bf16.mxu0 %v7688_v18  ;;  %3373 = vmatprep.subr.bf16.mxu1 %v7690_v23  ;;  %v7406_v18 = vcombine.high %v210_v9, %v226_v11  ;;  %v7436_v23 = vcombine.high %v241_v15, %v257_v16  ;;  %v7435_v56 = vcombine.low %v241_v15, %v257_v16  ;;  %v465_v11 = vld [vmem:[%s11360_s1 + $0xd30] sm:$0xff]  ;;  %v482_v15 = vld [vmem:[%s11360_s1 + $0xdb8] sm:$0xff] }
  0xbc   :  { %v7437_v59 = vcombine.low %v242_v17, %v258_v19 }
  0xbe   :  { %3333 = vmatpush1.bf16.msra.mxu0 %v7687_v25  ;;  %3374 = vmatpush1.bf16.msra.mxu1 %v7689_v26  ;;  %v289_v25 = vld [vmem:[%s11360_s1 + $0x7b0] sm:$0xff]  ;;  %v7438_v26 = vcombine.high %v242_v17, %v258_v19 }
  0xbf   :  { %3334 = vmatprep.subr.bf16.mxu0 %v7720_v27  ;;  %3375 = vmatprep.subr.bf16.mxu1 %v7722_v29  ;;  %v274_v27 = vld [vmem:[%s11360_s1 + $0x738] sm:$0xff]  ;;  %v7468_v29 = vcombine.high %v273_v24, %v289_v25  ;;  %v7467_v35 = vcombine.low %v273_v24, %v289_v25  ;;  %v497_v19 = vld [vmem:[%s11360_s1 + $0xe30] sm:$0xff] }
  0xc0   :  { %v7469_v36 = vcombine.low %v274_v27, %v290_v28  ;;  %v514_v24 = vld [vmem:[%s11360_s1 + $0xeb8] sm:$0xff] }
  0xc2   :  { %3335 = vmatpush1.bf16.msra.mxu0 %v7719_v31  ;;  %3376 = vmatpush1.bf16.msra.mxu1 %v7721_v32  ;;  %v321_v31 = vld [vmem:[%s11360_s1 + $0x8b0] sm:$0xff]  ;;  %v306_v32 = vld [vmem:[%s11360_s1 + $0x838] sm:$0xff] }
  0xc3   :  { %3386 = vmatprep.subr.bf16.mxu0 %v7244_v33  ;;  %3427 = vmatprep.subr.bf16.mxu1 %v7246_v38  ;;  %v7470_v33 = vcombine.high %v274_v27, %v290_v28  ;;  %v7500_v38 = vcombine.high %v305_v30, %v321_v31  ;;  %v7499_v44 = vcombine.low %v305_v30, %v321_v31  ;;  %v529_v28 = vld [vmem:[%s11360_s1 + $0xf30] sm:$0xff]  ;;  %v546_v30 = vld [vmem:[%s11360_s1 + $0xfb8] sm:$0xff] }
  0xc4   :  { %v7501_v45 = vcombine.low %v306_v32, %v322_v34 }
  0xc5   :  { %3337 = vmatmul.mubr.bf16.vlgmr.msra.gmra.mrb[8].mxu0 %v8902_v22  ;;  %3378 = vmatmul.mubr.bf16.vlgmr.msra.gmra.mrb[8].mxu1 %v8902_v22 }
  0xc6   :  { %3387 = vmatpush1.bf16.msra.mxu0 %v7243_v40  ;;  %3428 = vmatpush1.bf16.msra.mxu1 %v7245_v41  ;;  %v353_v40 = vld [vmem:[%s11360_s1 + $0x9b0] sm:$0xff]  ;;  %v338_v41 = vld [vmem:[%s11360_s1 + $0x938] sm:$0xff] }
  0xc7   :  { %3388 = vmatprep.subr.bf16.mxu0 %v7276_v42  ;;  %3429 = vmatprep.subr.bf16.mxu1 %v7278_v46  ;;  %v7502_v42 = vcombine.high %v306_v32, %v322_v34  ;;  %v7532_v46 = vcombine.high %v337_v39, %v353_v40  ;;  %v7531_v53 = vcombine.low %v337_v39, %v353_v40  ;;  %v51_v34 = vld [vmem:[%s11360_s1 + $0x40] sm:$0xff]  ;;  %v68_v39 = vld [vmem:[%s11360_s1 + $0xc8] sm:$0xff] }
  0xc8   :  { %3418 = vmatprep.mubr.bf16.mxu0 %v8782_v3  ;;  %3459 = vmatprep.mubr.bf16.mxu1 %v8782_v3  ;;  %v7533_v54 = vcombine.low %v338_v41, %v354_v43 }
  0xca   :  { %3389 = vmatpush1.bf16.msra.mxu0 %v7275_v49  ;;  %3430 = vmatpush1.bf16.msra.mxu1 %v7277_v50  ;;  %v385_v49 = vld [vmem:[%s11360_s1 + $0xab0] sm:$0xff]  ;;  %v370_v50 = vld [vmem:[%s11360_s1 + $0xa38] sm:$0xff] }
  0xcb   :  { %3390 = vmatprep.subr.bf16.mxu0 %v7308_v51  ;;  %3431 = vmatprep.subr.bf16.mxu1 %v7310_v55  ;;  %v7534_v51 = vcombine.high %v338_v41, %v354_v43  ;;  %v7564_v55 = vcombine.high %v369_v48, %v385_v49  ;;  %v7563_v63 = vcombine.low %v369_v48, %v385_v49  ;;  %v83_v43 = vld [vmem:[%s11360_s1 + $0x140] sm:$0xff]  ;;  %v100_v48 = vld [vmem:[%s11360_s1 + $0x1c8] sm:$0xff] }
  0xcc   :  { %v7565_v0 = vcombine.low %v370_v50, %v386_v52 }
  0xce   :  { %3391 = vmatpush1.bf16.msra.mxu0 %v7307_v58  ;;  %3432 = vmatpush1.bf16.msra.mxu1 %v7309_v60  ;;  %v417_v58 = vld [vmem:[%s11360_s1 + $0xbb0] sm:$0xff]  ;;  %v402_v60 = vld [vmem:[%s11360_s1 + $0xb38] sm:$0xff] }
  0xcf   :  { %3392 = vmatprep.subr.bf16.mxu0 %v7340_v61  ;;  %3433 = vmatprep.subr.bf16.mxu1 %v7342_v1  ;;  %v7566_v61 = vcombine.high %v370_v50, %v386_v52  ;;  %v7596_v1 = vcombine.high %v401_v57, %v417_v58  ;;  %v7595_v8 = vcombine.low %v401_v57, %v417_v58  ;;  %v115_v52 = vld [vmem:[%s11360_s1 + $0x240] sm:$0xff]  ;;  %v132_v57 = vld [vmem:[%s11360_s1 + $0x2c8] sm:$0xff] }
  0xd0   :  { %v7597_v9 = vcombine.low %v402_v60, %v418_v62 }
  0xd2   :  { %3393 = vmatpush1.bf16.msra.mxu0 %v7339_v4  ;;  %3434 = vmatpush1.bf16.msra.mxu1 %v7341_v5  ;;  %v449_v4 = vld [vmem:[%s11360_s1 + $0xcb0] sm:$0xff]  ;;  %v434_v5 = vld [vmem:[%s11360_s1 + $0xc38] sm:$0xff] }
  0xd3   :  { %3394 = vmatprep.subr.bf16.mxu0 %v7372_v6  ;;  %3435 = vmatprep.subr.bf16.mxu1 %v7374_v10  ;;  %v7598_v6 = vcombine.high %v402_v60, %v418_v62  ;;  %v7628_v10 = vcombine.high %v433_v2, %v449_v4  ;;  %v7627_v16 = vcombine.low %v433_v2, %v449_v4  ;;  %v147_v62 = vld [vmem:[%s11360_s1 + $0x340] sm:$0xff]  ;;  %v164_v2 = vld [vmem:[%s11360_s1 + $0x3c8] sm:$0xff] }
  0xd4   :  { %v7629_v17 = vcombine.low %v434_v5, %v450_v7 }
  0xd6   :  { %3395 = vmatpush1.bf16.msra.mxu0 %v7371_v12  ;;  %3436 = vmatpush1.bf16.msra.mxu1 %v7373_v13  ;;  %v481_v12 = vld [vmem:[%s11360_s1 + $0xdb0] sm:$0xff]  ;;  %v466_v13 = vld [vmem:[%s11360_s1 + $0xd38] sm:$0xff] }
  0xd7   :  { %3396 = vmatprep.subr.bf16.mxu0 %v7404_v14  ;;  %3437 = vmatprep.subr.bf16.mxu1 %v7406_v18  ;;  %v7630_v14 = vcombine.high %v434_v5, %v450_v7  ;;  %v7660_v18 = vcombine.high %v465_v11, %v481_v12  ;;  %v7659_v25 = vcombine.low %v465_v11, %v481_v12  ;;  %v179_v7 = vld [vmem:[%s11360_s1 + $0x440] sm:$0xff]  ;;  %v196_v11 = vld [vmem:[%s11360_s1 + $0x4c8] sm:$0xff] }
  0xda   :  { %3397 = vmatpush1.bf16.msra.mxu0 %v7403_v20  ;;  %3438 = vmatpush1.bf16.msra.mxu1 %v7405_v21  ;;  %v513_v20 = vld [vmem:[%s11360_s1 + $0xeb0] sm:$0xff]  ;;  %v498_v21 = vld [vmem:[%s11360_s1 + $0xe38] sm:$0xff] }
  0xdb   :  { %3398 = vmatprep.subr.bf16.mxu0 %v7436_v23  ;;  %3439 = vmatprep.subr.bf16.mxu1 %v7438_v26  ;;  %v7662_v23 = vcombine.high %v466_v13, %v482_v15  ;;  %v7661_v26 = vcombine.low %v466_v13, %v482_v15  ;;  %v7692_v27 = vcombine.high %v497_v19, %v513_v20  ;;  %v211_v15 = vld [vmem:[%s11360_s1 + $0x540] sm:$0xff] }
  0xdc   :  { %v7691_v31 = vcombine.low %v497_v19, %v513_v20  ;;  %v7693_v32 = vcombine.low %v498_v21, %v514_v24 }
  0xde   :  { %3399 = vmatpush1.bf16.msra.mxu0 %v7435_v56  ;;  %3440 = vmatpush1.bf16.msra.mxu1 %v7437_v59  ;;  %v545_v56 = vld [vmem:[%s11360_s1 + $0xfb0] sm:$0xff]  ;;  %v530_v59 = vld [vmem:[%s11360_s1 + $0xf38] sm:$0xff] }
  0xdf   :  { %3400 = vmatprep.subr.bf16.mxu0 %v7468_v29  ;;  %3441 = vmatprep.subr.bf16.mxu1 %v7470_v33  ;;  %v7694_v29 = vcombine.high %v498_v21, %v514_v24  ;;  %v7724_v33 = vcombine.high %v529_v28, %v545_v56  ;;  %v7723_v40 = vcombine.low %v529_v28, %v545_v56  ;;  %v228_v21 = vld [vmem:[%s11360_s1 + $0x5c8] sm:$0xff] }
  0xe0   :  { %v7725_v41 = vcombine.low %v530_v59, %v546_v30  ;;  %v244_v28 = vld [vmem:[%s11360_s1 + $0x648] sm:$0xff] }
  0xe2   :  { %3401 = vmatpush1.bf16.msra.mxu0 %v7467_v35  ;;  %3442 = vmatpush1.bf16.msra.mxu1 %v7469_v36  ;;  %v67_v35 = vld [vmem:[%s11360_s1 + $0xc0] sm:$0xff]  ;;  %v52_v36 = vld [vmem:[%s11360_s1 + $0x48] sm:$0xff] }
  0xe3   :  { %3402 = vmatprep.subr.bf16.mxu0 %v7500_v38  ;;  %3443 = vmatprep.subr.bf16.mxu1 %v7502_v42  ;;  %v7726_v38 = vcombine.high %v530_v59, %v546_v30  ;;  %v7248_v42 = vcombine.high %v51_v34, %v67_v35  ;;  %v7247_v49 = vcombine.low %v51_v34, %v67_v35  ;;  %v291_v34 = vld [vmem:[%s11360_s1 + $0x7c0] sm:$0xff] }
  0xe4   :  { %v7249_v50 = vcombine.low %v52_v36, %v68_v39 }
  0xe6   :  { %3403 = vmatpush1.bf16.msra.mxu0 %v7499_v44  ;;  %3444 = vmatpush1.bf16.msra.mxu1 %v7501_v45  ;;  %v99_v44 = vld [vmem:[%s11360_s1 + $0x1c0] sm:$0xff]  ;;  %v84_v45 = vld [vmem:[%s11360_s1 + $0x148] sm:$0xff] }
  0xe7   :  { %3404 = vmatprep.subr.bf16.mxu0 %v7532_v46  ;;  %3445 = vmatprep.subr.bf16.mxu1 %v7534_v51  ;;  %v7250_v46 = vcombine.high %v52_v36, %v68_v39  ;;  %v7280_v51 = vcombine.high %v83_v43, %v99_v44  ;;  %v7279_v58 = vcombine.low %v83_v43, %v99_v44  ;;  %v276_v39 = vld [vmem:[%s11360_s1 + $0x748] sm:$0xff] }
  0xe8   :  { %v7281_v60 = vcombine.low %v84_v45, %v100_v48 }
  0xea   :  { %3405 = vmatpush1.bf16.msra.mxu0 %v7531_v53  ;;  %3446 = vmatpush1.bf16.msra.mxu1 %v7533_v54  ;;  %v131_v53 = vld [vmem:[%s11360_s1 + $0x2c0] sm:$0xff]  ;;  %v116_v54 = vld [vmem:[%s11360_s1 + $0x248] sm:$0xff] }
  0xeb   :  { %3406 = vmatprep.subr.bf16.mxu0 %v7564_v55  ;;  %3447 = vmatprep.subr.bf16.mxu1 %v7566_v61  ;;  %v7282_v55 = vcombine.high %v84_v45, %v100_v48  ;;  %v7312_v61 = vcombine.high %v115_v52, %v131_v53  ;;  %v7311_v4 = vcombine.low %v115_v52, %v131_v53  ;;  %v307_v53 = vld [vmem:[%s11360_s1 + $0x840] sm:$0xff] }
  0xec   :  { %v7313_v5 = vcombine.low %v116_v54, %v132_v57 }
  0xee   :  { %3407 = vmatpush1.bf16.msra.mxu0 %v7563_v63  ;;  %3448 = vmatpush1.bf16.msra.mxu1 %v7565_v0  ;;  %v163_v63 = vld [vmem:[%s11360_s1 + $0x3c0] sm:$0xff]  ;;  %v148_v0 = vld [vmem:[%s11360_s1 + $0x348] sm:$0xff] }
  0xef   :  { %3408 = vmatprep.subr.bf16.mxu0 %v7596_v1  ;;  %3449 = vmatprep.subr.bf16.mxu1 %v7598_v6  ;;  %v7314_v1 = vcombine.high %v116_v54, %v132_v57  ;;  %v7344_v6 = vcombine.high %v147_v62, %v163_v63  ;;  %v7343_v12 = vcombine.low %v147_v62, %v163_v63  ;;  %v323_v54 = vld [vmem:[%s11360_s1 + $0x8c0] sm:$0xff] }
  0xf0   :  { %v7345_v13 = vcombine.low %v148_v0, %v164_v2 }
  0xf2   :  { %3409 = vmatpush1.bf16.msra.mxu0 %v7595_v8  ;;  %3450 = vmatpush1.bf16.msra.mxu1 %v7597_v9  ;;  %v195_v8 = vld [vmem:[%s11360_s1 + $0x4c0] sm:$0xff]  ;;  %v180_v9 = vld [vmem:[%s11360_s1 + $0x448] sm:$0xff] }
  0xf3   :  { %3410 = vmatprep.subr.bf16.mxu0 %v7628_v10  ;;  %3451 = vmatprep.subr.bf16.mxu1 %v7630_v14  ;;  %v7346_v10 = vcombine.high %v148_v0, %v164_v2  ;;  %v7376_v14 = vcombine.high %v179_v7, %v195_v8  ;;  %v7378_v20 = vcombine.high %v180_v9, %v196_v11 }
  0xf4   :  { %v7377_v24 = vcombine.low %v180_v9, %v196_v11  ;;  %v7504_v2 = vcombine.high %v307_v53, %v323_v54  ;;  %v7503_v9 = vcombine.low %v307_v53, %v323_v54  ;;  %v531_v54 = vld [vmem:[%s11360_s1 + $0xf40] sm:$0xff] }
  0xf6   :  { %3411 = vmatpush1.bf16.msra.mxu0 %v7627_v16  ;;  %3452 = vmatpush1.bf16.msra.mxu1 %v7629_v17  ;;  %v227_v16 = vld [vmem:[%s11360_s1 + $0x5c0] sm:$0xff]  ;;  %v212_v17 = vld [vmem:[%s11360_s1 + $0x548] sm:$0xff] }
  0xf7   :  { %3412 = vmatprep.subr.bf16.mxu0 %v7660_v18  ;;  %3453 = vmatprep.subr.bf16.mxu1 %v7662_v23  ;;  %v8640_v18 = vmov 1983009808   ;;  %v7375_v23 = vcombine.low %v179_v7, %v195_v8  ;;  %v7410_v59 = vcombine.high %v212_v17, %v228_v21  ;;  %v7407_v30 = vcombine.low %v211_v15, %v227_v16  ;;  %v356_v8 = vld [vmem:[%s11360_s1 + $0x9c8] sm:$0xff] }
  0xf8   :  { %v3831_v19 = vunpack.c.l.s4 %v8640_v18 }
  0xfa   :  { %3413 = vmatpush1.bf16.msra.mxu0 %v7659_v25  ;;  %3454 = vmatpush1.bf16.msra.mxu1 %v7661_v26  ;;  %v7408_v25 = vcombine.high %v211_v15, %v227_v16  ;;  %v243_v26 = vld [vmem:[%s11360_s1 + $0x640] sm:$0xff]  ;;  %v3832_v56 = vunpack.c.0.s8 %v3831_v19  ;;  %v388_v16 = vld [vmem:[%s11360_s1 + $0xac8] sm:$0xff] }
  0xfb   :  { %3414 = vmatprep.subr.bf16.mxu0 %v7692_v27  ;;  %3455 = vmatprep.subr.bf16.mxu1 %v7694_v29  ;;  %v259_v27 = vld [vmem:[%s11360_s1 + $0x6c0] sm:$0xff]  ;;  %v260_v29 = vld [vmem:[%s11360_s1 + $0x6c8] sm:$0xff] }
  0xfc   :  { %v9569_v35 = vsub.s32 %v3832_v56, %v8745_v47  ;;  %v435_v56 = vld [vmem:[%s11360_s1 + $0xc40] sm:$0xff] }
  0xfe   :  { %3415 = vmatpush1.bf16.msra.mxu0 %v7691_v31  ;;  %3456 = vmatpush1.bf16.msra.mxu1 %v7693_v32  ;;  %v7409_v31 = vcombine.low %v212_v17, %v228_v21  ;;  %v7440_v32 = vcombine.high %v243_v26, %v259_v27  ;;  %v419_v21 = vld [vmem:[%s11360_s1 + $0xbc0] sm:$0xff] }
  0xff   :  { %3416 = vmatprep.subr.bf16.mxu0 %v7724_v33  ;;  %3457 = vmatprep.subr.bf16.mxu1 %v7726_v38  ;;  %v275_v33 = vld [vmem:[%s11360_s1 + $0x740] sm:$0xff]  ;;  %v7442_v38 = vcombine.high %v244_v28, %v260_v29 }
 0x100   :  { %v7472_v52 = vcombine.high %v275_v33, %v291_v34  ;;  %v7471_v63 = vcombine.low %v275_v33, %v291_v34 }
 0x102   :  { %3417 = vmatpush1.bf16.msra.mxu0 %v7723_v40  ;;  %3458 = vmatpush1.bf16.msra.mxu1 %v7725_v41  ;;  %v292_v40 = vld [vmem:[%s11360_s1 + $0x7c8] sm:$0xff] }
 0x103   :  { %3468 = vmatprep.subr.bf16.mxu0 %v7248_v42  ;;  %3509 = vmatprep.subr.bf16.mxu1 %v7250_v46  ;;  %v7439_v46 = vcombine.low %v243_v26, %v259_v27 }
 0x105   :  { %3419 = vmatmul.mubr.bf16.vlgmr.msra.gmra.mrb[12].mxu0 %v8902_v22  ;;  %3460 = vmatmul.mubr.bf16.vlgmr.msra.gmra.mrb[12].mxu1 %v8902_v22 }
 0x106   :  { %3469 = vmatpush1.bf16.msra.mxu0 %v7247_v49  ;;  %3510 = vmatpush1.bf16.msra.mxu1 %v7249_v50 }
 0x107   :  { %3470 = vmatprep.subr.bf16.mxu0 %v7280_v51  ;;  %3511 = vmatprep.subr.bf16.mxu1 %v7282_v55  ;;  %v7441_v51 = vcombine.low %v244_v28, %v260_v29  ;;  %v308_v55 = vld [vmem:[%s11360_s1 + $0x848] sm:$0xff] }
 0x108   :  { %3500 = vmatprep.mubr.bf16.mxu0 %v8782_v3  ;;  %3541 = vmatprep.mubr.bf16.mxu1 %v8782_v3  ;;  %v436_v29 = vld [vmem:[%s11360_s1 + $0xc48] sm:$0xff] }
 0x10a   :  { %3471 = vmatpush1.bf16.msra.mxu0 %v7279_v58  ;;  %3512 = vmatpush1.bf16.msra.mxu1 %v7281_v60  ;;  %v7474_v60 = vcombine.high %v276_v39, %v292_v40 }
 0x10b   :  { %3472 = vmatprep.subr.bf16.mxu0 %v7312_v61  ;;  %3513 = vmatprep.subr.bf16.mxu1 %v7314_v1  ;;  %v324_v61 = vld [vmem:[%s11360_s1 + $0x8c8] sm:$0xff]  ;;  %v7473_v1 = vcombine.low %v276_v39, %v292_v40 }
 0x10c   :  { %v7506_v7 = vcombine.high %v308_v55, %v324_v61  ;;  %v468_v39 = vld [vmem:[%s11360_s1 + $0xd48] sm:$0xff] }
 0x10e   :  { %3473 = vmatpush1.bf16.msra.mxu0 %v7311_v4  ;;  %3514 = vmatpush1.bf16.msra.mxu1 %v7313_v5  ;;  %v339_v4 = vld [vmem:[%s11360_s1 + $0x940] sm:$0xff] }
 0x10f   :  { %3474 = vmatprep.subr.bf16.mxu0 %v7344_v6  ;;  %3515 = vmatprep.subr.bf16.mxu1 %v7346_v10  ;;  %v355_v5 = vld [vmem:[%s11360_s1 + $0x9c0] sm:$0xff]  ;;  %v340_v6 = vld [vmem:[%s11360_s1 + $0x948] sm:$0xff]  ;;  %v7505_v10 = vcombine.low %v308_v55, %v324_v61 }
 0x110   :  { %v7536_v11 = vcombine.high %v339_v4, %v355_v5  ;;  %v7538_v15 = vcombine.high %v340_v6, %v356_v8  ;;  %v7535_v17 = vcombine.low %v339_v4, %v355_v5  ;;  %v7537_v18 = vcombine.low %v340_v6, %v356_v8  ;;  %v547_v55 = vld [vmem:[%s11360_s1 + $0xfc0] sm:$0xff]  ;;  %v548_v61 = vld [vmem:[%s11360_s1 + $0xfc8] sm:$0xff]  ;;  %v53_v4 = vld [vmem:[%s11360_s1 + $0x50] sm:$0xff] }
 0x111   :  { %v69_v5 = vld [vmem:[%s11360_s1 + $0xd0] sm:$0xff]  ;;  %v54_v6 = vld [vmem:[%s11360_s1 + $0x58] sm:$0xff] }
 0x112   :  { %3475 = vmatpush1.bf16.msra.mxu0 %v7343_v12  ;;  %3516 = vmatpush1.bf16.msra.mxu1 %v7345_v13  ;;  %v371_v12 = vld [vmem:[%s11360_s1 + $0xa40] sm:$0xff]  ;;  %v70_v8 = vld [vmem:[%s11360_s1 + $0xd8] sm:$0xff] }
 0x113   :  { %3476 = vmatprep.subr.bf16.mxu0 %v7376_v14  ;;  %3517 = vmatprep.subr.bf16.mxu1 %v7378_v20  ;;  %v387_v13 = vld [vmem:[%s11360_s1 + $0xac0] sm:$0xff]  ;;  %v372_v14 = vld [vmem:[%s11360_s1 + $0xa48] sm:$0xff] }
 0x114   :  { %v7568_v19 = vcombine.high %v371_v12, %v387_v13  ;;  %v403_v20 = vld [vmem:[%s11360_s1 + $0xb40] sm:$0xff]  ;;  %v7567_v26 = vcombine.low %v371_v12, %v387_v13  ;;  %v7569_v27 = vcombine.low %v372_v14, %v388_v16  ;;  %v85_v12 = vld [vmem:[%s11360_s1 + $0x150] sm:$0xff] }
 0x115   :  { %v7600_v28 = vcombine.high %v403_v20, %v419_v21  ;;  %v101_v13 = vld [vmem:[%s11360_s1 + $0x1d0] sm:$0xff] }
 0x116   :  { %3477 = vmatpush1.bf16.msra.mxu0 %v7375_v23  ;;  %3518 = vmatpush1.bf16.msra.mxu1 %v7377_v24  ;;  %v404_v23 = vld [vmem:[%s11360_s1 + $0xb48] sm:$0xff]  ;;  %v7570_v24 = vcombine.high %v372_v14, %v388_v16  ;;  %v86_v14 = vld [vmem:[%s11360_s1 + $0x158] sm:$0xff] }
 0x117   :  { %3478 = vmatprep.subr.bf16.mxu0 %v7408_v25  ;;  %3519 = vmatprep.subr.bf16.mxu1 %v7410_v59  ;;  %v420_v25 = vld [vmem:[%s11360_s1 + $0xbc8] sm:$0xff]  ;;  %v451_v59 = vld [vmem:[%s11360_s1 + $0xcc0] sm:$0xff]  ;;  %v102_v16 = vld [vmem:[%s11360_s1 + $0x1d8] sm:$0xff] }
 0x118   :  { %v3174_v36 = vpop.f32.mrb[0].mxu0  ;;  %v3215_v41 = vpop.f32.mrb[0].mxu1  ;;  %v7601_v33 = vcombine.low %v404_v23, %v420_v25  ;;  %v7632_v34 = vcombine.high %v435_v56, %v451_v59 }
 0x119   :  { %v3176_v42 = vpop.f32.mrb[1].mxu0  ;;  %v3217_v44 = vpop.f32.mrb[1].mxu1 }
 0x11a   :  { %v3828_v43 = vcombine.low %v3174_v36, %v3176_v42  ;;  %v3178_v45 = vpop.f32.mrb[2].mxu0  ;;  %3479 = vmatpush1.bf16.msra.mxu0 %v7407_v30  ;;  %v3829_v48 = vcombine.low %v3215_v41, %v3217_v44  ;;  %v3219_v49 = vpop.f32.mrb[2].mxu1  ;;  %3520 = vmatpush1.bf16.msra.mxu1 %v7409_v31  ;;  %v7602_v30 = vcombine.high %v404_v23, %v420_v25  ;;  %v452_v31 = vld [vmem:[%s11360_s1 + $0xcc8] sm:$0xff]  ;;  %v467_v36 = vld [vmem:[%s11360_s1 + $0xd40] sm:$0xff]  ;;  %v118_v23 = vld [vmem:[%s11360_s1 + $0x258] sm:$0xff] }
 0x11b   :  { %v3179_v50 = vpop.f32.mrb[3].mxu0  ;;  %3480 = vmatprep.subr.bf16.mxu0 %v7440_v32  ;;  %v3220_v58 = vpop.f32.mrb[3].mxu1  ;;  %3521 = vmatprep.subr.bf16.mxu1 %v7442_v38  ;;  %v7599_v32 = vcombine.low %v403_v20, %v419_v21  ;;  %v483_v38 = vld [vmem:[%s11360_s1 + $0xdc0] sm:$0xff]  ;;  %v7634_v40 = vcombine.high %v436_v29, %v452_v31  ;;  %v484_v41 = vld [vmem:[%s11360_s1 + $0xdc8] sm:$0xff]  ;;  %v7631_v42 = vcombine.low %v435_v56, %v451_v59  ;;  %v117_v20 = vld [vmem:[%s11360_s1 + $0x250] sm:$0xff] }
 0x11c   :  { %v9587_v57 = vrot.slane %v3828_v43, %v9569_v35  ;;  %v9593_v62 = vrot.slane %v3829_v48, %v9569_v35  ;;  %v7633_v43 = vcombine.low %v436_v29, %v452_v31  ;;  %v7664_v44 = vcombine.high %v467_v36, %v483_v38  ;;  %v499_v45 = vld [vmem:[%s11360_s1 + $0xe40] sm:$0xff]  ;;  %v500_v48 = vld [vmem:[%s11360_s1 + $0xe48] sm:$0xff]  ;;  %v133_v21 = vld [vmem:[%s11360_s1 + $0x2d0] sm:$0xff] }
 0x11d   :  { %v7666_v49 = vcombine.high %v468_v39, %v484_v41  ;;  %v516_v50 = vld [vmem:[%s11360_s1 + $0xec8] sm:$0xff]  ;;  %v134_v25 = vld [vmem:[%s11360_s1 + $0x2d8] sm:$0xff] }
 0x11e   :  { %3481 = vmatpush1.bf16.msra.mxu0 %v7439_v46  ;;  %v3844_v0 = vcombine.low %v9587_v57, %v9593_v62  ;;  %3522 = vmatpush1.bf16.msra.mxu1 %v7441_v51  ;;  %v515_v46 = vld [vmem:[%s11360_s1 + $0xec0] sm:$0xff]  ;;  %v7663_v51 = vcombine.low %v467_v36, %v483_v38  ;;  %v532_v58 = vld [vmem:[%s11360_s1 + $0xf48] sm:$0xff] }
 0x11f   :  { %3482 = vmatprep.subr.bf16.mxu0 %v7472_v52  ;;  %3523 = vmatprep.subr.bf16.mxu1 %v7474_v60  ;;  %v7665_v52 = vcombine.low %v468_v39, %v484_v41  ;;  %v7696_v53 = vcombine.high %v499_v45, %v515_v46  ;;  %v7698_v60 = vcombine.high %v500_v48, %v516_v50 }
 0x122   :  { %3483 = vmatpush1.bf16.msra.mxu0 %v7471_v63  ;;  %3524 = vmatpush1.bf16.msra.mxu1 %v7473_v1  ;;  %v7695_v63 = vcombine.low %v499_v45, %v515_v46  ;;  %v7697_v1 = vcombine.low %v500_v48, %v516_v50 }
 0x123   :  { %3484 = vmatprep.subr.bf16.mxu0 %v7504_v2  ;;  %3525 = vmatprep.subr.bf16.mxu1 %v7506_v7  ;;  %v7728_v2 = vcombine.high %v531_v54, %v547_v55  ;;  %v7730_v7 = vcombine.high %v532_v58, %v548_v61 }
 0x126   :  { %3485 = vmatpush1.bf16.msra.mxu0 %v7503_v9  ;;  %3526 = vmatpush1.bf16.msra.mxu1 %v7505_v10  ;;  %v7727_v9 = vcombine.low %v531_v54, %v547_v55  ;;  %v7729_v10 = vcombine.low %v532_v58, %v548_v61 }
 0x127   :  { %3486 = vmatprep.subr.bf16.mxu0 %v7536_v11  ;;  %3527 = vmatprep.subr.bf16.mxu1 %v7538_v15  ;;  %v7252_v11 = vcombine.high %v53_v4, %v69_v5  ;;  %v7254_v15 = vcombine.high %v54_v6, %v70_v8 }
 0x12a   :  { %3487 = vmatpush1.bf16.msra.mxu0 %v7535_v17  ;;  %3528 = vmatpush1.bf16.msra.mxu1 %v7537_v18  ;;  %v7251_v17 = vcombine.low %v53_v4, %v69_v5  ;;  %v7253_v18 = vcombine.low %v54_v6, %v70_v8 }
 0x12b   :  { %3488 = vmatprep.subr.bf16.mxu0 %v7568_v19  ;;  %3529 = vmatprep.subr.bf16.mxu1 %v7570_v24  ;;  %v7284_v19 = vcombine.high %v85_v12, %v101_v13  ;;  %v7286_v24 = vcombine.high %v86_v14, %v102_v16 }
 0x12e   :  { %3489 = vmatpush1.bf16.msra.mxu0 %v7567_v26  ;;  %3530 = vmatpush1.bf16.msra.mxu1 %v7569_v27 }
 0x12f   :  { %3490 = vmatprep.subr.bf16.mxu0 %v7600_v28  ;;  %3531 = vmatprep.subr.bf16.mxu1 %v7602_v30 }
 0x132   :  { %3491 = vmatpush1.bf16.msra.mxu0 %v7599_v32  ;;  %3532 = vmatpush1.bf16.msra.mxu1 %v7601_v33 }
 0x133   :  { %3492 = vmatprep.subr.bf16.mxu0 %v7632_v34  ;;  %3533 = vmatprep.subr.bf16.mxu1 %v7634_v40 }
 0x136   :  { %3493 = vmatpush1.bf16.msra.mxu0 %v7631_v42  ;;  %3534 = vmatpush1.bf16.msra.mxu1 %v7633_v43 }
 0x137   :  { %3494 = vmatprep.subr.bf16.mxu0 %v7664_v44  ;;  %3535 = vmatprep.subr.bf16.mxu1 %v7666_v49 }
 0x13a   :  { %3495 = vmatpush1.bf16.msra.mxu0 %v7663_v51  ;;  %3536 = vmatpush1.bf16.msra.mxu1 %v7665_v52 }
 0x13b   :  { %3496 = vmatprep.subr.bf16.mxu0 %v7696_v53  ;;  %3537 = vmatprep.subr.bf16.mxu1 %v7698_v60 }
 0x13e   :  { %3497 = vmatpush1.bf16.msra.mxu0 %v7695_v63  ;;  %3538 = vmatpush1.bf16.msra.mxu1 %v7697_v1 }
 0x13f   :  { %3498 = vmatprep.subr.bf16.mxu0 %v7728_v2  ;;  %3539 = vmatprep.subr.bf16.mxu1 %v7730_v7 }
 0x142   :  { %3499 = vmatpush1.bf16.msra.mxu0 %v7727_v9  ;;  %3540 = vmatpush1.bf16.msra.mxu1 %v7729_v10 }
 0x143   :  { %3550 = vmatprep.subr.bf16.mxu0 %v7252_v11  ;;  %3591 = vmatprep.subr.bf16.mxu1 %v7254_v15 }
 0x145   :  { %3501 = vmatmul.mubr.bf16.vlgmr.msra.gmra.mrb[16].mxu0 %v8902_v22 }
 0x146   :  { %10 = vsyncpa [#allocation4], 0  ;;  %3542 = vmatmul.mubr.bf16.vlgmr.msra.gmra.mrb[16].mxu1 %v8902_v22  ;;  %3551 = vmatpush1.bf16.msra.mxu0 %v7251_v17  ;;  %v7283_v26 = vcombine.low %v85_v12, %v101_v13  ;;  %v7285_v27 = vcombine.low %v86_v14, %v102_v16  ;;  %v7316_v28 = vcombine.high %v117_v20, %v133_v21  ;;  %v149_v59 = vld [vmem:[%s11360_s1 + $0x350] sm:$0xff]  ;;  %v150_v30 = vld [vmem:[%s11360_s1 + $0x358] sm:$0xff]  ;;  %vm7203_vm1 = vcmask 1041408  }
 0x147   :  { %3592 = vmatpush1.bf16.msra.mxu1 %v7253_v18  ;;  %3552 = vmatprep.subr.bf16.mxu0 %v7284_v19  ;;  %v7318_v56 = vcombine.high %v118_v23, %v134_v25  ;;  %v165_v29 = vld [vmem:[%s11360_s1 + $0x3d0] sm:$0xff]  ;;  %v166_v31 = vld [vmem:[%s11360_s1 + $0x3d8] sm:$0xff]  ;;  %v7315_v32 = vcombine.low %v117_v20, %v133_v21  ;;  %v7317_v33 = vcombine.low %v118_v23, %v134_v25 }
 0x148   :  { %3593 = vmatprep.subr.bf16.mxu1 %v7286_v24  ;;  %3582 = vmatprep.mubr.bf16.mxu0 %v8782_v3  ;;  %v7348_v34 = vcombine.high %v149_v59, %v165_v29  ;;  %v7350_v36 = vcombine.high %v150_v30, %v166_v31  ;;  %v181_v38 = vld [vmem:[%s11360_s1 + $0x450] sm:$0xff]  ;;  %v182_v40 = vld [vmem:[%s11360_s1 + $0x458] sm:$0xff]  ;;  %v7347_v42 = vcombine.low %v149_v59, %v165_v29 }
 0x149   :  { %3623 = vmatprep.mubr.bf16.mxu1 %v8782_v3  ;;  %v197_v39 = vld [vmem:[%s11360_s1 + $0x4d0] sm:$0xff]  ;;  %v198_v41 = vld [vmem:[%s11360_s1 + $0x4d8] sm:$0xff]  ;;  %v7349_v43 = vcombine.low %v150_v30, %v166_v31 }
 0x14a   :  { %3553 = vmatpush1.bf16.msra.mxu0 %v7283_v26  ;;  %v7380_v44 = vcombine.high %v181_v38, %v197_v39  ;;  %v7382_v45 = vcombine.high %v182_v40, %v198_v41  ;;  %v213_v46 = vld [vmem:[%s11360_s1 + $0x550] sm:$0xff]  ;;  %v214_v49 = vld [vmem:[%s11360_s1 + $0x558] sm:$0xff]  ;;  %v7379_v51 = vcombine.low %v181_v38, %v197_v39  ;;  %v7381_v52 = vcombine.low %v182_v40, %v198_v41 }
 0x14b   :  { %3594 = vmatpush1.bf16.msra.mxu1 %v7285_v27  ;;  %3554 = vmatprep.subr.bf16.mxu0 %v7316_v28  ;;  %v229_v48 = vld [vmem:[%s11360_s1 + $0x5d0] sm:$0xff]  ;;  %v230_v50 = vld [vmem:[%s11360_s1 + $0x5d8] sm:$0xff] }
 0x14c   :  { %3595 = vmatprep.subr.bf16.mxu1 %v7318_v56  ;;  %v7412_v53 = vcombine.high %v213_v46, %v229_v48  ;;  %v7414_v54 = vcombine.high %v214_v49, %v230_v50  ;;  %v245_v55 = vld [vmem:[%s11360_s1 + $0x650] sm:$0xff]  ;;  %v246_v60 = vld [vmem:[%s11360_s1 + $0x658] sm:$0xff]  ;;  %v7411_v63 = vcombine.low %v213_v46, %v229_v48  ;;  %v7413_v1 = vcombine.low %v214_v49, %v230_v50 }
 0x14d   :  { %v261_v58 = vld [vmem:[%s11360_s1 + $0x6d0] sm:$0xff]  ;;  %v262_v61 = vld [vmem:[%s11360_s1 + $0x6d8] sm:$0xff] }
 0x14e   :  { %3555 = vmatpush1.bf16.msra.mxu0 %v7315_v32  ;;  %v7444_v2 = vcombine.high %v245_v55, %v261_v58  ;;  %v7446_v5 = vcombine.high %v246_v60, %v262_v61  ;;  %v277_v6 = vld [vmem:[%s11360_s1 + $0x750] sm:$0xff]  ;;  %v278_v10 = vld [vmem:[%s11360_s1 + $0x758] sm:$0xff]  ;;  %v7443_v15 = vcombine.low %v245_v55, %v261_v58  ;;  %v7445_v19 = vcombine.low %v246_v60, %v262_v61 }
 0x14f   :  { %3596 = vmatpush1.bf16.msra.mxu1 %v7317_v33  ;;  %3556 = vmatprep.subr.bf16.mxu0 %v7348_v34  ;;  %v293_v7 = vld [vmem:[%s11360_s1 + $0x7d0] sm:$0xff]  ;;  %v294_v11 = vld [vmem:[%s11360_s1 + $0x7d8] sm:$0xff] }
 0x150   :  { %3597 = vmatprep.subr.bf16.mxu1 %v7350_v36  ;;  %v7476_v20 = vcombine.high %v277_v6, %v293_v7  ;;  %v7478_v24 = vcombine.high %v278_v10, %v294_v11  ;;  %v309_v25 = vld [vmem:[%s11360_s1 + $0x850] sm:$0xff]  ;;  %v310_v28 = vld [vmem:[%s11360_s1 + $0x858] sm:$0xff]  ;;  %v7475_v59 = vcombine.low %v277_v6, %v293_v7  ;;  %v7477_v30 = vcombine.low %v278_v10, %v294_v11 }
 0x151   :  { %v325_v26 = vld [vmem:[%s11360_s1 + $0x8d0] sm:$0xff]  ;;  %v326_v56 = vld [vmem:[%s11360_s1 + $0x8d8] sm:$0xff] }
 0x152   :  { %3557 = vmatpush1.bf16.msra.mxu0 %v7347_v42  ;;  %v7508_v31 = vcombine.high %v309_v25, %v325_v26  ;;  %v7510_v32 = vcombine.high %v310_v28, %v326_v56  ;;  %v341_v33 = vld [vmem:[%s11360_s1 + $0x950] sm:$0xff]  ;;  %v342_v36 = vld [vmem:[%s11360_s1 + $0x958] sm:$0xff]  ;;  %v7507_v39 = vcombine.low %v309_v25, %v325_v26  ;;  %v7509_v40 = vcombine.low %v310_v28, %v326_v56 }
 0x153   :  { %3598 = vmatpush1.bf16.msra.mxu1 %v7349_v43  ;;  %3558 = vmatprep.subr.bf16.mxu0 %v7380_v44  ;;  %v357_v34 = vld [vmem:[%s11360_s1 + $0x9d0] sm:$0xff]  ;;  %v358_v38 = vld [vmem:[%s11360_s1 + $0x9d8] sm:$0xff] }
 0x154   :  { %3599 = vmatprep.subr.bf16.mxu1 %v7382_v45  ;;  %v7540_v41 = vcombine.high %v341_v33, %v357_v34  ;;  %v7542_v42 = vcombine.high %v342_v36, %v358_v38  ;;  %v373_v43 = vld [vmem:[%s11360_s1 + $0xa50] sm:$0xff]  ;;  %v374_v45 = vld [vmem:[%s11360_s1 + $0xa58] sm:$0xff]  ;;  %v7539_v48 = vcombine.low %v341_v33, %v357_v34  ;;  %v7541_v49 = vcombine.low %v342_v36, %v358_v38  ;;  %v55_v38 = vld [vmem:[%s11360_s1 + $0x60] sm:$0xff] }
 0x155   :  { %v389_v44 = vld [vmem:[%s11360_s1 + $0xad0] sm:$0xff]  ;;  %v390_v46 = vld [vmem:[%s11360_s1 + $0xad8] sm:$0xff] }
 0x156   :  { %3559 = vmatpush1.bf16.msra.mxu0 %v7379_v51  ;;  %v7572_v50 = vcombine.high %v373_v43, %v389_v44  ;;  %v7574_v51 = vcombine.high %v374_v45, %v390_v46  ;;  %v422_v55 = vld [vmem:[%s11360_s1 + $0xbd8] sm:$0xff]  ;;  %v7571_v58 = vcombine.low %v373_v43, %v389_v44  ;;  %v7573_v60 = vcombine.low %v374_v45, %v390_v46  ;;  %v469_v10 = vld [vmem:[%s11360_s1 + $0xd50] sm:$0xff]  ;;  %v87_v46 = vld [vmem:[%s11360_s1 + $0x160] sm:$0xff] }
 0x157   :  { %3600 = vmatpush1.bf16.msra.mxu1 %v7381_v52  ;;  %3560 = vmatprep.subr.bf16.mxu0 %v7412_v53  ;;  %v405_v52 = vld [vmem:[%s11360_s1 + $0xb50] sm:$0xff]  ;;  %v506_v57 = vld [vmem:[%s11360_s1 + $0xe78] sm:$0xff] }
 0x158   :  { %v3256_v4 = vpop.f32.mrb[4].mxu0  ;;  %3601 = vmatprep.subr.bf16.mxu1 %v7414_v54  ;;  %v3297_v8 = vpop.f32.mrb[4].mxu1  ;;  %v421_v53 = vld [vmem:[%s11360_s1 + $0xbd0] sm:$0xff]  ;;  %v406_v54 = vld [vmem:[%s11360_s1 + $0xb58] sm:$0xff] }
 0x159   :  { %v3258_v9 = vpop.f32.mrb[5].mxu0  ;;  %v3299_v13 = vpop.f32.mrb[5].mxu1  ;;  %v7604_v61 = vcombine.high %v405_v52, %v421_v53  ;;  %v7603_v6 = vcombine.low %v405_v52, %v421_v53  ;;  %v7605_v7 = vcombine.low %v406_v54, %v422_v55  ;;  %v485_v11 = vld [vmem:[%s11360_s1 + $0xdd0] sm:$0xff]  ;;  %v522_v62 = vld [vmem:[%s11360_s1 + $0xef8] sm:$0xff] }
 0x15a   :  { %v3845_v12 = vcombine.low %v3256_v4, %v3258_v9  ;;  %v3260_v14 = vpop.f32.mrb[6].mxu0  ;;  %3561 = vmatpush1.bf16.msra.mxu0 %v7411_v63  ;;  %v3846_v16 = vcombine.low %v3297_v8, %v3299_v13  ;;  %v3301_v17 = vpop.f32.mrb[6].mxu1  ;;  %v7606_v63 = vcombine.high %v406_v54, %v422_v55  ;;  %v438_v4 = vld [vmem:[%s11360_s1 + $0xc58] sm:$0xff]  ;;  %v533_v56 = vld [vmem:[%s11360_s1 + $0xf50] sm:$0xff]  ;;  %v119_v55 = vld [vmem:[%s11360_s1 + $0x260] sm:$0xff] }
 0x15b   :  { %3602 = vmatpush1.bf16.msra.mxu1 %v7413_v1  ;;  %v3261_v18 = vpop.f32.mrb[7].mxu0  ;;  %3562 = vmatprep.subr.bf16.mxu0 %v7444_v2  ;;  %v3302_v23 = vpop.f32.mrb[7].mxu1  ;;  %v437_v1 = vld [vmem:[%s11360_s1 + $0xc50] sm:$0xff]  ;;  %v486_v13 = vld [vmem:[%s11360_s1 + $0xdd8] sm:$0xff] }
 0x15c   :  { %v9782_v21 = vrot.slane %v3845_v12, %v9569_v35  ;;  %3603 = vmatprep.subr.bf16.mxu1 %v7446_v5  ;;  %v9791_v27 = vrot.slane %v3846_v16, %v9569_v35  ;;  %v453_v2 = vld [vmem:[%s11360_s1 + $0xcd0] sm:$0xff]  ;;  %v454_v5 = vld [vmem:[%s11360_s1 + $0xcd8] sm:$0xff]  ;;  %v7668_v16 = vcombine.high %v469_v10, %v485_v11 }
 0x15d   :  { %v7636_v8 = vcombine.high %v437_v1, %v453_v2  ;;  %v7638_v9 = vcombine.high %v438_v4, %v454_v5  ;;  %v470_v12 = vld [vmem:[%s11360_s1 + $0xd58] sm:$0xff]  ;;  %v7635_v14 = vcombine.low %v437_v1, %v453_v2  ;;  %v501_v18 = vld [vmem:[%s11360_s1 + $0xe50] sm:$0xff] }
 0x15e   :  { %3563 = vmatpush1.bf16.msra.mxu0 %v7443_v15  ;;  %v3861_v29 = vcombine.low %v9782_v21, %v9791_v27  ;;  %v7637_v15 = vcombine.low %v438_v4, %v454_v5  ;;  %v7670_v17 = vcombine.high %v470_v12, %v486_v13  ;;  %v518_v23 = vld [vmem:[%s11360_s1 + $0xed8] sm:$0xff]  ;;  %v7669_v25 = vcombine.low %v470_v12, %v486_v13  ;;  %v151_v5 = vld [vmem:[%s11360_s1 + $0x360] sm:$0xff]  ;;  %v8376_v21 = vld [vmem:[%s11362_s3 + $0xe8] sm:$0xff]  }
 0x15f   :  { %3604 = vmatpush1.bf16.msra.mxu1 %v7445_v19  ;;  %3564 = vmatprep.subr.bf16.mxu0 %v7476_v20  ;;  %v517_v19 = vld [vmem:[%s11360_s1 + $0xed0] sm:$0xff]  ;;  %v502_v20 = vld [vmem:[%s11360_s1 + $0xe58] sm:$0xff]  ;;  %v183_v13 = vld [vmem:[%s11360_s1 + $0x460] sm:$0xff] }
 0x160   :  { %3605 = vmatprep.subr.bf16.mxu1 %v7478_v24  ;;  %v7667_v24 = vcombine.low %v469_v10, %v485_v11  ;;  %v7700_v26 = vcombine.high %v501_v18, %v517_v19  ;;  %v7702_v28 = vcombine.high %v502_v20, %v518_v23  ;;  %v7701_v33 = vcombine.low %v502_v20, %v518_v23  ;;  %v215_v23 = vld [vmem:[%s11360_s1 + $0x560] sm:$0xff] }
 0x162   :  { %3565 = vmatpush1.bf16.msra.mxu0 %v7475_v59  ;;  %v549_v59 = vld [vmem:[%s11360_s1 + $0xfd0] sm:$0xff] }
 0x163   :  { %3606 = vmatpush1.bf16.msra.mxu1 %v7477_v30  ;;  %3566 = vmatprep.subr.bf16.mxu0 %v7508_v31  ;;  %v534_v30 = vld [vmem:[%s11360_s1 + $0xf58] sm:$0xff]  ;;  %v7732_v34 = vcombine.high %v533_v56, %v549_v59 }
 0x164   :  { %3607 = vmatprep.subr.bf16.mxu1 %v7510_v32  ;;  %v550_v31 = vld [vmem:[%s11360_s1 + $0xfd8] sm:$0xff]  ;;  %v7699_v32 = vcombine.low %v501_v18, %v517_v19 }
 0x165   :  { %v7734_v36 = vcombine.high %v534_v30, %v550_v31  ;;  %v7733_v43 = vcombine.low %v534_v30, %v550_v31  ;;  %v247_v31 = vld [vmem:[%s11360_s1 + $0x660] sm:$0xff] }
 0x166   :  { %3567 = vmatpush1.bf16.msra.mxu0 %v7507_v39  ;;  %v71_v39 = vld [vmem:[%s11360_s1 + $0xe0] sm:$0xff] }
 0x167   :  { %3608 = vmatpush1.bf16.msra.mxu1 %v7509_v40  ;;  %3568 = vmatprep.subr.bf16.mxu0 %v7540_v41  ;;  %v56_v40 = vld [vmem:[%s11360_s1 + $0x68] sm:$0xff]  ;;  %v7256_v44 = vcombine.high %v55_v38, %v71_v39 }
 0x168   :  { %3609 = vmatprep.subr.bf16.mxu1 %v7542_v42  ;;  %v72_v41 = vld [vmem:[%s11360_s1 + $0xe8] sm:$0xff]  ;;  %v7731_v42 = vcombine.low %v533_v56, %v549_v59 }
 0x169   :  { %v7258_v45 = vcombine.high %v56_v40, %v72_v41  ;;  %v7257_v52 = vcombine.low %v56_v40, %v72_v41 }
 0x16a   :  { %3569 = vmatpush1.bf16.msra.mxu0 %v7539_v48  ;;  %v103_v48 = vld [vmem:[%s11360_s1 + $0x1e0] sm:$0xff] }
 0x16b   :  { %3610 = vmatpush1.bf16.msra.mxu1 %v7541_v49  ;;  %3570 = vmatprep.subr.bf16.mxu0 %v7572_v50  ;;  %v88_v49 = vld [vmem:[%s11360_s1 + $0x168] sm:$0xff]  ;;  %v7288_v53 = vcombine.high %v87_v46, %v103_v48 }
 0x16c   :  { %3611 = vmatprep.subr.bf16.mxu1 %v7574_v51  ;;  %v104_v50 = vld [vmem:[%s11360_s1 + $0x1e8] sm:$0xff]  ;;  %v7255_v51 = vcombine.low %v55_v38, %v71_v39 }
 0x16d   :  { %v7290_v54 = vcombine.high %v88_v49, %v104_v50  ;;  %v7289_v1 = vcombine.low %v88_v49, %v104_v50 }
 0x16e   :  { %3571 = vmatpush1.bf16.msra.mxu0 %v7571_v58  ;;  %v135_v58 = vld [vmem:[%s11360_s1 + $0x2e0] sm:$0xff] }
 0x16f   :  { %3612 = vmatpush1.bf16.msra.mxu1 %v7573_v60  ;;  %3572 = vmatprep.subr.bf16.mxu0 %v7604_v61  ;;  %v120_v60 = vld [vmem:[%s11360_s1 + $0x268] sm:$0xff]  ;;  %v7320_v2 = vcombine.high %v119_v55, %v135_v58 }
 0x170   :  { %3613 = vmatprep.subr.bf16.mxu1 %v7606_v63  ;;  %v136_v61 = vld [vmem:[%s11360_s1 + $0x2e8] sm:$0xff]  ;;  %v7287_v63 = vcombine.low %v87_v46, %v103_v48 }
 0x171   :  { %v7322_v4 = vcombine.high %v120_v60, %v136_v61  ;;  %v7321_v10 = vcombine.low %v120_v60, %v136_v61  ;;  %v280_v46 = vld [vmem:[%s11360_s1 + $0x768] sm:$0xff] }
 0x172   :  { %3573 = vmatpush1.bf16.msra.mxu0 %v7603_v6  ;;  %v167_v6 = vld [vmem:[%s11360_s1 + $0x3e0] sm:$0xff]  ;;  %v296_v48 = vld [vmem:[%s11360_s1 + $0x7e8] sm:$0xff] }
 0x173   :  { %3614 = vmatpush1.bf16.msra.mxu1 %v7605_v7  ;;  %3574 = vmatprep.subr.bf16.mxu0 %v7636_v8  ;;  %v152_v7 = vld [vmem:[%s11360_s1 + $0x368] sm:$0xff]  ;;  %v7352_v11 = vcombine.high %v151_v5, %v167_v6 }
 0x174   :  { %3615 = vmatprep.subr.bf16.mxu1 %v7638_v9  ;;  %v168_v8 = vld [vmem:[%s11360_s1 + $0x3e8] sm:$0xff]  ;;  %v7319_v9 = vcombine.low %v119_v55, %v135_v58 }
 0x175   :  { %v7354_v12 = vcombine.high %v152_v7, %v168_v8  ;;  %v7353_v18 = vcombine.low %v152_v7, %v168_v8  ;;  %v328_v7 = vld [vmem:[%s11360_s1 + $0x8e8] sm:$0xff] }
 0x176   :  { %3575 = vmatpush1.bf16.msra.mxu0 %v7635_v14  ;;  %v199_v14 = vld [vmem:[%s11360_s1 + $0x4e0] sm:$0xff] }
 0x177   :  { %3616 = vmatpush1.bf16.msra.mxu1 %v7637_v15  ;;  %3576 = vmatprep.subr.bf16.mxu0 %v7668_v16  ;;  %v184_v15 = vld [vmem:[%s11360_s1 + $0x468] sm:$0xff]  ;;  %v7384_v19 = vcombine.high %v183_v13, %v199_v14 }
 0x178   :  { %3617 = vmatprep.subr.bf16.mxu1 %v7670_v17  ;;  %v200_v16 = vld [vmem:[%s11360_s1 + $0x4e8] sm:$0xff]  ;;  %v7351_v17 = vcombine.low %v151_v5, %v167_v6 }
 0x179   :  { %v7386_v20 = vcombine.high %v184_v15, %v200_v16  ;;  %v7385_v56 = vcombine.low %v184_v15, %v200_v16  ;;  %v312_v6 = vld [vmem:[%s11360_s1 + $0x868] sm:$0xff] }
 0x17a   :  { %3577 = vmatpush1.bf16.msra.mxu0 %v7667_v24  ;;  %v231_v24 = vld [vmem:[%s11360_s1 + $0x5e0] sm:$0xff]  ;;  %v344_v15 = vld [vmem:[%s11360_s1 + $0x968] sm:$0xff] }
 0x17b   :  { %3618 = vmatpush1.bf16.msra.mxu1 %v7669_v25  ;;  %3578 = vmatprep.subr.bf16.mxu0 %v7700_v26  ;;  %v216_v25 = vld [vmem:[%s11360_s1 + $0x568] sm:$0xff]  ;;  %v7416_v59 = vcombine.high %v215_v23, %v231_v24 }
 0x17c   :  { %3619 = vmatprep.subr.bf16.mxu1 %v7702_v28  ;;  %v232_v26 = vld [vmem:[%s11360_s1 + $0x5e8] sm:$0xff]  ;;  %v7383_v28 = vcombine.low %v183_v13, %v199_v14  ;;  %v343_v13 = vld [vmem:[%s11360_s1 + $0x960] sm:$0xff] }
 0x17d   :  { %v7418_v30 = vcombine.high %v216_v25, %v232_v26  ;;  %v7417_v38 = vcombine.low %v216_v25, %v232_v26  ;;  %v359_v14 = vld [vmem:[%s11360_s1 + $0x9e0] sm:$0xff]  ;;  %v360_v16 = vld [vmem:[%s11360_s1 + $0x9e8] sm:$0xff] }
 0x17e   :  { %3579 = vmatpush1.bf16.msra.mxu0 %v7699_v32  ;;  %v263_v32 = vld [vmem:[%s11360_s1 + $0x6e0] sm:$0xff]  ;;  %v376_v25 = vld [vmem:[%s11360_s1 + $0xa68] sm:$0xff] }
 0x17f   :  { %3620 = vmatpush1.bf16.msra.mxu1 %v7701_v33  ;;  %3580 = vmatprep.subr.bf16.mxu0 %v7732_v34  ;;  %v248_v33 = vld [vmem:[%s11360_s1 + $0x668] sm:$0xff]  ;;  %v7448_v39 = vcombine.high %v247_v31, %v263_v32 }
 0x180   :  { %3621 = vmatprep.subr.bf16.mxu1 %v7734_v36  ;;  %v264_v34 = vld [vmem:[%s11360_s1 + $0x6e8] sm:$0xff]  ;;  %v7415_v36 = vcombine.low %v215_v23, %v231_v24  ;;  %v375_v23 = vld [vmem:[%s11360_s1 + $0xa60] sm:$0xff] }
 0x181   :  { %v7450_v41 = vcombine.high %v248_v33, %v264_v34  ;;  %v7449_v58 = vcombine.low %v248_v33, %v264_v34  ;;  %v391_v24 = vld [vmem:[%s11360_s1 + $0xae0] sm:$0xff]  ;;  %v392_v26 = vld [vmem:[%s11360_s1 + $0xae8] sm:$0xff] }
 0x182   :  { %3581 = vmatpush1.bf16.msra.mxu0 %v7731_v42  ;;  %v279_v42 = vld [vmem:[%s11360_s1 + $0x760] sm:$0xff]  ;;  %v408_v33 = vld [vmem:[%s11360_s1 + $0xb68] sm:$0xff] }
 0x183   :  { %3622 = vmatpush1.bf16.msra.mxu1 %v7733_v43  ;;  %3632 = vmatprep.subr.bf16.mxu0 %v7256_v44  ;;  %v295_v43 = vld [vmem:[%s11360_s1 + $0x7e0] sm:$0xff]  ;;  %v424_v34 = vld [vmem:[%s11360_s1 + $0xbe8] sm:$0xff] }
 0x184   :  { %3673 = vmatprep.subr.bf16.mxu1 %v7258_v45  ;;  %v7480_v60 = vcombine.high %v279_v42, %v295_v43  ;;  %v7479_v8 = vcombine.low %v279_v42, %v295_v43  ;;  %v455_v42 = vld [vmem:[%s11360_s1 + $0xce0] sm:$0xff]  ;;  %v440_v43 = vld [vmem:[%s11360_s1 + $0xc68] sm:$0xff] }
 0x185   :  { %3583 = vmatmul.mubr.bf16.vlgmr.msra.gmra.mrb[20].mxu0 %v8902_v22 }
 0x186   :  { %3624 = vmatmul.mubr.bf16.vlgmr.msra.gmra.mrb[20].mxu1 %v8902_v22  ;;  %3633 = vmatpush1.bf16.msra.mxu0 %v7255_v51 }
 0x187   :  { %3674 = vmatpush1.bf16.msra.mxu1 %v7257_v52  ;;  %3634 = vmatprep.subr.bf16.mxu0 %v7288_v53  ;;  %v7447_v52 = vcombine.low %v247_v31, %v263_v32  ;;  %v407_v31 = vld [vmem:[%s11360_s1 + $0xb60] sm:$0xff] }
 0x188   :  { %3675 = vmatprep.subr.bf16.mxu1 %v7290_v54  ;;  %3664 = vmatprep.mubr.bf16.mxu0 %v8782_v3  ;;  %v423_v32 = vld [vmem:[%s11360_s1 + $0xbe0] sm:$0xff] }
 0x189   :  { %3705 = vmatprep.mubr.bf16.mxu1 %v8782_v3 }
 0x18a   :  { %3635 = vmatpush1.bf16.msra.mxu0 %v7287_v63 }
 0x18b   :  { %3676 = vmatpush1.bf16.msra.mxu1 %v7289_v1  ;;  %3636 = vmatprep.subr.bf16.mxu0 %v7320_v2  ;;  %v7482_v1 = vcombine.high %v280_v46, %v296_v48  ;;  %v311_v2 = vld [vmem:[%s11360_s1 + $0x860] sm:$0xff] }
 0x18c   :  { %3677 = vmatprep.subr.bf16.mxu1 %v7322_v4  ;;  %v327_v4 = vld [vmem:[%s11360_s1 + $0x8e0] sm:$0xff] }
 0x18e   :  { %3637 = vmatpush1.bf16.msra.mxu0 %v7319_v9 }
 0x18f   :  { %3678 = vmatpush1.bf16.msra.mxu1 %v7321_v10  ;;  %3638 = vmatprep.subr.bf16.mxu0 %v7352_v11  ;;  %v7481_v10 = vcombine.low %v280_v46, %v296_v48  ;;  %v7512_v11 = vcombine.high %v311_v2, %v327_v4  ;;  %v7609_v46 = vcombine.low %v408_v33, %v424_v34 }
 0x190   :  { %3679 = vmatprep.subr.bf16.mxu1 %v7354_v12  ;;  %v7514_v12 = vcombine.high %v312_v6, %v328_v7 }
 0x192   :  { %3639 = vmatpush1.bf16.msra.mxu0 %v7351_v17  ;;  %v7511_v17 = vcombine.low %v311_v2, %v327_v4  ;;  %v504_v2 = vld [vmem:[%s11360_s1 + $0xe68] sm:$0xff] }
 0x193   :  { %3680 = vmatpush1.bf16.msra.mxu1 %v7353_v18  ;;  %3640 = vmatprep.subr.bf16.mxu0 %v7384_v19  ;;  %v7513_v18 = vcombine.low %v312_v6, %v328_v7  ;;  %v7544_v19 = vcombine.high %v343_v13, %v359_v14  ;;  %v520_v4 = vld [vmem:[%s11360_s1 + $0xee8] sm:$0xff] }
 0x194   :  { %3681 = vmatprep.subr.bf16.mxu1 %v7386_v20  ;;  %v7546_v20 = vcombine.high %v344_v15, %v360_v16 }
 0x196   :  { %3641 = vmatpush1.bf16.msra.mxu0 %v7383_v28  ;;  %v7543_v28 = vcombine.low %v343_v13, %v359_v14  ;;  %v536_v13 = vld [vmem:[%s11360_s1 + $0xf68] sm:$0xff] }
 0x197   :  { %3682 = vmatpush1.bf16.msra.mxu1 %v7385_v56  ;;  %3642 = vmatprep.subr.bf16.mxu0 %v7416_v59  ;;  %v7545_v56 = vcombine.low %v344_v15, %v360_v16  ;;  %v7576_v59 = vcombine.high %v375_v23, %v391_v24  ;;  %v552_v14 = vld [vmem:[%s11360_s1 + $0xfe8] sm:$0xff]  ;;  %v7705_v16 = vcombine.low %v504_v2, %v520_v4 }
 0x198   :  { %v3338_v40 = vpop.f32.mrb[8].mxu0  ;;  %3683 = vmatprep.subr.bf16.mxu1 %v7418_v30  ;;  %v3379_v44 = vpop.f32.mrb[8].mxu1  ;;  %v7578_v30 = vcombine.high %v376_v25, %v392_v26 }
 0x199   :  { %v3340_v45 = vpop.f32.mrb[9].mxu0  ;;  %v3381_v50 = vpop.f32.mrb[9].mxu1 }
 0x19a   :  { %v3862_v49 = vcombine.low %v3338_v40, %v3340_v45  ;;  %v3342_v51 = vpop.f32.mrb[10].mxu0  ;;  %3643 = vmatpush1.bf16.msra.mxu0 %v7415_v36  ;;  %v3863_v53 = vcombine.low %v3379_v44, %v3381_v50  ;;  %v3383_v54 = vpop.f32.mrb[10].mxu1  ;;  %v7575_v36 = vcombine.low %v375_v23, %v391_v24  ;;  %v7610_v40 = vcombine.high %v408_v33, %v424_v34  ;;  %v456_v44 = vld [vmem:[%s11360_s1 + $0xce8] sm:$0xff]  ;;  %v471_v50 = vld [vmem:[%s11360_s1 + $0xd60] sm:$0xff]  ;;  %v58_v23 = vld [vmem:[%s11360_s1 + $0x78] sm:$0xff] }
 0x19b   :  { %3684 = vmatpush1.bf16.msra.mxu1 %v7417_v38  ;;  %v3343_v55 = vpop.f32.mrb[11].mxu0  ;;  %3644 = vmatprep.subr.bf16.mxu0 %v7448_v39  ;;  %v3384_v63 = vpop.f32.mrb[11].mxu1  ;;  %v7577_v38 = vcombine.low %v376_v25, %v392_v26  ;;  %v7608_v39 = vcombine.high %v407_v31, %v423_v32  ;;  %v7607_v45 = vcombine.low %v407_v31, %v423_v32  ;;  %v487_v51 = vld [vmem:[%s11360_s1 + $0xde0] sm:$0xff]  ;;  %v74_v24 = vld [vmem:[%s11360_s1 + $0xf8] sm:$0xff] }
 0x19c   :  { %v9986_v61 = vrot.slane %v3862_v49, %v9569_v35  ;;  %3685 = vmatprep.subr.bf16.mxu1 %v7450_v41  ;;  %v9995_v5 = vrot.slane %v3863_v53, %v9569_v35  ;;  %v439_v41 = vld [vmem:[%s11360_s1 + $0xc60] sm:$0xff]  ;;  %v7642_v49 = vcombine.high %v440_v43, %v456_v44  ;;  %v488_v53 = vld [vmem:[%s11360_s1 + $0xde8] sm:$0xff]  ;;  %v7641_v55 = vcombine.low %v440_v43, %v456_v44  ;;  %v90_v31 = vld [vmem:[%s11360_s1 + $0x178] sm:$0xff] }
 0x19d   :  { %v7640_v48 = vcombine.high %v439_v41, %v455_v42  ;;  %v7639_v54 = vcombine.low %v439_v41, %v455_v42  ;;  %v503_v63 = vld [vmem:[%s11360_s1 + $0xe60] sm:$0xff]  ;;  %v7671_v6 = vcombine.low %v471_v50, %v487_v51  ;;  %v7737_v26 = vcombine.low %v536_v13, %v552_v14  ;;  %v106_v32 = vld [vmem:[%s11360_s1 + $0x1f8] sm:$0xff] }
 0x19e   :  { %3645 = vmatpush1.bf16.msra.mxu0 %v7447_v52  ;;  %v3878_v9 = vcombine.low %v9986_v61, %v9995_v5  ;;  %v472_v52 = vld [vmem:[%s11360_s1 + $0xd68] sm:$0xff]  ;;  %v7261_v34 = vcombine.low %v58_v23, %v74_v24  ;;  %v122_v41 = vld [vmem:[%s11360_s1 + $0x278] sm:$0xff]  ;;  %v7293_v44 = vcombine.low %v90_v31, %v106_v32 }
 0x19f   :  { %3686 = vmatpush1.bf16.msra.mxu1 %v7449_v58  ;;  %3646 = vmatprep.subr.bf16.mxu0 %v7480_v60  ;;  %v7672_v58 = vcombine.high %v471_v50, %v487_v51  ;;  %v7674_v60 = vcombine.high %v472_v52, %v488_v53  ;;  %v7673_v7 = vcombine.low %v472_v52, %v488_v53  ;;  %v138_v42 = vld [vmem:[%s11360_s1 + $0x2f8] sm:$0xff]  ;;  %v8408_v61 = vld [vmem:[%s11362_s3 + $0x1e8] sm:$0xff]  }
 0x1a0   :  { %3687 = vmatprep.subr.bf16.mxu1 %v7482_v1  ;;  %v519_v1 = vld [vmem:[%s11360_s1 + $0xee0] sm:$0xff]  ;;  %v154_v50 = vld [vmem:[%s11360_s1 + $0x378] sm:$0xff]  ;;  %v7325_v53 = vcombine.low %v122_v41, %v138_v42 }
 0x1a1   :  { %v7703_v15 = vcombine.low %v503_v63, %v519_v1  ;;  %v170_v51 = vld [vmem:[%s11360_s1 + $0x3f8] sm:$0xff] }
 0x1a2   :  { %3647 = vmatpush1.bf16.msra.mxu0 %v7479_v8  ;;  %v7704_v8 = vcombine.high %v503_v63, %v519_v1  ;;  %v202_v63 = vld [vmem:[%s11360_s1 + $0x4f8] sm:$0xff] }
 0x1a3   :  { %3688 = vmatpush1.bf16.msra.mxu1 %v7481_v10  ;;  %3648 = vmatprep.subr.bf16.mxu0 %v7512_v11  ;;  %v7706_v10 = vcombine.high %v504_v2, %v520_v4  ;;  %v535_v11 = vld [vmem:[%s11360_s1 + $0xf60] sm:$0xff]  ;;  %v7357_v2 = vcombine.low %v154_v50, %v170_v51 }
 0x1a4   :  { %3689 = vmatprep.subr.bf16.mxu1 %v7514_v12  ;;  %v551_v12 = vld [vmem:[%s11360_s1 + $0xfe0] sm:$0xff] }
 0x1a5   :  { %v7735_v25 = vcombine.low %v535_v11, %v551_v12 }
 0x1a6   :  { %3649 = vmatpush1.bf16.msra.mxu0 %v7511_v17  ;;  %v7736_v17 = vcombine.high %v535_v11, %v551_v12  ;;  %v234_v11 = vld [vmem:[%s11360_s1 + $0x5f8] sm:$0xff] }
 0x1a7   :  { %3690 = vmatpush1.bf16.msra.mxu1 %v7513_v18  ;;  %3650 = vmatprep.subr.bf16.mxu0 %v7544_v19  ;;  %v7738_v18 = vcombine.high %v536_v13, %v552_v14  ;;  %v57_v19 = vld [vmem:[%s11360_s1 + $0x70] sm:$0xff] }
 0x1a8   :  { %3691 = vmatprep.subr.bf16.mxu1 %v7546_v20  ;;  %v73_v20 = vld [vmem:[%s11360_s1 + $0xf0] sm:$0xff] }
 0x1a9   :  { %v7259_v33 = vcombine.low %v57_v19, %v73_v20 }
 0x1aa   :  { %3651 = vmatpush1.bf16.msra.mxu0 %v7543_v28  ;;  %v7260_v28 = vcombine.high %v57_v19, %v73_v20  ;;  %v266_v19 = vld [vmem:[%s11360_s1 + $0x6f8] sm:$0xff] }
 0x1ab   :  { %3692 = vmatpush1.bf16.msra.mxu1 %v7545_v56  ;;  %3652 = vmatprep.subr.bf16.mxu0 %v7576_v59  ;;  %v7262_v56 = vcombine.high %v58_v23, %v74_v24  ;;  %v89_v59 = vld [vmem:[%s11360_s1 + $0x170] sm:$0xff] }
 0x1ac   :  { %3693 = vmatprep.subr.bf16.mxu1 %v7578_v30  ;;  %v105_v30 = vld [vmem:[%s11360_s1 + $0x1f0] sm:$0xff] }
 0x1ad   :  { %v7291_v43 = vcombine.low %v89_v59, %v105_v30 }
 0x1ae   :  { %3653 = vmatpush1.bf16.msra.mxu0 %v7575_v36  ;;  %v7292_v36 = vcombine.high %v89_v59, %v105_v30 }
 0x1af   :  { %3694 = vmatpush1.bf16.msra.mxu1 %v7577_v38  ;;  %3654 = vmatprep.subr.bf16.mxu0 %v7608_v39  ;;  %v7294_v38 = vcombine.high %v90_v31, %v106_v32  ;;  %v121_v39 = vld [vmem:[%s11360_s1 + $0x270] sm:$0xff]  ;;  %v282_v31 = vld [vmem:[%s11360_s1 + $0x778] sm:$0xff] }
 0x1b0   :  { %3695 = vmatprep.subr.bf16.mxu1 %v7610_v40  ;;  %v137_v40 = vld [vmem:[%s11360_s1 + $0x2f0] sm:$0xff]  ;;  %v298_v32 = vld [vmem:[%s11360_s1 + $0x7f8] sm:$0xff] }
 0x1b1   :  { %v7323_v52 = vcombine.low %v121_v39, %v137_v40 }
 0x1b2   :  { %3655 = vmatpush1.bf16.msra.mxu0 %v7607_v45  ;;  %v7324_v45 = vcombine.high %v121_v39, %v137_v40 }
 0x1b3   :  { %3696 = vmatpush1.bf16.msra.mxu1 %v7609_v46  ;;  %3656 = vmatprep.subr.bf16.mxu0 %v7640_v48  ;;  %v7326_v46 = vcombine.high %v122_v41, %v138_v42  ;;  %v153_v48 = vld [vmem:[%s11360_s1 + $0x370] sm:$0xff] }
 0x1b4   :  { %3697 = vmatprep.subr.bf16.mxu1 %v7642_v49  ;;  %v169_v49 = vld [vmem:[%s11360_s1 + $0x3f0] sm:$0xff] }
 0x1b5   :  { %v7355_v1 = vcombine.low %v153_v48, %v169_v49 }
 0x1b6   :  { %3657 = vmatpush1.bf16.msra.mxu0 %v7639_v54  ;;  %v7356_v54 = vcombine.high %v153_v48, %v169_v49  ;;  %v313_v48 = vld [vmem:[%s11360_s1 + $0x870] sm:$0xff] }
 0x1b7   :  { %3698 = vmatpush1.bf16.msra.mxu1 %v7641_v55  ;;  %3658 = vmatprep.subr.bf16.mxu0 %v7672_v58  ;;  %v7358_v55 = vcombine.high %v154_v50, %v170_v51  ;;  %v185_v58 = vld [vmem:[%s11360_s1 + $0x470] sm:$0xff]  ;;  %v10199_v50 = vsub.s32 0, %v8745_v47 }
 0x1b8   :  { %3699 = vmatprep.subr.bf16.mxu1 %v7674_v60  ;;  %v201_v60 = vld [vmem:[%s11360_s1 + $0x4f0] sm:$0xff] }
 0x1b9   :  { %v7388_v4 = vcombine.high %v185_v58, %v201_v60  ;;  %v7387_v12 = vcombine.low %v185_v58, %v201_v60  ;;  %v329_v49 = vld [vmem:[%s11360_s1 + $0x8f0] sm:$0xff]  ;;  %v10219_v58 = vsub.s32 2, %v8745_v47  ;;  %v10222_v60 = vsub.s32 3, %v8745_v47 }
 0x1ba   :  { %3659 = vmatpush1.bf16.msra.mxu0 %v7671_v6 }
 0x1bb   :  { %3700 = vmatpush1.bf16.msra.mxu1 %v7673_v7  ;;  %3660 = vmatprep.subr.bf16.mxu0 %v7704_v8  ;;  %v217_v7 = vld [vmem:[%s11360_s1 + $0x570] sm:$0xff] }
 0x1bc   :  { %3701 = vmatprep.subr.bf16.mxu1 %v7706_v10  ;;  %v233_v8 = vld [vmem:[%s11360_s1 + $0x5f0] sm:$0xff]  ;;  %v218_v10 = vld [vmem:[%s11360_s1 + $0x578] sm:$0xff] }
 0x1bd   :  { %v7420_v14 = vcombine.high %v217_v7, %v233_v8  ;;  %v7419_v20 = vcombine.low %v217_v7, %v233_v8  ;;  %v7421_v23 = vcombine.low %v218_v10, %v234_v11  ;;  %v361_v7 = vld [vmem:[%s11360_s1 + $0x9f0] sm:$0xff] }
 0x1be   :  { %3661 = vmatpush1.bf16.msra.mxu0 %v7703_v15  ;;  %v7422_v15 = vcombine.high %v218_v10, %v234_v11  ;;  %v346_v10 = vld [vmem:[%s11360_s1 + $0x978] sm:$0xff] }
 0x1bf   :  { %3702 = vmatpush1.bf16.msra.mxu1 %v7705_v16  ;;  %3662 = vmatprep.subr.bf16.mxu0 %v7736_v17  ;;  %v249_v16 = vld [vmem:[%s11360_s1 + $0x670] sm:$0xff]  ;;  %v362_v11 = vld [vmem:[%s11360_s1 + $0x9f8] sm:$0xff] }
 0x1c0   :  { %3703 = vmatprep.subr.bf16.mxu1 %v7738_v18  ;;  %v265_v17 = vld [vmem:[%s11360_s1 + $0x6f0] sm:$0xff]  ;;  %v250_v18 = vld [vmem:[%s11360_s1 + $0x678] sm:$0xff] }
 0x1c1   :  { %v7452_v24 = vcombine.high %v249_v16, %v265_v17  ;;  %v7453_v42 = vcombine.low %v250_v18, %v266_v19 }
 0x1c2   :  { %3663 = vmatpush1.bf16.msra.mxu0 %v7735_v25 }
 0x1c3   :  { %3704 = vmatpush1.bf16.msra.mxu1 %v7737_v26  ;;  %3714 = vmatprep.subr.bf16.mxu0 %v7260_v28  ;;  %v7454_v26 = vcombine.high %v250_v18, %v266_v19  ;;  %v281_v28 = vld [vmem:[%s11360_s1 + $0x770] sm:$0xff]  ;;  %v7550_v18 = vcombine.high %v346_v10, %v362_v11 }
 0x1c4   :  { %3755 = vmatprep.subr.bf16.mxu1 %v7262_v56  ;;  %v297_v56 = vld [vmem:[%s11360_s1 + $0x7f0] sm:$0xff] }
 0x1c5   :  { %3665 = vmatmul.mubr.bf16.vlgmr.msra.gmra.mrb[24].mxu0 %v8902_v22  ;;  %v377_v19 = vld [vmem:[%s11360_s1 + $0xa70] sm:$0xff] }
 0x1c6   :  { %3706 = vmatmul.mubr.bf16.vlgmr.msra.gmra.mrb[24].mxu1 %v8902_v22  ;;  %3715 = vmatpush1.bf16.msra.mxu0 %v7259_v33 }
 0x1c7   :  { %3756 = vmatpush1.bf16.msra.mxu1 %v7261_v34  ;;  %3716 = vmatprep.subr.bf16.mxu0 %v7292_v36 }
 0x1c8   :  { %3757 = vmatprep.subr.bf16.mxu1 %v7294_v38  ;;  %3746 = vmatprep.mubr.bf16.mxu0 %v8782_v3  ;;  %v7451_v38 = vcombine.low %v249_v16, %v265_v17 }
 0x1c9   :  { %3787 = vmatprep.mubr.bf16.mxu1 %v8782_v3  ;;  %v186_v3 = vld [vmem:[%s11360_s1 + $0x478] sm:$0xff] }
 0x1ca   :  { %3717 = vmatpush1.bf16.msra.mxu0 %v7291_v43  ;;  %v7390_v6 = vcombine.high %v186_v3, %v202_v63  ;;  %v7389_v13 = vcombine.low %v186_v3, %v202_v63  ;;  %v7484_v43 = vcombine.high %v281_v28, %v297_v56  ;;  %v7483_v3 = vcombine.low %v281_v28, %v297_v56 }
 0x1cb   :  { %3758 = vmatpush1.bf16.msra.mxu1 %v7293_v44  ;;  %3718 = vmatprep.subr.bf16.mxu0 %v7324_v45  ;;  %v7549_v56 = vcombine.low %v346_v10, %v362_v11 }
 0x1cc   :  { %3759 = vmatprep.subr.bf16.mxu1 %v7326_v46  ;;  %v7486_v46 = vcombine.high %v282_v31, %v298_v32 }
 0x1ce   :  { %3719 = vmatpush1.bf16.msra.mxu0 %v7323_v52  ;;  %v314_v52 = vld [vmem:[%s11360_s1 + $0x878] sm:$0xff] }
 0x1cf   :  { %3760 = vmatpush1.bf16.msra.mxu1 %v7325_v53  ;;  %3720 = vmatprep.subr.bf16.mxu0 %v7356_v54  ;;  %v330_v53 = vld [vmem:[%s11360_s1 + $0x8f8] sm:$0xff]  ;;  %v10213_v54 = vld [vmem:[%s11361_s2] sm:$0xff] }
 0x1d0   :  { %3761 = vmatprep.subr.bf16.mxu1 %v7358_v55  ;;  %v10216_v55 = vsub.s32 1, %v8745_v47  ;;  %v4010_v8 = vrot.slane %v10213_v54, %v10199_v50  ;;  %v7517_v16 = vcombine.low %v314_v52, %v330_v53 }
 0x1d2   :  { %3721 = vmatpush1.bf16.msra.mxu0 %v7355_v1  ;;  %v7485_v1 = vcombine.low %v282_v31, %v298_v32  ;;  %v409_v31 = vld [vmem:[%s11360_s1 + $0xb70] sm:$0xff] }
 0x1d3   :  { %3762 = vmatpush1.bf16.msra.mxu1 %v7357_v2  ;;  %3722 = vmatprep.subr.bf16.mxu0 %v7388_v4  ;;  %v7516_v2 = vcombine.high %v313_v48, %v329_v49  ;;  %v7518_v4 = vcombine.high %v314_v52, %v330_v53  ;;  %v425_v32 = vld [vmem:[%s11360_s1 + $0xbf0] sm:$0xff] }
 0x1d4   :  { %3763 = vmatprep.subr.bf16.mxu1 %v7390_v6  ;;  %v345_v6 = vld [vmem:[%s11360_s1 + $0x970] sm:$0xff]  ;;  %v7611_v52 = vcombine.low %v409_v31, %v425_v32 }
 0x1d5   :  { %v7548_v17 = vcombine.high %v345_v6, %v361_v7  ;;  %v7547_v28 = vcombine.low %v345_v6, %v361_v7  ;;  %v474_v6 = vld [vmem:[%s11360_s1 + $0xd78] sm:$0xff] }
 0x1d6   :  { %3723 = vmatpush1.bf16.msra.mxu0 %v7387_v12  ;;  %v4014_v12 = vrot.slane %v10213_v54, %v10216_v55  ;;  %v490_v7 = vld [vmem:[%s11360_s1 + $0xdf8] sm:$0xff] }
 0x1d7   :  { %3764 = vmatpush1.bf16.msra.mxu1 %v7389_v13  ;;  %3724 = vmatprep.subr.bf16.mxu0 %v7420_v14  ;;  %v4018_v13 = vrot.slane %v10213_v54, %v10219_v58  ;;  %v4022_v14 = vrot.slane %v10213_v54, %v10222_v60 }
 0x1d8   :  { %v3420_v25 = vpop.f32.mrb[12].mxu0  ;;  %3765 = vmatprep.subr.bf16.mxu1 %v7422_v15  ;;  %v3461_v59 = vpop.f32.mrb[12].mxu1  ;;  %v7515_v15 = vcombine.low %v313_v48, %v329_v49  ;;  %v458_v48 = vld [vmem:[%s11360_s1 + $0xcf8] sm:$0xff] }
 0x1d9   :  { %v3422_v30 = vpop.f32.mrb[13].mxu0  ;;  %v3463_v34 = vpop.f32.mrb[13].mxu1 }
 0x1da   :  { %v3879_v33 = vcombine.low %v3420_v25, %v3422_v30  ;;  %v3424_v36 = vpop.f32.mrb[14].mxu0  ;;  %3725 = vmatpush1.bf16.msra.mxu0 %v7419_v20  ;;  %v3880_v39 = vcombine.low %v3461_v59, %v3463_v34  ;;  %v3465_v40 = vpop.f32.mrb[14].mxu1  ;;  %v393_v20 = vld [vmem:[%s11360_s1 + $0xaf0] sm:$0xff]  ;;  %v4135_v25 = vcombine.low %v4010_v8, %v4014_v12  ;;  %v426_v34 = vld [vmem:[%s11360_s1 + $0xbf8] sm:$0xff] }
 0x1db   :  { %3766 = vmatpush1.bf16.msra.mxu1 %v7421_v23  ;;  %v3425_v41 = vpop.f32.mrb[15].mxu0  ;;  %3726 = vmatprep.subr.bf16.mxu0 %v7452_v24  ;;  %v3466_v45 = vpop.f32.mrb[15].mxu1  ;;  %v378_v23 = vld [vmem:[%s11360_s1 + $0xa78] sm:$0xff]  ;;  %v7580_v59 = vcombine.high %v377_v19, %v393_v20 }
 0x1dc   :  { %v10190_v44 = vrot.slane %v3879_v33, %v9569_v35  ;;  %3767 = vmatprep.subr.bf16.mxu1 %v7454_v26  ;;  %v10202_v51 = vrot.slane %v3880_v39, %v9569_v35  ;;  %v394_v24 = vld [vmem:[%s11360_s1 + $0xaf8] sm:$0xff]  ;;  %v4136_v26 = vcombine.low %v4018_v13, %v4022_v14  ;;  %v4143_v36 = vrot.slane %v4135_v25, %v9569_v35  ;;  %v457_v45 = vld [vmem:[%s11360_s1 + $0xcf0] sm:$0xff] }
 0x1dd   :  { %v7582_v30 = vcombine.high %v378_v23, %v394_v24  ;;  %v410_v33 = vld [vmem:[%s11360_s1 + $0xb78] sm:$0xff]  ;;  %v7579_v39 = vcombine.low %v377_v19, %v393_v20  ;;  %v7581_v40 = vcombine.low %v378_v23, %v394_v24  ;;  %v7612_v41 = vcombine.high %v409_v31, %v425_v32  ;;  %v505_v14 = vld [vmem:[%s11360_s1 + $0xe70] sm:$0xff] }
 0x1de   :  { %3727 = vmatpush1.bf16.msra.mxu0 %v7451_v38  ;;  %v3895_v63 = vcombine.low %v10190_v44, %v10202_v51  ;;  %v4150_v38 = vrot.slane %v4136_v26, %v9569_v35  ;;  %v7613_v53 = vcombine.low %v410_v33, %v426_v34  ;;  %v7678_v13 = vcombine.high %v474_v6, %v490_v7  ;;  %v537_v20 = vld [vmem:[%s11360_s1 + $0xf70] sm:$0xff]  ;;  %v538_v24 = vld [vmem:[%s11360_s1 + $0xf78] sm:$0xff]  ;;  %v8440_v44 = vld [vmem:[%s11362_s3 + $0x2e8] sm:$0xff]  }
 0x1df   :  { %3768 = vmatpush1.bf16.msra.mxu1 %v7453_v42  ;;  %3728 = vmatprep.subr.bf16.mxu0 %v7484_v43  ;;  %v7614_v42 = vcombine.high %v410_v33, %v426_v34  ;;  %v441_v43 = vld [vmem:[%s11360_s1 + $0xc70] sm:$0xff]  ;;  %v7710_v19 = vcombine.high %v506_v57, %v522_v62  ;;  %v554_v25 = vld [vmem:[%s11360_s1 + $0xff8] sm:$0xff]  ;;  %v10324_v31 = vsub.s32 4, %v8745_v47  ;;  %v10327_v32 = vsub.s32 5, %v8745_v47 }
 0x1e0   :  { %3769 = vmatprep.subr.bf16.mxu1 %v7486_v46  ;;  %v442_v46 = vld [vmem:[%s11360_s1 + $0xc78] sm:$0xff]  ;;  %v4151_v49 = vcombine.low %v4143_v36, %v4150_v38  ;;  %v7643_v10 = vcombine.low %v441_v43, %v457_v45  ;;  %v553_v23 = vld [vmem:[%s11360_s1 + $0xff0] sm:$0xff]  ;;  %v10333_v34 = vsub.s32 6, %v8745_v47  ;;  %v10336_v36 = vsub.s32 7, %v8745_v47 }
 0x1e1   :  { %v7645_v11 = vcombine.low %v442_v46, %v458_v48  ;;  %v7739_v38 = vcombine.low %v537_v20, %v553_v23  ;;  %v4026_v47 = vrot.slane %v10213_v54, %v10324_v31 }
 0x1e2   :  { %3729 = vmatpush1.bf16.msra.mxu0 %v7483_v3  ;;  %v7644_v3 = vcombine.high %v441_v43, %v457_v45  ;;  %v4279_v8 = vadd.f32 %v4151_v49, %v3844_v0  ;;  %v4030_v45 = vrot.slane %v10213_v54, %v10327_v32  ;;  %v8357_v49 = vld [vmem:[%s11362_s3] sm:$0xff]  }
 0x1e3   :  { %3770 = vmatpush1.bf16.msra.mxu1 %v7485_v1  ;;  %3730 = vmatprep.subr.bf16.mxu0 %v7516_v2  ;;  %v7646_v1 = vcombine.high %v442_v46, %v458_v48  ;;  %v473_v2 = vld [vmem:[%s11360_s1 + $0xd70] sm:$0xff]  ;;  %v4034_v46 = vrot.slane %v10213_v54, %v10333_v34  ;;  %v4038_v48 = vrot.slane %v10213_v54, %v10336_v36 }
 0x1e4   :  { %3771 = vmatprep.subr.bf16.mxu1 %v7518_v4  ;;  %v489_v4 = vld [vmem:[%s11360_s1 + $0xdf0] sm:$0xff]  ;;  %v4287_v0 = vmax.f32 %v4279_v8, 0.0  ;;  %v8362_v8 = vld [vmem:[%s11362_s3 + $0x88] sm:$0xff]  }
 0x1e5   :  { %v7676_v12 = vcombine.high %v473_v2, %v489_v4 }
 0x1e6   :  { %3731 = vmatpush1.bf16.msra.mxu0 %v7515_v15  ;;  %v521_v15 = vld [vmem:[%s11360_s1 + $0xef0] sm:$0xff]  ;;  %v10330_v33 = vrot.slane %v4287_v0, %v9569_v35 }
 0x1e7   :  { %3772 = vmatpush1.bf16.msra.mxu1 %v7517_v16  ;;  %3732 = vmatprep.subr.bf16.mxu0 %v7548_v17  ;;  %v7675_v16 = vcombine.low %v473_v2, %v489_v4  ;;  %v7677_v17 = vcombine.low %v474_v6, %v490_v7  ;;  %v7707_v26 = vcombine.low %v505_v14, %v521_v15  ;;  %v8361_v7 = vld [vmem:[%s11362_s3 + $0x8] sm:$0xff]  }
 0x1e8   :  { %3773 = vmatprep.subr.bf16.mxu1 %v7550_v18  ;;  %v7708_v18 = vcombine.high %v505_v14, %v521_v15  ;;  %v4318_v43 = vcombine.high %v10330_v33, %v10330_v33  ;;  %v4152_v2 = vcombine.low %v4026_v47, %v4030_v45  ;;  %v4153_v4 = vcombine.low %v4034_v46, %v4038_v48  ;;  %v8366_v14 = vld [vmem:[%s11362_s3 + $0x90] sm:$0xff]   ;;  %v8367_v15 = vld [vmem:[%s11362_s3 + $0x58] sm:$0xff]  }
 0x1e9   :  { %v8382_v48 = vld [vmem:[%s11362_s3 + $0xb0] sm:$0xff]  }
 0x1ea   :  { %3733 = vmatpush1.bf16.msra.mxu0 %v7547_v28  ;;  %v4303_v28 = vcombine.high %v4287_v0, %v4287_v0  ;;  %v4472_v54 = vpack.c.bf16 %v4318_v43, %v4318_v43  ;;  %v8369_v0 = vld [vmem:[%s11362_s3 + $0x18] sm:$0xff]  }
 0x1eb   :  { %3774 = vmatpush1.bf16.msra.mxu1 %v7549_v56  ;;  %3734 = vmatprep.subr.bf16.mxu0 %v7580_v59  ;;  %v7709_v56 = vcombine.low %v506_v57, %v522_v62  ;;  %v7740_v59 = vcombine.high %v537_v20, %v553_v23  ;;  %v8368_v57 = vld [vmem:[%s11362_s3 + $0xd8] sm:$0xff]   ;;  %v8373_v20 = vld [vmem:[%s11362_s3 + $0x20] sm:$0xff]  }
 0x1ec   :  { %3775 = vmatprep.subr.bf16.mxu1 %v7582_v30  ;;  %v7742_v30 = vcombine.high %v538_v24, %v554_v25  ;;  %v8374_v23 = vld [vmem:[%s11362_s3 + $0xa0] sm:$0xff]  }
 0x1ee   :  { %3735 = vmatpush1.bf16.msra.mxu0 %v7579_v39  ;;  %v10339_v39 = vrot.slane %v4303_v28, %v9569_v35 }
 0x1ef   :  { %3776 = vmatpush1.bf16.msra.mxu1 %v7581_v40  ;;  %3736 = vmatprep.subr.bf16.mxu0 %v7612_v41  ;;  %v7741_v40 = vcombine.low %v538_v24, %v554_v25  ;;  %v8355_v41 = vld [vmem:[%s11362_s3 + $0x40] sm:$0xff]   ;;  %v8375_v24 = vld [vmem:[%s11362_s3 + $0x68] sm:$0xff]  }
 0x1f0   :  { %3777 = vmatprep.subr.bf16.mxu1 %v7614_v42  ;;  %v8356_v42 = vld [vmem:[%s11362_s3 + $0xc0] sm:$0xff]   ;;  %v8378_v25 = vld [vmem:[%s11362_s3 + $0xa8] sm:$0xff]  }
 0x1f2   :  { %3737 = vmatpush1.bf16.msra.mxu0 %v7611_v52  ;;  %v4319_v52 = vcombine.high %v10339_v39, %v10339_v39 }
 0x1f3   :  { %3778 = vmatpush1.bf16.msra.mxu1 %v7613_v53  ;;  %3738 = vmatprep.subr.bf16.mxu0 %v7644_v3  ;;  %v8358_v53 = vld [vmem:[%s11362_s3 + $0x80] sm:$0xff]   ;;  %v8359_v3 = vld [vmem:[%s11362_s3 + $0x48] sm:$0xff]  }
 0x1f4   :  { %3779 = vmatprep.subr.bf16.mxu1 %v7646_v1  ;;  %v8360_v1 = vld [vmem:[%s11362_s3 + $0xc8] sm:$0xff]   ;;  %v4474_v6 = vpack.c.bf16 %v4319_v52, %v4319_v52 }
 0x1f6   :  { %3739 = vmatpush1.bf16.msra.mxu0 %v7643_v10  ;;  %v8363_v10 = vld [vmem:[%s11362_s3 + $0x50] sm:$0xff]  }
 0x1f7   :  { %3780 = vmatpush1.bf16.msra.mxu1 %v7645_v11  ;;  %3740 = vmatprep.subr.bf16.mxu0 %v7676_v12  ;;  %v4160_v11 = vrot.slane %v4152_v2, %v9569_v35  ;;  %v4167_v12 = vrot.slane %v4153_v4, %v9569_v35  ;;  %v10462_v2 = vld [vmem:[%s11361_s2 + $0x8] sm:$0xff]  ;;  %v8385_v4 = vld [vmem:[%s11362_s3 + $0x38] sm:$0xff]  }
 0x1f8   :  { %3781 = vmatprep.subr.bf16.mxu1 %v7678_v13  ;;  %v8365_v13 = vld [vmem:[%s11362_s3 + $0x10] sm:$0xff]  }
 0x1f9   :  { %v4168_v62 = vcombine.low %v4160_v11, %v4167_v12  ;;  %v4042_v11 = vrot.slane %v10462_v2, %v10199_v50 }
 0x1fa   :  { %3741 = vmatpush1.bf16.msra.mxu0 %v7675_v16  ;;  %v8370_v16 = vld [vmem:[%s11362_s3 + $0x98] sm:$0xff]  }
 0x1fb   :  { %3782 = vmatpush1.bf16.msra.mxu1 %v7677_v17  ;;  %3742 = vmatprep.subr.bf16.mxu0 %v7708_v18  ;;  %v8371_v17 = vld [vmem:[%s11362_s3 + $0x60] sm:$0xff]  }
 0x1fc   :  { %3783 = vmatprep.subr.bf16.mxu1 %v7710_v19  ;;  %v8372_v18 = vld [vmem:[%s11362_s3 + $0xe0] sm:$0xff]   ;;  %v4280_v19 = vadd.f32 %v4168_v62, %v3861_v29  ;;  %v8377_v29 = vld [vmem:[%s11362_s3 + $0x28] sm:$0xff]  }
 0x1fe   :  { %3743 = vmatpush1.bf16.msra.mxu0 %v7707_v26  ;;  %v4288_v27 = vmax.f32 %v4280_v19, 0.0  ;;  %v8379_v26 = vld [vmem:[%s11362_s3 + $0x70] sm:$0xff]  }
 0x1ff   :  { %3784 = vmatpush1.bf16.msra.mxu1 %v7709_v56  ;;  %3744 = vmatprep.subr.bf16.mxu0 %v7740_v59  ;;  %v8380_v56 = vld [vmem:[%s11362_s3 + $0xf0] sm:$0xff]  }
 0x200   :  { %3785 = vmatprep.subr.bf16.mxu1 %v7742_v30  ;;  %v4320_v47 = vcombine.high %v4288_v27, %v4288_v27 }
 0x202   :  { %3745 = vmatpush1.bf16.msra.mxu0 %v7739_v38 }
 0x203   :  { %3786 = vmatpush1.bf16.msra.mxu1 %v7741_v40  ;;  %8000 = vmatprep.subr.bf16.mxu0 %v8355_v41 }
 0x204   :  { %8022 = vmatprep.subr.bf16.mxu1 %v8356_v42  ;;  %v8381_v42 = vld [vmem:[%s11362_s3 + $0x30] sm:$0xff]  }
 0x205   :  { %3747 = vmatmul.mubr.bf16.vlgmr.msra.gmra.mrb[28].mxu0 %v8902_v22 }
 0x206   :  { %3788 = vmatmul.mubr.bf16.vlgmr.msra.gmra.mrb[28].mxu1 %v8902_v22  ;;  %8001 = vmatpush3.bf16.msra.mxu0 %v8357_v49  ;;  %v8364_v22 = vld [vmem:[%s11362_s3 + $0xd0] sm:$0xff]   ;;  %v8383_v49 = vld [vmem:[%s11362_s3 + $0x78] sm:$0xff]  }
 0x207   :  { %6590 = vmatprep.mubr.bf16.mxu0 %v4472_v54  ;;  %8023 = vmatpush3.bf16.msra.mxu1 %v8358_v53 }
 0x208   :  { %6630 = vmatprep.mubr.bf16.mxu1 %v4474_v6  ;;  %8002 = vmatprep.subr.bf16.mxu0 %v8359_v3  ;;  %v8384_v3 = vld [vmem:[%s11362_s3 + $0xf8] sm:$0xff]   ;;  %v10468_v6 = vrot.slane %v4320_v47, %v9569_v35  ;;  %v8404_v47 = vld [vmem:[%s11362_s3 + $0x1e0] sm:$0xff]  }
 0x209   :  { %8024 = vmatprep.subr.bf16.mxu1 %v8360_v1  ;;  %v10457_v1 = vrot.slane %v4288_v27, %v9569_v35  ;;  %v8395_v27 = vld [vmem:[%s11362_s3 + $0x150] sm:$0xff]  }
 0x20a   :  { %8003 = vmatpush3.bf16.msra.mxu0 %v8361_v7  ;;  %v4336_v62 = vcombine.high %v10468_v6, %v10468_v6 }
 0x20b   :  { %8025 = vmatpush3.bf16.msra.mxu1 %v8362_v8  ;;  %8004 = vmatprep.subr.bf16.mxu0 %v8363_v10  ;;  %v8386_v8 = vld [vmem:[%s11362_s3 + $0xb8] sm:$0xff]   ;;  %v8387_v10 = vld [vmem:[%s11362_s3 + $0x140] sm:$0xff]   ;;  %v4335_v12 = vcombine.high %v10457_v1, %v10457_v1 }
 0x20c   :  { %8026 = vmatprep.subr.bf16.mxu1 %v8364_v22  ;;  %v8388_v22 = vld [vmem:[%s11362_s3 + $0x1c0] sm:$0xff]  }
 0x20d   :  { %v4476_v19 = vpack.c.bf16 %v4335_v12, %v4335_v12 }
 0x20e   :  { %8005 = vmatpush3.bf16.msra.mxu0 %v8365_v13  ;;  %v4046_v13 = vrot.slane %v10462_v2, %v10216_v55 }
 0x20f   :  { %8027 = vmatpush3.bf16.msra.mxu1 %v8366_v14  ;;  %8006 = vmatprep.subr.bf16.mxu0 %v8367_v15  ;;  %v4050_v14 = vrot.slane %v10462_v2, %v10219_v58  ;;  %v4054_v15 = vrot.slane %v10462_v2, %v10222_v60 }
 0x210   :  { %8028 = vmatprep.subr.bf16.mxu1 %v8368_v57  ;;  %v8389_v57 = vld [vmem:[%s11362_s3 + $0x100] sm:$0xff]  }
 0x212   :  { %8007 = vmatpush3.bf16.msra.mxu0 %v8369_v0  ;;  %v4471_v0 = vpack.c.bf16 %v10330_v33, %v10330_v33  ;;  %v4169_v33 = vcombine.low %v4042_v11, %v4046_v13  ;;  %v8416_v11 = vld [vmem:[%s11362_s3 + $0x1f8] sm:$0xff]  }
 0x213   :  { %8029 = vmatpush3.bf16.msra.mxu1 %v8370_v16  ;;  %8008 = vmatprep.subr.bf16.mxu0 %v8371_v17  ;;  %v8390_v16 = vld [vmem:[%s11362_s3 + $0x180] sm:$0xff]   ;;  %v4473_v17 = vpack.c.bf16 %v10339_v39, %v10339_v39  ;;  %v8393_v39 = vld [vmem:[%s11362_s3 + $0x108] sm:$0xff]   ;;  %v8417_v13 = vld [vmem:[%s11362_s3 + $0x138] sm:$0xff]  }
 0x214   :  { %8030 = vmatprep.subr.bf16.mxu1 %v8372_v18  ;;  %v8391_v18 = vld [vmem:[%s11362_s3 + $0x148] sm:$0xff]  }
 0x216   :  { %8009 = vmatpush3.bf16.msra.mxu0 %v8373_v20  ;;  %v8392_v20 = vld [vmem:[%s11362_s3 + $0x1c8] sm:$0xff]  }
 0x217   :  { %8031 = vmatpush3.bf16.msra.mxu1 %v8374_v23  ;;  %8010 = vmatprep.subr.bf16.mxu0 %v8375_v24  ;;  %v4170_v23 = vcombine.low %v4050_v14, %v4054_v15  ;;  %v4478_v24 = vpack.c.bf16 %v4336_v62, %v4336_v62  ;;  %v8418_v15 = vld [vmem:[%s11362_s3 + $0x1b8] sm:$0xff]   ;;  %v8420_v62 = vld [vmem:[%s11362_s3 + $0x2c0] sm:$0xff]  }
 0x218   :  { %v3502_v28 = vpop.f32.mrb[16].mxu0  ;;  %8032 = vmatprep.subr.bf16.mxu1 %v8376_v21  ;;  %v8394_v21 = vld [vmem:[%s11362_s3 + $0x188] sm:$0xff]  }
 0x219   :  { %v3543_v59 = vpop.f32.mrb[16].mxu1  ;;  %v3504_v30 = vpop.f32.mrb[17].mxu0 }
 0x21a   :  { %v3896_v38 = vcombine.low %v3502_v28, %v3504_v30  ;;  %v3545_v40 = vpop.f32.mrb[17].mxu1  ;;  %v3506_v41 = vpop.f32.mrb[18].mxu0  ;;  %8011 = vmatpush3.bf16.msra.mxu0 %v8377_v29  ;;  %v8396_v29 = vld [vmem:[%s11362_s3 + $0x1d0] sm:$0xff]   ;;  %v8400_v30 = vld [vmem:[%s11362_s3 + $0x1d8] sm:$0xff]  }
 0x21b   :  { %v3897_v43 = vcombine.low %v3543_v59, %v3545_v40  ;;  %v3547_v45 = vpop.f32.mrb[18].mxu1  ;;  %8033 = vmatpush3.bf16.msra.mxu1 %v8378_v25  ;;  %v3507_v46 = vpop.f32.mrb[19].mxu0  ;;  %8012 = vmatprep.subr.bf16.mxu0 %v8379_v26  ;;  %v4177_v25 = vrot.slane %v4169_v33, %v9569_v35  ;;  %v4184_v26 = vrot.slane %v4170_v23, %v9569_v35  ;;  %v8397_v28 = vld [vmem:[%s11362_s3 + $0x110] sm:$0xff]   ;;  %v8399_v59 = vld [vmem:[%s11362_s3 + $0x158] sm:$0xff]  }
 0x21c   :  { %v10448_v52 = vrot.slane %v3896_v38, %v9569_v35  ;;  %v3548_v53 = vpop.f32.mrb[19].mxu1  ;;  %8034 = vmatprep.subr.bf16.mxu1 %v8380_v56  ;;  %v8398_v56 = vld [vmem:[%s11362_s3 + $0x190] sm:$0xff]   ;;  %v8401_v40 = vld [vmem:[%s11362_s3 + $0x118] sm:$0xff]   ;;  %v8405_v45 = vld [vmem:[%s11362_s3 + $0x120] sm:$0xff]   ;;  %v4475_v23 = vpack.c.bf16 %v10457_v1, %v10457_v1 }
 0x21d   :  { %v10454_v54 = vrot.slane %v3897_v43, %v9569_v35  ;;  %v4185_v38 = vcombine.low %v4177_v25, %v4184_v26  ;;  %v8402_v41 = vld [vmem:[%s11362_s3 + $0x198] sm:$0xff]   ;;  %v8406_v46 = vld [vmem:[%s11362_s3 + $0x1a0] sm:$0xff]   ;;  %v8411_v53 = vld [vmem:[%s11362_s3 + $0x170] sm:$0xff]  }
 0x21e   :  { %8013 = vmatpush3.bf16.msra.mxu0 %v8381_v42  ;;  %v8403_v42 = vld [vmem:[%s11362_s3 + $0x160] sm:$0xff]   ;;  %v8426_v26 = vld [vmem:[%s11362_s3 + $0x288] sm:$0xff]  }
 0x21f   :  { %v3912_v7 = vcombine.low %v10448_v52, %v10454_v54  ;;  %8035 = vmatpush3.bf16.msra.mxu1 %v8382_v48  ;;  %8014 = vmatprep.subr.bf16.mxu0 %v8383_v49  ;;  %v4281_v43 = vadd.f32 %v4185_v38, %v3878_v9  ;;  %v8407_v48 = vld [vmem:[%s11362_s3 + $0x168] sm:$0xff]   ;;  %v8429_v38 = vld [vmem:[%s11362_s3 + $0x210] sm:$0xff]  }
 0x220   :  { %8036 = vmatprep.subr.bf16.mxu1 %v8384_v3  ;;  %v8409_v9 = vld [vmem:[%s11362_s3 + $0x128] sm:$0xff]   ;;  %v8412_v3 = vld [vmem:[%s11362_s3 + $0x1f0] sm:$0xff]  }
 0x221   :  { %v4289_v5 = vmax.f32 %v4281_v43, 0.0  ;;  %v8410_v49 = vld [vmem:[%s11362_s3 + $0x1a8] sm:$0xff]   ;;  %v8433_v43 = vld [vmem:[%s11362_s3 + $0x218] sm:$0xff]  }
 0x222   :  { %8015 = vmatpush3.bf16.msra.mxu0 %v8385_v4  ;;  %v8413_v4 = vld [vmem:[%s11362_s3 + $0x130] sm:$0xff]   ;;  %v8472_v52 = vld [vmem:[%s11362_s3 + $0x3e8] sm:$0xff]  }
 0x223   :  { %8037 = vmatpush3.bf16.msra.mxu1 %v8386_v8  ;;  %8044 = vmatprep.subr.bf16.mxu0 %v8387_v10  ;;  %v4337_v8 = vcombine.high %v4289_v5, %v4289_v5  ;;  %v8414_v10 = vld [vmem:[%s11362_s3 + $0x1b0] sm:$0xff]   ;;  %v10587_v12 = vrot.slane %v4289_v5, %v9569_v35  ;;  %v8437_v5 = vld [vmem:[%s11362_s3 + $0x220] sm:$0xff]  }
 0x224   :  { %8066 = vmatprep.subr.bf16.mxu1 %v8388_v22  ;;  %v8415_v22 = vld [vmem:[%s11362_s3 + $0x178] sm:$0xff]  }
 0x225   :  { %6591 = vmatmul.mubr.bf16.vlgmr.msra.gmra.mrb[32].mxu0 %v4471_v0  ;;  %v10593_v14 = vrot.slane %v4337_v8, %v9569_v35  ;;  %v4058_v0 = vrot.slane %v10462_v2, %v10324_v31  ;;  %v8444_v8 = vld [vmem:[%s11362_s3 + $0x2f0] sm:$0xff]  }
 0x226   :  { %6631 = vmatmul.mubr.bf16.vlgmr.msra.gmra.mrb[32].mxu1 %v4473_v17  ;;  %8045 = vmatpush3.bf16.msra.mxu0 %v8389_v57  ;;  %v8419_v57 = vld [vmem:[%s11362_s3 + $0x240] sm:$0xff]   ;;  %v4062_v17 = vrot.slane %v10462_v2, %v10327_v32 }
 0x227   :  { %6670 = vmatprep.mubr.bf16.mxu0 %v4476_v19  ;;  %8067 = vmatpush3.bf16.msra.mxu1 %v8390_v16  ;;  %v4352_v16 = vcombine.high %v10587_v12, %v10587_v12  ;;  %v4070_v19 = vrot.slane %v10462_v2, %v10336_v36  ;;  %v4353_v33 = vcombine.high %v10593_v14, %v10593_v14 }
 0x228   :  { %6710 = vmatprep.mubr.bf16.mxu1 %v4478_v24  ;;  %8046 = vmatprep.subr.bf16.mxu0 %v8391_v18  ;;  %v4066_v18 = vrot.slane %v10462_v2, %v10333_v34  ;;  %v8422_v24 = vld [vmem:[%s11362_s3 + $0x280] sm:$0xff]   ;;  %v4477_v2 = vpack.c.bf16 %v10468_v6, %v10468_v6  ;;  %v4186_v1 = vcombine.low %v4058_v0, %v4062_v17  ;;  %v8425_v6 = vld [vmem:[%s11362_s3 + $0x208] sm:$0xff]  }
 0x229   :  { %8068 = vmatprep.subr.bf16.mxu1 %v8392_v20  ;;  %v8421_v20 = vld [vmem:[%s11362_s3 + $0x200] sm:$0xff]   ;;  %v4482_v25 = vpack.c.bf16 %v4353_v33, %v4353_v33 }
 0x22a   :  { %8047 = vmatpush3.bf16.msra.mxu0 %v8393_v39  ;;  %v8423_v39 = vld [vmem:[%s11362_s3 + $0x248] sm:$0xff]  }
 0x22b   :  { %8069 = vmatpush3.bf16.msra.mxu1 %v8394_v21  ;;  %8048 = vmatprep.subr.bf16.mxu0 %v8395_v27  ;;  %v4480_v21 = vpack.c.bf16 %v4352_v16, %v4352_v16  ;;  %v8424_v27 = vld [vmem:[%s11362_s3 + $0x2c8] sm:$0xff]  }
 0x22c   :  { %8070 = vmatprep.subr.bf16.mxu1 %v8396_v29  ;;  %v4187_v29 = vcombine.low %v4066_v18, %v4070_v19  ;;  %v8446_v18 = vld [vmem:[%s11362_s3 + $0x2b0] sm:$0xff]   ;;  %v8447_v19 = vld [vmem:[%s11362_s3 + $0x278] sm:$0xff]  }
 0x22e   :  { %8049 = vmatpush3.bf16.msra.mxu0 %v8397_v28  ;;  %v8427_v28 = vld [vmem:[%s11362_s3 + $0x250] sm:$0xff]  }
 0x22f   :  { %8071 = vmatpush3.bf16.msra.mxu1 %v8398_v56  ;;  %8050 = vmatprep.subr.bf16.mxu0 %v8399_v59  ;;  %v8428_v56 = vld [vmem:[%s11362_s3 + $0x2d0] sm:$0xff]   ;;  %v4194_v59 = vrot.slane %v4186_v1, %v9569_v35 }
 0x230   :  { %8072 = vmatprep.subr.bf16.mxu1 %v8400_v30  ;;  %v4201_v30 = vrot.slane %v4187_v29, %v9569_v35  ;;  %v8450_v29 = vld [vmem:[%s11362_s3 + $0x2b8] sm:$0xff]  }
 0x232   :  { %8051 = vmatpush3.bf16.msra.mxu0 %v8401_v40  ;;  %v8430_v40 = vld [vmem:[%s11362_s3 + $0x290] sm:$0xff]  }
 0x233   :  { %8073 = vmatpush3.bf16.msra.mxu1 %v8402_v41  ;;  %8052 = vmatprep.subr.bf16.mxu0 %v8403_v42  ;;  %v8431_v41 = vld [vmem:[%s11362_s3 + $0x258] sm:$0xff]  }
 0x234   :  { %8074 = vmatprep.subr.bf16.mxu1 %v8404_v47  ;;  %v8432_v42 = vld [vmem:[%s11362_s3 + $0x2d8] sm:$0xff]   ;;  %v4202_v47 = vcombine.low %v4194_v59, %v4201_v30 }
 0x236   :  { %8053 = vmatpush3.bf16.msra.mxu0 %v8405_v45  ;;  %v8434_v45 = vld [vmem:[%s11362_s3 + $0x298] sm:$0xff]  }
 0x237   :  { %8075 = vmatpush3.bf16.msra.mxu1 %v8406_v46  ;;  %8054 = vmatprep.subr.bf16.mxu0 %v8407_v48  ;;  %v8435_v46 = vld [vmem:[%s11362_s3 + $0x260] sm:$0xff]  }
 0x238   :  { %8076 = vmatprep.subr.bf16.mxu1 %v8408_v61  ;;  %v8436_v48 = vld [vmem:[%s11362_s3 + $0x2e0] sm:$0xff]   ;;  %v4282_v61 = vadd.f32 %v4202_v47, %v3895_v63  ;;  %v8441_v63 = vld [vmem:[%s11362_s3 + $0x228] sm:$0xff]   ;;  %v4481_v47 = vpack.c.bf16 %v10593_v14, %v10593_v14 }
 0x239   :  { %v8457_v14 = vld [vmem:[%s11362_s3 + $0x308] sm:$0xff]  }
 0x23a   :  { %8055 = vmatpush3.bf16.msra.mxu0 %v8409_v9  ;;  %v8438_v9 = vld [vmem:[%s11362_s3 + $0x2a0] sm:$0xff]   ;;  %v4290_v51 = vmax.f32 %v4282_v61, 0.0 }
 0x23b   :  { %8077 = vmatpush3.bf16.msra.mxu1 %v8410_v49  ;;  %8056 = vmatprep.subr.bf16.mxu0 %v8411_v53  ;;  %v8439_v49 = vld [vmem:[%s11362_s3 + $0x268] sm:$0xff]  }
 0x23c   :  { %8078 = vmatprep.subr.bf16.mxu1 %v8412_v3  ;;  %v8442_v53 = vld [vmem:[%s11362_s3 + $0x2a8] sm:$0xff]   ;;  %v8443_v3 = vld [vmem:[%s11362_s3 + $0x270] sm:$0xff]  }
 0x23e   :  { %8057 = vmatpush3.bf16.msra.mxu0 %v8413_v4 }
 0x23f   :  { %8079 = vmatpush3.bf16.msra.mxu1 %v8414_v10  ;;  %8058 = vmatprep.subr.bf16.mxu0 %v8415_v22 }
 0x240   :  { %8080 = vmatprep.subr.bf16.mxu1 %v8416_v11 }
 0x242   :  { %8059 = vmatpush3.bf16.msra.mxu0 %v8417_v13 }
 0x243   :  { %8081 = vmatpush3.bf16.msra.mxu1 %v8418_v15  ;;  %8088 = vmatprep.subr.bf16.mxu0 %v8419_v57  ;;  %v8445_v57 = vld [vmem:[%s11362_s3 + $0x230] sm:$0xff]  }
 0x244   :  { %8110 = vmatprep.subr.bf16.mxu1 %v8420_v62  ;;  %v4354_v62 = vcombine.high %v4290_v51, %v4290_v51 }
 0x245   :  { %6671 = vmatmul.mubr.bf16.vlgmr.msra.gmra.mrb[36].mxu0 %v4475_v23  ;;  %v8448_v23 = vld [vmem:[%s11362_s3 + $0x2f8] sm:$0xff]  }
 0x246   :  { %6711 = vmatmul.mubr.bf16.vlgmr.msra.gmra.mrb[36].mxu1 %v4477_v2  ;;  %8089 = vmatpush3.bf16.msra.mxu0 %v8421_v20  ;;  %v10716_v2 = vrot.slane %v4290_v51, %v9569_v35 }
 0x247   :  { %6750 = vmatprep.mubr.bf16.mxu0 %v4480_v21  ;;  %8111 = vmatpush3.bf16.msra.mxu1 %v8422_v24  ;;  %v8449_v21 = vld [vmem:[%s11362_s3 + $0x238] sm:$0xff]  }
 0x248   :  { %6790 = vmatprep.mubr.bf16.mxu1 %v4482_v25  ;;  %8090 = vmatprep.subr.bf16.mxu0 %v8423_v39  ;;  %v10721_v39 = vld [vmem:[%s11361_s2 + $0x10] sm:$0xff]  ;;  %v8451_v25 = vld [vmem:[%s11362_s3 + $0x340] sm:$0xff]  }
 0x249   :  { %8112 = vmatprep.subr.bf16.mxu1 %v8424_v27  ;;  %v10727_v27 = vrot.slane %v4354_v62, %v9569_v35  ;;  %v4082_v59 = vrot.slane %v10721_v39, %v10219_v58  ;;  %v4086_v30 = vrot.slane %v10721_v39, %v10222_v60  ;;  %v8470_v62 = vld [vmem:[%s11362_s3 + $0x3a0] sm:$0xff]  }
 0x24a   :  { %8091 = vmatpush3.bf16.msra.mxu0 %v8425_v6  ;;  %v8452_v6 = vld [vmem:[%s11362_s3 + $0x3c0] sm:$0xff]  }
 0x24b   :  { %8113 = vmatpush3.bf16.msra.mxu1 %v8426_v26  ;;  %8092 = vmatprep.subr.bf16.mxu0 %v8427_v28  ;;  %v4074_v26 = vrot.slane %v10721_v39, %v10199_v50  ;;  %v4369_v28 = vcombine.high %v10716_v2, %v10716_v2 }
 0x24c   :  { %8114 = vmatprep.subr.bf16.mxu1 %v8428_v56  ;;  %v4078_v56 = vrot.slane %v10721_v39, %v10216_v55 }
 0x24e   :  { %8093 = vmatpush3.bf16.msra.mxu0 %v8429_v38  ;;  %v8453_v38 = vld [vmem:[%s11362_s3 + $0x300] sm:$0xff]  }
 0x24f   :  { %8115 = vmatpush3.bf16.msra.mxu1 %v8430_v40  ;;  %8094 = vmatprep.subr.bf16.mxu0 %v8431_v41  ;;  %v4370_v40 = vcombine.high %v10727_v27, %v10727_v27  ;;  %v4479_v41 = vpack.c.bf16 %v10587_v12, %v10587_v12  ;;  %v4203_v12 = vcombine.low %v4074_v26, %v4078_v56  ;;  %v8483_v56 = vld [vmem:[%s11362_s3 + $0x440] sm:$0xff]  }
 0x250   :  { %8116 = vmatprep.subr.bf16.mxu1 %v8432_v42  ;;  %v8454_v42 = vld [vmem:[%s11362_s3 + $0x380] sm:$0xff]  }
 0x251   :  { %v4486_v61 = vpack.c.bf16 %v4370_v40, %v4370_v40  ;;  %v4094_v40 = vrot.slane %v10721_v39, %v10327_v32 }
 0x252   :  { %8095 = vmatpush3.bf16.msra.mxu0 %v8433_v43  ;;  %v8455_v43 = vld [vmem:[%s11362_s3 + $0x348] sm:$0xff]  }
 0x253   :  { %8117 = vmatpush3.bf16.msra.mxu1 %v8434_v45  ;;  %8096 = vmatprep.subr.bf16.mxu0 %v8435_v46  ;;  %v4484_v45 = vpack.c.bf16 %v4369_v28, %v4369_v28  ;;  %v8456_v46 = vld [vmem:[%s11362_s3 + $0x3c8] sm:$0xff]   ;;  %v8482_v28 = vld [vmem:[%s11362_s3 + $0x3b8] sm:$0xff]  }
 0x254   :  { %8118 = vmatprep.subr.bf16.mxu1 %v8436_v48  ;;  %v4204_v48 = vcombine.low %v4082_v59, %v4086_v30  ;;  %v8484_v59 = vld [vmem:[%s11362_s3 + $0x4c0] sm:$0xff]   ;;  %v4090_v30 = vrot.slane %v10721_v39, %v10324_v31 }
 0x256   :  { %8097 = vmatpush3.bf16.msra.mxu0 %v8437_v5  ;;  %v8458_v5 = vld [vmem:[%s11362_s3 + $0x388] sm:$0xff]   ;;  %v4218_v51 = vrot.slane %v4204_v48, %v9569_v35 }
 0x257   :  { %8119 = vmatpush3.bf16.msra.mxu1 %v8438_v9  ;;  %8098 = vmatprep.subr.bf16.mxu0 %v8439_v49  ;;  %v8459_v9 = vld [vmem:[%s11362_s3 + $0x350] sm:$0xff]  }
 0x258   :  { %v3584_v4 = vpop.f32.mrb[20].mxu0  ;;  %8120 = vmatprep.subr.bf16.mxu1 %v8440_v44  ;;  %v8460_v49 = vld [vmem:[%s11362_s3 + $0x3d0] sm:$0xff]   ;;  %v4211_v44 = vrot.slane %v4203_v12, %v9569_v35  ;;  %v8487_v12 = vld [vmem:[%s11362_s3 + $0x448] sm:$0xff]  }
 0x259   :  { %v3625_v10 = vpop.f32.mrb[20].mxu1  ;;  %v3586_v22 = vpop.f32.mrb[21].mxu0 }
 0x25a   :  { %v3913_v11 = vcombine.low %v3584_v4, %v3586_v22  ;;  %v3627_v13 = vpop.f32.mrb[21].mxu1  ;;  %v3588_v15 = vpop.f32.mrb[22].mxu0  ;;  %8099 = vmatpush3.bf16.msra.mxu0 %v8441_v63  ;;  %v8461_v63 = vld [vmem:[%s11362_s3 + $0x310] sm:$0xff]   ;;  %v8464_v4 = vld [vmem:[%s11362_s3 + $0x3d8] sm:$0xff]  }
 0x25b   :  { %v3914_v0 = vcombine.low %v3625_v10, %v3627_v13  ;;  %v3629_v16 = vpop.f32.mrb[22].mxu1  ;;  %8121 = vmatpush3.bf16.msra.mxu1 %v8442_v53  ;;  %v3589_v17 = vpop.f32.mrb[23].mxu0  ;;  %8100 = vmatprep.subr.bf16.mxu0 %v8443_v3  ;;  %v8462_v53 = vld [vmem:[%s11362_s3 + $0x390] sm:$0xff]   ;;  %v8463_v3 = vld [vmem:[%s11362_s3 + $0x358] sm:$0xff]   ;;  %v8468_v13 = vld [vmem:[%s11362_s3 + $0x3e0] sm:$0xff]  }
 0x25c   :  { %v10707_v20 = vrot.slane %v3913_v11, %v9569_v35  ;;  %v3630_v33 = vpop.f32.mrb[23].mxu1  ;;  %8122 = vmatprep.subr.bf16.mxu1 %v8444_v8  ;;  %v4219_v8 = vcombine.low %v4211_v44, %v4218_v51  ;;  %v8465_v10 = vld [vmem:[%s11362_s3 + $0x318] sm:$0xff]   ;;  %v8467_v11 = vld [vmem:[%s11362_s3 + $0x360] sm:$0xff]   ;;  %v8474_v16 = vld [vmem:[%s11362_s3 + $0x3a8] sm:$0xff]  }
 0x25d   :  { %v10713_v24 = vrot.slane %v3914_v0, %v9569_v35  ;;  %v8466_v22 = vld [vmem:[%s11362_s3 + $0x398] sm:$0xff]   ;;  %v8471_v0 = vld [vmem:[%s11362_s3 + $0x368] sm:$0xff]   ;;  %v8475_v17 = vld [vmem:[%s11362_s3 + $0x370] sm:$0xff]  }
 0x25e   :  { %8101 = vmatpush3.bf16.msra.mxu0 %v8445_v57  ;;  %v4283_v15 = vadd.f32 %v4219_v8, %v3912_v7  ;;  %v8469_v57 = vld [vmem:[%s11362_s3 + $0x320] sm:$0xff]   ;;  %v8473_v7 = vld [vmem:[%s11362_s3 + $0x328] sm:$0xff]   ;;  %v8492_v44 = vld [vmem:[%s11362_s3 + $0x4d0] sm:$0xff]  }
 0x25f   :  { %v3929_v1 = vcombine.low %v10707_v20, %v10713_v24  ;;  %8123 = vmatpush3.bf16.msra.mxu1 %v8446_v18  ;;  %8102 = vmatprep.subr.bf16.mxu0 %v8447_v19  ;;  %v8476_v18 = vld [vmem:[%s11362_s3 + $0x3f0] sm:$0xff]   ;;  %v8496_v8 = vld [vmem:[%s11362_s3 + $0x4d8] sm:$0xff]   ;;  %v8504_v20 = vld [vmem:[%s11362_s3 + $0x4e8] sm:$0xff]  }
 0x260   :  { %8124 = vmatprep.subr.bf16.mxu1 %v8448_v23  ;;  %v4291_v54 = vmax.f32 %v4283_v15, 0.0  ;;  %v8477_v19 = vld [vmem:[%s11362_s3 + $0x330] sm:$0xff]   ;;  %v8500_v15 = vld [vmem:[%s11362_s3 + $0x4e0] sm:$0xff]  }
 0x261   :  { %v8478_v23 = vld [vmem:[%s11362_s3 + $0x3b0] sm:$0xff]  }
 0x262   :  { %8103 = vmatpush3.bf16.msra.mxu0 %v8449_v21  ;;  %v4371_v33 = vcombine.high %v4291_v54, %v4291_v54  ;;  %v8479_v21 = vld [vmem:[%s11362_s3 + $0x378] sm:$0xff]  }
 0x263   :  { %8125 = vmatpush3.bf16.msra.mxu1 %v8450_v29  ;;  %8132 = vmatprep.subr.bf16.mxu0 %v8451_v25  ;;  %v8480_v29 = vld [vmem:[%s11362_s3 + $0x3f8] sm:$0xff]   ;;  %v10846_v25 = vrot.slane %v4291_v54, %v9569_v35  ;;  %v8506_v54 = vld [vmem:[%s11362_s3 + $0x4a8] sm:$0xff]  }
 0x264   :  { %8154 = vmatprep.subr.bf16.mxu1 %v8452_v6  ;;  %v8481_v6 = vld [vmem:[%s11362_s3 + $0x338] sm:$0xff]   ;;  %v10852_v26 = vrot.slane %v4371_v33, %v9569_v35 }
 0x265   :  { %6751 = vmatmul.mubr.bf16.vlgmr.msra.gmra.mrb[40].mxu0 %v4479_v41  ;;  %v4098_v41 = vrot.slane %v10721_v39, %v10333_v34 }
 0x266   :  { %6791 = vmatmul.mubr.bf16.vlgmr.msra.gmra.mrb[40].mxu1 %v4481_v47  ;;  %8133 = vmatpush3.bf16.msra.mxu0 %v8453_v38  ;;  %v4386_v38 = vcombine.high %v10846_v25, %v10846_v25  ;;  %v8485_v47 = vld [vmem:[%s11362_s3 + $0x400] sm:$0xff]  }
 0x267   :  { %6830 = vmatprep.mubr.bf16.mxu0 %v4484_v45  ;;  %8155 = vmatpush3.bf16.msra.mxu1 %v8454_v42  ;;  %v4102_v42 = vrot.slane %v10721_v39, %v10336_v36  ;;  %v4483_v45 = vpack.c.bf16 %v10716_v2, %v10716_v2  ;;  %v4485_v39 = vpack.c.bf16 %v10727_v27, %v10727_v27  ;;  %v8489_v27 = vld [vmem:[%s11362_s3 + $0x408] sm:$0xff]  }
 0x268   :  { %6870 = vmatprep.mubr.bf16.mxu1 %v4486_v61  ;;  %8134 = vmatprep.subr.bf16.mxu0 %v8455_v43  ;;  %v4387_v43 = vcombine.high %v10852_v26, %v10852_v26  ;;  %v4488_v48 = vpack.c.bf16 %v4386_v38, %v4386_v38  ;;  %v8488_v61 = vld [vmem:[%s11362_s3 + $0x4c8] sm:$0xff]   ;;  %v4220_v2 = vcombine.low %v4090_v30, %v4094_v40  ;;  %v8510_v30 = vld [vmem:[%s11362_s3 + $0x4b0] sm:$0xff]   ;;  %v8511_v38 = vld [vmem:[%s11362_s3 + $0x478] sm:$0xff]  }
 0x269   :  { %8156 = vmatprep.subr.bf16.mxu1 %v8456_v46  ;;  %v8486_v46 = vld [vmem:[%s11362_s3 + $0x480] sm:$0xff]  }
 0x26a   :  { %8135 = vmatpush3.bf16.msra.mxu0 %v8457_v14  ;;  %v4221_v14 = vcombine.low %v4098_v41, %v4102_v42  ;;  %v4228_v51 = vrot.slane %v4220_v2, %v9569_v35  ;;  %v8512_v42 = vld [vmem:[%s11362_s3 + $0x4f8] sm:$0xff]   ;;  %v8516_v2 = vld [vmem:[%s11362_s3 + $0x5c0] sm:$0xff]  }
 0x26b   :  { %8157 = vmatpush3.bf16.msra.mxu1 %v8458_v5  ;;  %8136 = vmatprep.subr.bf16.mxu0 %v8459_v9  ;;  %v4490_v5 = vpack.c.bf16 %v4387_v43, %v4387_v43  ;;  %v8490_v9 = vld [vmem:[%s11362_s3 + $0x488] sm:$0xff]  }
 0x26c   :  { %8158 = vmatprep.subr.bf16.mxu1 %v8460_v49  ;;  %v8491_v49 = vld [vmem:[%s11362_s3 + $0x450] sm:$0xff]  }
 0x26e   :  { %8137 = vmatpush3.bf16.msra.mxu0 %v8461_v63  ;;  %v4235_v63 = vrot.slane %v4221_v14, %v9569_v35 }
 0x26f   :  { %8159 = vmatpush3.bf16.msra.mxu1 %v8462_v53  ;;  %8138 = vmatprep.subr.bf16.mxu0 %v8463_v3  ;;  %v8493_v53 = vld [vmem:[%s11362_s3 + $0x410] sm:$0xff]  }
 0x270   :  { %8160 = vmatprep.subr.bf16.mxu1 %v8464_v4  ;;  %v8494_v3 = vld [vmem:[%s11362_s3 + $0x490] sm:$0xff]   ;;  %v8495_v4 = vld [vmem:[%s11362_s3 + $0x458] sm:$0xff]  }
 0x272   :  { %8139 = vmatpush3.bf16.msra.mxu0 %v8465_v10  ;;  %v4236_v10 = vcombine.low %v4228_v51, %v4235_v63  ;;  %v4487_v51 = vpack.c.bf16 %v10846_v25, %v10846_v25 }
 0x273   :  { %8161 = vmatpush3.bf16.msra.mxu1 %v8466_v22  ;;  %8140 = vmatprep.subr.bf16.mxu0 %v8467_v11  ;;  %v8497_v22 = vld [vmem:[%s11362_s3 + $0x418] sm:$0xff]  }
 0x274   :  { %8162 = vmatprep.subr.bf16.mxu1 %v8468_v13  ;;  %v8498_v11 = vld [vmem:[%s11362_s3 + $0x498] sm:$0xff]   ;;  %v8499_v13 = vld [vmem:[%s11362_s3 + $0x460] sm:$0xff]  }
 0x276   :  { %8141 = vmatpush3.bf16.msra.mxu0 %v8469_v57  ;;  %v4284_v57 = vadd.f32 %v4236_v10, %v3929_v1  ;;  %v8505_v1 = vld [vmem:[%s11362_s3 + $0x428] sm:$0xff]   ;;  %v8523_v10 = vld [vmem:[%s11362_s3 + $0x550] sm:$0xff]  }
 0x277   :  { %8163 = vmatpush3.bf16.msra.mxu1 %v8470_v62  ;;  %8142 = vmatprep.subr.bf16.mxu0 %v8471_v0  ;;  %v8501_v62 = vld [vmem:[%s11362_s3 + $0x420] sm:$0xff]  }
 0x278   :  { %8164 = vmatprep.subr.bf16.mxu1 %v8472_v52  ;;  %v8502_v0 = vld [vmem:[%s11362_s3 + $0x4a0] sm:$0xff]   ;;  %v8503_v52 = vld [vmem:[%s11362_s3 + $0x468] sm:$0xff]   ;;  %v4292_v24 = vmax.f32 %v4284_v57, 0.0  ;;  %v8526_v57 = vld [vmem:[%s11362_s3 + $0x590] sm:$0xff]  }
 0x27a   :  { %8143 = vmatpush3.bf16.msra.mxu0 %v8473_v7  ;;  %v8507_v7 = vld [vmem:[%s11362_s3 + $0x470] sm:$0xff]   ;;  %v10975_v43 = vrot.slane %v4292_v24, %v9569_v35 }
 0x27b   :  { %8165 = vmatpush3.bf16.msra.mxu1 %v8474_v16  ;;  %8144 = vmatprep.subr.bf16.mxu0 %v8475_v17  ;;  %v8508_v17 = vld [vmem:[%s11362_s3 + $0x4f0] sm:$0xff]  }
 0x27c   :  { %8166 = vmatprep.subr.bf16.mxu1 %v8476_v18 }
 0x27e   :  { %8145 = vmatpush3.bf16.msra.mxu0 %v8477_v19 }
 0x27f   :  { %8167 = vmatpush3.bf16.msra.mxu1 %v8478_v23  ;;  %8146 = vmatprep.subr.bf16.mxu0 %v8479_v21 }
 0x280   :  { %8168 = vmatprep.subr.bf16.mxu1 %v8480_v29  ;;  %v8509_v29 = vld [vmem:[%s11362_s3 + $0x430] sm:$0xff]  }
 0x282   :  { %8147 = vmatpush3.bf16.msra.mxu0 %v8481_v6  ;;  %v4388_v6 = vcombine.high %v4292_v24, %v4292_v24  ;;  %v8530_v24 = vld [vmem:[%s11362_s3 + $0x598] sm:$0xff]  }
 0x283   :  { %8169 = vmatpush3.bf16.msra.mxu1 %v8482_v28  ;;  %8176 = vmatprep.subr.bf16.mxu0 %v8483_v56 }
 0x284   :  { %8198 = vmatprep.subr.bf16.mxu1 %v8484_v59 }
 0x285   :  { %6831 = vmatmul.mubr.bf16.vlgmr.msra.gmra.mrb[44].mxu0 %v4483_v45  ;;  %v10980_v45 = vld [vmem:[%s11361_s2 + $0x18] sm:$0xff] }
 0x286   :  { %6871 = vmatmul.mubr.bf16.vlgmr.msra.gmra.mrb[44].mxu1 %v4485_v39  ;;  %8177 = vmatpush3.bf16.msra.mxu0 %v8485_v47  ;;  %v10986_v39 = vrot.slane %v4388_v6, %v9569_v35  ;;  %v4106_v14 = vrot.slane %v10980_v45, %v10199_v50  ;;  %v8540_v6 = vld [vmem:[%s11362_s3 + $0x5f0] sm:$0xff]  }
 0x287   :  { %6910 = vmatprep.mubr.bf16.mxu0 %v4488_v48  ;;  %8199 = vmatpush3.bf16.msra.mxu1 %v8486_v46  ;;  %v8513_v46 = vld [vmem:[%s11362_s3 + $0x438] sm:$0xff]  }
 0x288   :  { %6950 = vmatprep.mubr.bf16.mxu1 %v4490_v5  ;;  %8178 = vmatprep.subr.bf16.mxu0 %v8487_v12  ;;  %v8514_v48 = vld [vmem:[%s11362_s3 + $0x4b8] sm:$0xff]   ;;  %v4403_v5 = vcombine.high %v10975_v43, %v10975_v43  ;;  %v4404_v50 = vcombine.high %v10986_v39, %v10986_v39 }
 0x289   :  { %8200 = vmatprep.subr.bf16.mxu1 %v8488_v61  ;;  %v8515_v61 = vld [vmem:[%s11362_s3 + $0x540] sm:$0xff]  }
 0x28a   :  { %8179 = vmatpush3.bf16.msra.mxu0 %v8489_v27  ;;  %v4110_v27 = vrot.slane %v10980_v45, %v10216_v55  ;;  %v8518_v55 = vld [vmem:[%s11362_s3 + $0x580] sm:$0xff]   ;;  %v4492_v63 = vpack.c.bf16 %v4403_v5, %v4403_v5 }
 0x28b   :  { %8201 = vmatpush3.bf16.msra.mxu1 %v8490_v9  ;;  %8180 = vmatprep.subr.bf16.mxu0 %v8491_v49  ;;  %v4114_v9 = vrot.slane %v10980_v45, %v10219_v58  ;;  %v4118_v49 = vrot.slane %v10980_v45, %v10222_v60  ;;  %v4489_v58 = vpack.c.bf16 %v10852_v26, %v10852_v26  ;;  %v8519_v60 = vld [vmem:[%s11362_s3 + $0x548] sm:$0xff]   ;;  %v8550_v5 = vld [vmem:[%s11362_s3 + $0x680] sm:$0xff]  }
 0x28c   :  { %8202 = vmatprep.subr.bf16.mxu1 %v8492_v44  ;;  %v8517_v44 = vld [vmem:[%s11362_s3 + $0x500] sm:$0xff]   ;;  %v4237_v25 = vcombine.low %v4106_v14, %v4110_v27  ;;  %v8521_v26 = vld [vmem:[%s11362_s3 + $0x508] sm:$0xff]   ;;  %v4491_v14 = vpack.c.bf16 %v10975_v43, %v10975_v43  ;;  %v4493_v27 = vpack.c.bf16 %v10986_v39, %v10986_v39 }
 0x28d   :  { %v8554_v39 = vld [vmem:[%s11362_s3 + $0x688] sm:$0xff]  }
 0x28e   :  { %8181 = vmatpush3.bf16.msra.mxu0 %v8493_v53  ;;  %v8520_v53 = vld [vmem:[%s11362_s3 + $0x5c8] sm:$0xff]  }
 0x28f   :  { %8203 = vmatpush3.bf16.msra.mxu1 %v8494_v3  ;;  %8182 = vmatprep.subr.bf16.mxu0 %v8495_v4  ;;  %v4238_v3 = vcombine.low %v4114_v9, %v4118_v49  ;;  %v4494_v4 = vpack.c.bf16 %v4404_v50, %v4404_v50  ;;  %v8551_v9 = vld [vmem:[%s11362_s3 + $0x648] sm:$0xff]  }
 0x290   :  { %8204 = vmatprep.subr.bf16.mxu1 %v8496_v8  ;;  %v8522_v8 = vld [vmem:[%s11362_s3 + $0x588] sm:$0xff]  }
 0x291   :  { %v8553_v50 = vld [vmem:[%s11362_s3 + $0x608] sm:$0xff]  }
 0x292   :  { %8183 = vmatpush3.bf16.msra.mxu0 %v8497_v22  ;;  %v8524_v22 = vld [vmem:[%s11362_s3 + $0x5d0] sm:$0xff]  }
 0x293   :  { %8205 = vmatpush3.bf16.msra.mxu1 %v8498_v11  ;;  %8184 = vmatprep.subr.bf16.mxu0 %v8499_v13  ;;  %v4245_v11 = vrot.slane %v4237_v25, %v9569_v35  ;;  %v4252_v13 = vrot.slane %v4238_v3, %v9569_v35  ;;  %v8561_v25 = vld [vmem:[%s11362_s3 + $0x618] sm:$0xff]  }
 0x294   :  { %8206 = vmatprep.subr.bf16.mxu1 %v8500_v15  ;;  %v8525_v15 = vld [vmem:[%s11362_s3 + $0x510] sm:$0xff]   ;;  %v8562_v3 = vld [vmem:[%s11362_s3 + $0x698] sm:$0xff]  }
 0x296   :  { %8185 = vmatpush3.bf16.msra.mxu0 %v8501_v62  ;;  %v8527_v62 = vld [vmem:[%s11362_s3 + $0x558] sm:$0xff]  }
 0x297   :  { %8207 = vmatpush3.bf16.msra.mxu1 %v8502_v0  ;;  %8186 = vmatprep.subr.bf16.mxu0 %v8503_v52  ;;  %v8528_v0 = vld [vmem:[%s11362_s3 + $0x5d8] sm:$0xff]   ;;  %v4253_v52 = vcombine.low %v4245_v11, %v4252_v13  ;;  %v4134_v11 = vrot.slane %v10980_v45, %v10336_v36  ;;  %v8565_v13 = vld [vmem:[%s11362_s3 + $0x620] sm:$0xff]  }
 0x298   :  { %v3666_v16 = vpop.f32.mrb[24].mxu0  ;;  %8208 = vmatprep.subr.bf16.mxu1 %v8504_v20  ;;  %v8529_v20 = vld [vmem:[%s11362_s3 + $0x518] sm:$0xff]  }
 0x299   :  { %v3707_v18 = vpop.f32.mrb[24].mxu1  ;;  %v3668_v19 = vpop.f32.mrb[25].mxu0 }
 0x29a   :  { %v3930_v33 = vcombine.low %v3666_v16, %v3668_v19  ;;  %v3709_v23 = vpop.f32.mrb[25].mxu1  ;;  %v3670_v21 = vpop.f32.mrb[26].mxu0  ;;  %8187 = vmatpush3.bf16.msra.mxu0 %v8505_v1  ;;  %v8531_v1 = vld [vmem:[%s11362_s3 + $0x560] sm:$0xff]   ;;  %v8536_v19 = vld [vmem:[%s11362_s3 + $0x5e8] sm:$0xff]  }
 0x29b   :  { %v3931_v28 = vcombine.low %v3707_v18, %v3709_v23  ;;  %v3711_v56 = vpop.f32.mrb[26].mxu1  ;;  %8209 = vmatpush3.bf16.msra.mxu1 %v8506_v54  ;;  %v3671_v59 = vpop.f32.mrb[27].mxu0  ;;  %8188 = vmatprep.subr.bf16.mxu0 %v8507_v7  ;;  %v8532_v54 = vld [vmem:[%s11362_s3 + $0x5e0] sm:$0xff]   ;;  %v8535_v18 = vld [vmem:[%s11362_s3 + $0x568] sm:$0xff]  }
 0x29c   :  { %v10966_v40 = vrot.slane %v3930_v33, %v9569_v35  ;;  %v3712_v41 = vpop.f32.mrb[27].mxu1  ;;  %8210 = vmatprep.subr.bf16.mxu1 %v8508_v17  ;;  %v8533_v16 = vld [vmem:[%s11362_s3 + $0x520] sm:$0xff]   ;;  %v8537_v23 = vld [vmem:[%s11362_s3 + $0x528] sm:$0xff]   ;;  %v8542_v59 = vld [vmem:[%s11362_s3 + $0x5b0] sm:$0xff]  }
 0x29d   :  { %v10972_v47 = vrot.slane %v3931_v28, %v9569_v35  ;;  %v8534_v17 = vld [vmem:[%s11362_s3 + $0x5a0] sm:$0xff]   ;;  %v8538_v21 = vld [vmem:[%s11362_s3 + $0x5a8] sm:$0xff]   ;;  %v8541_v28 = vld [vmem:[%s11362_s3 + $0x530] sm:$0xff]  }
 0x29e   :  { %8189 = vmatpush3.bf16.msra.mxu0 %v8509_v29  ;;  %v8539_v29 = vld [vmem:[%s11362_s3 + $0x570] sm:$0xff]   ;;  %v8545_v41 = vld [vmem:[%s11362_s3 + $0x538] sm:$0xff]  }
 0x29f   :  { %v3946_v12 = vcombine.low %v10966_v40, %v10972_v47  ;;  %8211 = vmatpush3.bf16.msra.mxu1 %v8510_v30  ;;  %8190 = vmatprep.subr.bf16.mxu0 %v8511_v38  ;;  %v8543_v30 = vld [vmem:[%s11362_s3 + $0x578] sm:$0xff]  }
 0x2a0   :  { %8212 = vmatprep.subr.bf16.mxu1 %v8512_v42  ;;  %v8544_v38 = vld [vmem:[%s11362_s3 + $0x5f8] sm:$0xff]  }
 0x2a1   :  { %v4285_v7 = vadd.f32 %v4253_v52, %v3946_v12  ;;  %v8546_v47 = vld [vmem:[%s11362_s3 + $0x5b8] sm:$0xff]   ;;  %v8548_v12 = vld [vmem:[%s11362_s3 + $0x6c0] sm:$0xff]   ;;  %v8572_v52 = vld [vmem:[%s11362_s3 + $0x6f0] sm:$0xff]  }
 0x2a2   :  { %8191 = vmatpush3.bf16.msra.mxu0 %v8513_v46  ;;  %v8547_v46 = vld [vmem:[%s11362_s3 + $0x640] sm:$0xff]  }
 0x2a3   :  { %8213 = vmatpush3.bf16.msra.mxu1 %v8514_v48  ;;  %8220 = vmatprep.subr.bf16.mxu0 %v8515_v61  ;;  %v4293_v33 = vmax.f32 %v4285_v7, 0.0  ;;  %v8549_v61 = vld [vmem:[%s11362_s3 + $0x600] sm:$0xff]  }
 0x2a4   :  { %8242 = vmatprep.subr.bf16.mxu1 %v8516_v2 }
 0x2a5   :  { %6911 = vmatmul.mubr.bf16.vlgmr.msra.gmra.mrb[48].mxu0 %v4487_v51  ;;  %v4405_v56 = vcombine.high %v4293_v33, %v4293_v33  ;;  %v11102_v40 = vrot.slane %v4293_v33, %v9569_v35  ;;  %v8555_v51 = vld [vmem:[%s11362_s3 + $0x650] sm:$0xff]  }
 0x2a6   :  { %6951 = vmatmul.mubr.bf16.vlgmr.msra.gmra.mrb[48].mxu1 %v4489_v58  ;;  %8221 = vmatpush3.bf16.msra.mxu0 %v8517_v44  ;;  %v8552_v44 = vld [vmem:[%s11362_s3 + $0x6c8] sm:$0xff]   ;;  %v8557_v58 = vld [vmem:[%s11362_s3 + $0x610] sm:$0xff]  }
 0x2a7   :  { %6990 = vmatprep.mubr.bf16.mxu0 %v4492_v63  ;;  %8243 = vmatpush3.bf16.msra.mxu1 %v8518_v55  ;;  %v11108_v42 = vrot.slane %v4405_v56, %v9569_v35  ;;  %v4420_v48 = vcombine.high %v11102_v40, %v11102_v40  ;;  %v8556_v55 = vld [vmem:[%s11362_s3 + $0x6d0] sm:$0xff]   ;;  %v8559_v63 = vld [vmem:[%s11362_s3 + $0x658] sm:$0xff]  }
 0x2a8   :  { %7030 = vmatprep.mubr.bf16.mxu1 %v4494_v4  ;;  %8222 = vmatprep.subr.bf16.mxu0 %v8519_v60  ;;  %v8558_v60 = vld [vmem:[%s11362_s3 + $0x690] sm:$0xff]   ;;  %v8563_v4 = vld [vmem:[%s11362_s3 + $0x660] sm:$0xff]   ;;  %v8576_v56 = vld [vmem:[%s11362_s3 + $0x6f8] sm:$0xff]  }
 0x2a9   :  { %8244 = vmatprep.subr.bf16.mxu1 %v8520_v53  ;;  %v4421_v2 = vcombine.high %v11108_v42, %v11108_v42  ;;  %v4496_v49 = vpack.c.bf16 %v4420_v48, %v4420_v48  ;;  %v8560_v53 = vld [vmem:[%s11362_s3 + $0x6d8] sm:$0xff]  }
 0x2aa   :  { %8223 = vmatpush3.bf16.msra.mxu0 %v8521_v26  ;;  %v8564_v26 = vld [vmem:[%s11362_s3 + $0x6e0] sm:$0xff]  }
 0x2ab   :  { %8245 = vmatpush3.bf16.msra.mxu1 %v8522_v8  ;;  %8224 = vmatprep.subr.bf16.mxu0 %v8523_v10  ;;  %v4498_v43 = vpack.c.bf16 %v4421_v2, %v4421_v2  ;;  %v4122_v8 = vrot.slane %v10980_v45, %v10324_v31  ;;  %v4126_v10 = vrot.slane %v10980_v45, %v10327_v32  ;;  %v8566_v31 = vld [vmem:[%s11362_s3 + $0x6a0] sm:$0xff]   ;;  %v8567_v32 = vld [vmem:[%s11362_s3 + $0x668] sm:$0xff]  }
 0x2ac   :  { %8246 = vmatprep.subr.bf16.mxu1 %v8524_v22  ;;  %v4130_v22 = vrot.slane %v10980_v45, %v10333_v34  ;;  %v8568_v34 = vld [vmem:[%s11362_s3 + $0x6e8] sm:$0xff]  }
 0x2ad   :  { %v4254_v36 = vcombine.low %v4122_v8, %v4126_v10  ;;  %v8595_v8 = vld [vmem:[%s11362_s3 + $0x760] sm:$0xff]  }
 0x2ae   :  { %8225 = vmatpush3.bf16.msra.mxu0 %v8525_v15  ;;  %v4255_v45 = vcombine.low %v4130_v22, %v4134_v11  ;;  %v8569_v15 = vld [vmem:[%s11362_s3 + $0x628] sm:$0xff]   ;;  %v8596_v10 = vld [vmem:[%s11362_s3 + $0x7e0] sm:$0xff]  }
 0x2af   :  { %8247 = vmatpush3.bf16.msra.mxu1 %v8526_v57  ;;  %8226 = vmatprep.subr.bf16.mxu0 %v8527_v62  ;;  %v8570_v57 = vld [vmem:[%s11362_s3 + $0x6a8] sm:$0xff]   ;;  %v8571_v62 = vld [vmem:[%s11362_s3 + $0x670] sm:$0xff]   ;;  %v8597_v22 = vld [vmem:[%s11362_s3 + $0x720] sm:$0xff]  }
 0x2b0   :  { %8248 = vmatprep.subr.bf16.mxu1 %v8528_v0  ;;  %v8598_v11 = vld [vmem:[%s11362_s3 + $0x7a0] sm:$0xff]  }
 0x2b2   :  { %8227 = vmatpush3.bf16.msra.mxu0 %v8529_v20 }
 0x2b3   :  { %8249 = vmatpush3.bf16.msra.mxu1 %v8530_v24  ;;  %8228 = vmatprep.subr.bf16.mxu0 %v8531_v1  ;;  %v4262_v1 = vrot.slane %v4254_v36, %v9569_v35  ;;  %v8603_v36 = vld [vmem:[%s11362_s3 + $0x770] sm:$0xff]  }
 0x2b4   :  { %8250 = vmatprep.subr.bf16.mxu1 %v8532_v54  ;;  %v4269_v54 = vrot.slane %v4255_v45, %v9569_v35 }
 0x2b6   :  { %8229 = vmatpush3.bf16.msra.mxu0 %v8533_v16 }
 0x2b7   :  { %8251 = vmatpush3.bf16.msra.mxu1 %v8534_v17  ;;  %8230 = vmatprep.subr.bf16.mxu0 %v8535_v18  ;;  %v8573_v18 = vld [vmem:[%s11362_s3 + $0x630] sm:$0xff]  }
 0x2b8   :  { %8252 = vmatprep.subr.bf16.mxu1 %v8536_v19 }
 0x2ba   :  { %8231 = vmatpush3.bf16.msra.mxu0 %v8537_v23 }
 0x2bb   :  { %8253 = vmatpush3.bf16.msra.mxu1 %v8538_v21  ;;  %8232 = vmatprep.subr.bf16.mxu0 %v8539_v29  ;;  %v8574_v21 = vld [vmem:[%s11362_s3 + $0x6b0] sm:$0xff]   ;;  %v8575_v29 = vld [vmem:[%s11362_s3 + $0x678] sm:$0xff]  }
 0x2bc   :  { %8254 = vmatprep.subr.bf16.mxu1 %v8540_v6 }
 0x2be   :  { %8233 = vmatpush3.bf16.msra.mxu0 %v8541_v28 }
 0x2bf   :  { %8255 = vmatpush3.bf16.msra.mxu1 %v8542_v59  ;;  %8234 = vmatprep.subr.bf16.mxu0 %v8543_v30  ;;  %v4270_v30 = vcombine.low %v4262_v1, %v4269_v54  ;;  %v8605_v1 = vld [vmem:[%s11362_s3 + $0x730] sm:$0xff]  }
 0x2c0   :  { %8256 = vmatprep.subr.bf16.mxu1 %v8544_v38  ;;  %v8577_v38 = vld [vmem:[%s11362_s3 + $0x638] sm:$0xff]  }
 0x2c2   :  { %8235 = vmatpush3.bf16.msra.mxu0 %v8545_v41 }
 0x2c3   :  { %8257 = vmatpush3.bf16.msra.mxu1 %v8546_v47  ;;  %8264 = vmatprep.subr.bf16.mxu0 %v8547_v46  ;;  %v8578_v47 = vld [vmem:[%s11362_s3 + $0x6b8] sm:$0xff]   ;;  %v8579_v46 = vld [vmem:[%s11362_s3 + $0x740] sm:$0xff]  }
 0x2c4   :  { %8286 = vmatprep.subr.bf16.mxu1 %v8548_v12  ;;  %v8580_v12 = vld [vmem:[%s11362_s3 + $0x7c0] sm:$0xff]  }
 0x2c5   :  { %6991 = vmatmul.mubr.bf16.vlgmr.msra.gmra.mrb[52].mxu0 %v4491_v14  ;;  %v4495_v14 = vpack.c.bf16 %v11102_v40, %v11102_v40 }
 0x2c6   :  { %7031 = vmatmul.mubr.bf16.vlgmr.msra.gmra.mrb[52].mxu1 %v4493_v27  ;;  %8265 = vmatpush3.bf16.msra.mxu0 %v8549_v61  ;;  %v8581_v61 = vld [vmem:[%s11362_s3 + $0x700] sm:$0xff]   ;;  %v8583_v27 = vld [vmem:[%s11362_s3 + $0x748] sm:$0xff]  }
 0x2c7   :  { %7070 = vmatprep.mubr.bf16.mxu0 %v4496_v49  ;;  %8287 = vmatpush3.bf16.msra.mxu1 %v8550_v5  ;;  %v8582_v5 = vld [vmem:[%s11362_s3 + $0x780] sm:$0xff]   ;;  %v8584_v49 = vld [vmem:[%s11362_s3 + $0x7c8] sm:$0xff]  }
 0x2c8   :  { %7110 = vmatprep.mubr.bf16.mxu1 %v4498_v43  ;;  %8266 = vmatprep.subr.bf16.mxu0 %v8551_v9  ;;  %v4497_v9 = vpack.c.bf16 %v11108_v42, %v11108_v42  ;;  %v8585_v43 = vld [vmem:[%s11362_s3 + $0x708] sm:$0xff]  }
 0x2c9   :  { %8288 = vmatprep.subr.bf16.mxu1 %v8552_v44 }
 0x2ca   :  { %8267 = vmatpush3.bf16.msra.mxu0 %v8553_v50  ;;  %v8586_v50 = vld [vmem:[%s11362_s3 + $0x788] sm:$0xff]  }
 0x2cb   :  { %8289 = vmatpush3.bf16.msra.mxu1 %v8554_v39  ;;  %8268 = vmatprep.subr.bf16.mxu0 %v8555_v51  ;;  %v8587_v51 = vld [vmem:[%s11362_s3 + $0x750] sm:$0xff]  }
 0x2cc   :  { %8290 = vmatprep.subr.bf16.mxu1 %v8556_v55  ;;  %v8588_v55 = vld [vmem:[%s11362_s3 + $0x7d0] sm:$0xff]  }
 0x2ce   :  { %8269 = vmatpush3.bf16.msra.mxu0 %v8557_v58 }
 0x2cf   :  { %8291 = vmatpush3.bf16.msra.mxu1 %v8558_v60  ;;  %8270 = vmatprep.subr.bf16.mxu0 %v8559_v63  ;;  %v8589_v63 = vld [vmem:[%s11362_s3 + $0x710] sm:$0xff]  }
 0x2d0   :  { %8292 = vmatprep.subr.bf16.mxu1 %v8560_v53  ;;  %v8590_v53 = vld [vmem:[%s11362_s3 + $0x790] sm:$0xff]  }
 0x2d2   :  { %8271 = vmatpush3.bf16.msra.mxu0 %v8561_v25  ;;  %v8591_v25 = vld [vmem:[%s11362_s3 + $0x758] sm:$0xff]  }
 0x2d3   :  { %8293 = vmatpush3.bf16.msra.mxu1 %v8562_v3  ;;  %8272 = vmatprep.subr.bf16.mxu0 %v8563_v4  ;;  %v8592_v3 = vld [vmem:[%s11362_s3 + $0x7d8] sm:$0xff]  }
 0x2d4   :  { %8294 = vmatprep.subr.bf16.mxu1 %v8564_v26  ;;  %v8593_v4 = vld [vmem:[%s11362_s3 + $0x718] sm:$0xff]  }
 0x2d5   :  { %v8594_v26 = vld [vmem:[%s11362_s3 + $0x798] sm:$0xff]  }
 0x2d6   :  { %8273 = vmatpush3.bf16.msra.mxu0 %v8565_v13  ;;  %v8599_v13 = vld [vmem:[%s11362_s3 + $0x768] sm:$0xff]  }
 0x2d7   :  { %8295 = vmatpush3.bf16.msra.mxu1 %v8566_v31  ;;  %8274 = vmatprep.subr.bf16.mxu0 %v8567_v32  ;;  %v8600_v31 = vld [vmem:[%s11362_s3 + $0x7e8] sm:$0xff]  }
 0x2d8   :  { %v3748_v0 = vpop.f32.mrb[28].mxu0  ;;  %8296 = vmatprep.subr.bf16.mxu1 %v8568_v34  ;;  %v8601_v32 = vld [vmem:[%s11362_s3 + $0x728] sm:$0xff]  }
 0x2d9   :  { %v3789_v20 = vpop.f32.mrb[28].mxu1  ;;  %v3750_v24 = vpop.f32.mrb[29].mxu0  ;;  %v8602_v34 = vld [vmem:[%s11362_s3 + $0x7a8] sm:$0xff]  }
 0x2da   :  { %v3947_v7 = vcombine.low %v3748_v0, %v3750_v24  ;;  %v3791_v16 = vpop.f32.mrb[29].mxu1  ;;  %v3752_v17 = vpop.f32.mrb[30].mxu0  ;;  %8275 = vmatpush3.bf16.msra.mxu0 %v8569_v15  ;;  %v8604_v15 = vld [vmem:[%s11362_s3 + $0x7f0] sm:$0xff]  }
 0x2db   :  { %v3948_v19 = vcombine.low %v3789_v20, %v3791_v16  ;;  %v3793_v33 = vpop.f32.mrb[30].mxu1  ;;  %8297 = vmatpush3.bf16.msra.mxu1 %v8570_v57  ;;  %v3753_v23 = vpop.f32.mrb[31].mxu0  ;;  %8276 = vmatprep.subr.bf16.mxu0 %v8571_v62  ;;  %v7743_v62 = vld [vmem:[%s11363_s4] ss:$0 sm:$0xff]  ;;  %v8606_v17 = vld [vmem:[%s11362_s3 + $0x7b0] sm:$0xff]  }
 0x2dc   :  { %v3955_v6 = vrot.slane %v3947_v7, %v9569_v35  ;;  %v3794_v28 = vpop.f32.mrb[31].mxu1  ;;  %8298 = vmatprep.subr.bf16.mxu1 %v8572_v52  ;;  %v8608_v23 = vld [vmem:[%s11362_s3 + $0x7f8] sm:$0xff]  }
 0x2dd   :  { %v3962_v59 = vrot.slane %v3948_v19, %v9569_v35 }
 0x2de   :  { %8277 = vmatpush3.bf16.msra.mxu0 %v8573_v18  ;;  %v8607_v18 = vld [vmem:[%s11362_s3 + $0x778] sm:$0xff]  }
 0x2df   :  { %v3963_v41 = vcombine.low %v3955_v6, %v3962_v59  ;;  %8299 = vmatpush3.bf16.msra.mxu1 %v8574_v21  ;;  %8278 = vmatprep.subr.bf16.mxu0 %v8575_v29  ;;  %v8609_v29 = vld [vmem:[%s11362_s3 + $0x738] sm:$0xff]  }
 0x2e0   :  { %8300 = vmatprep.subr.bf16.mxu1 %v8576_v56  ;;  %v8610_v6 = vld [vmem:[%s11362_s3 + $0x7b8] sm:$0xff]   ;;  %s8641_s3 = smov [#allocation3]  }
 0x2e1   :  { %v4286_v48 = vadd.f32 %v4270_v30, %v3963_v41  ;;  %s7222_s0 = sshll.u32 %s8641_s3, 4  ;;  %s7223_s0 = int_to_ptr.vmem [resolvable:$true] %s7222_s0 }
 0x2e2   :  { %8279 = vmatpush3.bf16.msra.mxu0 %v8577_v38  ;;  %s8615_s1 = scalar_lea.vmem %s7223_s0, 32  ;;  %p8620_p1 = scmp.lt.s32.totalorder %s7223_s0, %s7223_s0 }
 0x2e3   :  { %v4294_v2 = vmax.f32 %v4286_v48, 0.0  ;;  %8301 = vmatpush3.bf16.msra.mxu1 %v8578_v47  ;;  %8308 = vmatprep.subr.bf16.mxu0 %v8579_v46  ;;  %p8616_p0 = scmp.ne.s32.totalorder %s7223_s0, %s8615_s1  ;;  %p8621_p2 = scmp.lt.s32.totalorder %s8615_s1, %s8615_s1 }
 0x2e4   :  { %8330 = vmatprep.subr.bf16.mxu1 %v8580_v12 }
 0x2e5   :  { %7071 = vmatmul.mubr.bf16.vlgmr.msra.gmra.mrb[56].mxu0 %v4495_v14  ;;  %v11252_v40 = vrot.slane %v4294_v2, %v9569_v35  ;;  %v4422_v44 = vcombine.high %v4294_v2, %v4294_v2  ;;  %p8622_p3 = por %p8621_p2, %p8620_p1 }
 0x2e6   :  { %7111 = vmatmul.mubr.bf16.vlgmr.msra.gmra.mrb[56].mxu1 %v4497_v9  ;;  %8309 = vmatpush3.bf16.msra.mxu0 %v8581_v61 }
 0x2e7   :  { %8331 = vmatpush3.bf16.msra.mxu1 %v8582_v5  ;;  %8310 = vmatprep.subr.bf16.mxu0 %v8583_v27  ;;  %v4437_v42 = vcombine.high %v11252_v40, %v11252_v40  ;;  %v11263_v39 = vrot.slane %v4422_v44, %v9569_v35  ;;  %v4499_v28 = vpack.c.bf16 %v11252_v40, %v11252_v40  ;;  %p8623_p4 = pnand %p8622_p3, %p8616_p0 }
 0x2e8   :  { %8332 = vmatprep.subr.bf16.mxu1 %v8584_v49 }
 0x2e9   :  { %v4500_v58 = vpack.c.bf16 %v4437_v42, %v4437_v42  ;;  %v4438_v60 = vcombine.high %v11263_v39, %v11263_v39  ;;  %v4501_v56 = vpack.c.bf16 %v11263_v39, %v11263_v39 }
 0x2ea   :  { %8311 = vmatpush3.bf16.msra.mxu0 %v8585_v43 }
 0x2eb   :  { %7150 = vmatprep.mubr.bf16.mxu0 %v4500_v58  ;;  %8333 = vmatpush3.bf16.msra.mxu1 %v8586_v50  ;;  %v4502_v35 = vpack.c.bf16 %v4438_v60, %v4438_v60 }
 0x2ec   :  { %8312 = vmatprep.subr.bf16.mxu0 %v8587_v51  ;;  %8334 = vmatprep.subr.bf16.mxu1 %v8588_v55 }
 0x2ed   :  { %7190 = vmatprep.mubr.bf16.mxu1 %v4502_v35 }
 0x2ee   :  { %8313 = vmatpush3.bf16.msra.mxu0 %v8589_v63 }
 0x2ef   :  { %8335 = vmatpush3.bf16.msra.mxu1 %v8590_v53  ;;  %8314 = vmatprep.subr.bf16.mxu0 %v8591_v25 }
 0x2f0   :  { %8336 = vmatprep.subr.bf16.mxu1 %v8592_v3 }
 0x2f2   :  { %8315 = vmatpush3.bf16.msra.mxu0 %v8593_v4 }
 0x2f3   :  { %8337 = vmatpush3.bf16.msra.mxu1 %v8594_v26  ;;  %8316 = vmatprep.subr.bf16.mxu0 %v8595_v8 }
 0x2f4   :  { %8338 = vmatprep.subr.bf16.mxu1 %v8596_v10 }
 0x2f6   :  { %8317 = vmatpush3.bf16.msra.mxu0 %v8597_v22 }
 0x2f7   :  { %8339 = vmatpush3.bf16.msra.mxu1 %v8598_v11  ;;  %8318 = vmatprep.subr.bf16.mxu0 %v8599_v13 }
 0x2f8   :  { %v8016_v45 = vpop.f32.mrb[32].mxu0  ;;  %8340 = vmatprep.subr.bf16.mxu1 %v8600_v31 }
 0x2f9   :  { %v8038_v57 = vpop.f32.mrb[32].mxu1  ;;  %v8017_v0 = vpop.f32.mrb[33].mxu0 }
 0x2fa   :  { %v8018_v52 = vadd.f32 %v8017_v0, %v8016_v45  ;;  %v8039_v20 = vpop.f32.mrb[33].mxu1  ;;  %v8019_v24 = vpop.f32.mrb[34].mxu0  ;;  %8319 = vmatpush3.bf16.msra.mxu0 %v8601_v32 }
 0x2fb   :  { %v8040_v54 = vadd.f32 %v8039_v20, %v8038_v57  ;;  %v8041_v7 = vpop.f32.mrb[34].mxu1  ;;  %8341 = vmatpush3.bf16.msra.mxu1 %v8602_v34  ;;  %v8020_v16 = vpop.f32.mrb[35].mxu0  ;;  %8320 = vmatprep.subr.bf16.mxu0 %v8603_v36 }
 0x2fc   :  { %v6593_v19 = vadd.f32 %v8018_v52, %v7743_v62  ;;  %v8042_v33 = vpop.f32.mrb[35].mxu1  ;;  %8342 = vmatprep.subr.bf16.mxu1 %v8604_v15 }
 0x2fe   :  { %v6633_v21 = vadd.f32 %v8040_v54, %v6593_v19  ;;  %8321 = vmatpush3.bf16.msra.mxu0 %v8605_v1 }
 0x2ff   :  { %8343 = vmatpush3.bf16.msra.mxu1 %v8606_v17  ;;  %8322 = vmatprep.subr.bf16.mxu0 %v8607_v18 }
 0x300   :  { %8344 = vmatprep.subr.bf16.mxu1 %v8608_v23 }
 0x302   :  { %8323 = vmatpush3.bf16.msra.mxu0 %v8609_v29 }
 0x303   :  { %8345 = vmatpush3.bf16.msra.mxu1 %v8610_v6 }
 0x305   :  { %7151 = vmatmul.mubr.bf16.vlgmr.msra.gmra.mrb[60].mxu0 %v4499_v28 }
 0x306   :  { %7191 = vmatmul.mubr.bf16.vlgmr.msra.gmra.mrb[60].mxu1 %v4501_v56 }
 0x318   :  { %v8060_v59 = vpop.f32.mrb[36].mxu0 }
 0x319   :  { %v8082_v30 = vpop.f32.mrb[36].mxu1  ;;  %v8061_v38 = vpop.f32.mrb[37].mxu0 }
 0x31a   :  { %v8062_v41 = vadd.f32 %v8061_v38, %v8060_v59  ;;  %v8083_v47 = vpop.f32.mrb[37].mxu1  ;;  %v8063_v46 = vpop.f32.mrb[38].mxu0 }
 0x31b   :  { %v8084_v12 = vadd.f32 %v8083_v47, %v8082_v30  ;;  %v8085_v48 = vpop.f32.mrb[38].mxu1  ;;  %v8064_v61 = vpop.f32.mrb[39].mxu0 }
 0x31c   :  { %v6673_v2 = vadd.f32 %v8062_v41, %v6633_v21  ;;  %v8086_v14 = vpop.f32.mrb[39].mxu1 }
 0x31e   :  { %v6713_v5 = vadd.f32 %v8084_v12, %v6673_v2 }
 0x338   :  { %v8104_v27 = vpop.f32.mrb[40].mxu0 }
 0x339   :  { %v8126_v9 = vpop.f32.mrb[40].mxu1  ;;  %v8105_v49 = vpop.f32.mrb[41].mxu0 }
 0x33a   :  { %v8106_v40 = vadd.f32 %v8105_v49, %v8104_v27  ;;  %v8127_v44 = vpop.f32.mrb[41].mxu1  ;;  %v8107_v43 = vpop.f32.mrb[42].mxu0 }
 0x33b   :  { %v8128_v42 = vadd.f32 %v8127_v44, %v8126_v9  ;;  %v8129_v50 = vpop.f32.mrb[42].mxu1  ;;  %v8108_v39 = vpop.f32.mrb[43].mxu0 }
 0x33c   :  { %v6753_v51 = vadd.f32 %v8106_v40, %v6713_v5  ;;  %v8130_v55 = vpop.f32.mrb[43].mxu1 }
 0x33e   :  { %v6793_v58 = vadd.f32 %v8128_v42, %v6753_v51  ;;  %v7200_v42 = vand.u32 127, %v567_v37 }
 0x340   :  { %vm7201_vm0 = vcmp.lt.s32.totalorder %v7200_v42, 20 }
 0x358   :  { %v8148_v60 = vpop.f32.mrb[44].mxu0 }
 0x359   :  { %v8170_v63 = vpop.f32.mrb[44].mxu1  ;;  %v8149_v35 = vpop.f32.mrb[45].mxu0 }
 0x35a   :  { %v8150_v53 = vadd.f32 %v8149_v35, %v8148_v60  ;;  %v8171_v25 = vpop.f32.mrb[45].mxu1  ;;  %v8151_v3 = vpop.f32.mrb[46].mxu0 }
 0x35b   :  { %v8172_v4 = vadd.f32 %v8171_v25, %v8170_v63  ;;  %v8173_v26 = vpop.f32.mrb[46].mxu1  ;;  %v8152_v8 = vpop.f32.mrb[47].mxu0 }
 0x35c   :  { %v6833_v10 = vadd.f32 %v8150_v53, %v6793_v58  ;;  %v8174_v22 = vpop.f32.mrb[47].mxu1 }
 0x35e   :  { %v6873_v11 = vadd.f32 %v8172_v4, %v6833_v10 }
 0x378   :  { %v8192_v13 = vpop.f32.mrb[48].mxu0 }
 0x379   :  { %v8214_v31 = vpop.f32.mrb[48].mxu1  ;;  %v8193_v32 = vpop.f32.mrb[49].mxu0 }
 0x37a   :  { %v8194_v34 = vadd.f32 %v8193_v32, %v8192_v13  ;;  %v8215_v36 = vpop.f32.mrb[49].mxu1  ;;  %v8195_v45 = vpop.f32.mrb[50].mxu0 }
 0x37b   :  { %v8216_v15 = vadd.f32 %v8215_v36, %v8214_v31  ;;  %v8217_v57 = vpop.f32.mrb[50].mxu1  ;;  %v8196_v62 = vpop.f32.mrb[51].mxu0 }
 0x37c   :  { %v6913_v0 = vadd.f32 %v8194_v34, %v6873_v11  ;;  %v8218_v52 = vpop.f32.mrb[51].mxu1 }
 0x37e   :  { %v6953_v20 = vadd.f32 %v8216_v15, %v6913_v0 }
 0x398   :  { %v8236_v24 = vpop.f32.mrb[52].mxu0 }
 0x399   :  { %v8258_v1 = vpop.f32.mrb[52].mxu1  ;;  %v8237_v54 = vpop.f32.mrb[53].mxu0 }
 0x39a   :  { %v8238_v7 = vadd.f32 %v8237_v54, %v8236_v24  ;;  %v8259_v16 = vpop.f32.mrb[53].mxu1  ;;  %v8239_v17 = vpop.f32.mrb[54].mxu0 }
 0x39b   :  { %v8260_v18 = vadd.f32 %v8259_v16, %v8258_v1  ;;  %v8261_v19 = vpop.f32.mrb[54].mxu1  ;;  %v8240_v33 = vpop.f32.mrb[55].mxu0 }
 0x39c   :  { %v6993_v23 = vadd.f32 %v8238_v7, %v6953_v20  ;;  %v8262_v21 = vpop.f32.mrb[55].mxu1 }
 0x39e   :  { %v7033_v29 = vadd.f32 %v8260_v18, %v6993_v23 }
 0x3b8   :  { %v8280_v6 = vpop.f32.mrb[56].mxu0 }
 0x3b9   :  { %v8302_v28 = vpop.f32.mrb[56].mxu1  ;;  %v8281_v56 = vpop.f32.mrb[57].mxu0 }
 0x3ba   :  { %v8282_v59 = vadd.f32 %v8281_v56, %v8280_v6  ;;  %v8303_v30 = vpop.f32.mrb[57].mxu1  ;;  %v8283_v38 = vpop.f32.mrb[58].mxu0 }
 0x3bb   :  { %v8304_v41 = vadd.f32 %v8303_v30, %v8302_v28  ;;  %v8305_v47 = vpop.f32.mrb[58].mxu1  ;;  %v8284_v46 = vpop.f32.mrb[59].mxu0 }
 0x3bc   :  { %v7073_v12 = vadd.f32 %v8282_v59, %v7033_v29  ;;  %v8306_v48 = vpop.f32.mrb[59].mxu1 }
 0x3be   :  { %v7113_v61 = vadd.f32 %v8304_v41, %v7073_v12 }
 0x3d8   :  { %v8324_v2 = vpop.f32.mrb[60].mxu0 }
 0x3d9   :  { %v8346_v14 = vpop.f32.mrb[60].mxu1  ;;  %v8325_v5 = vpop.f32.mrb[61].mxu0 }
 0x3da   :  { %v8326_v27 = vadd.f32 %v8325_v5, %v8324_v2  ;;  %v8347_v9 = vpop.f32.mrb[61].mxu1  ;;  %v8327_v49 = vpop.f32.mrb[62].mxu0 }
 0x3db   :  { %v8348_v40 = vadd.f32 %v8347_v9, %v8346_v14  ;;  %v8349_v44 = vpop.f32.mrb[62].mxu1  ;;  %v8328_v43 = vpop.f32.mrb[63].mxu0 }
 0x3dc   :  { %v7153_v50 = vadd.f32 %v8326_v27, %v7113_v61  ;;  %v8350_v39 = vpop.f32.mrb[63].mxu1 }
 0x3de   :  { %v7193_v51 = vadd.f32 %v8348_v40, %v7153_v50 }
 0x3e0   :  { %v7198_v55 = vmax.f32 %v7193_v51, 0.0 }
 0x3e2   :  { %v7202_v58 = vsel %vm7201_vm0, %v7198_v55, -1e+30 }
 0x3e3   :  { %v7204_v60 = vsel %vm7203_vm1, %v7202_v58, -inf }
 0x3e4   :  { %7205 = vmax.xlane.f32.xlu0 %v7204_v60 }
 0x471   :  { %v7206_v63 = vpop.xlane.xlu0 %7205 }
 0x472   :  { %v7207_v35 = vsub.f32 %v7202_v58, %v7206_v63 }
 0x474   :  { %v7208_v53 = vmul.f32 1.442695, %v7207_v35 }
 0x476   :  { %8611 = vpow2.f32 %v7208_v53 }
 0x480   :  { %v8612_v25 = vpop.eup %8611 }
 0x481   :  { %v7210_v3 = vsel %vm7203_vm1, %v8612_v25, 0.0 }
 0x482   :  { %7211 = vadd.xlane.f32.xlu0 %v7210_v3 }
 0x50f   :  { %v7212_v4 = vpop.xlane.xlu0 %7211 }
 0x510   :  { %8613 = vrcp.f32 %v7212_v4 }
 0x51a   :  { %v8614_v37 = vpop.eup %8613 }
 0x51b   :  { %v7214_v26 = vmul.f32 %v8614_v37, %v8612_v25 }
 0x51d   :  { %7215 = vst [vmem:[#allocation3] sm:$0x3] %v7214_v26 }
 0x51e   :  { %8626 = shalt.err (!%p8623_p4)
}
 0x51f   :  { %s8627_s2 = scalar_lea.hbm %s11364_s5, 32 }
 0x520   :  { %p8628_p5 = scmp.ne.s32.totalorder %s11364_s5, %s8627_s2  ;;  %p8631_p6 = scmp.lt.u32.totalorder %s8627_s2, %s11364_s5 }
 0x522   :  { %p8633_p7 = pnand %p8631_p6, %p8628_p5 }
 0x524   :  { %8636 = shalt.err (!%p8633_p7)
}
 0x525   :  { %7225 = dma.vmem_to_hbm [thread:$0]  %s7223_s0, 32, %s11364_s5, [#allocation4]  }
 0x526   :  { %8637 = dma.done.wait [#allocation4], 32  }
 0x527   :  { %8638 = vsyncadd [#allocation4], 4294967264 }
 0x528   :  { %7229 = vsyncpa [#allocation4], 1 }

</bundles_post_ra>
